<compile_context>
chip_gen: v5e
topology: v5e:2x2
jax: 0.10.0
libtpu: 0.0.40
codegen_flags: <defaults>
</compile_context>

<pallas_src>
import jax
import jax.numpy as jnp
from jax.experimental import pallas as pl
from jax.experimental.pallas import tpu as pltpu

IN_FEATURES = 508 * 64     # 32512
HIDDEN = 128


def _cldnn_c_kernel(x_ref, w1_ref, b1_ref, w2_ref, b2_ref, o_ref):
    """One batch tile per grid step.

    x_ref : (tb, 32512) f32   -- streamed per tile, cast to bf16 in-kernel
    w1_ref: (32512, 128) bf16 -- VMEM-resident (constant index map)
    b1_ref: (1, 128) f32      -- resident
    w2_ref: (128, out_pad) f32-- resident (zero-padded columns)
    b2_ref: (1, out_pad) f32  -- resident (zero-padded)
    o_ref : (tb, out_pad) f32 -- lane-dense output tile
    """
    # fc1: bf16 x bf16 -> f32 accumulation on the MXU.
    x_bf16 = x_ref[...].astype(jnp.bfloat16)
    acc = jnp.dot(x_bf16, w1_ref[...], preferred_element_type=jnp.float32)
    h = jnp.maximum(acc + b1_ref[...], 0.0)                     # bias + ReLU
    # fc2: tiny f32 matmul, lane-dense padded output.
    out = jnp.dot(h, w2_ref[...], preferred_element_type=jnp.float32)
    o_ref[...] = (out + b2_ref[...]).astype(o_ref.dtype)


@jax.jit
def _cldnn_c_forward_impl(x, w1, b1, w2, b2):
    """x: (B, 32512) f32. w1: (32512, 128) bf16-at-rest. b1: (1, 128).
    w2: (128, out_dim). b2: (1, out_dim). Returns (B, out_dim) f32."""
    B, K = x.shape
    assert K == IN_FEATURES
    out_dim = w2.shape[1]
    out_pad = ((out_dim + 127) // 128) * 128   # lane-dense padded width

    x = x.astype(jnp.float32)
    # No-op when the caller honors the bf16-at-rest contract (the normal,
    # hot path); only costs anything if f32 weights are passed by mistake.
    w1 = w1.astype(jnp.bfloat16)
    b1 = b1.astype(jnp.float32).reshape(1, HIDDEN)
    # Zero-pad fc2 params to `out_pad` columns (tiny, fused by XLA).
    w2p = jnp.zeros((HIDDEN, out_pad), jnp.float32).at[:, :out_dim].set(
        w2.astype(jnp.float32))
    b2p = jnp.zeros((1, out_pad), jnp.float32).at[:, :out_dim].set(
        b2.astype(jnp.float32).reshape(1, out_dim))

    # Batch tiling: whole batch in one block when small; otherwise 64-row
    # tiles (full-K f32 x tile = 8.3 MB) so double-buffered x tiles plus the
    # resident w1 stay well inside even v7x's 64 MiB VMEM.  Ragged batches
    # are zero-padded (padded rows are discarded below).
    tb = B if B <= 64 else 64
    pad_b = (-B) % tb
    if pad_b:
        x = jnp.pad(x, ((0, pad_b), (0, 0)))
    Bp = B + pad_b
    grid = (Bp // tb,)

    # Advisory cost estimate: true HBM traffic (w1 read exactly once).
    bytes_accessed = (
        Bp * K * 4                                    # x (f32, streamed)
        + K * HIDDEN * 2                              # w1 (bf16, once)
        + (HIDDEN + HIDDEN * out_pad + out_pad) * 4   # b1, w2, b2
        + Bp * out_pad * 4                            # output
    )
    flops = 2 * Bp * K * HIDDEN + 2 * Bp * HIDDEN * out_pad
    cost = pl.CostEstimate(flops=flops, transcendentals=0,
                           bytes_accessed=bytes_accessed)

    # Right-sized VMEM budget (capped for v7x's 64 MiB per TensorCore).
    need = (
        2 * tb * K * 4                                    # x tiles (f32, x2 buf)
        + 2 * K * HIDDEN * 2                              # w1 (bf16, 2 pipeline bufs)
        + tb * K * 2                                      # in-kernel bf16 cast temp
        + 2 * (HIDDEN + HIDDEN * out_pad + out_pad) * 4   # b1, w2, b2 residents
        + 2 * tb * out_pad * 4                            # output tiles (x2 buf)
        + tb * HIDDEN * 4                                 # fc1 activation temp
    )
    vmem_limit = int(min(need + (8 << 20), 56 << 20))

    out_padded = pl.pallas_call(
        _cldnn_c_kernel,
        out_shape=jax.ShapeDtypeStruct((Bp, out_pad), jnp.float32),
        grid_spec=pltpu.PrefetchScalarGridSpec(
            num_scalar_prefetch=0,
            grid=grid,
            in_specs=[
                pl.BlockSpec((tb, K), lambda i: (i, 0)),            # x tile
                pl.BlockSpec((K, HIDDEN), lambda i: (0, 0)),        # w1 resident
                pl.BlockSpec((1, HIDDEN), lambda i: (0, 0)),        # b1 resident
                pl.BlockSpec((HIDDEN, out_pad), lambda i: (0, 0)),  # w2 resident
                pl.BlockSpec((1, out_pad), lambda i: (0, 0)),       # b2 resident
            ],
            out_specs=pl.BlockSpec((tb, out_pad), lambda i: (i, 0)),
        ),
        compiler_params=pltpu.CompilerParams(
            dimension_semantics=("parallel",),
            vmem_limit_bytes=vmem_limit,
        ),
        cost_estimate=cost,
    )(x, w1, b1, w2p, b2p)

    return out_padded[:B, :out_dim]


def cldnn_c_forward(x, w1, b1, w2, b2, reverse=False, lambda_=1.0):
    """Forward pass of CLDNN_C.  GradReverse is identity in the forward pass,
    so `reverse` / `lambda_` are accepted for API parity and ignored."""
    del reverse, lambda_
    return _cldnn_c_forward_impl(x, w1, b1, w2, b2)


def init_params(key, output_dim):
    """Deterministic synthetic parameters matching the nn.Linear shapes,
    stored transposed as (in, out).  w1 is cast to bf16 ONCE here (at rest),
    outside the per-call hot path."""
    k1, k2, k3, k4 = jax.random.split(key, 4)
    s1 = 1.0 / (IN_FEATURES ** 0.5)
    s2 = 1.0 / (HIDDEN ** 0.5)
    w1 = jax.random.uniform(k1, (IN_FEATURES, HIDDEN), jnp.float32, -s1, s1)
    w1 = w1.astype(jnp.bfloat16)                       # bf16 at rest
    b1 = jax.random.uniform(k2, (1, HIDDEN), jnp.float32, -s1, s1)
    w2 = jax.random.uniform(k3, (HIDDEN, output_dim), jnp.float32, -s2, s2)
    b2 = jax.random.uniform(k4, (1, output_dim), jnp.float32, -s2, s2)
    return w1, b1, w2, b2


if __name__ == "__main__":
    key = jax.random.PRNGKey(0)
    kx, kp = jax.random.split(key)

    B = 2
    OUTPUT_DIM = 8

    x = jax.random.normal(kx, (B, IN_FEATURES), jnp.float32)
    w1, b1, w2, b2 = init_params(kp, OUTPUT_DIM)

    out = cldnn_c_forward(x, w1, b1, w2, b2)
    out = jax.block_until_ready(out)
    assert out.shape == (B, OUTPUT_DIM)

    # Reference 1: same bf16 operand rounding as the kernel (tight tolerance).
    h_bf = jnp.maximum(
        jnp.dot(x.astype(jnp.bfloat16), w1,
                preferred_element_type=jnp.float32) + b1, 0.0)
    out_ref_bf = h_bf @ w2 + b2
    assert jnp.allclose(out, out_ref_bf, atol=2e-3, rtol=2e-3), (
        jnp.max(jnp.abs(out - out_ref_bf))
    )

    # Reference 2: f32 x against the bf16-at-rest weights (PyTorch-equivalent
    # forward up to the deliberate bf16 weight/activation streaming).
    h_ref = jnp.maximum(x @ w1.astype(jnp.float32) + b1, 0.0)
    out_ref = h_ref @ w2 + b2
    assert jnp.allclose(out, out_ref, atol=2e-2, rtol=2e-2), (
        jnp.max(jnp.abs(out - out_ref))
    )

    print("KERNEL_OK")
</pallas_src>

<mosaic_0001>
module attributes {stable_mosaic.version = 11 : i64} {
  func.func @_cldnn_c_kernel(%arg0: i32, %arg1: memref<2x32512xf32, #tpu.memory_space<vmem>>, %arg2: memref<32512x128xbf16, #tpu.memory_space<vmem>>, %arg3: memref<1x128xf32, #tpu.memory_space<vmem>>, %arg4: memref<128x128xf32, #tpu.memory_space<vmem>>, %arg5: memref<1x128xf32, #tpu.memory_space<vmem>>, %arg6: memref<2x128xf32, #tpu.memory_space<vmem>>) attributes {dimension_semantics = [#tpu.dimension_semantics<parallel>], iteration_bounds = array<i64: 1>, scalar_prefetch = 0 : i64, scratch_operands = 0 : i64, tpu.core_type = #tpu.core_type<tc>, window_params = [{transform_indices = @transform_0, window_bounds = array<i64: 2, 32512>}, {pipeline_mode = #tpu.pipeline_mode<synchronous>, transform_indices = @transform_1, window_bounds = array<i64: 32512, 128>}, {pipeline_mode = #tpu.pipeline_mode<synchronous>, transform_indices = @transform_2, window_bounds = array<i64: 1, 128>}, {pipeline_mode = #tpu.pipeline_mode<synchronous>, transform_indices = @transform_3, window_bounds = array<i64: 128, 128>}, {pipeline_mode = #tpu.pipeline_mode<synchronous>, transform_indices = @transform_4, window_bounds = array<i64: 1, 128>}, {transform_indices = @transform_5, window_bounds = array<i64: 2, 128>}]} {
    %c0 = arith.constant 0 : index
    %c0_0 = arith.constant 0 : index
    %0 = vector.load %arg1[%c0, %c0_0] : memref<2x32512xf32, #tpu.memory_space<vmem>>, vector<2x32512xf32>
    %1 = arith.truncf %0 : vector<2x32512xf32> to vector<2x32512xbf16>
    %c0_1 = arith.constant 0 : index
    %c0_2 = arith.constant 0 : index
    %2 = vector.load %arg2[%c0_1, %c0_2] : memref<32512x128xbf16, #tpu.memory_space<vmem>>, vector<32512x128xbf16>
    %cst = arith.constant dense<0.000000e+00> : vector<2x128xf32>
    %3 = tpu.matmul %1, %2, %cst {dimension_numbers = #tpu.dot_dimension_numbers<[1], [0], [0], [1], [0, 0, 1, 1], [], []>} : vector<2x32512xbf16>, vector<32512x128xbf16>, vector<2x128xf32> -> vector<2x128xf32>
    %c0_3 = arith.constant 0 : index
    %c0_4 = arith.constant 0 : index
    %4 = vector.load %arg3[%c0_3, %c0_4] : memref<1x128xf32, #tpu.memory_space<vmem>>, vector<1x128xf32>
    %5 = vector.broadcast %4 : vector<1x128xf32> to vector<2x128xf32>
    %6 = arith.addf %3, %5 : vector<2x128xf32>
    %cst_5 = arith.constant 0.000000e+00 : f32
    %7 = vector.broadcast %cst_5 : f32 to vector<2x128xf32>
    %8 = arith.maximumf %6, %7 : vector<2x128xf32>
    %c0_6 = arith.constant 0 : index
    %c0_7 = arith.constant 0 : index
    %9 = vector.load %arg4[%c0_6, %c0_7] : memref<128x128xf32, #tpu.memory_space<vmem>>, vector<128x128xf32>
    %cst_8 = arith.constant dense<0.000000e+00> : vector<2x128xf32>
    %10 = tpu.matmul %8, %9, %cst_8 {dimension_numbers = #tpu.dot_dimension_numbers<[1], [0], [0], [1], [0, 0, 1, 1], [], []>} : vector<2x128xf32>, vector<128x128xf32>, vector<2x128xf32> -> vector<2x128xf32>
    %c0_9 = arith.constant 0 : index
    %c0_10 = arith.constant 0 : index
    %11 = vector.load %arg5[%c0_9, %c0_10] : memref<1x128xf32, #tpu.memory_space<vmem>>, vector<1x128xf32>
    %12 = vector.broadcast %11 : vector<1x128xf32> to vector<2x128xf32>
    %13 = arith.addf %10, %12 : vector<2x128xf32>
    %c0_11 = arith.constant 0 : index
    %c0_12 = arith.constant 0 : index
    %14 = vector.load %arg6[%c0_11, %c0_12] : memref<2x128xf32, #tpu.memory_space<vmem>>, vector<2x128xf32>
    tpu.vector_store %arg6[%c0_11, %c0_12], %13 {strides = array<i32>} : memref<2x128xf32, #tpu.memory_space<vmem>>, vector<2x128xf32>,
    return
  }
  func.func @transform_0(%arg0: i32) -> (i32, i32) {
    %c0_i32 = arith.constant 0 : i32
    %c0_i32_0 = arith.constant 0 : i32
    return %arg0, %c0_i32 : i32, i32
  }
  func.func @transform_1(%arg0: i32) -> (i32, i32) {
    %c0_i32 = arith.constant 0 : i32
    %c0_i32_0 = arith.constant 0 : i32
    %c0_i32_1 = arith.constant 0 : i32
    return %c0_i32, %c0_i32_0 : i32, i32
  }
  func.func @transform_2(%arg0: i32) -> (i32, i32) {
    %c0_i32 = arith.constant 0 : i32
    %c0_i32_0 = arith.constant 0 : i32
    %c0_i32_1 = arith.constant 0 : i32
    return %c0_i32, %c0_i32_0 : i32, i32
  }
  func.func @transform_3(%arg0: i32) -> (i32, i32) {
    %c0_i32 = arith.constant 0 : i32
    %c0_i32_0 = arith.constant 0 : i32
    %c0_i32_1 = arith.constant 0 : i32
    return %c0_i32, %c0_i32_0 : i32, i32
  }
  func.func @transform_4(%arg0: i32) -> (i32, i32) {
    %c0_i32 = arith.constant 0 : i32
    %c0_i32_0 = arith.constant 0 : i32
    %c0_i32_1 = arith.constant 0 : i32
    return %c0_i32, %c0_i32_0 : i32, i32
  }
  func.func @transform_5(%arg0: i32) -> (i32, i32) {
    %c0_i32 = arith.constant 0 : i32
    %c0_i32_0 = arith.constant 0 : i32
    return %arg0, %c0_i32 : i32, i32
  }
}

</mosaic_0001>

<bundles_post_ra>
// kernel: _cldnn_c_forward_impl.1
= control target key start
LH: loop header
LB: loop body
LE: loop exit
PB: predicated region body
PF: predicated region fallthrough
CT: control target
= control target key end

     0   :  { %10 = vsyncpa [#allocation3], 0  ;;  %s31178_s0 = inlined_call_operand.hbm [shape: f32[2,32512], index: 0, kind: input, shape index: {}]   ;;  %s31179_s1 = inlined_call_operand.hbm [shape: bf16[32512,128], index: 1, kind: input, shape index: {}]   ;;  %s31180_s2 = inlined_call_operand.hbm [shape: f32[1,128], index: 2, kind: input, shape index: {}]   ;;  %s31181_s3 = inlined_call_operand.vmem [shape: f32[128,128], index: 3, kind: input, shape index: {}]   ;;  %s31182_s4 = inlined_call_operand.vmem [shape: f32[1,128], index: 4, kind: input, shape index: {}]   ;;  %s31183_s5 = inlined_call_operand.hbm [shape: f32[2,128], index: 5, kind: output, shape index: {}]  }
   0x1   :  { %11 = vsyncpa [#allocation6], 0  ;;  %s28_s20 = sshll.u32 %s31179_s1, 4  ;;  %s29_s20 = int_to_ptr.hbm [resolvable:$true] %s28_s20 }
   0x2   :  { %12 = vsyncpa [#allocation4], 0  ;;  %s30911_s21 = smov [#allocation5]   ;;  %s18_s25 = sshll.u32 %s31178_s0, 4  ;;  %s19_s25 = int_to_ptr.hbm [resolvable:$true] %s18_s25 }
   0x3   :  { %s30_s22 = sshll.u32 %s30911_s21, 4  ;;  %s30912_s26 = smov 64   ;;  %s31_s22 = int_to_ptr.vmem [resolvable:$true] %s30_s22 }
   0x4   :  { %s30913_s27 = smov 4   ;;  %s30914_s28 = smov [#allocation2]  }
   0x5   :  { %36 = dma.hbm_to_vmem [thread:$0]  %s29_s20, 260096, %s31_s22, [#allocation6], %s30912_s26, %s30912_s26, %s30913_s27  }
   0x6   :  { %s20_s29 = sshll.u32 %s30914_s28, 4  ;;  %s42_s7 = sshll.u32 %s31180_s2, 4  ;;  %s21_s29 = int_to_ptr.vmem [resolvable:$true] %s20_s29  ;;  %s43_s7 = int_to_ptr.hbm [resolvable:$true] %s42_s7 }
   0x7   :  { %23 = dma.hbm_to_vmem [thread:$0]  %s19_s25, 8128, %s21_s29, [#allocation3]  }
   0x8   :  { %s30915_s1 = smov [#allocation7]  }
   0x9   :  { %s44_s8 = sshll.u32 %s30915_s1, 4  ;;  %s45_s8 = int_to_ptr.vmem [resolvable:$true] %s44_s8 }
   0xa   :  { %47 = dma.hbm_to_vmem [thread:$0]  %s43_s7, 16, %s45_s8, [#allocation6]  }
   0xb   :  { %30905 = dma.done.wait [#allocation3], 8128  }
   0xc   :  { %30906 = vsyncadd [#allocation3], 4294959168 }
   0xd   :  { %30907 = dma.done.wait [#allocation6], 260112  }
   0xe   :  { %30908 = vsyncadd [#allocation6], 4294707184  ;;  %v28776_v0 = vld [vmem:[#allocation5 + $0x38] sm:$0xff]  ;;  %v28775_v4 = vld [vmem:[#allocation5 + $0x30] sm:$0xff]  ;;  %s30916_s12 = smov [#allocation8]   ;;  %s20630_s16 = sshll.u32 %s31183_s5, 4  ;;  %s20631_s16 = int_to_ptr.hbm [resolvable:$true] %s20630_s16 }
   0xf   :  { %v28784_v1 = vld [vmem:[#allocation5 + $0x78] sm:$0xff]  ;;  %17279 = vmatpush.bf16.msra.mxu0 %v28776_v0  ;;  %v28783_v5 = vld [vmem:[#allocation5 + $0x70] sm:$0xff]  ;;  %v28774_v8 = vld [vmem:[#allocation5 + $0x28] sm:$0xff]  ;;  %s20628_s13 = sshll.u32 %s30916_s12, 4  ;;  %s20629_s13 = int_to_ptr.vmem [resolvable:$true] %s20628_s13 }
  0x10   :  { %v28792_v2 = vld [vmem:[#allocation5 + $0xb8] sm:$0xff]  ;;  %17292 = vmatpush.bf16.msra.mxu1 %v28784_v1  ;;  %v28791_v6 = vld [vmem:[#allocation5 + $0xb0] sm:$0xff]  ;;  %v28782_v9 = vld [vmem:[#allocation5 + $0x68] sm:$0xff] }
  0x11   :  { %v28800_v3 = vld [vmem:[#allocation5 + $0xf8] sm:$0xff]  ;;  %17305 = vmatpush.bf16.msra.mxu2 %v28792_v2  ;;  %v28799_v7 = vld [vmem:[#allocation5 + $0xf0] sm:$0xff]  ;;  %v28790_v10 = vld [vmem:[#allocation5 + $0xa8] sm:$0xff] }
  0x12   :  { %17318 = vmatpush.bf16.msra.mxu3 %v28800_v3  ;;  %v28798_v11 = vld [vmem:[#allocation5 + $0xe8] sm:$0xff]  ;;  %v28773_v12 = vld [vmem:[#allocation5 + $0x20] sm:$0xff]  ;;  %v28772_v16 = vld [vmem:[#allocation5 + $0x18] sm:$0xff] }
  0x13   :  { %17280 = vmatpush.bf16.msra.mxu0 %v28775_v4  ;;  %v28781_v13 = vld [vmem:[#allocation5 + $0x60] sm:$0xff]  ;;  %v28780_v17 = vld [vmem:[#allocation5 + $0x58] sm:$0xff]  ;;  %v28771_v21 = vld [vmem:[#allocation5 + $0x10] sm:$0xff] }
  0x14   :  { %17293 = vmatpush.bf16.msra.mxu1 %v28783_v5  ;;  %v28789_v14 = vld [vmem:[#allocation5 + $0xa0] sm:$0xff]  ;;  %v28788_v18 = vld [vmem:[#allocation5 + $0x98] sm:$0xff]  ;;  %v28779_v22 = vld [vmem:[#allocation5 + $0x50] sm:$0xff] }
  0x15   :  { %17306 = vmatpush.bf16.msra.mxu2 %v28791_v6  ;;  %v28797_v15 = vld [vmem:[#allocation5 + $0xe0] sm:$0xff]  ;;  %v28796_v19 = vld [vmem:[#allocation5 + $0xd8] sm:$0xff]  ;;  %v28787_v23 = vld [vmem:[#allocation5 + $0x90] sm:$0xff] }
  0x16   :  { %17319 = vmatpush.bf16.msra.mxu3 %v28799_v7  ;;  %v64_v20 = vld [vmem:[#allocation2] sm:$0xff]  ;;  %v28795_v24 = vld [vmem:[#allocation5 + $0xd0] sm:$0xff]  ;;  %v28808_v33 = vld [vmem:[#allocation5 + $0x138] sm:$0xff] }
  0x17   :  { %17281 = vmatpush.bf16.msra.mxu0 %v28774_v8  ;;  %192 = vst [vmem:[#allocation1] ss:$4 sm:$0xff] %v64_v20  ;;  %v28770_v25 = vld [vmem:[#allocation5 + $0x8] sm:$0xff]  ;;  %v28769_v29 = vld [vmem:[#allocation5] sm:$0xff]  ;;  %v28816_v35 = vld [vmem:[#allocation5 + $0x178] sm:$0xff] }
  0x18   :  { %17294 = vmatpush.bf16.msra.mxu1 %v28782_v9  ;;  %v28778_v26 = vld [vmem:[#allocation5 + $0x48] sm:$0xff]  ;;  %v28777_v30 = vld [vmem:[#allocation5 + $0x40] sm:$0xff]  ;;  %v28824_v36 = vld [vmem:[#allocation5 + $0x1b8] sm:$0xff] }
  0x19   :  { %17307 = vmatpush.bf16.msra.mxu2 %v28790_v10  ;;  %v28786_v27 = vld [vmem:[#allocation5 + $0x88] sm:$0xff]  ;;  %v28785_v32 = vld [vmem:[#allocation5 + $0x80] sm:$0xff]  ;;  %v28832_v41 = vld [vmem:[#allocation5 + $0x1f8] sm:$0xff] }
  0x1a   :  { %17320 = vmatpush.bf16.msra.mxu3 %v28798_v11  ;;  %v28794_v28 = vld [vmem:[#allocation5 + $0xc8] sm:$0xff]  ;;  %v28793_v38 = vld [vmem:[#allocation5 + $0xc0] sm:$0xff]  ;;  %v28807_v44 = vld [vmem:[#allocation5 + $0x130] sm:$0xff] }
  0x1b   :  { %17282 = vmatpush.bf16.msra.mxu0 %v28773_v12  ;;  %v65_v40 = vld [vmem:[#allocation2 + $0x8] sm:$0xff]  ;;  %v28805_v54 = vld [vmem:[#allocation5 + $0x120] sm:$0xff]  ;;  %v28804_v58 = vld [vmem:[#allocation5 + $0x118] sm:$0xff] }
  0x1c   :  { %17295 = vmatpush.bf16.msra.mxu1 %v28781_v13  ;;  %194 = vst [vmem:[#allocation1 + $0x20] ss:$4 sm:$0xff] %v65_v40  ;;  %v28815_v46 = vld [vmem:[#allocation5 + $0x170] sm:$0xff]  ;;  %v28806_v50 = vld [vmem:[#allocation5 + $0x128] sm:$0xff]  ;;  %v28813_v55 = vld [vmem:[#allocation5 + $0x160] sm:$0xff] }
  0x1d   :  { %17308 = vmatpush.bf16.msra.mxu2 %v28789_v14  ;;  %v28823_v47 = vld [vmem:[#allocation5 + $0x1b0] sm:$0xff]  ;;  %v28814_v51 = vld [vmem:[#allocation5 + $0x168] sm:$0xff]  ;;  %v28821_v56 = vld [vmem:[#allocation5 + $0x1a0] sm:$0xff] }
  0x1e   :  { %17321 = vmatpush.bf16.msra.mxu3 %v28797_v15  ;;  %v195_v31 = vld.sshfl [vmem:[#allocation1] sm:$0xff pattern:$0x73625140]  ;;  %v197_v34 = vld.sshfl [vmem:[#allocation1 + $0x10] sm:$0xff pattern:$0x73625140] }
  0x1f   :  { %17283 = vmatpush.bf16.msra.mxu0 %v28772_v16  ;;  %v196_v37 = vld.sshfl [vmem:[#allocation1 + $0x8] sm:$0xff pattern:$0x73625140]  ;;  %v765_v39 = vpack.c.bf16 %v195_v31, %v195_v31  ;;  %v767_v42 = vpack.c.bf16 %v197_v34, %v197_v34  ;;  %v198_v43 = vld.sshfl [vmem:[#allocation1 + $0x18] sm:$0xff pattern:$0x73625140] }
  0x20   :  { %17296 = vmatpush.bf16.msra.mxu1 %v28780_v17  ;;  %v766_v45 = vpack.c.bf16 %v196_v37, %v196_v37  ;;  %v768_v48 = vpack.c.bf16 %v198_v43, %v198_v43  ;;  %v28831_v49 = vld [vmem:[#allocation5 + $0x1f0] sm:$0xff]  ;;  %v28822_v52 = vld [vmem:[#allocation5 + $0x1a8] sm:$0xff]  ;;  %v28829_v57 = vld [vmem:[#allocation5 + $0x1e0] sm:$0xff] }
  0x21   :  { %17309 = vmatpush.bf16.msra.mxu2 %v28788_v18  ;;  %v28830_v53 = vld [vmem:[#allocation5 + $0x1e8] sm:$0xff]  ;;  %v28812_v59 = vld [vmem:[#allocation5 + $0x158] sm:$0xff]  ;;  %v28803_v62 = vld [vmem:[#allocation5 + $0x110] sm:$0xff] }
  0x22   :  { %17322 = vmatpush.bf16.msra.mxu3 %v28796_v19  ;;  %v28820_v60 = vld [vmem:[#allocation5 + $0x198] sm:$0xff]  ;;  %v28811_v63 = vld [vmem:[#allocation5 + $0x150] sm:$0xff]  ;;  %v28802_v3 = vld [vmem:[#allocation5 + $0x108] sm:$0xff] }
  0x23   :  { %17284 = vmatpush.bf16.msra.mxu0 %v28771_v21  ;;  %v28828_v61 = vld [vmem:[#allocation5 + $0x1d8] sm:$0xff]  ;;  %v28819_v0 = vld [vmem:[#allocation5 + $0x190] sm:$0xff]  ;;  %v28810_v4 = vld [vmem:[#allocation5 + $0x148] sm:$0xff] }
  0x24   :  { %17297 = vmatpush.bf16.msra.mxu1 %v28779_v22  ;;  %v28827_v1 = vld [vmem:[#allocation5 + $0x1d0] sm:$0xff]  ;;  %v28818_v5 = vld [vmem:[#allocation5 + $0x188] sm:$0xff]  ;;  %v28801_v7 = vld [vmem:[#allocation5 + $0x100] sm:$0xff] }
  0x25   :  { %17310 = vmatpush.bf16.msra.mxu2 %v28787_v23  ;;  %v66_v2 = vld [vmem:[#allocation2 + $0x10] sm:$0xff]  ;;  %v28826_v6 = vld [vmem:[#allocation5 + $0x1c8] sm:$0xff]  ;;  %v28809_v8 = vld [vmem:[#allocation5 + $0x140] sm:$0xff] }
  0x26   :  { %17323 = vmatpush.bf16.msra.mxu3 %v28795_v24  ;;  %203 = vst [vmem:[#allocation1] ss:$4 sm:$0xff] %v66_v2  ;;  %v28817_v9 = vld [vmem:[#allocation5 + $0x180] sm:$0xff]  ;;  %v28840_v10 = vld [vmem:[#allocation5 + $0x238] sm:$0xff]  ;;  %v28839_v22 = vld [vmem:[#allocation5 + $0x230] sm:$0xff] }
  0x27   :  { %17285 = vmatpush.bf16.msra.mxu0 %v28770_v25  ;;  %v28848_v11 = vld [vmem:[#allocation5 + $0x278] sm:$0xff]  ;;  %v201_v12 = vld.sshfl [vmem:[#allocation1 + $0x30] sm:$0xff pattern:$0x73625140]  ;;  %v28825_v16 = vld [vmem:[#allocation5 + $0x1c0] sm:$0xff] }
  0x28   :  { %17298 = vmatpush.bf16.msra.mxu1 %v28778_v26  ;;  %v199_v13 = vld.sshfl [vmem:[#allocation1 + $0x20] sm:$0xff pattern:$0x73625140]  ;;  %v200_v14 = vld.sshfl [vmem:[#allocation1 + $0x28] sm:$0xff pattern:$0x73625140]  ;;  %v771_v18 = vpack.c.bf16 %v201_v12, %v201_v12 }
  0x29   :  { %17311 = vmatpush.bf16.msra.mxu2 %v28786_v27  ;;  %v28856_v15 = vld [vmem:[#allocation5 + $0x2b8] sm:$0xff]  ;;  %v769_v20 = vpack.c.bf16 %v199_v13, %v199_v13  ;;  %v770_v21 = vpack.c.bf16 %v200_v14, %v200_v14  ;;  %v28847_v23 = vld [vmem:[#allocation5 + $0x270] sm:$0xff]  ;;  %v28838_v27 = vld [vmem:[#allocation5 + $0x228] sm:$0xff] }
  0x2a   :  { %17324 = vmatpush.bf16.msra.mxu3 %v28794_v28  ;;  %v28864_v17 = vld [vmem:[#allocation5 + $0x2f8] sm:$0xff]  ;;  %v28855_v24 = vld [vmem:[#allocation5 + $0x2b0] sm:$0xff]  ;;  %v28846_v28 = vld [vmem:[#allocation5 + $0x268] sm:$0xff] }
  0x2b   :  { %17286 = vmatpush.bf16.msra.mxu0 %v28769_v29  ;;  %v202_v19 = vld.sshfl [vmem:[#allocation1 + $0x38] sm:$0xff pattern:$0x73625140]  ;;  %v28854_v29 = vld [vmem:[#allocation5 + $0x2a8] sm:$0xff]  ;;  %v28837_v31 = vld [vmem:[#allocation5 + $0x220] sm:$0xff] }
  0x2c   :  { %17299 = vmatpush.bf16.msra.mxu1 %v28777_v30  ;;  %v772_v25 = vpack.c.bf16 %v202_v19, %v202_v19  ;;  %v28863_v26 = vld [vmem:[#allocation5 + $0x2f0] sm:$0xff]  ;;  %v28862_v30 = vld [vmem:[#allocation5 + $0x2e8] sm:$0xff]  ;;  %v28861_v34 = vld [vmem:[#allocation5 + $0x2e0] sm:$0xff] }
  0x2d   :  { %17312 = vmatpush.bf16.msra.mxu2 %v28785_v32  ;;  %v28845_v32 = vld [vmem:[#allocation5 + $0x260] sm:$0xff]  ;;  %v28852_v37 = vld [vmem:[#allocation5 + $0x298] sm:$0xff]  ;;  %v28843_v40 = vld [vmem:[#allocation5 + $0x250] sm:$0xff] }
  0x2e   :  { %17325 = vmatpush.bf16.msra.mxu3 %v28793_v38  ;;  %17287 = vmatmul.bf16.vlgmr.msra.gmra.mxu0 %v765_v39  ;;  %v28860_v38 = vld [vmem:[#allocation5 + $0x2d8] sm:$0xff]  ;;  %v28835_v39 = vld [vmem:[#allocation5 + $0x210] sm:$0xff] }
  0x2f   :  { %17331 = vmatpush.bf16.msrb.mxu0 %v28808_v33  ;;  %17300 = vmatmul.bf16.vlgmr.msra.gmra.mxu1 %v766_v45  ;;  %v28853_v33 = vld [vmem:[#allocation5 + $0x2a0] sm:$0xff]  ;;  %v28842_v45 = vld [vmem:[#allocation5 + $0x248] sm:$0xff]  ;;  %v28887_v2 = vld [vmem:[#allocation5 + $0x3b0] sm:$0xff] }
  0x30   :  { %17344 = vmatpush.bf16.msrb.mxu1 %v28816_v35  ;;  %17313 = vmatmul.bf16.vlgmr.msra.gmra.mxu2 %v767_v42  ;;  %v28836_v35 = vld [vmem:[#allocation5 + $0x218] sm:$0xff]  ;;  %v28859_v42 = vld [vmem:[#allocation5 + $0x2d0] sm:$0xff] }
  0x31   :  { %17357 = vmatpush.bf16.msrb.mxu2 %v28824_v36  ;;  %17326 = vmatmul.bf16.vlgmr.msra.gmra.mxu3 %v768_v48  ;;  %v28844_v36 = vld [vmem:[#allocation5 + $0x258] sm:$0xff]  ;;  %v28833_v48 = vld [vmem:[#allocation5 + $0x200] sm:$0xff]  ;;  %v28891_v19 = vld [vmem:[#allocation5 + $0x3d0] sm:$0xff] }
  0x32   :  { %17370 = vmatpush.bf16.msrb.mxu3 %v28832_v41  ;;  %v28851_v41 = vld [vmem:[#allocation5 + $0x290] sm:$0xff]  ;;  %v67_v43 = vld [vmem:[#allocation2 + $0x18] sm:$0xff] }
  0x33   :  { %17332 = vmatpush.bf16.msrb.mxu0 %v28807_v44  ;;  %v28834_v44 = vld [vmem:[#allocation5 + $0x208] sm:$0xff]  ;;  %204 = vst [vmem:[#allocation1 + $0x20] ss:$4 sm:$0xff] %v67_v43  ;;  %v28868_v12 = vld [vmem:[#allocation5 + $0x318] sm:$0xff]  ;;  %v28919_v43 = vld [vmem:[#allocation5 + $0x4b0] sm:$0xff] }
  0x34   :  { %17345 = vmatpush.bf16.msrb.mxu1 %v28815_v46  ;;  %v28850_v46 = vld [vmem:[#allocation5 + $0x288] sm:$0xff]  ;;  %v28876_v13 = vld [vmem:[#allocation5 + $0x358] sm:$0xff] }
  0x35   :  { %17358 = vmatpush.bf16.msrb.mxu2 %v28823_v47  ;;  %v28858_v47 = vld [vmem:[#allocation5 + $0x2c8] sm:$0xff]  ;;  %v28884_v14 = vld [vmem:[#allocation5 + $0x398] sm:$0xff] }
  0x36   :  { %17371 = vmatpush.bf16.msrb.mxu3 %v28831_v49  ;;  %v28841_v49 = vld [vmem:[#allocation5 + $0x240] sm:$0xff] }
  0x37   :  { %17333 = vmatpush.bf16.msrb.mxu0 %v28806_v50  ;;  %v205_v50 = vld.sshfl [vmem:[#allocation1] sm:$0xff pattern:$0x73625140] }
  0x38   :  { %17346 = vmatpush.bf16.msrb.mxu1 %v28814_v51  ;;  %v28849_v51 = vld [vmem:[#allocation5 + $0x280] sm:$0xff] }
  0x39   :  { %17359 = vmatpush.bf16.msrb.mxu2 %v28822_v52  ;;  %v28872_v52 = vld [vmem:[#allocation5 + $0x338] sm:$0xff] }
  0x3a   :  { %17372 = vmatpush.bf16.msrb.mxu3 %v28830_v53  ;;  %v207_v53 = vld.sshfl [vmem:[#allocation1 + $0x10] sm:$0xff pattern:$0x73625140] }
  0x3b   :  { %17334 = vmatpush.bf16.msrb.mxu0 %v28805_v54  ;;  %v28880_v54 = vld [vmem:[#allocation5 + $0x378] sm:$0xff] }
  0x3c   :  { %17347 = vmatpush.bf16.msrb.mxu1 %v28813_v55  ;;  %v28888_v55 = vld [vmem:[#allocation5 + $0x3b8] sm:$0xff] }
  0x3d   :  { %17360 = vmatpush.bf16.msrb.mxu2 %v28821_v56  ;;  %v206_v56 = vld.sshfl [vmem:[#allocation1 + $0x8] sm:$0xff pattern:$0x73625140] }
  0x3e   :  { %17373 = vmatpush.bf16.msrb.mxu3 %v28829_v57  ;;  %v28857_v57 = vld [vmem:[#allocation5 + $0x2c0] sm:$0xff] }
  0x3f   :  { %17335 = vmatpush.bf16.msrb.mxu0 %v28804_v58  ;;  %v773_v58 = vpack.c.bf16 %v205_v50, %v205_v50  ;;  %v28909_v50 = vld [vmem:[#allocation5 + $0x460] sm:$0xff] }
  0x40   :  { %17348 = vmatpush.bf16.msrb.mxu1 %v28812_v59  ;;  %v208_v59 = vld.sshfl [vmem:[#allocation1 + $0x18] sm:$0xff pattern:$0x73625140] }
  0x41   :  { %17361 = vmatpush.bf16.msrb.mxu2 %v28820_v60  ;;  %v775_v60 = vpack.c.bf16 %v207_v53, %v207_v53  ;;  %v28900_v53 = vld [vmem:[#allocation5 + $0x418] sm:$0xff] }
  0x42   :  { %17374 = vmatpush.bf16.msrb.mxu3 %v28828_v61  ;;  %v28896_v61 = vld [vmem:[#allocation5 + $0x3f8] sm:$0xff] }
  0x43   :  { %17336 = vmatpush.bf16.msrb.mxu0 %v28803_v62  ;;  %v774_v62 = vpack.c.bf16 %v206_v56, %v206_v56  ;;  %v28924_v56 = vld [vmem:[#allocation5 + $0x4d8] sm:$0xff] }
  0x44   :  { %17349 = vmatpush.bf16.msrb.mxu1 %v28811_v63  ;;  %v28871_v63 = vld [vmem:[#allocation5 + $0x330] sm:$0xff] }
  0x45   :  { %17362 = vmatpush.bf16.msrb.mxu2 %v28819_v0  ;;  %v776_v0 = vpack.c.bf16 %v208_v59, %v208_v59  ;;  %v28915_v59 = vld [vmem:[#allocation5 + $0x490] sm:$0xff] }
  0x46   :  { %17375 = vmatpush.bf16.msrb.mxu3 %v28827_v1  ;;  %v28879_v1 = vld [vmem:[#allocation5 + $0x370] sm:$0xff] }
  0x47   :  { %17337 = vmatpush.bf16.msrb.mxu0 %v28802_v3  ;;  %v28895_v3 = vld [vmem:[#allocation5 + $0x3f0] sm:$0xff] }
  0x48   :  { %17350 = vmatpush.bf16.msrb.mxu1 %v28810_v4  ;;  %v28870_v4 = vld [vmem:[#allocation5 + $0x328] sm:$0xff] }
  0x49   :  { %17363 = vmatpush.bf16.msrb.mxu2 %v28818_v5  ;;  %v28878_v5 = vld [vmem:[#allocation5 + $0x368] sm:$0xff] }
  0x4a   :  { %17376 = vmatpush.bf16.msrb.mxu3 %v28826_v6  ;;  %v28886_v6 = vld [vmem:[#allocation5 + $0x3a8] sm:$0xff] }
  0x4b   :  { %17338 = vmatpush.bf16.msrb.mxu0 %v28801_v7  ;;  %v28894_v7 = vld [vmem:[#allocation5 + $0x3e8] sm:$0xff] }
  0x4c   :  { %17351 = vmatpush.bf16.msrb.mxu1 %v28809_v8  ;;  %v28869_v8 = vld [vmem:[#allocation5 + $0x320] sm:$0xff] }
  0x4d   :  { %17364 = vmatpush.bf16.msrb.mxu2 %v28817_v9  ;;  %v28877_v9 = vld [vmem:[#allocation5 + $0x360] sm:$0xff] }
  0x4e   :  { %17377 = vmatpush.bf16.msrb.mxu3 %v28825_v16  ;;  %17339 = vmatmul.bf16.vlgmr.msrb.gmra.mxu0 %v769_v20  ;;  %v28867_v16 = vld [vmem:[#allocation5 + $0x310] sm:$0xff]  ;;  %v28866_v20 = vld [vmem:[#allocation5 + $0x308] sm:$0xff] }
  0x4f   :  { %17383 = vmatpush.bf16.msra.mxu0 %v28840_v10  ;;  %17352 = vmatmul.bf16.vlgmr.msrb.gmra.mxu1 %v770_v21  ;;  %v28885_v10 = vld [vmem:[#allocation5 + $0x3a0] sm:$0xff] }
  0x50   :  { %17396 = vmatpush.bf16.msra.mxu1 %v28848_v11  ;;  %17365 = vmatmul.bf16.vlgmr.msrb.gmra.mxu2 %v771_v18  ;;  %v28893_v11 = vld [vmem:[#allocation5 + $0x3e0] sm:$0xff]  ;;  %v28883_v18 = vld [vmem:[#allocation5 + $0x390] sm:$0xff] }
  0x51   :  { %17409 = vmatpush.bf16.msra.mxu2 %v28856_v15  ;;  %17378 = vmatmul.bf16.vlgmr.msrb.gmra.mxu3 %v772_v25  ;;  %v28892_v15 = vld [vmem:[#allocation5 + $0x3d8] sm:$0xff]  ;;  %v68_v21 = vld [vmem:[#allocation2 + $0x20] sm:$0xff] }
  0x52   :  { %17422 = vmatpush.bf16.msra.mxu3 %v28864_v17  ;;  %v28875_v17 = vld [vmem:[#allocation5 + $0x350] sm:$0xff]  ;;  %213 = vst [vmem:[#allocation1] ss:$4 sm:$0xff] %v68_v21  ;;  %v28865_v25 = vld [vmem:[#allocation5 + $0x300] sm:$0xff] }
  0x53   :  { %17384 = vmatpush.bf16.msra.mxu0 %v28839_v22  ;;  %v28874_v22 = vld [vmem:[#allocation5 + $0x348] sm:$0xff]  ;;  %v28959_v21 = vld [vmem:[#allocation5 + $0x5f0] sm:$0xff] }
  0x54   :  { %17397 = vmatpush.bf16.msra.mxu1 %v28847_v23  ;;  %v28882_v23 = vld [vmem:[#allocation5 + $0x388] sm:$0xff] }
  0x55   :  { %17410 = vmatpush.bf16.msra.mxu2 %v28855_v24  ;;  %v28890_v24 = vld [vmem:[#allocation5 + $0x3c8] sm:$0xff] }
  0x56   :  { %17423 = vmatpush.bf16.msra.mxu3 %v28863_v26  ;;  %v28873_v26 = vld [vmem:[#allocation5 + $0x340] sm:$0xff] }
  0x57   :  { %17385 = vmatpush.bf16.msra.mxu0 %v28838_v27  ;;  %v28881_v27 = vld [vmem:[#allocation5 + $0x380] sm:$0xff] }
  0x58   :  { %17398 = vmatpush.bf16.msra.mxu1 %v28846_v28  ;;  %v28904_v28 = vld [vmem:[#allocation5 + $0x438] sm:$0xff] }
  0x59   :  { %17411 = vmatpush.bf16.msra.mxu2 %v28854_v29  ;;  %v28912_v29 = vld [vmem:[#allocation5 + $0x478] sm:$0xff] }
  0x5a   :  { %17424 = vmatpush.bf16.msra.mxu3 %v28862_v30  ;;  %v209_v30 = vld.sshfl [vmem:[#allocation1 + $0x20] sm:$0xff pattern:$0x73625140] }
  0x5b   :  { %17386 = vmatpush.bf16.msra.mxu0 %v28837_v31  ;;  %v211_v31 = vld.sshfl [vmem:[#allocation1 + $0x30] sm:$0xff pattern:$0x73625140] }
  0x5c   :  { %17399 = vmatpush.bf16.msra.mxu1 %v28845_v32  ;;  %v210_v32 = vld.sshfl [vmem:[#allocation1 + $0x28] sm:$0xff pattern:$0x73625140] }
  0x5d   :  { %17412 = vmatpush.bf16.msra.mxu2 %v28853_v33  ;;  %v28920_v33 = vld [vmem:[#allocation5 + $0x4b8] sm:$0xff] }
  0x5e   :  { %17425 = vmatpush.bf16.msra.mxu3 %v28861_v34  ;;  %v28889_v34 = vld [vmem:[#allocation5 + $0x3c0] sm:$0xff] }
  0x5f   :  { %17387 = vmatpush.bf16.msra.mxu0 %v28836_v35  ;;  %v212_v35 = vld.sshfl [vmem:[#allocation1 + $0x38] sm:$0xff pattern:$0x73625140] }
  0x60   :  { %17400 = vmatpush.bf16.msra.mxu1 %v28844_v36  ;;  %v777_v36 = vpack.c.bf16 %v209_v30, %v209_v30  ;;  %v28949_v30 = vld [vmem:[#allocation5 + $0x5a0] sm:$0xff] }
  0x61   :  { %17413 = vmatpush.bf16.msra.mxu2 %v28852_v37  ;;  %v28928_v37 = vld [vmem:[#allocation5 + $0x4f8] sm:$0xff] }
  0x62   :  { %17426 = vmatpush.bf16.msra.mxu3 %v28860_v38  ;;  %v779_v38 = vpack.c.bf16 %v211_v31, %v211_v31 }
  0x63   :  { %17388 = vmatpush.bf16.msra.mxu0 %v28835_v39  ;;  %v778_v39 = vpack.c.bf16 %v210_v32, %v210_v32 }
  0x64   :  { %17401 = vmatpush.bf16.msra.mxu1 %v28843_v40  ;;  %v780_v40 = vpack.c.bf16 %v212_v35, %v212_v35  ;;  %v28932_v35 = vld [vmem:[#allocation5 + $0x518] sm:$0xff] }
  0x65   :  { %17414 = vmatpush.bf16.msra.mxu2 %v28851_v41  ;;  %v28903_v41 = vld [vmem:[#allocation5 + $0x430] sm:$0xff] }
  0x66   :  { %17427 = vmatpush.bf16.msra.mxu3 %v28859_v42  ;;  %v28911_v42 = vld [vmem:[#allocation5 + $0x470] sm:$0xff] }
  0x67   :  { %17389 = vmatpush.bf16.msra.mxu0 %v28834_v44  ;;  %v28927_v44 = vld [vmem:[#allocation5 + $0x4f0] sm:$0xff] }
  0x68   :  { %17402 = vmatpush.bf16.msra.mxu1 %v28842_v45  ;;  %v28902_v45 = vld [vmem:[#allocation5 + $0x428] sm:$0xff] }
  0x69   :  { %17415 = vmatpush.bf16.msra.mxu2 %v28850_v46  ;;  %v28910_v46 = vld [vmem:[#allocation5 + $0x468] sm:$0xff] }
  0x6a   :  { %17428 = vmatpush.bf16.msra.mxu3 %v28858_v47  ;;  %v28918_v47 = vld [vmem:[#allocation5 + $0x4a8] sm:$0xff] }
  0x6b   :  { %17390 = vmatpush.bf16.msra.mxu0 %v28833_v48  ;;  %v28926_v48 = vld [vmem:[#allocation5 + $0x4e8] sm:$0xff] }
  0x6c   :  { %17403 = vmatpush.bf16.msra.mxu1 %v28841_v49  ;;  %v28901_v49 = vld [vmem:[#allocation5 + $0x420] sm:$0xff] }
  0x6d   :  { %17416 = vmatpush.bf16.msra.mxu2 %v28849_v51  ;;  %v28917_v51 = vld [vmem:[#allocation5 + $0x4a0] sm:$0xff] }
  0x6e   :  { %17429 = vmatpush.bf16.msra.mxu3 %v28857_v57  ;;  %17391 = vmatmul.bf16.vlgmr.msra.gmra.mxu0 %v773_v58  ;;  %v28899_v57 = vld [vmem:[#allocation5 + $0x410] sm:$0xff] }
  0x6f   :  { %17435 = vmatpush.bf16.msrb.mxu0 %v28872_v52  ;;  %17404 = vmatmul.bf16.vlgmr.msra.gmra.mxu1 %v774_v62  ;;  %v28925_v52 = vld [vmem:[#allocation5 + $0x4e0] sm:$0xff]  ;;  %v28907_v58 = vld [vmem:[#allocation5 + $0x450] sm:$0xff] }
  0x70   :  { %17448 = vmatpush.bf16.msrb.mxu1 %v28880_v54  ;;  %17417 = vmatmul.bf16.vlgmr.msra.gmra.mxu2 %v775_v60  ;;  %v28908_v54 = vld [vmem:[#allocation5 + $0x458] sm:$0xff]  ;;  %v28923_v60 = vld [vmem:[#allocation5 + $0x4d0] sm:$0xff] }
  0x71   :  { %17461 = vmatpush.bf16.msrb.mxu2 %v28888_v55  ;;  %17430 = vmatmul.bf16.vlgmr.msra.gmra.mxu3 %v776_v0  ;;  %v28916_v55 = vld [vmem:[#allocation5 + $0x498] sm:$0xff]  ;;  %v69_v62 = vld [vmem:[#allocation2 + $0x28] sm:$0xff] }
  0x72   :  { %17474 = vmatpush.bf16.msrb.mxu3 %v28896_v61  ;;  %v28898_v61 = vld [vmem:[#allocation5 + $0x408] sm:$0xff]  ;;  %214 = vst [vmem:[#allocation1 + $0x20] ss:$4 sm:$0xff] %v69_v62 }
  0x73   :  { %17436 = vmatpush.bf16.msrb.mxu0 %v28871_v63  ;;  %v28906_v63 = vld [vmem:[#allocation5 + $0x448] sm:$0xff] }
  0x74   :  { %17449 = vmatpush.bf16.msrb.mxu1 %v28879_v1  ;;  %v28914_v0 = vld [vmem:[#allocation5 + $0x488] sm:$0xff] }
  0x75   :  { %17462 = vmatpush.bf16.msrb.mxu2 %v28887_v2  ;;  %v28922_v1 = vld [vmem:[#allocation5 + $0x4c8] sm:$0xff]  ;;  %v28897_v2 = vld [vmem:[#allocation5 + $0x400] sm:$0xff] }
  0x76   :  { %17475 = vmatpush.bf16.msrb.mxu3 %v28895_v3  ;;  %v28905_v3 = vld [vmem:[#allocation5 + $0x440] sm:$0xff] }
  0x77   :  { %17437 = vmatpush.bf16.msrb.mxu0 %v28870_v4  ;;  %v28913_v4 = vld [vmem:[#allocation5 + $0x480] sm:$0xff] }
  0x78   :  { %17450 = vmatpush.bf16.msrb.mxu1 %v28878_v5  ;;  %v215_v5 = vld.sshfl [vmem:[#allocation1] sm:$0xff pattern:$0x73625140] }
  0x79   :  { %17463 = vmatpush.bf16.msrb.mxu2 %v28886_v6  ;;  %v217_v6 = vld.sshfl [vmem:[#allocation1 + $0x10] sm:$0xff pattern:$0x73625140]  ;;  %v220_v62 = vld.sshfl [vmem:[#allocation1 + $0x28] sm:$0xff pattern:$0x73625140] }
  0x7a   :  { %17476 = vmatpush.bf16.msrb.mxu3 %v28894_v7  ;;  %v28936_v7 = vld [vmem:[#allocation5 + $0x538] sm:$0xff] }
  0x7b   :  { %17438 = vmatpush.bf16.msrb.mxu0 %v28869_v8  ;;  %v28944_v8 = vld [vmem:[#allocation5 + $0x578] sm:$0xff] }
  0x7c   :  { %17451 = vmatpush.bf16.msrb.mxu1 %v28877_v9  ;;  %v216_v9 = vld.sshfl [vmem:[#allocation1 + $0x8] sm:$0xff pattern:$0x73625140] }
  0x7d   :  { %17464 = vmatpush.bf16.msrb.mxu2 %v28885_v10  ;;  %v28952_v10 = vld [vmem:[#allocation5 + $0x5b8] sm:$0xff] }
  0x7e   :  { %17477 = vmatpush.bf16.msrb.mxu3 %v28893_v11  ;;  %v28921_v11 = vld [vmem:[#allocation5 + $0x4c0] sm:$0xff] }
  0x7f   :  { %17439 = vmatpush.bf16.msrb.mxu0 %v28868_v12  ;;  %v218_v12 = vld.sshfl [vmem:[#allocation1 + $0x18] sm:$0xff pattern:$0x73625140] }
  0x80   :  { %17452 = vmatpush.bf16.msrb.mxu1 %v28876_v13  ;;  %v781_v13 = vpack.c.bf16 %v215_v5, %v215_v5  ;;  %v28992_v5 = vld [vmem:[#allocation5 + $0x6f8] sm:$0xff] }
  0x81   :  { %17465 = vmatpush.bf16.msrb.mxu2 %v28884_v14  ;;  %v783_v14 = vpack.c.bf16 %v217_v6, %v217_v6  ;;  %v786_v6 = vpack.c.bf16 %v220_v62, %v220_v62  ;;  %v29007_v62 = vld [vmem:[#allocation5 + $0x770] sm:$0xff] }
  0x82   :  { %17478 = vmatpush.bf16.msrb.mxu3 %v28892_v15  ;;  %v28960_v15 = vld [vmem:[#allocation5 + $0x5f8] sm:$0xff] }
  0x83   :  { %17440 = vmatpush.bf16.msrb.mxu0 %v28867_v16  ;;  %v782_v16 = vpack.c.bf16 %v216_v9, %v216_v9  ;;  %v28975_v9 = vld [vmem:[#allocation5 + $0x670] sm:$0xff] }
  0x84   :  { %17453 = vmatpush.bf16.msrb.mxu1 %v28875_v17  ;;  %v784_v17 = vpack.c.bf16 %v218_v12, %v218_v12  ;;  %v28966_v12 = vld [vmem:[#allocation5 + $0x628] sm:$0xff] }
  0x85   :  { %17466 = vmatpush.bf16.msrb.mxu2 %v28883_v18  ;;  %v28935_v18 = vld [vmem:[#allocation5 + $0x530] sm:$0xff] }
  0x86   :  { %17479 = vmatpush.bf16.msrb.mxu3 %v28891_v19  ;;  %v28943_v19 = vld [vmem:[#allocation5 + $0x570] sm:$0xff] }
  0x87   :  { %17441 = vmatpush.bf16.msrb.mxu0 %v28866_v20  ;;  %v28951_v20 = vld [vmem:[#allocation5 + $0x5b0] sm:$0xff] }
  0x88   :  { %17454 = vmatpush.bf16.msrb.mxu1 %v28874_v22  ;;  %v28934_v22 = vld [vmem:[#allocation5 + $0x528] sm:$0xff] }
  0x89   :  { %17467 = vmatpush.bf16.msrb.mxu2 %v28882_v23  ;;  %v28942_v23 = vld [vmem:[#allocation5 + $0x568] sm:$0xff] }
  0x8a   :  { %17480 = vmatpush.bf16.msrb.mxu3 %v28890_v24  ;;  %v28950_v24 = vld [vmem:[#allocation5 + $0x5a8] sm:$0xff] }
  0x8b   :  { %17442 = vmatpush.bf16.msrb.mxu0 %v28865_v25  ;;  %v30807_v25 = vld [vmem:[#allocation7] ss:$0 sm:$0xff] }
  0x8c   :  { %17455 = vmatpush.bf16.msrb.mxu1 %v28873_v26  ;;  %v28958_v26 = vld [vmem:[#allocation5 + $0x5e8] sm:$0xff] }
  0x8d   :  { %17468 = vmatpush.bf16.msrb.mxu2 %v28881_v27  ;;  %v28933_v27 = vld [vmem:[#allocation5 + $0x520] sm:$0xff] }
  0x8e   :  { %17481 = vmatpush.bf16.msrb.mxu3 %v28889_v34  ;;  %17443 = vmatmul.bf16.vlgmr.msrb.gmra.mxu0 %v777_v36  ;;  %v28940_v36 = vld [vmem:[#allocation5 + $0x558] sm:$0xff] }
  0x8f   :  { %17487 = vmatpush.bf16.msra.mxu0 %v28904_v28  ;;  %17456 = vmatmul.bf16.vlgmr.msrb.gmra.mxu1 %v778_v39 }
  0x90   :  { %17500 = vmatpush.bf16.msra.mxu1 %v28912_v29  ;;  %17469 = vmatmul.bf16.vlgmr.msrb.gmra.mxu2 %v779_v38  ;;  %v28941_v29 = vld [vmem:[#allocation5 + $0x560] sm:$0xff]  ;;  %v28956_v38 = vld [vmem:[#allocation5 + $0x5d8] sm:$0xff] }
  0x91   :  { %17513 = vmatpush.bf16.msra.mxu2 %v28920_v33  ;;  %17482 = vmatmul.bf16.vlgmr.msrb.gmra.mxu3 %v780_v40  ;;  %v28957_v33 = vld [vmem:[#allocation5 + $0x5e0] sm:$0xff]  ;;  %v28931_v40 = vld [vmem:[#allocation5 + $0x510] sm:$0xff] }
  0x92   :  { %17526 = vmatpush.bf16.msra.mxu3 %v28928_v37  ;;  %v28948_v37 = vld [vmem:[#allocation5 + $0x598] sm:$0xff] }
  0x93   :  { %17488 = vmatpush.bf16.msra.mxu0 %v28903_v41 }
  0x94   :  { %17501 = vmatpush.bf16.msra.mxu1 %v28911_v42 }
  0x95   :  { %17514 = vmatpush.bf16.msra.mxu2 %v28919_v43  ;;  %v28939_v43 = vld [vmem:[#allocation5 + $0x550] sm:$0xff] }
  0x96   :  { %17527 = vmatpush.bf16.msra.mxu3 %v28927_v44  ;;  %v28947_v44 = vld [vmem:[#allocation5 + $0x590] sm:$0xff] }
  0x97   :  { %17489 = vmatpush.bf16.msra.mxu0 %v28902_v45 }
  0x98   :  { %17502 = vmatpush.bf16.msra.mxu1 %v28910_v46 }
  0x99   :  { %17515 = vmatpush.bf16.msra.mxu2 %v28918_v47  ;;  %v28955_v47 = vld [vmem:[#allocation5 + $0x5d0] sm:$0xff] }
  0x9a   :  { %17528 = vmatpush.bf16.msra.mxu3 %v28926_v48 }
  0x9b   :  { %17490 = vmatpush.bf16.msra.mxu0 %v28901_v49  ;;  %v28930_v49 = vld [vmem:[#allocation5 + $0x508] sm:$0xff] }
  0x9c   :  { %17503 = vmatpush.bf16.msra.mxu1 %v28909_v50  ;;  %v70_v50 = vld [vmem:[#allocation2 + $0x30] sm:$0xff] }
  0x9d   :  { %17516 = vmatpush.bf16.msra.mxu2 %v28917_v51  ;;  %v28938_v51 = vld [vmem:[#allocation5 + $0x548] sm:$0xff]  ;;  %223 = vst [vmem:[#allocation1] ss:$4 sm:$0xff] %v70_v50  ;;  %v29000_v50 = vld [vmem:[#allocation5 + $0x738] sm:$0xff] }
  0x9e   :  { %17529 = vmatpush.bf16.msra.mxu3 %v28925_v52  ;;  %v28946_v52 = vld [vmem:[#allocation5 + $0x588] sm:$0xff] }
  0x9f   :  { %17491 = vmatpush.bf16.msra.mxu0 %v28900_v53  ;;  %v28954_v53 = vld [vmem:[#allocation5 + $0x5c8] sm:$0xff] }
  0xa0   :  { %17504 = vmatpush.bf16.msra.mxu1 %v28908_v54 }
  0xa1   :  { %17517 = vmatpush.bf16.msra.mxu2 %v28916_v55  ;;  %v28929_v55 = vld [vmem:[#allocation5 + $0x500] sm:$0xff] }
  0xa2   :  { %17530 = vmatpush.bf16.msra.mxu3 %v28924_v56  ;;  %v28937_v56 = vld [vmem:[#allocation5 + $0x540] sm:$0xff] }
  0xa3   :  { %17492 = vmatpush.bf16.msra.mxu0 %v28899_v57  ;;  %v28945_v57 = vld [vmem:[#allocation5 + $0x580] sm:$0xff] }
  0xa4   :  { %17505 = vmatpush.bf16.msra.mxu1 %v28907_v58  ;;  %v219_v58 = vld.sshfl [vmem:[#allocation1 + $0x20] sm:$0xff pattern:$0x73625140] }
  0xa5   :  { %17518 = vmatpush.bf16.msra.mxu2 %v28915_v59  ;;  %v221_v59 = vld.sshfl [vmem:[#allocation1 + $0x30] sm:$0xff pattern:$0x73625140] }
  0xa6   :  { %17531 = vmatpush.bf16.msra.mxu3 %v28923_v60  ;;  %v28968_v60 = vld [vmem:[#allocation5 + $0x638] sm:$0xff] }
  0xa7   :  { %17493 = vmatpush.bf16.msra.mxu0 %v28898_v61  ;;  %v28976_v61 = vld [vmem:[#allocation5 + $0x678] sm:$0xff] }
  0xa8   :  { %17506 = vmatpush.bf16.msra.mxu1 %v28906_v63 }
  0xa9   :  { %17519 = vmatpush.bf16.msra.mxu2 %v28914_v0  ;;  %v28984_v0 = vld [vmem:[#allocation5 + $0x6b8] sm:$0xff] }
  0xaa   :  { %17532 = vmatpush.bf16.msra.mxu3 %v28922_v1  ;;  %v28953_v1 = vld [vmem:[#allocation5 + $0x5c0] sm:$0xff] }
  0xab   :  { %17494 = vmatpush.bf16.msra.mxu0 %v28897_v2  ;;  %v17288_v28 = vpop.f32.mrf.mxu0  ;;  %v222_v2 = vld.sshfl [vmem:[#allocation1 + $0x38] sm:$0xff pattern:$0x73625140] }
  0xac   :  { %17507 = vmatpush.bf16.msra.mxu1 %v28905_v3  ;;  %v17289_v31 = vadd.f32 %v30807_v25, %v17288_v28  ;;  %v17301_v32 = vpop.f32.mrf.mxu1  ;;  %v785_v3 = vpack.c.bf16 %v219_v58, %v219_v58  ;;  %v28972_v25 = vld [vmem:[#allocation5 + $0x658] sm:$0xff] }
  0xad   :  { %17520 = vmatpush.bf16.msra.mxu2 %v28913_v4  ;;  %v787_v4 = vpack.c.bf16 %v221_v59, %v221_v59  ;;  %v28988_v28 = vld [vmem:[#allocation5 + $0x6d8] sm:$0xff] }
  0xae   :  { %17533 = vmatpush.bf16.msra.mxu3 %v28921_v11  ;;  %17495 = vmatmul.bf16.vlgmr.msra.gmra.mxu0 %v781_v13  ;;  %v17302_v34 = vadd.f32 %v17301_v32, %v17289_v31  ;;  %v28991_v11 = vld [vmem:[#allocation5 + $0x6f0] sm:$0xff]  ;;  %v28974_v13 = vld [vmem:[#allocation5 + $0x668] sm:$0xff]  ;;  %v29024_v58 = vld [vmem:[#allocation5 + $0x7f8] sm:$0xff] }
  0xaf   :  { %17539 = vmatpush.bf16.msrb.mxu0 %v28936_v7  ;;  %17508 = vmatmul.bf16.vlgmr.msra.gmra.mxu1 %v782_v16  ;;  %v788_v7 = vpack.c.bf16 %v222_v2, %v222_v2  ;;  %v28965_v16 = vld [vmem:[#allocation5 + $0x620] sm:$0xff]  ;;  %v28971_v31 = vld [vmem:[#allocation5 + $0x650] sm:$0xff]  ;;  %v29006_v2 = vld [vmem:[#allocation5 + $0x768] sm:$0xff] }
  0xb0   :  { %17552 = vmatpush.bf16.msrb.mxu1 %v28944_v8  ;;  %17521 = vmatmul.bf16.vlgmr.msra.gmra.mxu2 %v783_v14  ;;  %v28967_v8 = vld [vmem:[#allocation5 + $0x630] sm:$0xff]  ;;  %v28982_v14 = vld [vmem:[#allocation5 + $0x6a8] sm:$0xff] }
  0xb1   :  { %17565 = vmatpush.bf16.msrb.mxu2 %v28952_v10  ;;  %17534 = vmatmul.bf16.vlgmr.msra.gmra.mxu3 %v784_v17  ;;  %v28983_v10 = vld [vmem:[#allocation5 + $0x6b0] sm:$0xff]  ;;  %v28973_v17 = vld [vmem:[#allocation5 + $0x660] sm:$0xff] }
  0xb2   :  { %17578 = vmatpush.bf16.msrb.mxu3 %v28960_v15  ;;  %v28990_v15 = vld [vmem:[#allocation5 + $0x6e8] sm:$0xff]  ;;  %v28979_v32 = vld [vmem:[#allocation5 + $0x690] sm:$0xff] }
  0xb3   :  { %17540 = vmatpush.bf16.msrb.mxu0 %v28935_v18  ;;  %v17314_v39 = vpop.f32.mrf.mxu2  ;;  %v17290_v42 = vpop.f32.mrf.mxu0  ;;  %v28981_v18 = vld [vmem:[#allocation5 + $0x6a0] sm:$0xff] }
  0xb4   :  { %17553 = vmatpush.bf16.msrb.mxu1 %v28943_v19  ;;  %v17315_v41 = vadd.f32 %v17314_v39, %v17302_v34  ;;  %v17327_v45 = vpop.f32.mrf.mxu3  ;;  %v17303_v46 = vpop.f32.mrf.mxu1  ;;  %v71_v39 = vld [vmem:[#allocation2 + $0x38] sm:$0xff] }
  0xb5   :  { %17566 = vmatpush.bf16.msrb.mxu2 %v28951_v20  ;;  %224 = vst [vmem:[#allocation1 + $0x20] ss:$4 sm:$0xff] %v71_v39  ;;  %v28977_v46 = vld [vmem:[#allocation5 + $0x680] sm:$0xff]  ;;  %v29032_v39 = vld [vmem:[#allocation5 + $0x838] sm:$0xff] }
  0xb6   :  { %17579 = vmatpush.bf16.msrb.mxu3 %v28959_v21  ;;  %v30956_v48 = vadd.f32 %v17327_v45, %v17315_v41  ;;  %v28978_v41 = vld [vmem:[#allocation5 + $0x688] sm:$0xff]  ;;  %v28969_v45 = vld [vmem:[#allocation5 + $0x640] sm:$0xff] }
  0xb7   :  { %17541 = vmatpush.bf16.msrb.mxu0 %v28934_v22  ;;  %v28989_v22 = vld [vmem:[#allocation5 + $0x6e0] sm:$0xff] }
  0xb8   :  { %17554 = vmatpush.bf16.msrb.mxu1 %v28942_v23  ;;  %v28964_v23 = vld [vmem:[#allocation5 + $0x618] sm:$0xff] }
  0xb9   :  { %17567 = vmatpush.bf16.msrb.mxu2 %v28950_v24 }
  0xba   :  { %17580 = vmatpush.bf16.msrb.mxu3 %v28958_v26  ;;  %v28980_v26 = vld [vmem:[#allocation5 + $0x698] sm:$0xff] }
  0xbb   :  { %17542 = vmatpush.bf16.msrb.mxu0 %v28933_v27  ;;  %v17316_v54 = vpop.f32.mrf.mxu2 }
  0xbc   :  { %17555 = vmatpush.bf16.msrb.mxu1 %v28941_v29  ;;  %v17329_v63 = vpop.f32.mrf.mxu3  ;;  %v28985_v54 = vld [vmem:[#allocation5 + $0x6c0] sm:$0xff] }
  0xbd   :  { %17568 = vmatpush.bf16.msrb.mxu2 %v28949_v30  ;;  %v28963_v30 = vld [vmem:[#allocation5 + $0x610] sm:$0xff] }
  0xbe   :  { %17581 = vmatpush.bf16.msrb.mxu3 %v28957_v33  ;;  %v29015_v63 = vld [vmem:[#allocation5 + $0x7b0] sm:$0xff] }
  0xbf   :  { %17543 = vmatpush.bf16.msrb.mxu0 %v28932_v35 }
  0xc0   :  { %17556 = vmatpush.bf16.msrb.mxu1 %v28940_v36 }
  0xc1   :  { %17569 = vmatpush.bf16.msrb.mxu2 %v28948_v37  ;;  %v28987_v37 = vld [vmem:[#allocation5 + $0x6d0] sm:$0xff] }
  0xc2   :  { %17582 = vmatpush.bf16.msrb.mxu3 %v28956_v38  ;;  %v28962_v38 = vld [vmem:[#allocation5 + $0x608] sm:$0xff] }
  0xc3   :  { %17544 = vmatpush.bf16.msrb.mxu0 %v28931_v40  ;;  %v28970_v40 = vld [vmem:[#allocation5 + $0x648] sm:$0xff] }
  0xc4   :  { %17557 = vmatpush.bf16.msrb.mxu1 %v28939_v43  ;;  %v28986_v43 = vld [vmem:[#allocation5 + $0x6c8] sm:$0xff] }
  0xc5   :  { %17570 = vmatpush.bf16.msrb.mxu2 %v28947_v44  ;;  %v28961_v44 = vld [vmem:[#allocation5 + $0x600] sm:$0xff] }
  0xc6   :  { %17583 = vmatpush.bf16.msrb.mxu3 %v28955_v47  ;;  %v225_v47 = vld.sshfl [vmem:[#allocation1] sm:$0xff pattern:$0x73625140] }
  0xc7   :  { %17545 = vmatpush.bf16.msrb.mxu0 %v28930_v49 }
  0xc8   :  { %17558 = vmatpush.bf16.msrb.mxu1 %v28938_v51  ;;  %v29008_v51 = vld [vmem:[#allocation5 + $0x778] sm:$0xff] }
  0xc9   :  { %17571 = vmatpush.bf16.msrb.mxu2 %v28946_v52  ;;  %v226_v52 = vld.sshfl [vmem:[#allocation1 + $0x8] sm:$0xff pattern:$0x73625140] }
  0xca   :  { %17584 = vmatpush.bf16.msrb.mxu3 %v28954_v53  ;;  %v29016_v53 = vld [vmem:[#allocation5 + $0x7b8] sm:$0xff]  ;;  %v790_v59 = vpack.c.bf16 %v226_v52, %v226_v52  ;;  %v29047_v52 = vld [vmem:[#allocation5 + $0x8b0] sm:$0xff] }
  0xcb   :  { %17546 = vmatpush.bf16.msrb.mxu0 %v28929_v55  ;;  %v17340_v19 = vpop.f32.mrf.mxu0  ;;  %v228_v55 = vld.sshfl [vmem:[#allocation1 + $0x18] sm:$0xff pattern:$0x73625140] }
  0xcc   :  { %17559 = vmatpush.bf16.msrb.mxu1 %v28937_v56  ;;  %v17353_v20 = vpop.f32.mrf.mxu1  ;;  %v17341_v21 = vadd.f32 %v17340_v19, %v30956_v48  ;;  %v227_v48 = vld.sshfl [vmem:[#allocation1 + $0x10] sm:$0xff pattern:$0x73625140]  ;;  %v789_v56 = vpack.c.bf16 %v225_v47, %v225_v47  ;;  %v29056_v47 = vld [vmem:[#allocation5 + $0x8f8] sm:$0xff] }
  0xcd   :  { %17572 = vmatpush.bf16.msrb.mxu2 %v28945_v57  ;;  %v791_v57 = vpack.c.bf16 %v227_v48, %v227_v48 }
  0xce   :  { %17585 = vmatpush.bf16.msrb.mxu3 %v28953_v1  ;;  %17547 = vmatmul.bf16.vlgmr.msrb.gmra.mxu0 %v785_v3  ;;  %v17354_v24 = vadd.f32 %v17353_v20, %v17341_v21  ;;  %v28998_v1 = vld [vmem:[#allocation5 + $0x728] sm:$0xff]  ;;  %v28995_v21 = vld [vmem:[#allocation5 + $0x710] sm:$0xff] }
  0xcf   :  { %17591 = vmatpush.bf16.msra.mxu0 %v28968_v60  ;;  %17560 = vmatmul.bf16.vlgmr.msrb.gmra.mxu1 %v786_v6  ;;  %v792_v60 = vpack.c.bf16 %v228_v55, %v228_v55  ;;  %v29014_v3 = vld [vmem:[#allocation5 + $0x7a8] sm:$0xff] }
  0xd0   :  { %17604 = vmatpush.bf16.msra.mxu1 %v28976_v61  ;;  %17573 = vmatmul.bf16.vlgmr.msrb.gmra.mxu2 %v787_v4  ;;  %v28999_v61 = vld [vmem:[#allocation5 + $0x730] sm:$0xff]  ;;  %v29022_v4 = vld [vmem:[#allocation5 + $0x7e8] sm:$0xff] }
  0xd1   :  { %17617 = vmatpush.bf16.msra.mxu2 %v28984_v0  ;;  %17586 = vmatmul.bf16.vlgmr.msrb.gmra.mxu3 %v788_v7  ;;  %v29023_v0 = vld [vmem:[#allocation5 + $0x7f0] sm:$0xff]  ;;  %v28997_v7 = vld [vmem:[#allocation5 + $0x720] sm:$0xff]  ;;  %v29038_v55 = vld [vmem:[#allocation5 + $0x868] sm:$0xff] }
  0xd2   :  { %17630 = vmatpush.bf16.msra.mxu3 %v28992_v5 }
  0xd3   :  { %17592 = vmatpush.bf16.msra.mxu0 %v28967_v8  ;;  %v17366_v27 = vpop.f32.mrf.mxu2  ;;  %v17342_v34 = vpop.f32.mrf.mxu0  ;;  %v29005_v8 = vld [vmem:[#allocation5 + $0x760] sm:$0xff] }
  0xd4   :  { %17605 = vmatpush.bf16.msra.mxu1 %v28975_v9  ;;  %v17367_v29 = vadd.f32 %v17366_v27, %v17354_v24  ;;  %v17379_v33 = vpop.f32.mrf.mxu3  ;;  %v17355_v36 = vpop.f32.mrf.mxu1  ;;  %v29013_v9 = vld [vmem:[#allocation5 + $0x7a0] sm:$0xff]  ;;  %v29011_v24 = vld [vmem:[#allocation5 + $0x790] sm:$0xff]  ;;  %v28994_v27 = vld [vmem:[#allocation5 + $0x708] sm:$0xff] }
  0xd5   :  { %17618 = vmatpush.bf16.msra.mxu2 %v28983_v10  ;;  %v29001_v34 = vld [vmem:[#allocation5 + $0x740] sm:$0xff] }
  0xd6   :  { %17631 = vmatpush.bf16.msra.mxu3 %v28991_v11  ;;  %v17380_v35 = vadd.f32 %v17379_v33, %v17367_v29  ;;  %v29002_v29 = vld [vmem:[#allocation5 + $0x748] sm:$0xff]  ;;  %v28993_v33 = vld [vmem:[#allocation5 + $0x700] sm:$0xff] }
  0xd7   :  { %17593 = vmatpush.bf16.msra.mxu0 %v28966_v12  ;;  %v29021_v12 = vld [vmem:[#allocation5 + $0x7e0] sm:$0xff] }
  0xd8   :  { %17606 = vmatpush.bf16.msra.mxu1 %v28974_v13  ;;  %v28996_v13 = vld [vmem:[#allocation5 + $0x718] sm:$0xff] }
  0xd9   :  { %17619 = vmatpush.bf16.msra.mxu2 %v28982_v14  ;;  %v29004_v14 = vld [vmem:[#allocation5 + $0x758] sm:$0xff] }
  0xda   :  { %17632 = vmatpush.bf16.msra.mxu3 %v28990_v15  ;;  %v29012_v15 = vld [vmem:[#allocation5 + $0x798] sm:$0xff] }
  0xdb   :  { %17594 = vmatpush.bf16.msra.mxu0 %v28965_v16  ;;  %v17368_v42 = vpop.f32.mrf.mxu2 }
  0xdc   :  { %17607 = vmatpush.bf16.msra.mxu1 %v28973_v17  ;;  %v17381_v49 = vpop.f32.mrf.mxu3  ;;  %v29048_v42 = vld [vmem:[#allocation5 + $0x8b8] sm:$0xff] }
  0xdd   :  { %17620 = vmatpush.bf16.msra.mxu2 %v28981_v18  ;;  %v29020_v18 = vld [vmem:[#allocation5 + $0x7d8] sm:$0xff] }
  0xde   :  { %17633 = vmatpush.bf16.msra.mxu3 %v28989_v22 }
  0xdf   :  { %17595 = vmatpush.bf16.msra.mxu0 %v28964_v23  ;;  %v29003_v23 = vld [vmem:[#allocation5 + $0x750] sm:$0xff] }
  0xe0   :  { %17608 = vmatpush.bf16.msra.mxu1 %v28972_v25 }
  0xe1   :  { %17621 = vmatpush.bf16.msra.mxu2 %v28980_v26  ;;  %v29019_v26 = vld [vmem:[#allocation5 + $0x7d0] sm:$0xff] }
  0xe2   :  { %17634 = vmatpush.bf16.msra.mxu3 %v28988_v28  ;;  %v72_v28 = vld [vmem:[#allocation2 + $0x40] sm:$0xff] }
  0xe3   :  { %17596 = vmatpush.bf16.msra.mxu0 %v28963_v30  ;;  %v29010_v30 = vld [vmem:[#allocation5 + $0x788] sm:$0xff]  ;;  %233 = vst [vmem:[#allocation1] ss:$4 sm:$0xff] %v72_v28  ;;  %v29064_v28 = vld [vmem:[#allocation5 + $0x938] sm:$0xff] }
  0xe4   :  { %17609 = vmatpush.bf16.msra.mxu1 %v28971_v31 }
  0xe5   :  { %17622 = vmatpush.bf16.msra.mxu2 %v28979_v32  ;;  %v29018_v32 = vld [vmem:[#allocation5 + $0x7c8] sm:$0xff] }
  0xe6   :  { %17635 = vmatpush.bf16.msra.mxu3 %v28987_v37  ;;  %v229_v37 = vld.sshfl [vmem:[#allocation1 + $0x20] sm:$0xff pattern:$0x73625140] }
  0xe7   :  { %17597 = vmatpush.bf16.msra.mxu0 %v28962_v38  ;;  %v231_v38 = vld.sshfl [vmem:[#allocation1 + $0x30] sm:$0xff pattern:$0x73625140] }
  0xe8   :  { %17610 = vmatpush.bf16.msra.mxu1 %v28970_v40  ;;  %v29040_v40 = vld [vmem:[#allocation5 + $0x878] sm:$0xff] }
  0xe9   :  { %17623 = vmatpush.bf16.msra.mxu2 %v28978_v41  ;;  %v230_v41 = vld.sshfl [vmem:[#allocation1 + $0x28] sm:$0xff pattern:$0x73625140] }
  0xea   :  { %17636 = vmatpush.bf16.msra.mxu3 %v28986_v43  ;;  %v29017_v43 = vld [vmem:[#allocation5 + $0x7c0] sm:$0xff]  ;;  %v794_v48 = vpack.c.bf16 %v230_v41, %v230_v41  ;;  %v29079_v41 = vld [vmem:[#allocation5 + $0x9b0] sm:$0xff] }
  0xeb   :  { %17598 = vmatpush.bf16.msra.mxu0 %v28961_v44  ;;  %v17392_v5 = vpop.f32.mrf.mxu0  ;;  %v232_v44 = vld.sshfl [vmem:[#allocation1 + $0x38] sm:$0xff pattern:$0x73625140] }
  0xec   :  { %17611 = vmatpush.bf16.msra.mxu1 %v28969_v45  ;;  %v17393_v6 = vadd.f32 %v17392_v5, %v17380_v35  ;;  %v17405_v10 = vpop.f32.mrf.mxu1  ;;  %v29009_v35 = vld [vmem:[#allocation5 + $0x780] sm:$0xff]  ;;  %v793_v45 = vpack.c.bf16 %v229_v37, %v229_v37  ;;  %v796_v49 = vpack.c.bf16 %v232_v44, %v232_v44  ;;  %v29070_v44 = vld [vmem:[#allocation5 + $0x968] sm:$0xff] }
  0xed   :  { %17624 = vmatpush.bf16.msra.mxu2 %v28977_v46  ;;  %v795_v46 = vpack.c.bf16 %v231_v38, %v231_v38 }
  0xee   :  { %17637 = vmatpush.bf16.msra.mxu3 %v28985_v54  ;;  %17599 = vmatmul.bf16.vlgmr.msra.gmra.mxu0 %v789_v56  ;;  %v17406_v11 = vadd.f32 %v17405_v10, %v17393_v6  ;;  %v29030_v54 = vld [vmem:[#allocation5 + $0x828] sm:$0xff]  ;;  %v29027_v10 = vld [vmem:[#allocation5 + $0x810] sm:$0xff] }
  0xef   :  { %17643 = vmatpush.bf16.msrb.mxu0 %v29000_v50  ;;  %17612 = vmatmul.bf16.vlgmr.msra.gmra.mxu1 %v790_v59  ;;  %v29031_v50 = vld [vmem:[#allocation5 + $0x830] sm:$0xff]  ;;  %v29046_v56 = vld [vmem:[#allocation5 + $0x8a8] sm:$0xff] }
  0xf0   :  { %17656 = vmatpush.bf16.msrb.mxu1 %v29008_v51  ;;  %17625 = vmatmul.bf16.vlgmr.msra.gmra.mxu2 %v791_v57  ;;  %v29039_v51 = vld [vmem:[#allocation5 + $0x870] sm:$0xff]  ;;  %v29054_v57 = vld [vmem:[#allocation5 + $0x8e8] sm:$0xff] }
  0xf1   :  { %17669 = vmatpush.bf16.msrb.mxu2 %v29016_v53  ;;  %17638 = vmatmul.bf16.vlgmr.msra.gmra.mxu3 %v792_v60  ;;  %v29055_v53 = vld [vmem:[#allocation5 + $0x8f0] sm:$0xff]  ;;  %v29029_v60 = vld [vmem:[#allocation5 + $0x820] sm:$0xff] }
  0xf2   :  { %17682 = vmatpush.bf16.msrb.mxu3 %v29024_v58 }
  0xf3   :  { %17644 = vmatpush.bf16.msrb.mxu0 %v28999_v61  ;;  %v17418_v16 = vpop.f32.mrf.mxu2  ;;  %v17394_v19 = vpop.f32.mrf.mxu0 }
  0xf4   :  { %17657 = vmatpush.bf16.msrb.mxu1 %v29007_v62  ;;  %v17419_v17 = vadd.f32 %v17418_v16, %v17406_v11  ;;  %v17431_v20 = vpop.f32.mrf.mxu3  ;;  %v17407_v25 = vpop.f32.mrf.mxu1  ;;  %v29037_v62 = vld [vmem:[#allocation5 + $0x860] sm:$0xff]  ;;  %v29026_v16 = vld [vmem:[#allocation5 + $0x808] sm:$0xff] }
  0xf5   :  { %17670 = vmatpush.bf16.msrb.mxu2 %v29015_v63  ;;  %v29045_v63 = vld [vmem:[#allocation5 + $0x8a0] sm:$0xff]  ;;  %v29042_v19 = vld [vmem:[#allocation5 + $0x888] sm:$0xff] }
  0xf6   :  { %17683 = vmatpush.bf16.msrb.mxu3 %v29023_v0  ;;  %v30959_v22 = vadd.f32 %v17431_v20, %v17419_v17  ;;  %v73_v17 = vld [vmem:[#allocation2 + $0x48] sm:$0xff]  ;;  %v29041_v25 = vld [vmem:[#allocation5 + $0x880] sm:$0xff] }
  0xf7   :  { %17645 = vmatpush.bf16.msrb.mxu0 %v28998_v1  ;;  %v29053_v1 = vld [vmem:[#allocation5 + $0x8e0] sm:$0xff]  ;;  %234 = vst [vmem:[#allocation1 + $0x20] ss:$4 sm:$0xff] %v73_v17  ;;  %v29096_v17 = vld [vmem:[#allocation5 + $0xa38] sm:$0xff] }
  0xf8   :  { %17658 = vmatpush.bf16.msrb.mxu1 %v29006_v2  ;;  %v29028_v2 = vld [vmem:[#allocation5 + $0x818] sm:$0xff] }
  0xf9   :  { %17671 = vmatpush.bf16.msrb.mxu2 %v29014_v3  ;;  %v29036_v3 = vld [vmem:[#allocation5 + $0x858] sm:$0xff] }
  0xfa   :  { %17684 = vmatpush.bf16.msrb.mxu3 %v29022_v4  ;;  %v29044_v4 = vld [vmem:[#allocation5 + $0x898] sm:$0xff] }
  0xfb   :  { %17646 = vmatpush.bf16.msrb.mxu0 %v28997_v7  ;;  %v17420_v31 = vpop.f32.mrf.mxu2  ;;  %v29052_v7 = vld [vmem:[#allocation5 + $0x8d8] sm:$0xff] }
  0xfc   :  { %17659 = vmatpush.bf16.msrb.mxu1 %v29005_v8  ;;  %v17433_v36 = vpop.f32.mrf.mxu3  ;;  %v29080_v31 = vld [vmem:[#allocation5 + $0x9b8] sm:$0xff] }
  0xfd   :  { %17672 = vmatpush.bf16.msrb.mxu2 %v29013_v9  ;;  %v29088_v36 = vld [vmem:[#allocation5 + $0x9f8] sm:$0xff] }
  0xfe   :  { %17685 = vmatpush.bf16.msrb.mxu3 %v29021_v12 }
  0xff   :  { %17647 = vmatpush.bf16.msrb.mxu0 %v28996_v13  ;;  %v29035_v13 = vld [vmem:[#allocation5 + $0x850] sm:$0xff] }
 0x100   :  { %17660 = vmatpush.bf16.msrb.mxu1 %v29004_v14  ;;  %v29043_v14 = vld [vmem:[#allocation5 + $0x890] sm:$0xff] }
 0x101   :  { %17673 = vmatpush.bf16.msrb.mxu2 %v29012_v15  ;;  %v29051_v15 = vld [vmem:[#allocation5 + $0x8d0] sm:$0xff] }
 0x102   :  { %17686 = vmatpush.bf16.msrb.mxu3 %v29020_v18  ;;  %v29034_v18 = vld [vmem:[#allocation5 + $0x848] sm:$0xff] }
 0x103   :  { %17648 = vmatpush.bf16.msrb.mxu0 %v28995_v21  ;;  %v29050_v21 = vld [vmem:[#allocation5 + $0x8c8] sm:$0xff] }
 0x104   :  { %17661 = vmatpush.bf16.msrb.mxu1 %v29003_v23  ;;  %v29025_v23 = vld [vmem:[#allocation5 + $0x800] sm:$0xff] }
 0x105   :  { %17674 = vmatpush.bf16.msrb.mxu2 %v29011_v24  ;;  %v29033_v24 = vld [vmem:[#allocation5 + $0x840] sm:$0xff] }
 0x106   :  { %17687 = vmatpush.bf16.msrb.mxu3 %v29019_v26  ;;  %v235_v26 = vld.sshfl [vmem:[#allocation1] sm:$0xff pattern:$0x73625140] }
 0x107   :  { %17649 = vmatpush.bf16.msrb.mxu0 %v28994_v27  ;;  %v237_v27 = vld.sshfl [vmem:[#allocation1 + $0x10] sm:$0xff pattern:$0x73625140] }
 0x108   :  { %17662 = vmatpush.bf16.msrb.mxu1 %v29002_v29  ;;  %v29072_v29 = vld [vmem:[#allocation5 + $0x978] sm:$0xff] }
 0x109   :  { %17675 = vmatpush.bf16.msrb.mxu2 %v29010_v30  ;;  %v236_v30 = vld.sshfl [vmem:[#allocation1 + $0x8] sm:$0xff pattern:$0x73625140] }
 0x10a   :  { %17688 = vmatpush.bf16.msrb.mxu3 %v29018_v32  ;;  %v29049_v32 = vld [vmem:[#allocation5 + $0x8c0] sm:$0xff]  ;;  %v798_v37 = vpack.c.bf16 %v236_v30, %v236_v30  ;;  %v29111_v30 = vld [vmem:[#allocation5 + $0xab0] sm:$0xff] }
 0x10b   :  { %17650 = vmatpush.bf16.msrb.mxu0 %v28993_v33  ;;  %v17444_v58 = vpop.f32.mrf.mxu0  ;;  %v238_v33 = vld.sshfl [vmem:[#allocation1 + $0x18] sm:$0xff pattern:$0x73625140] }
 0x10c   :  { %17663 = vmatpush.bf16.msrb.mxu1 %v29001_v34  ;;  %v17445_v59 = vadd.f32 %v17444_v58, %v30959_v22  ;;  %v17457_v61 = vpop.f32.mrf.mxu1  ;;  %v797_v34 = vpack.c.bf16 %v235_v26, %v235_v26  ;;  %v800_v38 = vpack.c.bf16 %v238_v33, %v238_v33  ;;  %v29102_v33 = vld [vmem:[#allocation5 + $0xa68] sm:$0xff] }
 0x10d   :  { %17676 = vmatpush.bf16.msrb.mxu2 %v29009_v35  ;;  %v799_v35 = vpack.c.bf16 %v237_v27, %v237_v27 }
 0x10e   :  { %17689 = vmatpush.bf16.msrb.mxu3 %v29017_v43  ;;  %17651 = vmatmul.bf16.vlgmr.msrb.gmra.mxu0 %v793_v45  ;;  %v17458_v0 = vadd.f32 %v17457_v61, %v17445_v59  ;;  %v29062_v43 = vld [vmem:[#allocation5 + $0x928] sm:$0xff] }
 0x10f   :  { %17695 = vmatpush.bf16.msra.mxu0 %v29032_v39  ;;  %17664 = vmatmul.bf16.vlgmr.msrb.gmra.mxu1 %v794_v48  ;;  %v29063_v39 = vld [vmem:[#allocation5 + $0x930] sm:$0xff]  ;;  %v29078_v45 = vld [vmem:[#allocation5 + $0x9a8] sm:$0xff] }
 0x110   :  { %17708 = vmatpush.bf16.msra.mxu1 %v29040_v40  ;;  %17677 = vmatmul.bf16.vlgmr.msrb.gmra.mxu2 %v795_v46  ;;  %v29071_v40 = vld [vmem:[#allocation5 + $0x970] sm:$0xff]  ;;  %v29086_v46 = vld [vmem:[#allocation5 + $0x9e8] sm:$0xff] }
 0x111   :  { %17721 = vmatpush.bf16.msra.mxu2 %v29048_v42  ;;  %17690 = vmatmul.bf16.vlgmr.msrb.gmra.mxu3 %v796_v49  ;;  %v29087_v42 = vld [vmem:[#allocation5 + $0x9f0] sm:$0xff]  ;;  %v29061_v49 = vld [vmem:[#allocation5 + $0x920] sm:$0xff] }
 0x112   :  { %17734 = vmatpush.bf16.msra.mxu3 %v29056_v47 }
 0x113   :  { %17696 = vmatpush.bf16.msra.mxu0 %v29031_v50  ;;  %v17470_v5 = vpop.f32.mrf.mxu2  ;;  %v17446_v9 = vpop.f32.mrf.mxu0 }
 0x114   :  { %17709 = vmatpush.bf16.msra.mxu1 %v29039_v51  ;;  %v17471_v6 = vadd.f32 %v17470_v5, %v17458_v0  ;;  %v17483_v8 = vpop.f32.mrf.mxu3  ;;  %v17459_v11 = vpop.f32.mrf.mxu1  ;;  %v29069_v51 = vld [vmem:[#allocation5 + $0x960] sm:$0xff]  ;;  %v29059_v0 = vld [vmem:[#allocation5 + $0x910] sm:$0xff]  ;;  %v29058_v5 = vld [vmem:[#allocation5 + $0x908] sm:$0xff] }
 0x115   :  { %17722 = vmatpush.bf16.msra.mxu2 %v29047_v52  ;;  %v29077_v52 = vld [vmem:[#allocation5 + $0x9a0] sm:$0xff] }
 0x116   :  { %17735 = vmatpush.bf16.msra.mxu3 %v29055_v53  ;;  %v30962_v12 = vadd.f32 %v17483_v8, %v17471_v6  ;;  %v74_v6 = vld [vmem:[#allocation2 + $0x50] sm:$0xff]  ;;  %v29074_v8 = vld [vmem:[#allocation5 + $0x988] sm:$0xff] }
 0x117   :  { %17697 = vmatpush.bf16.msra.mxu0 %v29030_v54  ;;  %v29085_v54 = vld [vmem:[#allocation5 + $0x9e0] sm:$0xff]  ;;  %243 = vst [vmem:[#allocation1] ss:$4 sm:$0xff] %v74_v6  ;;  %v29128_v6 = vld [vmem:[#allocation5 + $0xb38] sm:$0xff] }
 0x118   :  { %17710 = vmatpush.bf16.msra.mxu1 %v29038_v55  ;;  %v29060_v55 = vld [vmem:[#allocation5 + $0x918] sm:$0xff] }
 0x119   :  { %17723 = vmatpush.bf16.msra.mxu2 %v29046_v56  ;;  %v29068_v56 = vld [vmem:[#allocation5 + $0x958] sm:$0xff] }
 0x11a   :  { %17736 = vmatpush.bf16.msra.mxu3 %v29054_v57  ;;  %v29076_v57 = vld [vmem:[#allocation5 + $0x998] sm:$0xff] }
 0x11b   :  { %17698 = vmatpush.bf16.msra.mxu0 %v29029_v60  ;;  %v17472_v20 = vpop.f32.mrf.mxu2  ;;  %v29084_v60 = vld [vmem:[#allocation5 + $0x9d8] sm:$0xff] }
 0x11c   :  { %17711 = vmatpush.bf16.msra.mxu1 %v29037_v62  ;;  %v17485_v22 = vpop.f32.mrf.mxu3  ;;  %v29112_v20 = vld [vmem:[#allocation5 + $0xab8] sm:$0xff] }
 0x11d   :  { %17724 = vmatpush.bf16.msra.mxu2 %v29045_v63  ;;  %v242_v22 = vld.sshfl [vmem:[#allocation1 + $0x38] sm:$0xff pattern:$0x73625140] }
 0x11e   :  { %17737 = vmatpush.bf16.msra.mxu3 %v29053_v1  ;;  %v804_v27 = vpack.c.bf16 %v242_v22, %v242_v22  ;;  %v29134_v22 = vld [vmem:[#allocation5 + $0xb68] sm:$0xff] }
 0x11f   :  { %17699 = vmatpush.bf16.msra.mxu0 %v29028_v2  ;;  %v29067_v2 = vld [vmem:[#allocation5 + $0x950] sm:$0xff] }
 0x120   :  { %17712 = vmatpush.bf16.msra.mxu1 %v29036_v3  ;;  %v29075_v3 = vld [vmem:[#allocation5 + $0x990] sm:$0xff] }
 0x121   :  { %17725 = vmatpush.bf16.msra.mxu2 %v29044_v4  ;;  %v29083_v4 = vld [vmem:[#allocation5 + $0x9d0] sm:$0xff] }
 0x122   :  { %17738 = vmatpush.bf16.msra.mxu3 %v29052_v7  ;;  %v29066_v7 = vld [vmem:[#allocation5 + $0x948] sm:$0xff] }
 0x123   :  { %17700 = vmatpush.bf16.msra.mxu0 %v29027_v10  ;;  %v29082_v10 = vld [vmem:[#allocation5 + $0x9c8] sm:$0xff] }
 0x124   :  { %17713 = vmatpush.bf16.msra.mxu1 %v29035_v13  ;;  %v29065_v13 = vld [vmem:[#allocation5 + $0x940] sm:$0xff] }
 0x125   :  { %17726 = vmatpush.bf16.msra.mxu2 %v29043_v14  ;;  %v29073_v14 = vld [vmem:[#allocation5 + $0x980] sm:$0xff] }
 0x126   :  { %17739 = vmatpush.bf16.msra.mxu3 %v29051_v15  ;;  %v239_v15 = vld.sshfl [vmem:[#allocation1 + $0x20] sm:$0xff pattern:$0x73625140] }
 0x127   :  { %17701 = vmatpush.bf16.msra.mxu0 %v29026_v16  ;;  %v241_v16 = vld.sshfl [vmem:[#allocation1 + $0x30] sm:$0xff pattern:$0x73625140] }
 0x128   :  { %17714 = vmatpush.bf16.msra.mxu1 %v29034_v18  ;;  %v29104_v18 = vld [vmem:[#allocation5 + $0xa78] sm:$0xff] }
 0x129   :  { %17727 = vmatpush.bf16.msra.mxu2 %v29042_v19  ;;  %v240_v19 = vld.sshfl [vmem:[#allocation1 + $0x28] sm:$0xff pattern:$0x73625140] }
 0x12a   :  { %17740 = vmatpush.bf16.msra.mxu3 %v29050_v21  ;;  %v29081_v21 = vld [vmem:[#allocation5 + $0x9c0] sm:$0xff]  ;;  %v802_v26 = vpack.c.bf16 %v240_v19, %v240_v19  ;;  %v29143_v19 = vld [vmem:[#allocation5 + $0xbb0] sm:$0xff] }
 0x12b   :  { %17702 = vmatpush.bf16.msra.mxu0 %v29025_v23  ;;  %v17496_v47 = vpop.f32.mrf.mxu0  ;;  %v801_v23 = vpack.c.bf16 %v239_v15, %v239_v15 }
 0x12c   :  { %17715 = vmatpush.bf16.msra.mxu1 %v29033_v24  ;;  %v17497_v48 = vadd.f32 %v17496_v47, %v30962_v12  ;;  %v17509_v50 = vpop.f32.mrf.mxu1  ;;  %v29057_v12 = vld [vmem:[#allocation5 + $0x900] sm:$0xff]  ;;  %v803_v24 = vpack.c.bf16 %v241_v16, %v241_v16 }
 0x12d   :  { %17728 = vmatpush.bf16.msra.mxu2 %v29041_v25  ;;  %v29120_v25 = vld [vmem:[#allocation5 + $0xaf8] sm:$0xff] }
 0x12e   :  { %17741 = vmatpush.bf16.msra.mxu3 %v29049_v32  ;;  %17703 = vmatmul.bf16.vlgmr.msra.gmra.mxu0 %v797_v34  ;;  %v17510_v53 = vadd.f32 %v17509_v50, %v17497_v48  ;;  %v29094_v32 = vld [vmem:[#allocation5 + $0xa28] sm:$0xff] }
 0x12f   :  { %17747 = vmatpush.bf16.msrb.mxu0 %v29064_v28  ;;  %17716 = vmatmul.bf16.vlgmr.msra.gmra.mxu1 %v798_v37  ;;  %v29095_v28 = vld [vmem:[#allocation5 + $0xa30] sm:$0xff]  ;;  %v29110_v34 = vld [vmem:[#allocation5 + $0xaa8] sm:$0xff] }
 0x130   :  { %17760 = vmatpush.bf16.msrb.mxu1 %v29072_v29  ;;  %17729 = vmatmul.bf16.vlgmr.msra.gmra.mxu2 %v799_v35  ;;  %v29103_v29 = vld [vmem:[#allocation5 + $0xa70] sm:$0xff]  ;;  %v29118_v35 = vld [vmem:[#allocation5 + $0xae8] sm:$0xff] }
 0x131   :  { %17773 = vmatpush.bf16.msrb.mxu2 %v29080_v31  ;;  %17742 = vmatmul.bf16.vlgmr.msra.gmra.mxu3 %v800_v38  ;;  %v29119_v31 = vld [vmem:[#allocation5 + $0xaf0] sm:$0xff]  ;;  %v29093_v38 = vld [vmem:[#allocation5 + $0xa20] sm:$0xff] }
 0x132   :  { %17786 = vmatpush.bf16.msrb.mxu3 %v29088_v36 }
 0x133   :  { %17748 = vmatpush.bf16.msrb.mxu0 %v29063_v39  ;;  %v17522_v58 = vpop.f32.mrf.mxu2  ;;  %v17498_v62 = vpop.f32.mrf.mxu0 }
 0x134   :  { %17761 = vmatpush.bf16.msrb.mxu1 %v29071_v40  ;;  %v17523_v59 = vadd.f32 %v17522_v58, %v17510_v53  ;;  %v17535_v61 = vpop.f32.mrf.mxu3  ;;  %v17511_v1 = vpop.f32.mrf.mxu1  ;;  %v29101_v40 = vld [vmem:[#allocation5 + $0xa60] sm:$0xff]  ;;  %v29091_v53 = vld [vmem:[#allocation5 + $0xa10] sm:$0xff]  ;;  %v29090_v58 = vld [vmem:[#allocation5 + $0xa08] sm:$0xff] }
 0x135   :  { %17774 = vmatpush.bf16.msrb.mxu2 %v29079_v41  ;;  %v29109_v41 = vld [vmem:[#allocation5 + $0xaa0] sm:$0xff] }
 0x136   :  { %17787 = vmatpush.bf16.msrb.mxu3 %v29087_v42  ;;  %v30965_v63 = vadd.f32 %v17535_v61, %v17523_v59  ;;  %v75_v59 = vld [vmem:[#allocation2 + $0x58] sm:$0xff]  ;;  %v29106_v61 = vld [vmem:[#allocation5 + $0xa88] sm:$0xff] }
 0x137   :  { %17749 = vmatpush.bf16.msrb.mxu0 %v29062_v43  ;;  %v29117_v43 = vld [vmem:[#allocation5 + $0xae0] sm:$0xff]  ;;  %244 = vst [vmem:[#allocation1 + $0x20] ss:$4 sm:$0xff] %v75_v59  ;;  %v29160_v59 = vld [vmem:[#allocation5 + $0xc38] sm:$0xff] }
 0x138   :  { %17762 = vmatpush.bf16.msrb.mxu1 %v29070_v44  ;;  %v29092_v44 = vld [vmem:[#allocation5 + $0xa18] sm:$0xff]  ;;  %v29089_v1 = vld [vmem:[#allocation5 + $0xa00] sm:$0xff] }
 0x139   :  { %17775 = vmatpush.bf16.msrb.mxu2 %v29078_v45  ;;  %v29100_v45 = vld [vmem:[#allocation5 + $0xa58] sm:$0xff] }
 0x13a   :  { %17788 = vmatpush.bf16.msrb.mxu3 %v29086_v46  ;;  %v29108_v46 = vld [vmem:[#allocation5 + $0xa98] sm:$0xff] }
 0x13b   :  { %17750 = vmatpush.bf16.msrb.mxu0 %v29061_v49  ;;  %v17524_v9 = vpop.f32.mrf.mxu2  ;;  %v29116_v49 = vld [vmem:[#allocation5 + $0xad8] sm:$0xff] }
 0x13c   :  { %17763 = vmatpush.bf16.msrb.mxu1 %v29069_v51  ;;  %v17537_v11 = vpop.f32.mrf.mxu3  ;;  %v29144_v9 = vld [vmem:[#allocation5 + $0xbb8] sm:$0xff] }
 0x13d   :  { %17776 = vmatpush.bf16.msrb.mxu2 %v29077_v52  ;;  %v248_v11 = vld.sshfl [vmem:[#allocation1 + $0x18] sm:$0xff pattern:$0x73625140] }
 0x13e   :  { %17789 = vmatpush.bf16.msrb.mxu3 %v29085_v54  ;;  %v808_v16 = vpack.c.bf16 %v248_v11, %v248_v11  ;;  %v29166_v11 = vld [vmem:[#allocation5 + $0xc68] sm:$0xff] }
 0x13f   :  { %17751 = vmatpush.bf16.msrb.mxu0 %v29060_v55  ;;  %v29099_v55 = vld [vmem:[#allocation5 + $0xa50] sm:$0xff] }
 0x140   :  { %17764 = vmatpush.bf16.msrb.mxu1 %v29068_v56  ;;  %v29107_v56 = vld [vmem:[#allocation5 + $0xa90] sm:$0xff] }
 0x141   :  { %17777 = vmatpush.bf16.msrb.mxu2 %v29076_v57  ;;  %v29115_v57 = vld [vmem:[#allocation5 + $0xad0] sm:$0xff] }
 0x142   :  { %17790 = vmatpush.bf16.msrb.mxu3 %v29084_v60  ;;  %v29098_v60 = vld [vmem:[#allocation5 + $0xa48] sm:$0xff] }
 0x143   :  { %17752 = vmatpush.bf16.msrb.mxu0 %v29059_v0 }
 0x144   :  { %17765 = vmatpush.bf16.msrb.mxu1 %v29067_v2  ;;  %v29097_v2 = vld [vmem:[#allocation5 + $0xa40] sm:$0xff] }
 0x145   :  { %17778 = vmatpush.bf16.msrb.mxu2 %v29075_v3  ;;  %v29105_v3 = vld [vmem:[#allocation5 + $0xa80] sm:$0xff] }
 0x146   :  { %17791 = vmatpush.bf16.msrb.mxu3 %v29083_v4  ;;  %v245_v4 = vld.sshfl [vmem:[#allocation1] sm:$0xff pattern:$0x73625140] }
 0x147   :  { %17753 = vmatpush.bf16.msrb.mxu0 %v29058_v5  ;;  %v247_v5 = vld.sshfl [vmem:[#allocation1 + $0x10] sm:$0xff pattern:$0x73625140] }
 0x148   :  { %17766 = vmatpush.bf16.msrb.mxu1 %v29066_v7  ;;  %v29136_v7 = vld [vmem:[#allocation5 + $0xb78] sm:$0xff] }
 0x149   :  { %17779 = vmatpush.bf16.msrb.mxu2 %v29074_v8  ;;  %v246_v8 = vld.sshfl [vmem:[#allocation1 + $0x8] sm:$0xff pattern:$0x73625140] }
 0x14a   :  { %17792 = vmatpush.bf16.msrb.mxu3 %v29082_v10  ;;  %v29113_v10 = vld [vmem:[#allocation5 + $0xac0] sm:$0xff]  ;;  %v806_v15 = vpack.c.bf16 %v246_v8, %v246_v8  ;;  %v29175_v8 = vld [vmem:[#allocation5 + $0xcb0] sm:$0xff] }
 0x14b   :  { %17754 = vmatpush.bf16.msrb.mxu0 %v29057_v12  ;;  %v17548_v36 = vpop.f32.mrf.mxu0  ;;  %v805_v12 = vpack.c.bf16 %v245_v4, %v245_v4 }
 0x14c   :  { %17767 = vmatpush.bf16.msrb.mxu1 %v29065_v13  ;;  %v17549_v37 = vadd.f32 %v17548_v36, %v30965_v63  ;;  %v17561_v39 = vpop.f32.mrf.mxu1  ;;  %v29114_v63 = vld [vmem:[#allocation5 + $0xac8] sm:$0xff]  ;;  %v807_v13 = vpack.c.bf16 %v247_v5, %v247_v5 }
 0x14d   :  { %17780 = vmatpush.bf16.msrb.mxu2 %v29073_v14  ;;  %v29152_v14 = vld [vmem:[#allocation5 + $0xbf8] sm:$0xff] }
 0x14e   :  { %17793 = vmatpush.bf16.msrb.mxu3 %v29081_v21  ;;  %17755 = vmatmul.bf16.vlgmr.msrb.gmra.mxu0 %v801_v23  ;;  %v17562_v42 = vadd.f32 %v17561_v39, %v17549_v37  ;;  %v29126_v21 = vld [vmem:[#allocation5 + $0xb28] sm:$0xff] }
 0x14f   :  { %17799 = vmatpush.bf16.msra.mxu0 %v29096_v17  ;;  %17768 = vmatmul.bf16.vlgmr.msrb.gmra.mxu1 %v802_v26  ;;  %v29127_v17 = vld [vmem:[#allocation5 + $0xb30] sm:$0xff]  ;;  %v29142_v23 = vld [vmem:[#allocation5 + $0xba8] sm:$0xff] }
 0x150   :  { %17812 = vmatpush.bf16.msra.mxu1 %v29104_v18  ;;  %17781 = vmatmul.bf16.vlgmr.msrb.gmra.mxu2 %v803_v24  ;;  %v29135_v18 = vld [vmem:[#allocation5 + $0xb70] sm:$0xff]  ;;  %v29150_v24 = vld [vmem:[#allocation5 + $0xbe8] sm:$0xff] }
 0x151   :  { %17825 = vmatpush.bf16.msra.mxu2 %v29112_v20  ;;  %17794 = vmatmul.bf16.vlgmr.msrb.gmra.mxu3 %v804_v27  ;;  %v29151_v20 = vld [vmem:[#allocation5 + $0xbf0] sm:$0xff]  ;;  %v29125_v27 = vld [vmem:[#allocation5 + $0xb20] sm:$0xff] }
 0x152   :  { %17838 = vmatpush.bf16.msra.mxu3 %v29120_v25 }
 0x153   :  { %17800 = vmatpush.bf16.msra.mxu0 %v29095_v28  ;;  %v17574_v47 = vpop.f32.mrf.mxu2  ;;  %v17550_v51 = vpop.f32.mrf.mxu0 }
 0x154   :  { %17813 = vmatpush.bf16.msra.mxu1 %v29103_v29  ;;  %v17575_v48 = vadd.f32 %v17574_v47, %v17562_v42  ;;  %v17587_v50 = vpop.f32.mrf.mxu3  ;;  %v17563_v54 = vpop.f32.mrf.mxu1  ;;  %v29133_v29 = vld [vmem:[#allocation5 + $0xb60] sm:$0xff]  ;;  %v29123_v42 = vld [vmem:[#allocation5 + $0xb10] sm:$0xff]  ;;  %v29122_v47 = vld [vmem:[#allocation5 + $0xb08] sm:$0xff] }
 0x155   :  { %17826 = vmatpush.bf16.msra.mxu2 %v29111_v30  ;;  %v29141_v30 = vld [vmem:[#allocation5 + $0xba0] sm:$0xff] }
 0x156   :  { %17839 = vmatpush.bf16.msra.mxu3 %v29119_v31  ;;  %v30968_v52 = vadd.f32 %v17587_v50, %v17575_v48  ;;  %v76_v48 = vld [vmem:[#allocation2 + $0x60] sm:$0xff] }
 0x157   :  { %17801 = vmatpush.bf16.msra.mxu0 %v29094_v32  ;;  %v29149_v32 = vld [vmem:[#allocation5 + $0xbe0] sm:$0xff]  ;;  %v29138_v50 = vld [vmem:[#allocation5 + $0xb88] sm:$0xff]  ;;  %253 = vst [vmem:[#allocation1] ss:$4 sm:$0xff] %v76_v48  ;;  %v29192_v48 = vld [vmem:[#allocation5 + $0xd38] sm:$0xff] }
 0x158   :  { %17814 = vmatpush.bf16.msra.mxu1 %v29102_v33  ;;  %v29124_v33 = vld [vmem:[#allocation5 + $0xb18] sm:$0xff]  ;;  %v29121_v54 = vld [vmem:[#allocation5 + $0xb00] sm:$0xff] }
 0x159   :  { %17827 = vmatpush.bf16.msra.mxu2 %v29110_v34  ;;  %v29132_v34 = vld [vmem:[#allocation5 + $0xb58] sm:$0xff] }
 0x15a   :  { %17840 = vmatpush.bf16.msra.mxu3 %v29118_v35  ;;  %v29140_v35 = vld [vmem:[#allocation5 + $0xb98] sm:$0xff] }
 0x15b   :  { %17802 = vmatpush.bf16.msra.mxu0 %v29093_v38  ;;  %v17576_v62 = vpop.f32.mrf.mxu2  ;;  %v29148_v38 = vld [vmem:[#allocation5 + $0xbd8] sm:$0xff] }
 0x15c   :  { %17815 = vmatpush.bf16.msra.mxu1 %v29101_v40  ;;  %v17589_v0 = vpop.f32.mrf.mxu3  ;;  %v29176_v62 = vld [vmem:[#allocation5 + $0xcb8] sm:$0xff] }
 0x15d   :  { %17828 = vmatpush.bf16.msra.mxu2 %v29109_v41  ;;  %v252_v0 = vld.sshfl [vmem:[#allocation1 + $0x38] sm:$0xff pattern:$0x73625140] }
 0x15e   :  { %17841 = vmatpush.bf16.msra.mxu3 %v29117_v43  ;;  %v812_v5 = vpack.c.bf16 %v252_v0, %v252_v0  ;;  %v29198_v0 = vld [vmem:[#allocation5 + $0xd68] sm:$0xff] }
 0x15f   :  { %17803 = vmatpush.bf16.msra.mxu0 %v29092_v44  ;;  %v29131_v44 = vld [vmem:[#allocation5 + $0xb50] sm:$0xff] }
 0x160   :  { %17816 = vmatpush.bf16.msra.mxu1 %v29100_v45  ;;  %v29139_v45 = vld [vmem:[#allocation5 + $0xb90] sm:$0xff] }
 0x161   :  { %17829 = vmatpush.bf16.msra.mxu2 %v29108_v46  ;;  %v29147_v46 = vld [vmem:[#allocation5 + $0xbd0] sm:$0xff] }
 0x162   :  { %17842 = vmatpush.bf16.msra.mxu3 %v29116_v49  ;;  %v29130_v49 = vld [vmem:[#allocation5 + $0xb48] sm:$0xff] }
 0x163   :  { %17804 = vmatpush.bf16.msra.mxu0 %v29091_v53 }
 0x164   :  { %17817 = vmatpush.bf16.msra.mxu1 %v29099_v55  ;;  %v29129_v55 = vld [vmem:[#allocation5 + $0xb40] sm:$0xff] }
 0x165   :  { %17830 = vmatpush.bf16.msra.mxu2 %v29107_v56  ;;  %v29137_v56 = vld [vmem:[#allocation5 + $0xb80] sm:$0xff] }
 0x166   :  { %17843 = vmatpush.bf16.msra.mxu3 %v29115_v57  ;;  %v249_v57 = vld.sshfl [vmem:[#allocation1 + $0x20] sm:$0xff pattern:$0x73625140] }
 0x167   :  { %17805 = vmatpush.bf16.msra.mxu0 %v29090_v58  ;;  %v251_v58 = vld.sshfl [vmem:[#allocation1 + $0x30] sm:$0xff pattern:$0x73625140] }
 0x168   :  { %17818 = vmatpush.bf16.msra.mxu1 %v29098_v60  ;;  %v29168_v60 = vld [vmem:[#allocation5 + $0xc78] sm:$0xff] }
 0x169   :  { %17831 = vmatpush.bf16.msra.mxu2 %v29106_v61  ;;  %v250_v61 = vld.sshfl [vmem:[#allocation1 + $0x28] sm:$0xff pattern:$0x73625140] }
 0x16a   :  { %17844 = vmatpush.bf16.msra.mxu3 %v29114_v63  ;;  %v29145_v63 = vld [vmem:[#allocation5 + $0xbc0] sm:$0xff]  ;;  %v810_v4 = vpack.c.bf16 %v250_v61, %v250_v61  ;;  %v29207_v61 = vld [vmem:[#allocation5 + $0xdb0] sm:$0xff] }
 0x16b   :  { %17806 = vmatpush.bf16.msra.mxu0 %v29089_v1  ;;  %v17600_v25 = vpop.f32.mrf.mxu0  ;;  %v809_v1 = vpack.c.bf16 %v249_v57, %v249_v57 }
 0x16c   :  { %17819 = vmatpush.bf16.msra.mxu1 %v29097_v2  ;;  %v17601_v26 = vadd.f32 %v17600_v25, %v30968_v52  ;;  %v17613_v28 = vpop.f32.mrf.mxu1  ;;  %v29146_v52 = vld [vmem:[#allocation5 + $0xbc8] sm:$0xff]  ;;  %v811_v2 = vpack.c.bf16 %v251_v58, %v251_v58 }
 0x16d   :  { %17832 = vmatpush.bf16.msra.mxu2 %v29105_v3  ;;  %v29184_v3 = vld [vmem:[#allocation5 + $0xcf8] sm:$0xff] }
 0x16e   :  { %17845 = vmatpush.bf16.msra.mxu3 %v29113_v10  ;;  %17807 = vmatmul.bf16.vlgmr.msra.gmra.mxu0 %v805_v12  ;;  %v17614_v31 = vadd.f32 %v17613_v28, %v17601_v26  ;;  %v29158_v10 = vld [vmem:[#allocation5 + $0xc28] sm:$0xff] }
 0x16f   :  { %17851 = vmatpush.bf16.msrb.mxu0 %v29128_v6  ;;  %17820 = vmatmul.bf16.vlgmr.msra.gmra.mxu1 %v806_v15  ;;  %v29159_v6 = vld [vmem:[#allocation5 + $0xc30] sm:$0xff]  ;;  %v29174_v12 = vld [vmem:[#allocation5 + $0xca8] sm:$0xff] }
 0x170   :  { %17864 = vmatpush.bf16.msrb.mxu1 %v29136_v7  ;;  %17833 = vmatmul.bf16.vlgmr.msra.gmra.mxu2 %v807_v13  ;;  %v29167_v7 = vld [vmem:[#allocation5 + $0xc70] sm:$0xff]  ;;  %v29182_v13 = vld [vmem:[#allocation5 + $0xce8] sm:$0xff] }
 0x171   :  { %17877 = vmatpush.bf16.msrb.mxu2 %v29144_v9  ;;  %17846 = vmatmul.bf16.vlgmr.msra.gmra.mxu3 %v808_v16  ;;  %v29183_v9 = vld [vmem:[#allocation5 + $0xcf0] sm:$0xff]  ;;  %v29157_v16 = vld [vmem:[#allocation5 + $0xc20] sm:$0xff] }
 0x172   :  { %17890 = vmatpush.bf16.msrb.mxu3 %v29152_v14 }
 0x173   :  { %17852 = vmatpush.bf16.msrb.mxu0 %v29127_v17  ;;  %v17626_v36 = vpop.f32.mrf.mxu2  ;;  %v17602_v40 = vpop.f32.mrf.mxu0 }
 0x174   :  { %17865 = vmatpush.bf16.msrb.mxu1 %v29135_v18  ;;  %v17627_v37 = vadd.f32 %v17626_v36, %v17614_v31  ;;  %v17639_v39 = vpop.f32.mrf.mxu3  ;;  %v17615_v43 = vpop.f32.mrf.mxu1  ;;  %v29165_v18 = vld [vmem:[#allocation5 + $0xc60] sm:$0xff]  ;;  %v29155_v31 = vld [vmem:[#allocation5 + $0xc10] sm:$0xff]  ;;  %v29154_v36 = vld [vmem:[#allocation5 + $0xc08] sm:$0xff] }
 0x175   :  { %17878 = vmatpush.bf16.msrb.mxu2 %v29143_v19  ;;  %v29173_v19 = vld [vmem:[#allocation5 + $0xca0] sm:$0xff] }
 0x176   :  { %17891 = vmatpush.bf16.msrb.mxu3 %v29151_v20  ;;  %v30971_v41 = vadd.f32 %v17639_v39, %v17627_v37  ;;  %v77_v37 = vld [vmem:[#allocation2 + $0x68] sm:$0xff]  ;;  %v29153_v43 = vld [vmem:[#allocation5 + $0xc00] sm:$0xff] }
 0x177   :  { %17853 = vmatpush.bf16.msrb.mxu0 %v29126_v21  ;;  %v29181_v21 = vld [vmem:[#allocation5 + $0xce0] sm:$0xff]  ;;  %v29170_v39 = vld [vmem:[#allocation5 + $0xc88] sm:$0xff]  ;;  %254 = vst [vmem:[#allocation1 + $0x20] ss:$4 sm:$0xff] %v77_v37  ;;  %v29224_v37 = vld [vmem:[#allocation5 + $0xe38] sm:$0xff] }
 0x178   :  { %17866 = vmatpush.bf16.msrb.mxu1 %v29134_v22  ;;  %v29156_v22 = vld [vmem:[#allocation5 + $0xc18] sm:$0xff] }
 0x179   :  { %17879 = vmatpush.bf16.msrb.mxu2 %v29142_v23  ;;  %v29164_v23 = vld [vmem:[#allocation5 + $0xc58] sm:$0xff] }
 0x17a   :  { %17892 = vmatpush.bf16.msrb.mxu3 %v29150_v24  ;;  %v29172_v24 = vld [vmem:[#allocation5 + $0xc98] sm:$0xff] }
 0x17b   :  { %17854 = vmatpush.bf16.msrb.mxu0 %v29125_v27  ;;  %v17628_v51 = vpop.f32.mrf.mxu2  ;;  %v29180_v27 = vld [vmem:[#allocation5 + $0xcd8] sm:$0xff] }
 0x17c   :  { %17867 = vmatpush.bf16.msrb.mxu1 %v29133_v29  ;;  %v17641_v53 = vpop.f32.mrf.mxu3  ;;  %v29208_v51 = vld [vmem:[#allocation5 + $0xdb8] sm:$0xff] }
 0x17d   :  { %17880 = vmatpush.bf16.msrb.mxu2 %v29141_v30  ;;  %v258_v53 = vld.sshfl [vmem:[#allocation1 + $0x18] sm:$0xff pattern:$0x73625140] }
 0x17e   :  { %17893 = vmatpush.bf16.msrb.mxu3 %v29149_v32  ;;  %v816_v58 = vpack.c.bf16 %v258_v53, %v258_v53  ;;  %v29230_v53 = vld [vmem:[#allocation5 + $0xe68] sm:$0xff] }
 0x17f   :  { %17855 = vmatpush.bf16.msrb.mxu0 %v29124_v33  ;;  %v29163_v33 = vld [vmem:[#allocation5 + $0xc50] sm:$0xff] }
 0x180   :  { %17868 = vmatpush.bf16.msrb.mxu1 %v29132_v34  ;;  %v29171_v34 = vld [vmem:[#allocation5 + $0xc90] sm:$0xff] }
 0x181   :  { %17881 = vmatpush.bf16.msrb.mxu2 %v29140_v35  ;;  %v29179_v35 = vld [vmem:[#allocation5 + $0xcd0] sm:$0xff] }
 0x182   :  { %17894 = vmatpush.bf16.msrb.mxu3 %v29148_v38  ;;  %v29162_v38 = vld [vmem:[#allocation5 + $0xc48] sm:$0xff] }
 0x183   :  { %17856 = vmatpush.bf16.msrb.mxu0 %v29123_v42 }
 0x184   :  { %17869 = vmatpush.bf16.msrb.mxu1 %v29131_v44  ;;  %v29161_v44 = vld [vmem:[#allocation5 + $0xc40] sm:$0xff] }
 0x185   :  { %17882 = vmatpush.bf16.msrb.mxu2 %v29139_v45  ;;  %v29169_v45 = vld [vmem:[#allocation5 + $0xc80] sm:$0xff] }
 0x186   :  { %17895 = vmatpush.bf16.msrb.mxu3 %v29147_v46  ;;  %v255_v46 = vld.sshfl [vmem:[#allocation1] sm:$0xff pattern:$0x73625140] }
 0x187   :  { %17857 = vmatpush.bf16.msrb.mxu0 %v29122_v47  ;;  %v257_v47 = vld.sshfl [vmem:[#allocation1 + $0x10] sm:$0xff pattern:$0x73625140] }
 0x188   :  { %17870 = vmatpush.bf16.msrb.mxu1 %v29130_v49  ;;  %v29200_v49 = vld [vmem:[#allocation5 + $0xd78] sm:$0xff] }
 0x189   :  { %17883 = vmatpush.bf16.msrb.mxu2 %v29138_v50  ;;  %v256_v50 = vld.sshfl [vmem:[#allocation1 + $0x8] sm:$0xff pattern:$0x73625140] }
 0x18a   :  { %17896 = vmatpush.bf16.msrb.mxu3 %v29146_v52  ;;  %v29177_v52 = vld [vmem:[#allocation5 + $0xcc0] sm:$0xff]  ;;  %v814_v57 = vpack.c.bf16 %v256_v50, %v256_v50  ;;  %v29239_v50 = vld [vmem:[#allocation5 + $0xeb0] sm:$0xff] }
 0x18b   :  { %17858 = vmatpush.bf16.msrb.mxu0 %v29121_v54  ;;  %v17652_v14 = vpop.f32.mrf.mxu0  ;;  %v813_v54 = vpack.c.bf16 %v255_v46, %v255_v46 }
 0x18c   :  { %17871 = vmatpush.bf16.msrb.mxu1 %v29129_v55  ;;  %v17653_v15 = vadd.f32 %v17652_v14, %v30971_v41  ;;  %v17665_v17 = vpop.f32.mrf.mxu1  ;;  %v29178_v41 = vld [vmem:[#allocation5 + $0xcc8] sm:$0xff]  ;;  %v815_v55 = vpack.c.bf16 %v257_v47, %v257_v47 }
 0x18d   :  { %17884 = vmatpush.bf16.msrb.mxu2 %v29137_v56  ;;  %v29216_v56 = vld [vmem:[#allocation5 + $0xdf8] sm:$0xff] }
 0x18e   :  { %17897 = vmatpush.bf16.msrb.mxu3 %v29145_v63  ;;  %17859 = vmatmul.bf16.vlgmr.msrb.gmra.mxu0 %v809_v1  ;;  %v17666_v20 = vadd.f32 %v17665_v17, %v17653_v15  ;;  %v29190_v63 = vld [vmem:[#allocation5 + $0xd28] sm:$0xff] }
 0x18f   :  { %17903 = vmatpush.bf16.msra.mxu0 %v29160_v59  ;;  %17872 = vmatmul.bf16.vlgmr.msrb.gmra.mxu1 %v810_v4  ;;  %v29191_v59 = vld [vmem:[#allocation5 + $0xd30] sm:$0xff]  ;;  %v29206_v1 = vld [vmem:[#allocation5 + $0xda8] sm:$0xff] }
 0x190   :  { %17916 = vmatpush.bf16.msra.mxu1 %v29168_v60  ;;  %17885 = vmatmul.bf16.vlgmr.msrb.gmra.mxu2 %v811_v2  ;;  %v29199_v60 = vld [vmem:[#allocation5 + $0xd70] sm:$0xff]  ;;  %v29214_v2 = vld [vmem:[#allocation5 + $0xde8] sm:$0xff] }
 0x191   :  { %17929 = vmatpush.bf16.msra.mxu2 %v29176_v62  ;;  %17898 = vmatmul.bf16.vlgmr.msrb.gmra.mxu3 %v812_v5  ;;  %v29215_v62 = vld [vmem:[#allocation5 + $0xdf0] sm:$0xff]  ;;  %v29189_v5 = vld [vmem:[#allocation5 + $0xd20] sm:$0xff] }
 0x192   :  { %17942 = vmatpush.bf16.msra.mxu3 %v29184_v3 }
 0x193   :  { %17904 = vmatpush.bf16.msra.mxu0 %v29159_v6  ;;  %v17678_v25 = vpop.f32.mrf.mxu2  ;;  %v17654_v29 = vpop.f32.mrf.mxu0 }
 0x194   :  { %17917 = vmatpush.bf16.msra.mxu1 %v29167_v7  ;;  %v17679_v26 = vadd.f32 %v17678_v25, %v17666_v20  ;;  %v17691_v28 = vpop.f32.mrf.mxu3  ;;  %v17667_v32 = vpop.f32.mrf.mxu1  ;;  %v29197_v7 = vld [vmem:[#allocation5 + $0xd60] sm:$0xff]  ;;  %v29187_v20 = vld [vmem:[#allocation5 + $0xd10] sm:$0xff]  ;;  %v29186_v25 = vld [vmem:[#allocation5 + $0xd08] sm:$0xff] }
 0x195   :  { %17930 = vmatpush.bf16.msra.mxu2 %v29175_v8  ;;  %v29205_v8 = vld [vmem:[#allocation5 + $0xda0] sm:$0xff] }
 0x196   :  { %17943 = vmatpush.bf16.msra.mxu3 %v29183_v9  ;;  %v30974_v30 = vadd.f32 %v17691_v28, %v17679_v26  ;;  %v78_v26 = vld [vmem:[#allocation2 + $0x70] sm:$0xff]  ;;  %v29202_v28 = vld [vmem:[#allocation5 + $0xd88] sm:$0xff]  ;;  %v29185_v32 = vld [vmem:[#allocation5 + $0xd00] sm:$0xff] }
 0x197   :  { %17905 = vmatpush.bf16.msra.mxu0 %v29158_v10  ;;  %v29213_v10 = vld [vmem:[#allocation5 + $0xde0] sm:$0xff]  ;;  %263 = vst [vmem:[#allocation1] ss:$4 sm:$0xff] %v78_v26  ;;  %v29256_v26 = vld [vmem:[#allocation5 + $0xf38] sm:$0xff] }
 0x198   :  { %17918 = vmatpush.bf16.msra.mxu1 %v29166_v11  ;;  %v29188_v11 = vld [vmem:[#allocation5 + $0xd18] sm:$0xff] }
 0x199   :  { %17931 = vmatpush.bf16.msra.mxu2 %v29174_v12  ;;  %v29196_v12 = vld [vmem:[#allocation5 + $0xd58] sm:$0xff] }
 0x19a   :  { %17944 = vmatpush.bf16.msra.mxu3 %v29182_v13  ;;  %v29204_v13 = vld [vmem:[#allocation5 + $0xd98] sm:$0xff] }
 0x19b   :  { %17906 = vmatpush.bf16.msra.mxu0 %v29157_v16  ;;  %v17680_v40 = vpop.f32.mrf.mxu2  ;;  %v29212_v16 = vld [vmem:[#allocation5 + $0xdd8] sm:$0xff] }
 0x19c   :  { %17919 = vmatpush.bf16.msra.mxu1 %v29165_v18  ;;  %v17693_v42 = vpop.f32.mrf.mxu3  ;;  %v29240_v40 = vld [vmem:[#allocation5 + $0xeb8] sm:$0xff] }
 0x19d   :  { %17932 = vmatpush.bf16.msra.mxu2 %v29173_v19  ;;  %v262_v42 = vld.sshfl [vmem:[#allocation1 + $0x38] sm:$0xff pattern:$0x73625140] }
 0x19e   :  { %17945 = vmatpush.bf16.msra.mxu3 %v29181_v21  ;;  %v820_v47 = vpack.c.bf16 %v262_v42, %v262_v42  ;;  %v29262_v42 = vld [vmem:[#allocation5 + $0xf68] sm:$0xff] }
 0x19f   :  { %17907 = vmatpush.bf16.msra.mxu0 %v29156_v22  ;;  %v29195_v22 = vld [vmem:[#allocation5 + $0xd50] sm:$0xff] }
 0x1a0   :  { %17920 = vmatpush.bf16.msra.mxu1 %v29164_v23  ;;  %v29203_v23 = vld [vmem:[#allocation5 + $0xd90] sm:$0xff] }
 0x1a1   :  { %17933 = vmatpush.bf16.msra.mxu2 %v29172_v24  ;;  %v29211_v24 = vld [vmem:[#allocation5 + $0xdd0] sm:$0xff] }
 0x1a2   :  { %17946 = vmatpush.bf16.msra.mxu3 %v29180_v27  ;;  %v29194_v27 = vld [vmem:[#allocation5 + $0xd48] sm:$0xff] }
 0x1a3   :  { %17908 = vmatpush.bf16.msra.mxu0 %v29155_v31 }
 0x1a4   :  { %17921 = vmatpush.bf16.msra.mxu1 %v29163_v33  ;;  %v29193_v33 = vld [vmem:[#allocation5 + $0xd40] sm:$0xff] }
 0x1a5   :  { %17934 = vmatpush.bf16.msra.mxu2 %v29171_v34  ;;  %v29201_v34 = vld [vmem:[#allocation5 + $0xd80] sm:$0xff] }
 0x1a6   :  { %17947 = vmatpush.bf16.msra.mxu3 %v29179_v35  ;;  %v259_v35 = vld.sshfl [vmem:[#allocation1 + $0x20] sm:$0xff pattern:$0x73625140] }
 0x1a7   :  { %17909 = vmatpush.bf16.msra.mxu0 %v29154_v36  ;;  %v261_v36 = vld.sshfl [vmem:[#allocation1 + $0x30] sm:$0xff pattern:$0x73625140] }
 0x1a8   :  { %17922 = vmatpush.bf16.msra.mxu1 %v29162_v38  ;;  %v29232_v38 = vld [vmem:[#allocation5 + $0xe78] sm:$0xff] }
 0x1a9   :  { %17935 = vmatpush.bf16.msra.mxu2 %v29170_v39  ;;  %v260_v39 = vld.sshfl [vmem:[#allocation1 + $0x28] sm:$0xff pattern:$0x73625140] }
 0x1aa   :  { %17948 = vmatpush.bf16.msra.mxu3 %v29178_v41  ;;  %v29209_v41 = vld [vmem:[#allocation5 + $0xdc0] sm:$0xff]  ;;  %v818_v46 = vpack.c.bf16 %v260_v39, %v260_v39  ;;  %v29271_v39 = vld [vmem:[#allocation5 + $0xfb0] sm:$0xff] }
 0x1ab   :  { %17910 = vmatpush.bf16.msra.mxu0 %v29153_v43  ;;  %v17704_v3 = vpop.f32.mrf.mxu0  ;;  %v817_v43 = vpack.c.bf16 %v259_v35, %v259_v35 }
 0x1ac   :  { %17923 = vmatpush.bf16.msra.mxu1 %v29161_v44  ;;  %v17705_v4 = vadd.f32 %v17704_v3, %v30974_v30  ;;  %v17717_v6 = vpop.f32.mrf.mxu1  ;;  %v29210_v30 = vld [vmem:[#allocation5 + $0xdc8] sm:$0xff]  ;;  %v819_v44 = vpack.c.bf16 %v261_v36, %v261_v36 }
 0x1ad   :  { %17936 = vmatpush.bf16.msra.mxu2 %v29169_v45  ;;  %v29248_v45 = vld [vmem:[#allocation5 + $0xef8] sm:$0xff] }
 0x1ae   :  { %17949 = vmatpush.bf16.msra.mxu3 %v29177_v52  ;;  %17911 = vmatmul.bf16.vlgmr.msra.gmra.mxu0 %v813_v54  ;;  %v17718_v9 = vadd.f32 %v17717_v6, %v17705_v4  ;;  %v29222_v52 = vld [vmem:[#allocation5 + $0xe28] sm:$0xff] }
 0x1af   :  { %17955 = vmatpush.bf16.msrb.mxu0 %v29192_v48  ;;  %17924 = vmatmul.bf16.vlgmr.msra.gmra.mxu1 %v814_v57  ;;  %v29223_v48 = vld [vmem:[#allocation5 + $0xe30] sm:$0xff]  ;;  %v29238_v54 = vld [vmem:[#allocation5 + $0xea8] sm:$0xff] }
 0x1b0   :  { %17968 = vmatpush.bf16.msrb.mxu1 %v29200_v49  ;;  %17937 = vmatmul.bf16.vlgmr.msra.gmra.mxu2 %v815_v55  ;;  %v29231_v49 = vld [vmem:[#allocation5 + $0xe70] sm:$0xff]  ;;  %v29246_v55 = vld [vmem:[#allocation5 + $0xee8] sm:$0xff] }
 0x1b1   :  { %17981 = vmatpush.bf16.msrb.mxu2 %v29208_v51  ;;  %17950 = vmatmul.bf16.vlgmr.msra.gmra.mxu3 %v816_v58  ;;  %v29247_v51 = vld [vmem:[#allocation5 + $0xef0] sm:$0xff]  ;;  %v29221_v58 = vld [vmem:[#allocation5 + $0xe20] sm:$0xff] }
 0x1b2   :  { %17994 = vmatpush.bf16.msrb.mxu3 %v29216_v56 }
 0x1b3   :  { %17956 = vmatpush.bf16.msrb.mxu0 %v29191_v59  ;;  %v17730_v14 = vpop.f32.mrf.mxu2  ;;  %v17706_v18 = vpop.f32.mrf.mxu0 }
 0x1b4   :  { %17969 = vmatpush.bf16.msrb.mxu1 %v29199_v60  ;;  %v17731_v15 = vadd.f32 %v17730_v14, %v17718_v9  ;;  %v17743_v17 = vpop.f32.mrf.mxu3  ;;  %v17719_v21 = vpop.f32.mrf.mxu1  ;;  %v29229_v60 = vld [vmem:[#allocation5 + $0xe60] sm:$0xff]  ;;  %v29219_v9 = vld [vmem:[#allocation5 + $0xe10] sm:$0xff]  ;;  %v29218_v14 = vld [vmem:[#allocation5 + $0xe08] sm:$0xff] }
 0x1b5   :  { %17982 = vmatpush.bf16.msrb.mxu2 %v29207_v61  ;;  %v29237_v61 = vld [vmem:[#allocation5 + $0xea0] sm:$0xff] }
 0x1b6   :  { %17995 = vmatpush.bf16.msrb.mxu3 %v29215_v62  ;;  %v30977_v19 = vadd.f32 %v17743_v17, %v17731_v15  ;;  %v79_v15 = vld [vmem:[#allocation2 + $0x78] sm:$0xff]  ;;  %v29234_v17 = vld [vmem:[#allocation5 + $0xe88] sm:$0xff] }
 0x1b7   :  { %17957 = vmatpush.bf16.msrb.mxu0 %v29190_v63  ;;  %v29245_v63 = vld [vmem:[#allocation5 + $0xee0] sm:$0xff]  ;;  %264 = vst [vmem:[#allocation1 + $0x20] ss:$4 sm:$0xff] %v79_v15  ;;  %v29288_v15 = vld [vmem:[#allocation5 + $0x1038] sm:$0xff] }
 0x1b8   :  { %17970 = vmatpush.bf16.msrb.mxu1 %v29198_v0  ;;  %v29220_v0 = vld [vmem:[#allocation5 + $0xe18] sm:$0xff]  ;;  %v29217_v21 = vld [vmem:[#allocation5 + $0xe00] sm:$0xff] }
 0x1b9   :  { %17983 = vmatpush.bf16.msrb.mxu2 %v29206_v1  ;;  %v29228_v1 = vld [vmem:[#allocation5 + $0xe58] sm:$0xff] }
 0x1ba   :  { %17996 = vmatpush.bf16.msrb.mxu3 %v29214_v2  ;;  %v29236_v2 = vld [vmem:[#allocation5 + $0xe98] sm:$0xff] }
 0x1bb   :  { %17958 = vmatpush.bf16.msrb.mxu0 %v29189_v5  ;;  %v17732_v29 = vpop.f32.mrf.mxu2  ;;  %v29244_v5 = vld [vmem:[#allocation5 + $0xed8] sm:$0xff] }
 0x1bc   :  { %17971 = vmatpush.bf16.msrb.mxu1 %v29197_v7  ;;  %v17745_v31 = vpop.f32.mrf.mxu3  ;;  %v29272_v29 = vld [vmem:[#allocation5 + $0xfb8] sm:$0xff] }
 0x1bd   :  { %17984 = vmatpush.bf16.msrb.mxu2 %v29205_v8  ;;  %v268_v31 = vld.sshfl [vmem:[#allocation1 + $0x18] sm:$0xff pattern:$0x73625140] }
 0x1be   :  { %17997 = vmatpush.bf16.msrb.mxu3 %v29213_v10  ;;  %v824_v36 = vpack.c.bf16 %v268_v31, %v268_v31  ;;  %v29294_v31 = vld [vmem:[#allocation5 + $0x1068] sm:$0xff] }
 0x1bf   :  { %17959 = vmatpush.bf16.msrb.mxu0 %v29188_v11  ;;  %v29227_v11 = vld [vmem:[#allocation5 + $0xe50] sm:$0xff] }
 0x1c0   :  { %17972 = vmatpush.bf16.msrb.mxu1 %v29196_v12  ;;  %v29235_v12 = vld [vmem:[#allocation5 + $0xe90] sm:$0xff] }
 0x1c1   :  { %17985 = vmatpush.bf16.msrb.mxu2 %v29204_v13  ;;  %v29243_v13 = vld [vmem:[#allocation5 + $0xed0] sm:$0xff] }
 0x1c2   :  { %17998 = vmatpush.bf16.msrb.mxu3 %v29212_v16  ;;  %v29226_v16 = vld [vmem:[#allocation5 + $0xe48] sm:$0xff] }
 0x1c3   :  { %17960 = vmatpush.bf16.msrb.mxu0 %v29187_v20 }
 0x1c4   :  { %17973 = vmatpush.bf16.msrb.mxu1 %v29195_v22  ;;  %v29225_v22 = vld [vmem:[#allocation5 + $0xe40] sm:$0xff] }
 0x1c5   :  { %17986 = vmatpush.bf16.msrb.mxu2 %v29203_v23  ;;  %v29233_v23 = vld [vmem:[#allocation5 + $0xe80] sm:$0xff] }
 0x1c6   :  { %17999 = vmatpush.bf16.msrb.mxu3 %v29211_v24  ;;  %v265_v24 = vld.sshfl [vmem:[#allocation1] sm:$0xff pattern:$0x73625140] }
 0x1c7   :  { %17961 = vmatpush.bf16.msrb.mxu0 %v29186_v25  ;;  %v267_v25 = vld.sshfl [vmem:[#allocation1 + $0x10] sm:$0xff pattern:$0x73625140] }
 0x1c8   :  { %17974 = vmatpush.bf16.msrb.mxu1 %v29194_v27  ;;  %v29264_v27 = vld [vmem:[#allocation5 + $0xf78] sm:$0xff] }
 0x1c9   :  { %17987 = vmatpush.bf16.msrb.mxu2 %v29202_v28  ;;  %v266_v28 = vld.sshfl [vmem:[#allocation1 + $0x8] sm:$0xff pattern:$0x73625140] }
 0x1ca   :  { %18000 = vmatpush.bf16.msrb.mxu3 %v29210_v30  ;;  %v29241_v30 = vld [vmem:[#allocation5 + $0xec0] sm:$0xff]  ;;  %v822_v35 = vpack.c.bf16 %v266_v28, %v266_v28  ;;  %v29303_v28 = vld [vmem:[#allocation5 + $0x10b0] sm:$0xff] }
 0x1cb   :  { %17962 = vmatpush.bf16.msrb.mxu0 %v29185_v32  ;;  %v17756_v56 = vpop.f32.mrf.mxu0  ;;  %v821_v32 = vpack.c.bf16 %v265_v24, %v265_v24 }
 0x1cc   :  { %17975 = vmatpush.bf16.msrb.mxu1 %v29193_v33  ;;  %v17757_v57 = vadd.f32 %v17756_v56, %v30977_v19  ;;  %v17769_v59 = vpop.f32.mrf.mxu1  ;;  %v29242_v19 = vld [vmem:[#allocation5 + $0xec8] sm:$0xff]  ;;  %v823_v33 = vpack.c.bf16 %v267_v25, %v267_v25 }
 0x1cd   :  { %17988 = vmatpush.bf16.msrb.mxu2 %v29201_v34  ;;  %v29280_v34 = vld [vmem:[#allocation5 + $0xff8] sm:$0xff] }
 0x1ce   :  { %18001 = vmatpush.bf16.msrb.mxu3 %v29209_v41  ;;  %17963 = vmatmul.bf16.vlgmr.msrb.gmra.mxu0 %v817_v43  ;;  %v17770_v62 = vadd.f32 %v17769_v59, %v17757_v57  ;;  %v29254_v41 = vld [vmem:[#allocation5 + $0xf28] sm:$0xff] }
 0x1cf   :  { %18007 = vmatpush.bf16.msra.mxu0 %v29224_v37  ;;  %17976 = vmatmul.bf16.vlgmr.msrb.gmra.mxu1 %v818_v46  ;;  %v29255_v37 = vld [vmem:[#allocation5 + $0xf30] sm:$0xff]  ;;  %v29270_v43 = vld [vmem:[#allocation5 + $0xfa8] sm:$0xff] }
 0x1d0   :  { %18020 = vmatpush.bf16.msra.mxu1 %v29232_v38  ;;  %17989 = vmatmul.bf16.vlgmr.msrb.gmra.mxu2 %v819_v44  ;;  %v29263_v38 = vld [vmem:[#allocation5 + $0xf70] sm:$0xff]  ;;  %v29278_v44 = vld [vmem:[#allocation5 + $0xfe8] sm:$0xff] }
 0x1d1   :  { %18033 = vmatpush.bf16.msra.mxu2 %v29240_v40  ;;  %18002 = vmatmul.bf16.vlgmr.msrb.gmra.mxu3 %v820_v47  ;;  %v29279_v40 = vld [vmem:[#allocation5 + $0xff0] sm:$0xff]  ;;  %v29253_v47 = vld [vmem:[#allocation5 + $0xf20] sm:$0xff] }
 0x1d2   :  { %18046 = vmatpush.bf16.msra.mxu3 %v29248_v45 }
 0x1d3   :  { %18008 = vmatpush.bf16.msra.mxu0 %v29223_v48  ;;  %v17782_v3 = vpop.f32.mrf.mxu2  ;;  %v17758_v7 = vpop.f32.mrf.mxu0 }
 0x1d4   :  { %18021 = vmatpush.bf16.msra.mxu1 %v29231_v49  ;;  %v17783_v4 = vadd.f32 %v17782_v3, %v17770_v62  ;;  %v17795_v6 = vpop.f32.mrf.mxu3  ;;  %v17771_v10 = vpop.f32.mrf.mxu1  ;;  %v29261_v49 = vld [vmem:[#allocation5 + $0xf60] sm:$0xff]  ;;  %v29251_v62 = vld [vmem:[#allocation5 + $0xf10] sm:$0xff]  ;;  %v29250_v3 = vld [vmem:[#allocation5 + $0xf08] sm:$0xff] }
 0x1d5   :  { %18034 = vmatpush.bf16.msra.mxu2 %v29239_v50  ;;  %v29269_v50 = vld [vmem:[#allocation5 + $0xfa0] sm:$0xff] }
 0x1d6   :  { %18047 = vmatpush.bf16.msra.mxu3 %v29247_v51  ;;  %v30980_v8 = vadd.f32 %v17795_v6, %v17783_v4  ;;  %v80_v4 = vld [vmem:[#allocation2 + $0x80] sm:$0xff] }
 0x1d7   :  { %18009 = vmatpush.bf16.msra.mxu0 %v29222_v52  ;;  %v29277_v52 = vld [vmem:[#allocation5 + $0xfe0] sm:$0xff]  ;;  %v29266_v6 = vld [vmem:[#allocation5 + $0xf88] sm:$0xff]  ;;  %273 = vst [vmem:[#allocation1] ss:$4 sm:$0xff] %v80_v4  ;;  %v29320_v4 = vld [vmem:[#allocation5 + $0x1138] sm:$0xff] }
 0x1d8   :  { %18022 = vmatpush.bf16.msra.mxu1 %v29230_v53  ;;  %v29252_v53 = vld [vmem:[#allocation5 + $0xf18] sm:$0xff]  ;;  %v29249_v10 = vld [vmem:[#allocation5 + $0xf00] sm:$0xff] }
 0x1d9   :  { %18035 = vmatpush.bf16.msra.mxu2 %v29238_v54  ;;  %v29260_v54 = vld [vmem:[#allocation5 + $0xf58] sm:$0xff] }
 0x1da   :  { %18048 = vmatpush.bf16.msra.mxu3 %v29246_v55  ;;  %v29268_v55 = vld [vmem:[#allocation5 + $0xf98] sm:$0xff] }
 0x1db   :  { %18010 = vmatpush.bf16.msra.mxu0 %v29221_v58  ;;  %v17784_v18 = vpop.f32.mrf.mxu2  ;;  %v29276_v58 = vld [vmem:[#allocation5 + $0xfd8] sm:$0xff] }
 0x1dc   :  { %18023 = vmatpush.bf16.msra.mxu1 %v29229_v60  ;;  %v17797_v20 = vpop.f32.mrf.mxu3  ;;  %v29304_v18 = vld [vmem:[#allocation5 + $0x10b8] sm:$0xff] }
 0x1dd   :  { %18036 = vmatpush.bf16.msra.mxu2 %v29237_v61  ;;  %v272_v20 = vld.sshfl [vmem:[#allocation1 + $0x38] sm:$0xff pattern:$0x73625140] }
 0x1de   :  { %18049 = vmatpush.bf16.msra.mxu3 %v29245_v63  ;;  %v828_v25 = vpack.c.bf16 %v272_v20, %v272_v20  ;;  %v29326_v20 = vld [vmem:[#allocation5 + $0x1168] sm:$0xff] }
 0x1df   :  { %18011 = vmatpush.bf16.msra.mxu0 %v29220_v0  ;;  %v29259_v0 = vld [vmem:[#allocation5 + $0xf50] sm:$0xff] }
 0x1e0   :  { %18024 = vmatpush.bf16.msra.mxu1 %v29228_v1  ;;  %v29267_v1 = vld [vmem:[#allocation5 + $0xf90] sm:$0xff] }
 0x1e1   :  { %18037 = vmatpush.bf16.msra.mxu2 %v29236_v2  ;;  %v29275_v2 = vld [vmem:[#allocation5 + $0xfd0] sm:$0xff] }
 0x1e2   :  { %18050 = vmatpush.bf16.msra.mxu3 %v29244_v5  ;;  %v29258_v5 = vld [vmem:[#allocation5 + $0xf48] sm:$0xff] }
 0x1e3   :  { %18012 = vmatpush.bf16.msra.mxu0 %v29219_v9 }
 0x1e4   :  { %18025 = vmatpush.bf16.msra.mxu1 %v29227_v11  ;;  %v29257_v11 = vld [vmem:[#allocation5 + $0xf40] sm:$0xff] }
 0x1e5   :  { %18038 = vmatpush.bf16.msra.mxu2 %v29235_v12  ;;  %v29265_v12 = vld [vmem:[#allocation5 + $0xf80] sm:$0xff] }
 0x1e6   :  { %18051 = vmatpush.bf16.msra.mxu3 %v29243_v13  ;;  %v269_v13 = vld.sshfl [vmem:[#allocation1 + $0x20] sm:$0xff pattern:$0x73625140] }
 0x1e7   :  { %18013 = vmatpush.bf16.msra.mxu0 %v29218_v14  ;;  %v271_v14 = vld.sshfl [vmem:[#allocation1 + $0x30] sm:$0xff pattern:$0x73625140] }
 0x1e8   :  { %18026 = vmatpush.bf16.msra.mxu1 %v29226_v16  ;;  %v29296_v16 = vld [vmem:[#allocation5 + $0x1078] sm:$0xff] }
 0x1e9   :  { %18039 = vmatpush.bf16.msra.mxu2 %v29234_v17  ;;  %v270_v17 = vld.sshfl [vmem:[#allocation1 + $0x28] sm:$0xff pattern:$0x73625140] }
 0x1ea   :  { %18052 = vmatpush.bf16.msra.mxu3 %v29242_v19  ;;  %v29273_v19 = vld [vmem:[#allocation5 + $0xfc0] sm:$0xff]  ;;  %v826_v24 = vpack.c.bf16 %v270_v17, %v270_v17  ;;  %v29335_v17 = vld [vmem:[#allocation5 + $0x11b0] sm:$0xff] }
 0x1eb   :  { %18014 = vmatpush.bf16.msra.mxu0 %v29217_v21  ;;  %v17808_v45 = vpop.f32.mrf.mxu0  ;;  %v825_v21 = vpack.c.bf16 %v269_v13, %v269_v13 }
 0x1ec   :  { %18027 = vmatpush.bf16.msra.mxu1 %v29225_v22  ;;  %v17809_v46 = vadd.f32 %v17808_v45, %v30980_v8  ;;  %v17821_v48 = vpop.f32.mrf.mxu1  ;;  %v29274_v8 = vld [vmem:[#allocation5 + $0xfc8] sm:$0xff]  ;;  %v827_v22 = vpack.c.bf16 %v271_v14, %v271_v14 }
 0x1ed   :  { %18040 = vmatpush.bf16.msra.mxu2 %v29233_v23  ;;  %v29312_v23 = vld [vmem:[#allocation5 + $0x10f8] sm:$0xff] }
 0x1ee   :  { %18053 = vmatpush.bf16.msra.mxu3 %v29241_v30  ;;  %18015 = vmatmul.bf16.vlgmr.msra.gmra.mxu0 %v821_v32  ;;  %v17822_v51 = vadd.f32 %v17821_v48, %v17809_v46  ;;  %v29286_v30 = vld [vmem:[#allocation5 + $0x1028] sm:$0xff] }
 0x1ef   :  { %18059 = vmatpush.bf16.msrb.mxu0 %v29256_v26  ;;  %18028 = vmatmul.bf16.vlgmr.msra.gmra.mxu1 %v822_v35  ;;  %v29287_v26 = vld [vmem:[#allocation5 + $0x1030] sm:$0xff]  ;;  %v29302_v32 = vld [vmem:[#allocation5 + $0x10a8] sm:$0xff] }
 0x1f0   :  { %18072 = vmatpush.bf16.msrb.mxu1 %v29264_v27  ;;  %18041 = vmatmul.bf16.vlgmr.msra.gmra.mxu2 %v823_v33  ;;  %v29295_v27 = vld [vmem:[#allocation5 + $0x1070] sm:$0xff]  ;;  %v29310_v33 = vld [vmem:[#allocation5 + $0x10e8] sm:$0xff] }
 0x1f1   :  { %18085 = vmatpush.bf16.msrb.mxu2 %v29272_v29  ;;  %18054 = vmatmul.bf16.vlgmr.msra.gmra.mxu3 %v824_v36  ;;  %v29311_v29 = vld [vmem:[#allocation5 + $0x10f0] sm:$0xff]  ;;  %v29285_v36 = vld [vmem:[#allocation5 + $0x1020] sm:$0xff] }
 0x1f2   :  { %18098 = vmatpush.bf16.msrb.mxu3 %v29280_v34 }
 0x1f3   :  { %18060 = vmatpush.bf16.msrb.mxu0 %v29255_v37  ;;  %v17834_v56 = vpop.f32.mrf.mxu2  ;;  %v17810_v60 = vpop.f32.mrf.mxu0 }
 0x1f4   :  { %18073 = vmatpush.bf16.msrb.mxu1 %v29263_v38  ;;  %v17835_v57 = vadd.f32 %v17834_v56, %v17822_v51  ;;  %v17847_v59 = vpop.f32.mrf.mxu3  ;;  %v17823_v63 = vpop.f32.mrf.mxu1  ;;  %v29293_v38 = vld [vmem:[#allocation5 + $0x1060] sm:$0xff]  ;;  %v29283_v51 = vld [vmem:[#allocation5 + $0x1010] sm:$0xff]  ;;  %v29282_v56 = vld [vmem:[#allocation5 + $0x1008] sm:$0xff] }
 0x1f5   :  { %18086 = vmatpush.bf16.msrb.mxu2 %v29271_v39  ;;  %v29301_v39 = vld [vmem:[#allocation5 + $0x10a0] sm:$0xff] }
 0x1f6   :  { %18099 = vmatpush.bf16.msrb.mxu3 %v29279_v40  ;;  %v30983_v61 = vadd.f32 %v17847_v59, %v17835_v57  ;;  %v81_v57 = vld [vmem:[#allocation2 + $0x88] sm:$0xff]  ;;  %v29281_v63 = vld [vmem:[#allocation5 + $0x1000] sm:$0xff] }
 0x1f7   :  { %18061 = vmatpush.bf16.msrb.mxu0 %v29254_v41  ;;  %v29309_v41 = vld [vmem:[#allocation5 + $0x10e0] sm:$0xff]  ;;  %v29298_v59 = vld [vmem:[#allocation5 + $0x1088] sm:$0xff]  ;;  %274 = vst [vmem:[#allocation1 + $0x20] ss:$4 sm:$0xff] %v81_v57  ;;  %v29352_v57 = vld [vmem:[#allocation5 + $0x1238] sm:$0xff] }
 0x1f8   :  { %18074 = vmatpush.bf16.msrb.mxu1 %v29262_v42  ;;  %v29284_v42 = vld [vmem:[#allocation5 + $0x1018] sm:$0xff] }
 0x1f9   :  { %18087 = vmatpush.bf16.msrb.mxu2 %v29270_v43  ;;  %v29292_v43 = vld [vmem:[#allocation5 + $0x1058] sm:$0xff] }
 0x1fa   :  { %18100 = vmatpush.bf16.msrb.mxu3 %v29278_v44  ;;  %v29300_v44 = vld [vmem:[#allocation5 + $0x1098] sm:$0xff] }
 0x1fb   :  { %18062 = vmatpush.bf16.msrb.mxu0 %v29253_v47  ;;  %v17836_v7 = vpop.f32.mrf.mxu2  ;;  %v29308_v47 = vld [vmem:[#allocation5 + $0x10d8] sm:$0xff] }
 0x1fc   :  { %18075 = vmatpush.bf16.msrb.mxu1 %v29261_v49  ;;  %v17849_v9 = vpop.f32.mrf.mxu3  ;;  %v29336_v7 = vld [vmem:[#allocation5 + $0x11b8] sm:$0xff] }
 0x1fd   :  { %18088 = vmatpush.bf16.msrb.mxu2 %v29269_v50  ;;  %v278_v9 = vld.sshfl [vmem:[#allocation1 + $0x18] sm:$0xff pattern:$0x73625140] }
 0x1fe   :  { %18101 = vmatpush.bf16.msrb.mxu3 %v29277_v52  ;;  %v832_v14 = vpack.c.bf16 %v278_v9, %v278_v9  ;;  %v29358_v9 = vld [vmem:[#allocation5 + $0x1268] sm:$0xff] }
 0x1ff   :  { %18063 = vmatpush.bf16.msrb.mxu0 %v29252_v53  ;;  %v29291_v53 = vld [vmem:[#allocation5 + $0x1050] sm:$0xff] }
 0x200   :  { %18076 = vmatpush.bf16.msrb.mxu1 %v29260_v54  ;;  %v29299_v54 = vld [vmem:[#allocation5 + $0x1090] sm:$0xff] }
 0x201   :  { %18089 = vmatpush.bf16.msrb.mxu2 %v29268_v55  ;;  %v29307_v55 = vld [vmem:[#allocation5 + $0x10d0] sm:$0xff] }
 0x202   :  { %18102 = vmatpush.bf16.msrb.mxu3 %v29276_v58  ;;  %v29290_v58 = vld [vmem:[#allocation5 + $0x1048] sm:$0xff] }
 0x203   :  { %18064 = vmatpush.bf16.msrb.mxu0 %v29251_v62 }
 0x204   :  { %18077 = vmatpush.bf16.msrb.mxu1 %v29259_v0  ;;  %v29289_v0 = vld [vmem:[#allocation5 + $0x1040] sm:$0xff] }
 0x205   :  { %18090 = vmatpush.bf16.msrb.mxu2 %v29267_v1  ;;  %v29297_v1 = vld [vmem:[#allocation5 + $0x1080] sm:$0xff] }
 0x206   :  { %18103 = vmatpush.bf16.msrb.mxu3 %v29275_v2  ;;  %v275_v2 = vld.sshfl [vmem:[#allocation1] sm:$0xff pattern:$0x73625140] }
 0x207   :  { %18065 = vmatpush.bf16.msrb.mxu0 %v29250_v3  ;;  %v277_v3 = vld.sshfl [vmem:[#allocation1 + $0x10] sm:$0xff pattern:$0x73625140] }
 0x208   :  { %18078 = vmatpush.bf16.msrb.mxu1 %v29258_v5  ;;  %v29328_v5 = vld [vmem:[#allocation5 + $0x1178] sm:$0xff] }
 0x209   :  { %18091 = vmatpush.bf16.msrb.mxu2 %v29266_v6  ;;  %v276_v6 = vld.sshfl [vmem:[#allocation1 + $0x8] sm:$0xff pattern:$0x73625140] }
 0x20a   :  { %18104 = vmatpush.bf16.msrb.mxu3 %v29274_v8  ;;  %v29305_v8 = vld [vmem:[#allocation5 + $0x10c0] sm:$0xff]  ;;  %v830_v13 = vpack.c.bf16 %v276_v6, %v276_v6  ;;  %v29367_v6 = vld [vmem:[#allocation5 + $0x12b0] sm:$0xff] }
 0x20b   :  { %18066 = vmatpush.bf16.msrb.mxu0 %v29249_v10  ;;  %v17860_v34 = vpop.f32.mrf.mxu0  ;;  %v829_v10 = vpack.c.bf16 %v275_v2, %v275_v2 }
 0x20c   :  { %18079 = vmatpush.bf16.msrb.mxu1 %v29257_v11  ;;  %v17861_v35 = vadd.f32 %v17860_v34, %v30983_v61  ;;  %v17873_v37 = vpop.f32.mrf.mxu1  ;;  %v29306_v61 = vld [vmem:[#allocation5 + $0x10c8] sm:$0xff]  ;;  %v831_v11 = vpack.c.bf16 %v277_v3, %v277_v3 }
 0x20d   :  { %18092 = vmatpush.bf16.msrb.mxu2 %v29265_v12  ;;  %v29344_v12 = vld [vmem:[#allocation5 + $0x11f8] sm:$0xff] }
 0x20e   :  { %18105 = vmatpush.bf16.msrb.mxu3 %v29273_v19  ;;  %18067 = vmatmul.bf16.vlgmr.msrb.gmra.mxu0 %v825_v21  ;;  %v17874_v40 = vadd.f32 %v17873_v37, %v17861_v35  ;;  %v29318_v19 = vld [vmem:[#allocation5 + $0x1128] sm:$0xff] }
 0x20f   :  { %18111 = vmatpush.bf16.msra.mxu0 %v29288_v15  ;;  %18080 = vmatmul.bf16.vlgmr.msrb.gmra.mxu1 %v826_v24  ;;  %v29319_v15 = vld [vmem:[#allocation5 + $0x1130] sm:$0xff]  ;;  %v29334_v21 = vld [vmem:[#allocation5 + $0x11a8] sm:$0xff] }
 0x210   :  { %18124 = vmatpush.bf16.msra.mxu1 %v29296_v16  ;;  %18093 = vmatmul.bf16.vlgmr.msrb.gmra.mxu2 %v827_v22  ;;  %v29327_v16 = vld [vmem:[#allocation5 + $0x1170] sm:$0xff]  ;;  %v29342_v22 = vld [vmem:[#allocation5 + $0x11e8] sm:$0xff] }
 0x211   :  { %18137 = vmatpush.bf16.msra.mxu2 %v29304_v18  ;;  %18106 = vmatmul.bf16.vlgmr.msrb.gmra.mxu3 %v828_v25  ;;  %v29343_v18 = vld [vmem:[#allocation5 + $0x11f0] sm:$0xff]  ;;  %v29317_v25 = vld [vmem:[#allocation5 + $0x1120] sm:$0xff] }
 0x212   :  { %18150 = vmatpush.bf16.msra.mxu3 %v29312_v23 }
 0x213   :  { %18112 = vmatpush.bf16.msra.mxu0 %v29287_v26  ;;  %v17886_v45 = vpop.f32.mrf.mxu2  ;;  %v17862_v49 = vpop.f32.mrf.mxu0 }
 0x214   :  { %18125 = vmatpush.bf16.msra.mxu1 %v29295_v27  ;;  %v17887_v46 = vadd.f32 %v17886_v45, %v17874_v40  ;;  %v17899_v48 = vpop.f32.mrf.mxu3  ;;  %v17875_v52 = vpop.f32.mrf.mxu1  ;;  %v29325_v27 = vld [vmem:[#allocation5 + $0x1160] sm:$0xff]  ;;  %v29315_v40 = vld [vmem:[#allocation5 + $0x1110] sm:$0xff]  ;;  %v29314_v45 = vld [vmem:[#allocation5 + $0x1108] sm:$0xff] }
 0x215   :  { %18138 = vmatpush.bf16.msra.mxu2 %v29303_v28  ;;  %v29333_v28 = vld [vmem:[#allocation5 + $0x11a0] sm:$0xff] }
 0x216   :  { %18151 = vmatpush.bf16.msra.mxu3 %v29311_v29  ;;  %v30986_v50 = vadd.f32 %v17899_v48, %v17887_v46  ;;  %v82_v46 = vld [vmem:[#allocation2 + $0x90] sm:$0xff]  ;;  %v29330_v48 = vld [vmem:[#allocation5 + $0x1188] sm:$0xff]  ;;  %v29313_v52 = vld [vmem:[#allocation5 + $0x1100] sm:$0xff] }
 0x217   :  { %18113 = vmatpush.bf16.msra.mxu0 %v29286_v30  ;;  %v29341_v30 = vld [vmem:[#allocation5 + $0x11e0] sm:$0xff]  ;;  %283 = vst [vmem:[#allocation1] ss:$4 sm:$0xff] %v82_v46  ;;  %v29384_v46 = vld [vmem:[#allocation5 + $0x1338] sm:$0xff] }
 0x218   :  { %18126 = vmatpush.bf16.msra.mxu1 %v29294_v31  ;;  %v29316_v31 = vld [vmem:[#allocation5 + $0x1118] sm:$0xff] }
 0x219   :  { %18139 = vmatpush.bf16.msra.mxu2 %v29302_v32  ;;  %v29324_v32 = vld [vmem:[#allocation5 + $0x1158] sm:$0xff] }
 0x21a   :  { %18152 = vmatpush.bf16.msra.mxu3 %v29310_v33  ;;  %v29332_v33 = vld [vmem:[#allocation5 + $0x1198] sm:$0xff] }
 0x21b   :  { %18114 = vmatpush.bf16.msra.mxu0 %v29285_v36  ;;  %v17888_v60 = vpop.f32.mrf.mxu2  ;;  %v29340_v36 = vld [vmem:[#allocation5 + $0x11d8] sm:$0xff] }
 0x21c   :  { %18127 = vmatpush.bf16.msra.mxu1 %v29293_v38  ;;  %v17901_v62 = vpop.f32.mrf.mxu3  ;;  %v29368_v60 = vld [vmem:[#allocation5 + $0x12b8] sm:$0xff] }
 0x21d   :  { %18140 = vmatpush.bf16.msra.mxu2 %v29301_v39  ;;  %v282_v62 = vld.sshfl [vmem:[#allocation1 + $0x38] sm:$0xff pattern:$0x73625140] }
 0x21e   :  { %18153 = vmatpush.bf16.msra.mxu3 %v29309_v41  ;;  %v836_v3 = vpack.c.bf16 %v282_v62, %v282_v62  ;;  %v29390_v62 = vld [vmem:[#allocation5 + $0x1368] sm:$0xff] }
 0x21f   :  { %18115 = vmatpush.bf16.msra.mxu0 %v29284_v42  ;;  %v29323_v42 = vld [vmem:[#allocation5 + $0x1150] sm:$0xff] }
 0x220   :  { %18128 = vmatpush.bf16.msra.mxu1 %v29292_v43  ;;  %v29331_v43 = vld [vmem:[#allocation5 + $0x1190] sm:$0xff] }
 0x221   :  { %18141 = vmatpush.bf16.msra.mxu2 %v29300_v44  ;;  %v29339_v44 = vld [vmem:[#allocation5 + $0x11d0] sm:$0xff] }
 0x222   :  { %18154 = vmatpush.bf16.msra.mxu3 %v29308_v47  ;;  %v29322_v47 = vld [vmem:[#allocation5 + $0x1148] sm:$0xff] }
 0x223   :  { %18116 = vmatpush.bf16.msra.mxu0 %v29283_v51 }
 0x224   :  { %18129 = vmatpush.bf16.msra.mxu1 %v29291_v53  ;;  %v29321_v53 = vld [vmem:[#allocation5 + $0x1140] sm:$0xff] }
 0x225   :  { %18142 = vmatpush.bf16.msra.mxu2 %v29299_v54  ;;  %v29329_v54 = vld [vmem:[#allocation5 + $0x1180] sm:$0xff] }
 0x226   :  { %18155 = vmatpush.bf16.msra.mxu3 %v29307_v55  ;;  %v279_v55 = vld.sshfl [vmem:[#allocation1 + $0x20] sm:$0xff pattern:$0x73625140] }
 0x227   :  { %18117 = vmatpush.bf16.msra.mxu0 %v29282_v56  ;;  %v281_v56 = vld.sshfl [vmem:[#allocation1 + $0x30] sm:$0xff pattern:$0x73625140] }
 0x228   :  { %18130 = vmatpush.bf16.msra.mxu1 %v29290_v58  ;;  %v29360_v58 = vld [vmem:[#allocation5 + $0x1278] sm:$0xff] }
 0x229   :  { %18143 = vmatpush.bf16.msra.mxu2 %v29298_v59  ;;  %v280_v59 = vld.sshfl [vmem:[#allocation1 + $0x28] sm:$0xff pattern:$0x73625140] }
 0x22a   :  { %18156 = vmatpush.bf16.msra.mxu3 %v29306_v61  ;;  %v29337_v61 = vld [vmem:[#allocation5 + $0x11c0] sm:$0xff]  ;;  %v834_v2 = vpack.c.bf16 %v280_v59, %v280_v59  ;;  %v29399_v59 = vld [vmem:[#allocation5 + $0x13b0] sm:$0xff] }
 0x22b   :  { %18118 = vmatpush.bf16.msra.mxu0 %v29281_v63  ;;  %v17912_v23 = vpop.f32.mrf.mxu0  ;;  %v833_v63 = vpack.c.bf16 %v279_v55, %v279_v55 }
 0x22c   :  { %18131 = vmatpush.bf16.msra.mxu1 %v29289_v0  ;;  %v17913_v24 = vadd.f32 %v17912_v23, %v30986_v50  ;;  %v17925_v26 = vpop.f32.mrf.mxu1  ;;  %v29338_v50 = vld [vmem:[#allocation5 + $0x11c8] sm:$0xff]  ;;  %v835_v0 = vpack.c.bf16 %v281_v56, %v281_v56 }
 0x22d   :  { %18144 = vmatpush.bf16.msra.mxu2 %v29297_v1  ;;  %v29376_v1 = vld [vmem:[#allocation5 + $0x12f8] sm:$0xff] }
 0x22e   :  { %18157 = vmatpush.bf16.msra.mxu3 %v29305_v8  ;;  %18119 = vmatmul.bf16.vlgmr.msra.gmra.mxu0 %v829_v10  ;;  %v17926_v29 = vadd.f32 %v17925_v26, %v17913_v24  ;;  %v29350_v8 = vld [vmem:[#allocation5 + $0x1228] sm:$0xff] }
 0x22f   :  { %18163 = vmatpush.bf16.msrb.mxu0 %v29320_v4  ;;  %18132 = vmatmul.bf16.vlgmr.msra.gmra.mxu1 %v830_v13  ;;  %v29351_v4 = vld [vmem:[#allocation5 + $0x1230] sm:$0xff]  ;;  %v29366_v10 = vld [vmem:[#allocation5 + $0x12a8] sm:$0xff] }
 0x230   :  { %18176 = vmatpush.bf16.msrb.mxu1 %v29328_v5  ;;  %18145 = vmatmul.bf16.vlgmr.msra.gmra.mxu2 %v831_v11  ;;  %v29359_v5 = vld [vmem:[#allocation5 + $0x1270] sm:$0xff]  ;;  %v29374_v11 = vld [vmem:[#allocation5 + $0x12e8] sm:$0xff] }
 0x231   :  { %18189 = vmatpush.bf16.msrb.mxu2 %v29336_v7  ;;  %18158 = vmatmul.bf16.vlgmr.msra.gmra.mxu3 %v832_v14  ;;  %v29375_v7 = vld [vmem:[#allocation5 + $0x12f0] sm:$0xff]  ;;  %v29349_v14 = vld [vmem:[#allocation5 + $0x1220] sm:$0xff] }
 0x232   :  { %18202 = vmatpush.bf16.msrb.mxu3 %v29344_v12 }
 0x233   :  { %18164 = vmatpush.bf16.msrb.mxu0 %v29319_v15  ;;  %v17938_v34 = vpop.f32.mrf.mxu2  ;;  %v17914_v38 = vpop.f32.mrf.mxu0 }
 0x234   :  { %18177 = vmatpush.bf16.msrb.mxu1 %v29327_v16  ;;  %v17939_v35 = vadd.f32 %v17938_v34, %v17926_v29  ;;  %v17951_v37 = vpop.f32.mrf.mxu3  ;;  %v17927_v41 = vpop.f32.mrf.mxu1  ;;  %v29357_v16 = vld [vmem:[#allocation5 + $0x1260] sm:$0xff]  ;;  %v29347_v29 = vld [vmem:[#allocation5 + $0x1210] sm:$0xff]  ;;  %v29346_v34 = vld [vmem:[#allocation5 + $0x1208] sm:$0xff] }
 0x235   :  { %18190 = vmatpush.bf16.msrb.mxu2 %v29335_v17  ;;  %v29365_v17 = vld [vmem:[#allocation5 + $0x12a0] sm:$0xff] }
 0x236   :  { %18203 = vmatpush.bf16.msrb.mxu3 %v29343_v18  ;;  %v30989_v39 = vadd.f32 %v17951_v37, %v17939_v35  ;;  %v83_v35 = vld [vmem:[#allocation2 + $0x98] sm:$0xff]  ;;  %v29362_v37 = vld [vmem:[#allocation5 + $0x1288] sm:$0xff] }
 0x237   :  { %18165 = vmatpush.bf16.msrb.mxu0 %v29318_v19  ;;  %v29373_v19 = vld [vmem:[#allocation5 + $0x12e0] sm:$0xff]  ;;  %284 = vst [vmem:[#allocation1 + $0x20] ss:$4 sm:$0xff] %v83_v35  ;;  %v29416_v35 = vld [vmem:[#allocation5 + $0x1438] sm:$0xff] }
 0x238   :  { %18178 = vmatpush.bf16.msrb.mxu1 %v29326_v20  ;;  %v29348_v20 = vld [vmem:[#allocation5 + $0x1218] sm:$0xff]  ;;  %v29345_v41 = vld [vmem:[#allocation5 + $0x1200] sm:$0xff] }
 0x239   :  { %18191 = vmatpush.bf16.msrb.mxu2 %v29334_v21  ;;  %v29356_v21 = vld [vmem:[#allocation5 + $0x1258] sm:$0xff] }
 0x23a   :  { %18204 = vmatpush.bf16.msrb.mxu3 %v29342_v22  ;;  %v29364_v22 = vld [vmem:[#allocation5 + $0x1298] sm:$0xff] }
 0x23b   :  { %18166 = vmatpush.bf16.msrb.mxu0 %v29317_v25  ;;  %v17940_v49 = vpop.f32.mrf.mxu2  ;;  %v29372_v25 = vld [vmem:[#allocation5 + $0x12d8] sm:$0xff] }
 0x23c   :  { %18179 = vmatpush.bf16.msrb.mxu1 %v29325_v27  ;;  %v17953_v51 = vpop.f32.mrf.mxu3  ;;  %v29400_v49 = vld [vmem:[#allocation5 + $0x13b8] sm:$0xff] }
 0x23d   :  { %18192 = vmatpush.bf16.msrb.mxu2 %v29333_v28  ;;  %v288_v51 = vld.sshfl [vmem:[#allocation1 + $0x18] sm:$0xff pattern:$0x73625140] }
 0x23e   :  { %18205 = vmatpush.bf16.msrb.mxu3 %v29341_v30  ;;  %v840_v56 = vpack.c.bf16 %v288_v51, %v288_v51  ;;  %v29422_v51 = vld [vmem:[#allocation5 + $0x1468] sm:$0xff] }
 0x23f   :  { %18167 = vmatpush.bf16.msrb.mxu0 %v29316_v31  ;;  %v29355_v31 = vld [vmem:[#allocation5 + $0x1250] sm:$0xff] }
 0x240   :  { %18180 = vmatpush.bf16.msrb.mxu1 %v29324_v32  ;;  %v29363_v32 = vld [vmem:[#allocation5 + $0x1290] sm:$0xff] }
 0x241   :  { %18193 = vmatpush.bf16.msrb.mxu2 %v29332_v33  ;;  %v29371_v33 = vld [vmem:[#allocation5 + $0x12d0] sm:$0xff] }
 0x242   :  { %18206 = vmatpush.bf16.msrb.mxu3 %v29340_v36  ;;  %v29354_v36 = vld [vmem:[#allocation5 + $0x1248] sm:$0xff] }
 0x243   :  { %18168 = vmatpush.bf16.msrb.mxu0 %v29315_v40 }
 0x244   :  { %18181 = vmatpush.bf16.msrb.mxu1 %v29323_v42  ;;  %v29353_v42 = vld [vmem:[#allocation5 + $0x1240] sm:$0xff] }
 0x245   :  { %18194 = vmatpush.bf16.msrb.mxu2 %v29331_v43  ;;  %v29361_v43 = vld [vmem:[#allocation5 + $0x1280] sm:$0xff] }
 0x246   :  { %18207 = vmatpush.bf16.msrb.mxu3 %v29339_v44  ;;  %v285_v44 = vld.sshfl [vmem:[#allocation1] sm:$0xff pattern:$0x73625140] }
 0x247   :  { %18169 = vmatpush.bf16.msrb.mxu0 %v29314_v45  ;;  %v287_v45 = vld.sshfl [vmem:[#allocation1 + $0x10] sm:$0xff pattern:$0x73625140] }
 0x248   :  { %18182 = vmatpush.bf16.msrb.mxu1 %v29322_v47  ;;  %v29392_v47 = vld [vmem:[#allocation5 + $0x1378] sm:$0xff] }
 0x249   :  { %18195 = vmatpush.bf16.msrb.mxu2 %v29330_v48  ;;  %v286_v48 = vld.sshfl [vmem:[#allocation1 + $0x8] sm:$0xff pattern:$0x73625140] }
 0x24a   :  { %18208 = vmatpush.bf16.msrb.mxu3 %v29338_v50  ;;  %v29369_v50 = vld [vmem:[#allocation5 + $0x12c0] sm:$0xff]  ;;  %v838_v55 = vpack.c.bf16 %v286_v48, %v286_v48  ;;  %v29431_v48 = vld [vmem:[#allocation5 + $0x14b0] sm:$0xff] }
 0x24b   :  { %18170 = vmatpush.bf16.msrb.mxu0 %v29313_v52  ;;  %v17964_v12 = vpop.f32.mrf.mxu0  ;;  %v837_v52 = vpack.c.bf16 %v285_v44, %v285_v44 }
 0x24c   :  { %18183 = vmatpush.bf16.msrb.mxu1 %v29321_v53  ;;  %v17965_v13 = vadd.f32 %v17964_v12, %v30989_v39  ;;  %v17977_v15 = vpop.f32.mrf.mxu1  ;;  %v29370_v39 = vld [vmem:[#allocation5 + $0x12c8] sm:$0xff]  ;;  %v839_v53 = vpack.c.bf16 %v287_v45, %v287_v45 }
 0x24d   :  { %18196 = vmatpush.bf16.msrb.mxu2 %v29329_v54  ;;  %v29408_v54 = vld [vmem:[#allocation5 + $0x13f8] sm:$0xff] }
 0x24e   :  { %18209 = vmatpush.bf16.msrb.mxu3 %v29337_v61  ;;  %18171 = vmatmul.bf16.vlgmr.msrb.gmra.mxu0 %v833_v63  ;;  %v17978_v18 = vadd.f32 %v17977_v15, %v17965_v13  ;;  %v29382_v61 = vld [vmem:[#allocation5 + $0x1328] sm:$0xff] }
 0x24f   :  { %18215 = vmatpush.bf16.msra.mxu0 %v29352_v57  ;;  %18184 = vmatmul.bf16.vlgmr.msrb.gmra.mxu1 %v834_v2  ;;  %v29383_v57 = vld [vmem:[#allocation5 + $0x1330] sm:$0xff]  ;;  %v29398_v63 = vld [vmem:[#allocation5 + $0x13a8] sm:$0xff] }
 0x250   :  { %18228 = vmatpush.bf16.msra.mxu1 %v29360_v58  ;;  %18197 = vmatmul.bf16.vlgmr.msrb.gmra.mxu2 %v835_v0  ;;  %v29391_v58 = vld [vmem:[#allocation5 + $0x1370] sm:$0xff]  ;;  %v29406_v0 = vld [vmem:[#allocation5 + $0x13e8] sm:$0xff] }
 0x251   :  { %18241 = vmatpush.bf16.msra.mxu2 %v29368_v60  ;;  %18210 = vmatmul.bf16.vlgmr.msrb.gmra.mxu3 %v836_v3  ;;  %v29407_v60 = vld [vmem:[#allocation5 + $0x13f0] sm:$0xff]  ;;  %v29381_v3 = vld [vmem:[#allocation5 + $0x1320] sm:$0xff] }
 0x252   :  { %18254 = vmatpush.bf16.msra.mxu3 %v29376_v1 }
 0x253   :  { %18216 = vmatpush.bf16.msra.mxu0 %v29351_v4  ;;  %v17990_v23 = vpop.f32.mrf.mxu2  ;;  %v17966_v27 = vpop.f32.mrf.mxu0 }
 0x254   :  { %18229 = vmatpush.bf16.msra.mxu1 %v29359_v5  ;;  %v17991_v24 = vadd.f32 %v17990_v23, %v17978_v18  ;;  %v18003_v26 = vpop.f32.mrf.mxu3  ;;  %v17979_v30 = vpop.f32.mrf.mxu1  ;;  %v29389_v5 = vld [vmem:[#allocation5 + $0x1360] sm:$0xff]  ;;  %v29379_v18 = vld [vmem:[#allocation5 + $0x1310] sm:$0xff]  ;;  %v29378_v23 = vld [vmem:[#allocation5 + $0x1308] sm:$0xff] }
 0x255   :  { %18242 = vmatpush.bf16.msra.mxu2 %v29367_v6  ;;  %v29397_v6 = vld [vmem:[#allocation5 + $0x13a0] sm:$0xff] }
 0x256   :  { %18255 = vmatpush.bf16.msra.mxu3 %v29375_v7  ;;  %v30992_v28 = vadd.f32 %v18003_v26, %v17991_v24  ;;  %v84_v24 = vld [vmem:[#allocation2 + $0xa0] sm:$0xff] }
 0x257   :  { %18217 = vmatpush.bf16.msra.mxu0 %v29350_v8  ;;  %v29405_v8 = vld [vmem:[#allocation5 + $0x13e0] sm:$0xff]  ;;  %v29394_v26 = vld [vmem:[#allocation5 + $0x1388] sm:$0xff]  ;;  %293 = vst [vmem:[#allocation1] ss:$4 sm:$0xff] %v84_v24  ;;  %v29448_v24 = vld [vmem:[#allocation5 + $0x1538] sm:$0xff] }
 0x258   :  { %18230 = vmatpush.bf16.msra.mxu1 %v29358_v9  ;;  %v29380_v9 = vld [vmem:[#allocation5 + $0x1318] sm:$0xff]  ;;  %v29377_v30 = vld [vmem:[#allocation5 + $0x1300] sm:$0xff] }
 0x259   :  { %18243 = vmatpush.bf16.msra.mxu2 %v29366_v10  ;;  %v29388_v10 = vld [vmem:[#allocation5 + $0x1358] sm:$0xff] }
 0x25a   :  { %18256 = vmatpush.bf16.msra.mxu3 %v29374_v11  ;;  %v29396_v11 = vld [vmem:[#allocation5 + $0x1398] sm:$0xff] }
 0x25b   :  { %18218 = vmatpush.bf16.msra.mxu0 %v29349_v14  ;;  %v17992_v38 = vpop.f32.mrf.mxu2  ;;  %v29404_v14 = vld [vmem:[#allocation5 + $0x13d8] sm:$0xff] }
 0x25c   :  { %18231 = vmatpush.bf16.msra.mxu1 %v29357_v16  ;;  %v18005_v40 = vpop.f32.mrf.mxu3  ;;  %v29432_v38 = vld [vmem:[#allocation5 + $0x14b8] sm:$0xff] }
 0x25d   :  { %18244 = vmatpush.bf16.msra.mxu2 %v29365_v17  ;;  %v292_v40 = vld.sshfl [vmem:[#allocation1 + $0x38] sm:$0xff pattern:$0x73625140] }
 0x25e   :  { %18257 = vmatpush.bf16.msra.mxu3 %v29373_v19  ;;  %v844_v45 = vpack.c.bf16 %v292_v40, %v292_v40  ;;  %v29454_v40 = vld [vmem:[#allocation5 + $0x1568] sm:$0xff] }
 0x25f   :  { %18219 = vmatpush.bf16.msra.mxu0 %v29348_v20  ;;  %v29387_v20 = vld [vmem:[#allocation5 + $0x1350] sm:$0xff] }
 0x260   :  { %18232 = vmatpush.bf16.msra.mxu1 %v29356_v21  ;;  %v29395_v21 = vld [vmem:[#allocation5 + $0x1390] sm:$0xff] }
 0x261   :  { %18245 = vmatpush.bf16.msra.mxu2 %v29364_v22  ;;  %v29403_v22 = vld [vmem:[#allocation5 + $0x13d0] sm:$0xff] }
 0x262   :  { %18258 = vmatpush.bf16.msra.mxu3 %v29372_v25  ;;  %v29386_v25 = vld [vmem:[#allocation5 + $0x1348] sm:$0xff] }
 0x263   :  { %18220 = vmatpush.bf16.msra.mxu0 %v29347_v29 }
 0x264   :  { %18233 = vmatpush.bf16.msra.mxu1 %v29355_v31  ;;  %v29385_v31 = vld [vmem:[#allocation5 + $0x1340] sm:$0xff] }
 0x265   :  { %18246 = vmatpush.bf16.msra.mxu2 %v29363_v32  ;;  %v29393_v32 = vld [vmem:[#allocation5 + $0x1380] sm:$0xff] }
 0x266   :  { %18259 = vmatpush.bf16.msra.mxu3 %v29371_v33  ;;  %v289_v33 = vld.sshfl [vmem:[#allocation1 + $0x20] sm:$0xff pattern:$0x73625140] }
 0x267   :  { %18221 = vmatpush.bf16.msra.mxu0 %v29346_v34  ;;  %v291_v34 = vld.sshfl [vmem:[#allocation1 + $0x30] sm:$0xff pattern:$0x73625140] }
 0x268   :  { %18234 = vmatpush.bf16.msra.mxu1 %v29354_v36  ;;  %v29424_v36 = vld [vmem:[#allocation5 + $0x1478] sm:$0xff] }
 0x269   :  { %18247 = vmatpush.bf16.msra.mxu2 %v29362_v37  ;;  %v290_v37 = vld.sshfl [vmem:[#allocation1 + $0x28] sm:$0xff pattern:$0x73625140] }
 0x26a   :  { %18260 = vmatpush.bf16.msra.mxu3 %v29370_v39  ;;  %v29401_v39 = vld [vmem:[#allocation5 + $0x13c0] sm:$0xff]  ;;  %v842_v44 = vpack.c.bf16 %v290_v37, %v290_v37  ;;  %v29463_v37 = vld [vmem:[#allocation5 + $0x15b0] sm:$0xff] }
 0x26b   :  { %18222 = vmatpush.bf16.msra.mxu0 %v29345_v41  ;;  %v18016_v1 = vpop.f32.mrf.mxu0  ;;  %v841_v41 = vpack.c.bf16 %v289_v33, %v289_v33 }
 0x26c   :  { %18235 = vmatpush.bf16.msra.mxu1 %v29353_v42  ;;  %v18017_v2 = vadd.f32 %v18016_v1, %v30992_v28  ;;  %v18029_v4 = vpop.f32.mrf.mxu1  ;;  %v29402_v28 = vld [vmem:[#allocation5 + $0x13c8] sm:$0xff]  ;;  %v843_v42 = vpack.c.bf16 %v291_v34, %v291_v34 }
 0x26d   :  { %18248 = vmatpush.bf16.msra.mxu2 %v29361_v43  ;;  %v29440_v43 = vld [vmem:[#allocation5 + $0x14f8] sm:$0xff] }
 0x26e   :  { %18261 = vmatpush.bf16.msra.mxu3 %v29369_v50  ;;  %18223 = vmatmul.bf16.vlgmr.msra.gmra.mxu0 %v837_v52  ;;  %v18030_v7 = vadd.f32 %v18029_v4, %v18017_v2  ;;  %v29414_v50 = vld [vmem:[#allocation5 + $0x1428] sm:$0xff] }
 0x26f   :  { %18267 = vmatpush.bf16.msrb.mxu0 %v29384_v46  ;;  %18236 = vmatmul.bf16.vlgmr.msra.gmra.mxu1 %v838_v55  ;;  %v29415_v46 = vld [vmem:[#allocation5 + $0x1430] sm:$0xff]  ;;  %v29430_v52 = vld [vmem:[#allocation5 + $0x14a8] sm:$0xff] }
 0x270   :  { %18280 = vmatpush.bf16.msrb.mxu1 %v29392_v47  ;;  %18249 = vmatmul.bf16.vlgmr.msra.gmra.mxu2 %v839_v53  ;;  %v29423_v47 = vld [vmem:[#allocation5 + $0x1470] sm:$0xff]  ;;  %v29438_v53 = vld [vmem:[#allocation5 + $0x14e8] sm:$0xff] }
 0x271   :  { %18293 = vmatpush.bf16.msrb.mxu2 %v29400_v49  ;;  %18262 = vmatmul.bf16.vlgmr.msra.gmra.mxu3 %v840_v56  ;;  %v29439_v49 = vld [vmem:[#allocation5 + $0x14f0] sm:$0xff]  ;;  %v29413_v56 = vld [vmem:[#allocation5 + $0x1420] sm:$0xff] }
 0x272   :  { %18306 = vmatpush.bf16.msrb.mxu3 %v29408_v54 }
 0x273   :  { %18268 = vmatpush.bf16.msrb.mxu0 %v29383_v57  ;;  %v18042_v12 = vpop.f32.mrf.mxu2  ;;  %v18018_v16 = vpop.f32.mrf.mxu0 }
 0x274   :  { %18281 = vmatpush.bf16.msrb.mxu1 %v29391_v58  ;;  %v18043_v13 = vadd.f32 %v18042_v12, %v18030_v7  ;;  %v18055_v15 = vpop.f32.mrf.mxu3  ;;  %v18031_v19 = vpop.f32.mrf.mxu1  ;;  %v29421_v58 = vld [vmem:[#allocation5 + $0x1460] sm:$0xff]  ;;  %v29411_v7 = vld [vmem:[#allocation5 + $0x1410] sm:$0xff]  ;;  %v29410_v12 = vld [vmem:[#allocation5 + $0x1408] sm:$0xff] }
 0x275   :  { %18294 = vmatpush.bf16.msrb.mxu2 %v29399_v59  ;;  %v29429_v59 = vld [vmem:[#allocation5 + $0x14a0] sm:$0xff] }
 0x276   :  { %18307 = vmatpush.bf16.msrb.mxu3 %v29407_v60  ;;  %v30995_v17 = vadd.f32 %v18055_v15, %v18043_v13  ;;  %v85_v13 = vld [vmem:[#allocation2 + $0xa8] sm:$0xff]  ;;  %v29409_v19 = vld [vmem:[#allocation5 + $0x1400] sm:$0xff] }
 0x277   :  { %18269 = vmatpush.bf16.msrb.mxu0 %v29382_v61  ;;  %v29437_v61 = vld [vmem:[#allocation5 + $0x14e0] sm:$0xff]  ;;  %v29426_v15 = vld [vmem:[#allocation5 + $0x1488] sm:$0xff]  ;;  %294 = vst [vmem:[#allocation1 + $0x20] ss:$4 sm:$0xff] %v85_v13  ;;  %v29480_v13 = vld [vmem:[#allocation5 + $0x1638] sm:$0xff] }
 0x278   :  { %18282 = vmatpush.bf16.msrb.mxu1 %v29390_v62  ;;  %v29412_v62 = vld [vmem:[#allocation5 + $0x1418] sm:$0xff] }
 0x279   :  { %18295 = vmatpush.bf16.msrb.mxu2 %v29398_v63  ;;  %v29420_v63 = vld [vmem:[#allocation5 + $0x1458] sm:$0xff] }
 0x27a   :  { %18308 = vmatpush.bf16.msrb.mxu3 %v29406_v0  ;;  %v29428_v0 = vld [vmem:[#allocation5 + $0x1498] sm:$0xff] }
 0x27b   :  { %18270 = vmatpush.bf16.msrb.mxu0 %v29381_v3  ;;  %v18044_v27 = vpop.f32.mrf.mxu2  ;;  %v29436_v3 = vld [vmem:[#allocation5 + $0x14d8] sm:$0xff] }
 0x27c   :  { %18283 = vmatpush.bf16.msrb.mxu1 %v29389_v5  ;;  %v18057_v29 = vpop.f32.mrf.mxu3  ;;  %v29464_v27 = vld [vmem:[#allocation5 + $0x15b8] sm:$0xff] }
 0x27d   :  { %18296 = vmatpush.bf16.msrb.mxu2 %v29397_v6  ;;  %v298_v29 = vld.sshfl [vmem:[#allocation1 + $0x18] sm:$0xff pattern:$0x73625140] }
 0x27e   :  { %18309 = vmatpush.bf16.msrb.mxu3 %v29405_v8  ;;  %v848_v34 = vpack.c.bf16 %v298_v29, %v298_v29  ;;  %v29486_v29 = vld [vmem:[#allocation5 + $0x1668] sm:$0xff] }
 0x27f   :  { %18271 = vmatpush.bf16.msrb.mxu0 %v29380_v9  ;;  %v29419_v9 = vld [vmem:[#allocation5 + $0x1450] sm:$0xff] }
 0x280   :  { %18284 = vmatpush.bf16.msrb.mxu1 %v29388_v10  ;;  %v29427_v10 = vld [vmem:[#allocation5 + $0x1490] sm:$0xff] }
 0x281   :  { %18297 = vmatpush.bf16.msrb.mxu2 %v29396_v11  ;;  %v29435_v11 = vld [vmem:[#allocation5 + $0x14d0] sm:$0xff] }
 0x282   :  { %18310 = vmatpush.bf16.msrb.mxu3 %v29404_v14  ;;  %v29418_v14 = vld [vmem:[#allocation5 + $0x1448] sm:$0xff] }
 0x283   :  { %18272 = vmatpush.bf16.msrb.mxu0 %v29379_v18 }
 0x284   :  { %18285 = vmatpush.bf16.msrb.mxu1 %v29387_v20  ;;  %v29417_v20 = vld [vmem:[#allocation5 + $0x1440] sm:$0xff] }
 0x285   :  { %18298 = vmatpush.bf16.msrb.mxu2 %v29395_v21  ;;  %v29425_v21 = vld [vmem:[#allocation5 + $0x1480] sm:$0xff] }
 0x286   :  { %18311 = vmatpush.bf16.msrb.mxu3 %v29403_v22  ;;  %v295_v22 = vld.sshfl [vmem:[#allocation1] sm:$0xff pattern:$0x73625140] }
 0x287   :  { %18273 = vmatpush.bf16.msrb.mxu0 %v29378_v23  ;;  %v297_v23 = vld.sshfl [vmem:[#allocation1 + $0x10] sm:$0xff pattern:$0x73625140] }
 0x288   :  { %18286 = vmatpush.bf16.msrb.mxu1 %v29386_v25  ;;  %v29456_v25 = vld [vmem:[#allocation5 + $0x1578] sm:$0xff] }
 0x289   :  { %18299 = vmatpush.bf16.msrb.mxu2 %v29394_v26  ;;  %v296_v26 = vld.sshfl [vmem:[#allocation1 + $0x8] sm:$0xff pattern:$0x73625140] }
 0x28a   :  { %18312 = vmatpush.bf16.msrb.mxu3 %v29402_v28  ;;  %v29433_v28 = vld [vmem:[#allocation5 + $0x14c0] sm:$0xff]  ;;  %v846_v33 = vpack.c.bf16 %v296_v26, %v296_v26  ;;  %v29495_v26 = vld [vmem:[#allocation5 + $0x16b0] sm:$0xff] }
 0x28b   :  { %18274 = vmatpush.bf16.msrb.mxu0 %v29377_v30  ;;  %v18068_v54 = vpop.f32.mrf.mxu0  ;;  %v845_v30 = vpack.c.bf16 %v295_v22, %v295_v22 }
 0x28c   :  { %18287 = vmatpush.bf16.msrb.mxu1 %v29385_v31  ;;  %v18069_v55 = vadd.f32 %v18068_v54, %v30995_v17  ;;  %v18081_v57 = vpop.f32.mrf.mxu1  ;;  %v29434_v17 = vld [vmem:[#allocation5 + $0x14c8] sm:$0xff]  ;;  %v847_v31 = vpack.c.bf16 %v297_v23, %v297_v23 }
 0x28d   :  { %18300 = vmatpush.bf16.msrb.mxu2 %v29393_v32  ;;  %v29472_v32 = vld [vmem:[#allocation5 + $0x15f8] sm:$0xff] }
 0x28e   :  { %18313 = vmatpush.bf16.msrb.mxu3 %v29401_v39  ;;  %18275 = vmatmul.bf16.vlgmr.msrb.gmra.mxu0 %v841_v41  ;;  %v18082_v60 = vadd.f32 %v18081_v57, %v18069_v55  ;;  %v29446_v39 = vld [vmem:[#allocation5 + $0x1528] sm:$0xff] }
 0x28f   :  { %18319 = vmatpush.bf16.msra.mxu0 %v29416_v35  ;;  %18288 = vmatmul.bf16.vlgmr.msrb.gmra.mxu1 %v842_v44  ;;  %v29447_v35 = vld [vmem:[#allocation5 + $0x1530] sm:$0xff]  ;;  %v29462_v41 = vld [vmem:[#allocation5 + $0x15a8] sm:$0xff] }
 0x290   :  { %18332 = vmatpush.bf16.msra.mxu1 %v29424_v36  ;;  %18301 = vmatmul.bf16.vlgmr.msrb.gmra.mxu2 %v843_v42  ;;  %v29455_v36 = vld [vmem:[#allocation5 + $0x1570] sm:$0xff]  ;;  %v29470_v42 = vld [vmem:[#allocation5 + $0x15e8] sm:$0xff] }
 0x291   :  { %18345 = vmatpush.bf16.msra.mxu2 %v29432_v38  ;;  %18314 = vmatmul.bf16.vlgmr.msrb.gmra.mxu3 %v844_v45  ;;  %v29471_v38 = vld [vmem:[#allocation5 + $0x15f0] sm:$0xff]  ;;  %v29445_v45 = vld [vmem:[#allocation5 + $0x1520] sm:$0xff] }
 0x292   :  { %18358 = vmatpush.bf16.msra.mxu3 %v29440_v43 }
 0x293   :  { %18320 = vmatpush.bf16.msra.mxu0 %v29415_v46  ;;  %v18094_v1 = vpop.f32.mrf.mxu2  ;;  %v18070_v5 = vpop.f32.mrf.mxu0 }
 0x294   :  { %18333 = vmatpush.bf16.msra.mxu1 %v29423_v47  ;;  %v18095_v2 = vadd.f32 %v18094_v1, %v18082_v60  ;;  %v18107_v4 = vpop.f32.mrf.mxu3  ;;  %v18083_v8 = vpop.f32.mrf.mxu1  ;;  %v29453_v47 = vld [vmem:[#allocation5 + $0x1560] sm:$0xff]  ;;  %v29443_v60 = vld [vmem:[#allocation5 + $0x1510] sm:$0xff]  ;;  %v29442_v1 = vld [vmem:[#allocation5 + $0x1508] sm:$0xff] }
 0x295   :  { %18346 = vmatpush.bf16.msra.mxu2 %v29431_v48  ;;  %v29461_v48 = vld [vmem:[#allocation5 + $0x15a0] sm:$0xff] }
 0x296   :  { %18359 = vmatpush.bf16.msra.mxu3 %v29439_v49  ;;  %v30998_v6 = vadd.f32 %v18107_v4, %v18095_v2  ;;  %v86_v2 = vld [vmem:[#allocation2 + $0xb0] sm:$0xff]  ;;  %v29458_v4 = vld [vmem:[#allocation5 + $0x1588] sm:$0xff]  ;;  %v29441_v8 = vld [vmem:[#allocation5 + $0x1500] sm:$0xff] }
 0x297   :  { %18321 = vmatpush.bf16.msra.mxu0 %v29414_v50  ;;  %v29469_v50 = vld [vmem:[#allocation5 + $0x15e0] sm:$0xff]  ;;  %303 = vst [vmem:[#allocation1] ss:$4 sm:$0xff] %v86_v2  ;;  %v29512_v2 = vld [vmem:[#allocation5 + $0x1738] sm:$0xff] }
 0x298   :  { %18334 = vmatpush.bf16.msra.mxu1 %v29422_v51  ;;  %v29444_v51 = vld [vmem:[#allocation5 + $0x1518] sm:$0xff] }
 0x299   :  { %18347 = vmatpush.bf16.msra.mxu2 %v29430_v52  ;;  %v29452_v52 = vld [vmem:[#allocation5 + $0x1558] sm:$0xff] }
 0x29a   :  { %18360 = vmatpush.bf16.msra.mxu3 %v29438_v53  ;;  %v29460_v53 = vld [vmem:[#allocation5 + $0x1598] sm:$0xff] }
 0x29b   :  { %18322 = vmatpush.bf16.msra.mxu0 %v29413_v56  ;;  %v18096_v16 = vpop.f32.mrf.mxu2  ;;  %v29468_v56 = vld [vmem:[#allocation5 + $0x15d8] sm:$0xff] }
 0x29c   :  { %18335 = vmatpush.bf16.msra.mxu1 %v29421_v58  ;;  %v18109_v18 = vpop.f32.mrf.mxu3  ;;  %v29496_v16 = vld [vmem:[#allocation5 + $0x16b8] sm:$0xff] }
 0x29d   :  { %18348 = vmatpush.bf16.msra.mxu2 %v29429_v59  ;;  %v302_v18 = vld.sshfl [vmem:[#allocation1 + $0x38] sm:$0xff pattern:$0x73625140] }
 0x29e   :  { %18361 = vmatpush.bf16.msra.mxu3 %v29437_v61  ;;  %v852_v23 = vpack.c.bf16 %v302_v18, %v302_v18  ;;  %v29518_v18 = vld [vmem:[#allocation5 + $0x1768] sm:$0xff] }
 0x29f   :  { %18323 = vmatpush.bf16.msra.mxu0 %v29412_v62  ;;  %v29451_v62 = vld [vmem:[#allocation5 + $0x1550] sm:$0xff] }
 0x2a0   :  { %18336 = vmatpush.bf16.msra.mxu1 %v29420_v63  ;;  %v29459_v63 = vld [vmem:[#allocation5 + $0x1590] sm:$0xff] }
 0x2a1   :  { %18349 = vmatpush.bf16.msra.mxu2 %v29428_v0  ;;  %v29467_v0 = vld [vmem:[#allocation5 + $0x15d0] sm:$0xff] }
 0x2a2   :  { %18362 = vmatpush.bf16.msra.mxu3 %v29436_v3  ;;  %v29450_v3 = vld [vmem:[#allocation5 + $0x1548] sm:$0xff] }
 0x2a3   :  { %18324 = vmatpush.bf16.msra.mxu0 %v29411_v7 }
 0x2a4   :  { %18337 = vmatpush.bf16.msra.mxu1 %v29419_v9  ;;  %v29449_v9 = vld [vmem:[#allocation5 + $0x1540] sm:$0xff] }
 0x2a5   :  { %18350 = vmatpush.bf16.msra.mxu2 %v29427_v10  ;;  %v29457_v10 = vld [vmem:[#allocation5 + $0x1580] sm:$0xff] }
 0x2a6   :  { %18363 = vmatpush.bf16.msra.mxu3 %v29435_v11  ;;  %v299_v11 = vld.sshfl [vmem:[#allocation1 + $0x20] sm:$0xff pattern:$0x73625140] }
 0x2a7   :  { %18325 = vmatpush.bf16.msra.mxu0 %v29410_v12  ;;  %v301_v12 = vld.sshfl [vmem:[#allocation1 + $0x30] sm:$0xff pattern:$0x73625140] }
 0x2a8   :  { %18338 = vmatpush.bf16.msra.mxu1 %v29418_v14  ;;  %v29488_v14 = vld [vmem:[#allocation5 + $0x1678] sm:$0xff] }
 0x2a9   :  { %18351 = vmatpush.bf16.msra.mxu2 %v29426_v15  ;;  %v300_v15 = vld.sshfl [vmem:[#allocation1 + $0x28] sm:$0xff pattern:$0x73625140] }
 0x2aa   :  { %18364 = vmatpush.bf16.msra.mxu3 %v29434_v17  ;;  %v29465_v17 = vld [vmem:[#allocation5 + $0x15c0] sm:$0xff]  ;;  %v850_v22 = vpack.c.bf16 %v300_v15, %v300_v15  ;;  %v29527_v15 = vld [vmem:[#allocation5 + $0x17b0] sm:$0xff] }
 0x2ab   :  { %18326 = vmatpush.bf16.msra.mxu0 %v29409_v19  ;;  %v18120_v43 = vpop.f32.mrf.mxu0  ;;  %v849_v19 = vpack.c.bf16 %v299_v11, %v299_v11 }
 0x2ac   :  { %18339 = vmatpush.bf16.msra.mxu1 %v29417_v20  ;;  %v18121_v44 = vadd.f32 %v18120_v43, %v30998_v6  ;;  %v18133_v46 = vpop.f32.mrf.mxu1  ;;  %v29466_v6 = vld [vmem:[#allocation5 + $0x15c8] sm:$0xff]  ;;  %v851_v20 = vpack.c.bf16 %v301_v12, %v301_v12 }
 0x2ad   :  { %18352 = vmatpush.bf16.msra.mxu2 %v29425_v21  ;;  %v29504_v21 = vld [vmem:[#allocation5 + $0x16f8] sm:$0xff] }
 0x2ae   :  { %18365 = vmatpush.bf16.msra.mxu3 %v29433_v28  ;;  %18327 = vmatmul.bf16.vlgmr.msra.gmra.mxu0 %v845_v30  ;;  %v18134_v49 = vadd.f32 %v18133_v46, %v18121_v44  ;;  %v29478_v28 = vld [vmem:[#allocation5 + $0x1628] sm:$0xff] }
 0x2af   :  { %18371 = vmatpush.bf16.msrb.mxu0 %v29448_v24  ;;  %18340 = vmatmul.bf16.vlgmr.msra.gmra.mxu1 %v846_v33  ;;  %v29479_v24 = vld [vmem:[#allocation5 + $0x1630] sm:$0xff]  ;;  %v29494_v30 = vld [vmem:[#allocation5 + $0x16a8] sm:$0xff] }
 0x2b0   :  { %18384 = vmatpush.bf16.msrb.mxu1 %v29456_v25  ;;  %18353 = vmatmul.bf16.vlgmr.msra.gmra.mxu2 %v847_v31  ;;  %v29487_v25 = vld [vmem:[#allocation5 + $0x1670] sm:$0xff]  ;;  %v29502_v31 = vld [vmem:[#allocation5 + $0x16e8] sm:$0xff] }
 0x2b1   :  { %18397 = vmatpush.bf16.msrb.mxu2 %v29464_v27  ;;  %18366 = vmatmul.bf16.vlgmr.msra.gmra.mxu3 %v848_v34  ;;  %v29503_v27 = vld [vmem:[#allocation5 + $0x16f0] sm:$0xff]  ;;  %v29477_v34 = vld [vmem:[#allocation5 + $0x1620] sm:$0xff] }
 0x2b2   :  { %18410 = vmatpush.bf16.msrb.mxu3 %v29472_v32 }
 0x2b3   :  { %18372 = vmatpush.bf16.msrb.mxu0 %v29447_v35  ;;  %v18146_v54 = vpop.f32.mrf.mxu2  ;;  %v18122_v58 = vpop.f32.mrf.mxu0 }
 0x2b4   :  { %18385 = vmatpush.bf16.msrb.mxu1 %v29455_v36  ;;  %v18147_v55 = vadd.f32 %v18146_v54, %v18134_v49  ;;  %v18159_v57 = vpop.f32.mrf.mxu3  ;;  %v18135_v61 = vpop.f32.mrf.mxu1  ;;  %v29485_v36 = vld [vmem:[#allocation5 + $0x1660] sm:$0xff]  ;;  %v29475_v49 = vld [vmem:[#allocation5 + $0x1610] sm:$0xff]  ;;  %v29474_v54 = vld [vmem:[#allocation5 + $0x1608] sm:$0xff] }
 0x2b5   :  { %18398 = vmatpush.bf16.msrb.mxu2 %v29463_v37  ;;  %v29493_v37 = vld [vmem:[#allocation5 + $0x16a0] sm:$0xff] }
 0x2b6   :  { %18411 = vmatpush.bf16.msrb.mxu3 %v29471_v38  ;;  %v31001_v59 = vadd.f32 %v18159_v57, %v18147_v55  ;;  %v87_v55 = vld [vmem:[#allocation2 + $0xb8] sm:$0xff]  ;;  %v29490_v57 = vld [vmem:[#allocation5 + $0x1688] sm:$0xff] }
 0x2b7   :  { %18373 = vmatpush.bf16.msrb.mxu0 %v29446_v39  ;;  %v29501_v39 = vld [vmem:[#allocation5 + $0x16e0] sm:$0xff]  ;;  %304 = vst [vmem:[#allocation1 + $0x20] ss:$4 sm:$0xff] %v87_v55  ;;  %v29544_v55 = vld [vmem:[#allocation5 + $0x1838] sm:$0xff] }
 0x2b8   :  { %18386 = vmatpush.bf16.msrb.mxu1 %v29454_v40  ;;  %v29476_v40 = vld [vmem:[#allocation5 + $0x1618] sm:$0xff]  ;;  %v29473_v61 = vld [vmem:[#allocation5 + $0x1600] sm:$0xff] }
 0x2b9   :  { %18399 = vmatpush.bf16.msrb.mxu2 %v29462_v41  ;;  %v29484_v41 = vld [vmem:[#allocation5 + $0x1658] sm:$0xff] }
 0x2ba   :  { %18412 = vmatpush.bf16.msrb.mxu3 %v29470_v42  ;;  %v29492_v42 = vld [vmem:[#allocation5 + $0x1698] sm:$0xff] }
 0x2bb   :  { %18374 = vmatpush.bf16.msrb.mxu0 %v29445_v45  ;;  %v18148_v5 = vpop.f32.mrf.mxu2  ;;  %v29500_v45 = vld [vmem:[#allocation5 + $0x16d8] sm:$0xff] }
 0x2bc   :  { %18387 = vmatpush.bf16.msrb.mxu1 %v29453_v47  ;;  %v18161_v7 = vpop.f32.mrf.mxu3  ;;  %v29528_v5 = vld [vmem:[#allocation5 + $0x17b8] sm:$0xff] }
 0x2bd   :  { %18400 = vmatpush.bf16.msrb.mxu2 %v29461_v48  ;;  %v308_v7 = vld.sshfl [vmem:[#allocation1 + $0x18] sm:$0xff pattern:$0x73625140] }
 0x2be   :  { %18413 = vmatpush.bf16.msrb.mxu3 %v29469_v50  ;;  %v856_v12 = vpack.c.bf16 %v308_v7, %v308_v7  ;;  %v29550_v7 = vld [vmem:[#allocation5 + $0x1868] sm:$0xff] }
 0x2bf   :  { %18375 = vmatpush.bf16.msrb.mxu0 %v29444_v51  ;;  %v29483_v51 = vld [vmem:[#allocation5 + $0x1650] sm:$0xff] }
 0x2c0   :  { %18388 = vmatpush.bf16.msrb.mxu1 %v29452_v52  ;;  %v29491_v52 = vld [vmem:[#allocation5 + $0x1690] sm:$0xff] }
 0x2c1   :  { %18401 = vmatpush.bf16.msrb.mxu2 %v29460_v53  ;;  %v29499_v53 = vld [vmem:[#allocation5 + $0x16d0] sm:$0xff] }
 0x2c2   :  { %18414 = vmatpush.bf16.msrb.mxu3 %v29468_v56  ;;  %v29482_v56 = vld [vmem:[#allocation5 + $0x1648] sm:$0xff] }
 0x2c3   :  { %18376 = vmatpush.bf16.msrb.mxu0 %v29443_v60 }
 0x2c4   :  { %18389 = vmatpush.bf16.msrb.mxu1 %v29451_v62  ;;  %v29481_v62 = vld [vmem:[#allocation5 + $0x1640] sm:$0xff] }
 0x2c5   :  { %18402 = vmatpush.bf16.msrb.mxu2 %v29459_v63  ;;  %v29489_v63 = vld [vmem:[#allocation5 + $0x1680] sm:$0xff] }
 0x2c6   :  { %18415 = vmatpush.bf16.msrb.mxu3 %v29467_v0  ;;  %v305_v0 = vld.sshfl [vmem:[#allocation1] sm:$0xff pattern:$0x73625140] }
 0x2c7   :  { %18377 = vmatpush.bf16.msrb.mxu0 %v29442_v1  ;;  %v307_v1 = vld.sshfl [vmem:[#allocation1 + $0x10] sm:$0xff pattern:$0x73625140] }
 0x2c8   :  { %18390 = vmatpush.bf16.msrb.mxu1 %v29450_v3  ;;  %v29520_v3 = vld [vmem:[#allocation5 + $0x1778] sm:$0xff] }
 0x2c9   :  { %18403 = vmatpush.bf16.msrb.mxu2 %v29458_v4  ;;  %v306_v4 = vld.sshfl [vmem:[#allocation1 + $0x8] sm:$0xff pattern:$0x73625140] }
 0x2ca   :  { %18416 = vmatpush.bf16.msrb.mxu3 %v29466_v6  ;;  %v29497_v6 = vld [vmem:[#allocation5 + $0x16c0] sm:$0xff]  ;;  %v854_v11 = vpack.c.bf16 %v306_v4, %v306_v4  ;;  %v29559_v4 = vld [vmem:[#allocation5 + $0x18b0] sm:$0xff] }
 0x2cb   :  { %18378 = vmatpush.bf16.msrb.mxu0 %v29441_v8  ;;  %v18172_v32 = vpop.f32.mrf.mxu0  ;;  %v853_v8 = vpack.c.bf16 %v305_v0, %v305_v0 }
 0x2cc   :  { %18391 = vmatpush.bf16.msrb.mxu1 %v29449_v9  ;;  %v18173_v33 = vadd.f32 %v18172_v32, %v31001_v59  ;;  %v18185_v35 = vpop.f32.mrf.mxu1  ;;  %v29498_v59 = vld [vmem:[#allocation5 + $0x16c8] sm:$0xff]  ;;  %v855_v9 = vpack.c.bf16 %v307_v1, %v307_v1 }
 0x2cd   :  { %18404 = vmatpush.bf16.msrb.mxu2 %v29457_v10  ;;  %v29536_v10 = vld [vmem:[#allocation5 + $0x17f8] sm:$0xff] }
 0x2ce   :  { %18417 = vmatpush.bf16.msrb.mxu3 %v29465_v17  ;;  %18379 = vmatmul.bf16.vlgmr.msrb.gmra.mxu0 %v849_v19  ;;  %v18186_v38 = vadd.f32 %v18185_v35, %v18173_v33  ;;  %v29510_v17 = vld [vmem:[#allocation5 + $0x1728] sm:$0xff] }
 0x2cf   :  { %18423 = vmatpush.bf16.msra.mxu0 %v29480_v13  ;;  %18392 = vmatmul.bf16.vlgmr.msrb.gmra.mxu1 %v850_v22  ;;  %v29511_v13 = vld [vmem:[#allocation5 + $0x1730] sm:$0xff]  ;;  %v29526_v19 = vld [vmem:[#allocation5 + $0x17a8] sm:$0xff] }
 0x2d0   :  { %18436 = vmatpush.bf16.msra.mxu1 %v29488_v14  ;;  %18405 = vmatmul.bf16.vlgmr.msrb.gmra.mxu2 %v851_v20  ;;  %v29519_v14 = vld [vmem:[#allocation5 + $0x1770] sm:$0xff]  ;;  %v29534_v20 = vld [vmem:[#allocation5 + $0x17e8] sm:$0xff] }
 0x2d1   :  { %18449 = vmatpush.bf16.msra.mxu2 %v29496_v16  ;;  %18418 = vmatmul.bf16.vlgmr.msrb.gmra.mxu3 %v852_v23  ;;  %v29535_v16 = vld [vmem:[#allocation5 + $0x17f0] sm:$0xff]  ;;  %v29509_v23 = vld [vmem:[#allocation5 + $0x1720] sm:$0xff] }
 0x2d2   :  { %18462 = vmatpush.bf16.msra.mxu3 %v29504_v21 }
 0x2d3   :  { %18424 = vmatpush.bf16.msra.mxu0 %v29479_v24  ;;  %v18198_v43 = vpop.f32.mrf.mxu2  ;;  %v18174_v47 = vpop.f32.mrf.mxu0 }
 0x2d4   :  { %18437 = vmatpush.bf16.msra.mxu1 %v29487_v25  ;;  %v18199_v44 = vadd.f32 %v18198_v43, %v18186_v38  ;;  %v18211_v46 = vpop.f32.mrf.mxu3  ;;  %v18187_v50 = vpop.f32.mrf.mxu1  ;;  %v29517_v25 = vld [vmem:[#allocation5 + $0x1760] sm:$0xff]  ;;  %v29507_v38 = vld [vmem:[#allocation5 + $0x1710] sm:$0xff]  ;;  %v29506_v43 = vld [vmem:[#allocation5 + $0x1708] sm:$0xff] }
 0x2d5   :  { %18450 = vmatpush.bf16.msra.mxu2 %v29495_v26  ;;  %v29525_v26 = vld [vmem:[#allocation5 + $0x17a0] sm:$0xff] }
 0x2d6   :  { %18463 = vmatpush.bf16.msra.mxu3 %v29503_v27  ;;  %v31004_v48 = vadd.f32 %v18211_v46, %v18199_v44  ;;  %v88_v44 = vld [vmem:[#allocation2 + $0xc0] sm:$0xff] }
 0x2d7   :  { %18425 = vmatpush.bf16.msra.mxu0 %v29478_v28  ;;  %v29533_v28 = vld [vmem:[#allocation5 + $0x17e0] sm:$0xff]  ;;  %v29522_v46 = vld [vmem:[#allocation5 + $0x1788] sm:$0xff]  ;;  %313 = vst [vmem:[#allocation1] ss:$4 sm:$0xff] %v88_v44  ;;  %v29576_v44 = vld [vmem:[#allocation5 + $0x1938] sm:$0xff] }
 0x2d8   :  { %18438 = vmatpush.bf16.msra.mxu1 %v29486_v29  ;;  %v29508_v29 = vld [vmem:[#allocation5 + $0x1718] sm:$0xff]  ;;  %v29505_v50 = vld [vmem:[#allocation5 + $0x1700] sm:$0xff] }
 0x2d9   :  { %18451 = vmatpush.bf16.msra.mxu2 %v29494_v30  ;;  %v29516_v30 = vld [vmem:[#allocation5 + $0x1758] sm:$0xff] }
 0x2da   :  { %18464 = vmatpush.bf16.msra.mxu3 %v29502_v31  ;;  %v29524_v31 = vld [vmem:[#allocation5 + $0x1798] sm:$0xff] }
 0x2db   :  { %18426 = vmatpush.bf16.msra.mxu0 %v29477_v34  ;;  %v18200_v58 = vpop.f32.mrf.mxu2  ;;  %v29532_v34 = vld [vmem:[#allocation5 + $0x17d8] sm:$0xff] }
 0x2dc   :  { %18439 = vmatpush.bf16.msra.mxu1 %v29485_v36  ;;  %v18213_v60 = vpop.f32.mrf.mxu3  ;;  %v29560_v58 = vld [vmem:[#allocation5 + $0x18b8] sm:$0xff] }
 0x2dd   :  { %18452 = vmatpush.bf16.msra.mxu2 %v29493_v37  ;;  %v312_v60 = vld.sshfl [vmem:[#allocation1 + $0x38] sm:$0xff pattern:$0x73625140] }
 0x2de   :  { %18465 = vmatpush.bf16.msra.mxu3 %v29501_v39  ;;  %v860_v1 = vpack.c.bf16 %v312_v60, %v312_v60  ;;  %v29582_v60 = vld [vmem:[#allocation5 + $0x1968] sm:$0xff] }
 0x2df   :  { %18427 = vmatpush.bf16.msra.mxu0 %v29476_v40  ;;  %v29515_v40 = vld [vmem:[#allocation5 + $0x1750] sm:$0xff] }
 0x2e0   :  { %18440 = vmatpush.bf16.msra.mxu1 %v29484_v41  ;;  %v29523_v41 = vld [vmem:[#allocation5 + $0x1790] sm:$0xff] }
 0x2e1   :  { %18453 = vmatpush.bf16.msra.mxu2 %v29492_v42  ;;  %v29531_v42 = vld [vmem:[#allocation5 + $0x17d0] sm:$0xff] }
 0x2e2   :  { %18466 = vmatpush.bf16.msra.mxu3 %v29500_v45  ;;  %v29514_v45 = vld [vmem:[#allocation5 + $0x1748] sm:$0xff] }
 0x2e3   :  { %18428 = vmatpush.bf16.msra.mxu0 %v29475_v49 }
 0x2e4   :  { %18441 = vmatpush.bf16.msra.mxu1 %v29483_v51  ;;  %v29513_v51 = vld [vmem:[#allocation5 + $0x1740] sm:$0xff] }
 0x2e5   :  { %18454 = vmatpush.bf16.msra.mxu2 %v29491_v52  ;;  %v29521_v52 = vld [vmem:[#allocation5 + $0x1780] sm:$0xff] }
 0x2e6   :  { %18467 = vmatpush.bf16.msra.mxu3 %v29499_v53  ;;  %v309_v53 = vld.sshfl [vmem:[#allocation1 + $0x20] sm:$0xff pattern:$0x73625140] }
 0x2e7   :  { %18429 = vmatpush.bf16.msra.mxu0 %v29474_v54  ;;  %v311_v54 = vld.sshfl [vmem:[#allocation1 + $0x30] sm:$0xff pattern:$0x73625140] }
 0x2e8   :  { %18442 = vmatpush.bf16.msra.mxu1 %v29482_v56  ;;  %v29552_v56 = vld [vmem:[#allocation5 + $0x1878] sm:$0xff] }
 0x2e9   :  { %18455 = vmatpush.bf16.msra.mxu2 %v29490_v57  ;;  %v310_v57 = vld.sshfl [vmem:[#allocation1 + $0x28] sm:$0xff pattern:$0x73625140] }
 0x2ea   :  { %18468 = vmatpush.bf16.msra.mxu3 %v29498_v59  ;;  %v29529_v59 = vld [vmem:[#allocation5 + $0x17c0] sm:$0xff]  ;;  %v858_v0 = vpack.c.bf16 %v310_v57, %v310_v57  ;;  %v29591_v57 = vld [vmem:[#allocation5 + $0x19b0] sm:$0xff] }
 0x2eb   :  { %18430 = vmatpush.bf16.msra.mxu0 %v29473_v61  ;;  %v18224_v21 = vpop.f32.mrf.mxu0  ;;  %v857_v61 = vpack.c.bf16 %v309_v53, %v309_v53 }
 0x2ec   :  { %18443 = vmatpush.bf16.msra.mxu1 %v29481_v62  ;;  %v18225_v22 = vadd.f32 %v18224_v21, %v31004_v48  ;;  %v18237_v24 = vpop.f32.mrf.mxu1  ;;  %v29530_v48 = vld [vmem:[#allocation5 + $0x17c8] sm:$0xff]  ;;  %v859_v62 = vpack.c.bf16 %v311_v54, %v311_v54 }
 0x2ed   :  { %18456 = vmatpush.bf16.msra.mxu2 %v29489_v63  ;;  %v29568_v63 = vld [vmem:[#allocation5 + $0x18f8] sm:$0xff] }
 0x2ee   :  { %18469 = vmatpush.bf16.msra.mxu3 %v29497_v6  ;;  %18431 = vmatmul.bf16.vlgmr.msra.gmra.mxu0 %v853_v8  ;;  %v18238_v27 = vadd.f32 %v18237_v24, %v18225_v22  ;;  %v29542_v6 = vld [vmem:[#allocation5 + $0x1828] sm:$0xff] }
 0x2ef   :  { %18475 = vmatpush.bf16.msrb.mxu0 %v29512_v2  ;;  %18444 = vmatmul.bf16.vlgmr.msra.gmra.mxu1 %v854_v11  ;;  %v29543_v2 = vld [vmem:[#allocation5 + $0x1830] sm:$0xff]  ;;  %v29558_v8 = vld [vmem:[#allocation5 + $0x18a8] sm:$0xff] }
 0x2f0   :  { %18488 = vmatpush.bf16.msrb.mxu1 %v29520_v3  ;;  %18457 = vmatmul.bf16.vlgmr.msra.gmra.mxu2 %v855_v9  ;;  %v29551_v3 = vld [vmem:[#allocation5 + $0x1870] sm:$0xff]  ;;  %v29566_v9 = vld [vmem:[#allocation5 + $0x18e8] sm:$0xff] }
 0x2f1   :  { %18501 = vmatpush.bf16.msrb.mxu2 %v29528_v5  ;;  %18470 = vmatmul.bf16.vlgmr.msra.gmra.mxu3 %v856_v12  ;;  %v29567_v5 = vld [vmem:[#allocation5 + $0x18f0] sm:$0xff]  ;;  %v29541_v12 = vld [vmem:[#allocation5 + $0x1820] sm:$0xff] }
 0x2f2   :  { %18514 = vmatpush.bf16.msrb.mxu3 %v29536_v10 }
 0x2f3   :  { %18476 = vmatpush.bf16.msrb.mxu0 %v29511_v13  ;;  %v18250_v32 = vpop.f32.mrf.mxu2  ;;  %v18226_v36 = vpop.f32.mrf.mxu0 }
 0x2f4   :  { %18489 = vmatpush.bf16.msrb.mxu1 %v29519_v14  ;;  %v18251_v33 = vadd.f32 %v18250_v32, %v18238_v27  ;;  %v18263_v35 = vpop.f32.mrf.mxu3  ;;  %v18239_v39 = vpop.f32.mrf.mxu1  ;;  %v29549_v14 = vld [vmem:[#allocation5 + $0x1860] sm:$0xff]  ;;  %v29539_v27 = vld [vmem:[#allocation5 + $0x1810] sm:$0xff]  ;;  %v29538_v32 = vld [vmem:[#allocation5 + $0x1808] sm:$0xff] }
 0x2f5   :  { %18502 = vmatpush.bf16.msrb.mxu2 %v29527_v15  ;;  %v29557_v15 = vld [vmem:[#allocation5 + $0x18a0] sm:$0xff] }
 0x2f6   :  { %18515 = vmatpush.bf16.msrb.mxu3 %v29535_v16  ;;  %v31007_v37 = vadd.f32 %v18263_v35, %v18251_v33  ;;  %v89_v33 = vld [vmem:[#allocation2 + $0xc8] sm:$0xff]  ;;  %v29537_v39 = vld [vmem:[#allocation5 + $0x1800] sm:$0xff] }
 0x2f7   :  { %18477 = vmatpush.bf16.msrb.mxu0 %v29510_v17  ;;  %v29565_v17 = vld [vmem:[#allocation5 + $0x18e0] sm:$0xff]  ;;  %v29554_v35 = vld [vmem:[#allocation5 + $0x1888] sm:$0xff]  ;;  %314 = vst [vmem:[#allocation1 + $0x20] ss:$4 sm:$0xff] %v89_v33  ;;  %v29608_v33 = vld [vmem:[#allocation5 + $0x1a38] sm:$0xff] }
 0x2f8   :  { %18490 = vmatpush.bf16.msrb.mxu1 %v29518_v18  ;;  %v29540_v18 = vld [vmem:[#allocation5 + $0x1818] sm:$0xff] }
 0x2f9   :  { %18503 = vmatpush.bf16.msrb.mxu2 %v29526_v19  ;;  %v29548_v19 = vld [vmem:[#allocation5 + $0x1858] sm:$0xff] }
 0x2fa   :  { %18516 = vmatpush.bf16.msrb.mxu3 %v29534_v20  ;;  %v29556_v20 = vld [vmem:[#allocation5 + $0x1898] sm:$0xff] }
 0x2fb   :  { %18478 = vmatpush.bf16.msrb.mxu0 %v29509_v23  ;;  %v18252_v47 = vpop.f32.mrf.mxu2  ;;  %v29564_v23 = vld [vmem:[#allocation5 + $0x18d8] sm:$0xff] }
 0x2fc   :  { %18491 = vmatpush.bf16.msrb.mxu1 %v29517_v25  ;;  %v18265_v49 = vpop.f32.mrf.mxu3  ;;  %v29592_v47 = vld [vmem:[#allocation5 + $0x19b8] sm:$0xff] }
 0x2fd   :  { %18504 = vmatpush.bf16.msrb.mxu2 %v29525_v26  ;;  %v318_v49 = vld.sshfl [vmem:[#allocation1 + $0x18] sm:$0xff pattern:$0x73625140] }
 0x2fe   :  { %18517 = vmatpush.bf16.msrb.mxu3 %v29533_v28  ;;  %v864_v54 = vpack.c.bf16 %v318_v49, %v318_v49  ;;  %v29614_v49 = vld [vmem:[#allocation5 + $0x1a68] sm:$0xff] }
 0x2ff   :  { %18479 = vmatpush.bf16.msrb.mxu0 %v29508_v29  ;;  %v29547_v29 = vld [vmem:[#allocation5 + $0x1850] sm:$0xff] }
 0x300   :  { %18492 = vmatpush.bf16.msrb.mxu1 %v29516_v30  ;;  %v29555_v30 = vld [vmem:[#allocation5 + $0x1890] sm:$0xff] }
 0x301   :  { %18505 = vmatpush.bf16.msrb.mxu2 %v29524_v31  ;;  %v29563_v31 = vld [vmem:[#allocation5 + $0x18d0] sm:$0xff] }
 0x302   :  { %18518 = vmatpush.bf16.msrb.mxu3 %v29532_v34  ;;  %v29546_v34 = vld [vmem:[#allocation5 + $0x1848] sm:$0xff] }
 0x303   :  { %18480 = vmatpush.bf16.msrb.mxu0 %v29507_v38 }
 0x304   :  { %18493 = vmatpush.bf16.msrb.mxu1 %v29515_v40  ;;  %v29545_v40 = vld [vmem:[#allocation5 + $0x1840] sm:$0xff] }
 0x305   :  { %18506 = vmatpush.bf16.msrb.mxu2 %v29523_v41  ;;  %v29553_v41 = vld [vmem:[#allocation5 + $0x1880] sm:$0xff] }
 0x306   :  { %18519 = vmatpush.bf16.msrb.mxu3 %v29531_v42  ;;  %v315_v42 = vld.sshfl [vmem:[#allocation1] sm:$0xff pattern:$0x73625140] }
 0x307   :  { %18481 = vmatpush.bf16.msrb.mxu0 %v29506_v43  ;;  %v317_v43 = vld.sshfl [vmem:[#allocation1 + $0x10] sm:$0xff pattern:$0x73625140] }
 0x308   :  { %18494 = vmatpush.bf16.msrb.mxu1 %v29514_v45  ;;  %v29584_v45 = vld [vmem:[#allocation5 + $0x1978] sm:$0xff] }
 0x309   :  { %18507 = vmatpush.bf16.msrb.mxu2 %v29522_v46  ;;  %v316_v46 = vld.sshfl [vmem:[#allocation1 + $0x8] sm:$0xff pattern:$0x73625140] }
 0x30a   :  { %18520 = vmatpush.bf16.msrb.mxu3 %v29530_v48  ;;  %v29561_v48 = vld [vmem:[#allocation5 + $0x18c0] sm:$0xff]  ;;  %v862_v53 = vpack.c.bf16 %v316_v46, %v316_v46  ;;  %v29623_v46 = vld [vmem:[#allocation5 + $0x1ab0] sm:$0xff] }
 0x30b   :  { %18482 = vmatpush.bf16.msrb.mxu0 %v29505_v50  ;;  %v18276_v10 = vpop.f32.mrf.mxu0  ;;  %v861_v50 = vpack.c.bf16 %v315_v42, %v315_v42 }
 0x30c   :  { %18495 = vmatpush.bf16.msrb.mxu1 %v29513_v51  ;;  %v18277_v11 = vadd.f32 %v18276_v10, %v31007_v37  ;;  %v18289_v13 = vpop.f32.mrf.mxu1  ;;  %v29562_v37 = vld [vmem:[#allocation5 + $0x18c8] sm:$0xff]  ;;  %v863_v51 = vpack.c.bf16 %v317_v43, %v317_v43 }
 0x30d   :  { %18508 = vmatpush.bf16.msrb.mxu2 %v29521_v52  ;;  %v29600_v52 = vld [vmem:[#allocation5 + $0x19f8] sm:$0xff] }
 0x30e   :  { %18521 = vmatpush.bf16.msrb.mxu3 %v29529_v59  ;;  %18483 = vmatmul.bf16.vlgmr.msrb.gmra.mxu0 %v857_v61  ;;  %v18290_v16 = vadd.f32 %v18289_v13, %v18277_v11  ;;  %v29574_v59 = vld [vmem:[#allocation5 + $0x1928] sm:$0xff] }
 0x30f   :  { %18527 = vmatpush.bf16.msra.mxu0 %v29544_v55  ;;  %18496 = vmatmul.bf16.vlgmr.msrb.gmra.mxu1 %v858_v0  ;;  %v29575_v55 = vld [vmem:[#allocation5 + $0x1930] sm:$0xff]  ;;  %v29590_v61 = vld [vmem:[#allocation5 + $0x19a8] sm:$0xff] }
 0x310   :  { %18540 = vmatpush.bf16.msra.mxu1 %v29552_v56  ;;  %18509 = vmatmul.bf16.vlgmr.msrb.gmra.mxu2 %v859_v62  ;;  %v29583_v56 = vld [vmem:[#allocation5 + $0x1970] sm:$0xff]  ;;  %v29598_v62 = vld [vmem:[#allocation5 + $0x19e8] sm:$0xff] }
 0x311   :  { %18553 = vmatpush.bf16.msra.mxu2 %v29560_v58  ;;  %18522 = vmatmul.bf16.vlgmr.msrb.gmra.mxu3 %v860_v1  ;;  %v29599_v58 = vld [vmem:[#allocation5 + $0x19f0] sm:$0xff]  ;;  %v29573_v1 = vld [vmem:[#allocation5 + $0x1920] sm:$0xff] }
 0x312   :  { %18566 = vmatpush.bf16.msra.mxu3 %v29568_v63 }
 0x313   :  { %18528 = vmatpush.bf16.msra.mxu0 %v29543_v2  ;;  %v18302_v21 = vpop.f32.mrf.mxu2  ;;  %v18278_v25 = vpop.f32.mrf.mxu0 }
 0x314   :  { %18541 = vmatpush.bf16.msra.mxu1 %v29551_v3  ;;  %v18303_v22 = vadd.f32 %v18302_v21, %v18290_v16  ;;  %v18315_v24 = vpop.f32.mrf.mxu3  ;;  %v18291_v28 = vpop.f32.mrf.mxu1  ;;  %v29581_v3 = vld [vmem:[#allocation5 + $0x1960] sm:$0xff]  ;;  %v29571_v16 = vld [vmem:[#allocation5 + $0x1910] sm:$0xff]  ;;  %v29570_v21 = vld [vmem:[#allocation5 + $0x1908] sm:$0xff] }
 0x315   :  { %18554 = vmatpush.bf16.msra.mxu2 %v29559_v4  ;;  %v29589_v4 = vld [vmem:[#allocation5 + $0x19a0] sm:$0xff] }
 0x316   :  { %18567 = vmatpush.bf16.msra.mxu3 %v29567_v5  ;;  %v31010_v26 = vadd.f32 %v18315_v24, %v18303_v22  ;;  %v90_v22 = vld [vmem:[#allocation2 + $0xd0] sm:$0xff]  ;;  %v29586_v24 = vld [vmem:[#allocation5 + $0x1988] sm:$0xff]  ;;  %v29569_v28 = vld [vmem:[#allocation5 + $0x1900] sm:$0xff] }
 0x317   :  { %18529 = vmatpush.bf16.msra.mxu0 %v29542_v6  ;;  %v29597_v6 = vld [vmem:[#allocation5 + $0x19e0] sm:$0xff]  ;;  %323 = vst [vmem:[#allocation1] ss:$4 sm:$0xff] %v90_v22  ;;  %v29640_v22 = vld [vmem:[#allocation5 + $0x1b38] sm:$0xff] }
 0x318   :  { %18542 = vmatpush.bf16.msra.mxu1 %v29550_v7  ;;  %v29572_v7 = vld [vmem:[#allocation5 + $0x1918] sm:$0xff] }
 0x319   :  { %18555 = vmatpush.bf16.msra.mxu2 %v29558_v8  ;;  %v29580_v8 = vld [vmem:[#allocation5 + $0x1958] sm:$0xff] }
 0x31a   :  { %18568 = vmatpush.bf16.msra.mxu3 %v29566_v9  ;;  %v29588_v9 = vld [vmem:[#allocation5 + $0x1998] sm:$0xff] }
 0x31b   :  { %18530 = vmatpush.bf16.msra.mxu0 %v29541_v12  ;;  %v18304_v36 = vpop.f32.mrf.mxu2  ;;  %v29596_v12 = vld [vmem:[#allocation5 + $0x19d8] sm:$0xff] }
 0x31c   :  { %18543 = vmatpush.bf16.msra.mxu1 %v29549_v14  ;;  %v18317_v38 = vpop.f32.mrf.mxu3  ;;  %v29624_v36 = vld [vmem:[#allocation5 + $0x1ab8] sm:$0xff] }
 0x31d   :  { %18556 = vmatpush.bf16.msra.mxu2 %v29557_v15  ;;  %v322_v38 = vld.sshfl [vmem:[#allocation1 + $0x38] sm:$0xff pattern:$0x73625140] }
 0x31e   :  { %18569 = vmatpush.bf16.msra.mxu3 %v29565_v17  ;;  %v868_v43 = vpack.c.bf16 %v322_v38, %v322_v38  ;;  %v29646_v38 = vld [vmem:[#allocation5 + $0x1b68] sm:$0xff] }
 0x31f   :  { %18531 = vmatpush.bf16.msra.mxu0 %v29540_v18  ;;  %v29579_v18 = vld [vmem:[#allocation5 + $0x1950] sm:$0xff] }
 0x320   :  { %18544 = vmatpush.bf16.msra.mxu1 %v29548_v19  ;;  %v29587_v19 = vld [vmem:[#allocation5 + $0x1990] sm:$0xff] }
 0x321   :  { %18557 = vmatpush.bf16.msra.mxu2 %v29556_v20  ;;  %v29595_v20 = vld [vmem:[#allocation5 + $0x19d0] sm:$0xff] }
 0x322   :  { %18570 = vmatpush.bf16.msra.mxu3 %v29564_v23  ;;  %v29578_v23 = vld [vmem:[#allocation5 + $0x1948] sm:$0xff] }
 0x323   :  { %18532 = vmatpush.bf16.msra.mxu0 %v29539_v27 }
 0x324   :  { %18545 = vmatpush.bf16.msra.mxu1 %v29547_v29  ;;  %v29577_v29 = vld [vmem:[#allocation5 + $0x1940] sm:$0xff] }
 0x325   :  { %18558 = vmatpush.bf16.msra.mxu2 %v29555_v30  ;;  %v29585_v30 = vld [vmem:[#allocation5 + $0x1980] sm:$0xff] }
 0x326   :  { %18571 = vmatpush.bf16.msra.mxu3 %v29563_v31  ;;  %v319_v31 = vld.sshfl [vmem:[#allocation1 + $0x20] sm:$0xff pattern:$0x73625140] }
 0x327   :  { %18533 = vmatpush.bf16.msra.mxu0 %v29538_v32  ;;  %v321_v32 = vld.sshfl [vmem:[#allocation1 + $0x30] sm:$0xff pattern:$0x73625140] }
 0x328   :  { %18546 = vmatpush.bf16.msra.mxu1 %v29546_v34  ;;  %v29616_v34 = vld [vmem:[#allocation5 + $0x1a78] sm:$0xff] }
 0x329   :  { %18559 = vmatpush.bf16.msra.mxu2 %v29554_v35  ;;  %v320_v35 = vld.sshfl [vmem:[#allocation1 + $0x28] sm:$0xff pattern:$0x73625140] }
 0x32a   :  { %18572 = vmatpush.bf16.msra.mxu3 %v29562_v37  ;;  %v29593_v37 = vld [vmem:[#allocation5 + $0x19c0] sm:$0xff]  ;;  %v866_v42 = vpack.c.bf16 %v320_v35, %v320_v35  ;;  %v29655_v35 = vld [vmem:[#allocation5 + $0x1bb0] sm:$0xff] }
 0x32b   :  { %18534 = vmatpush.bf16.msra.mxu0 %v29537_v39  ;;  %v18328_v63 = vpop.f32.mrf.mxu0  ;;  %v865_v39 = vpack.c.bf16 %v319_v31, %v319_v31 }
 0x32c   :  { %18547 = vmatpush.bf16.msra.mxu1 %v29545_v40  ;;  %v18329_v0 = vadd.f32 %v18328_v63, %v31010_v26  ;;  %v18341_v2 = vpop.f32.mrf.mxu1  ;;  %v29594_v26 = vld [vmem:[#allocation5 + $0x19c8] sm:$0xff]  ;;  %v867_v40 = vpack.c.bf16 %v321_v32, %v321_v32 }
 0x32d   :  { %18560 = vmatpush.bf16.msra.mxu2 %v29553_v41  ;;  %v29632_v41 = vld [vmem:[#allocation5 + $0x1af8] sm:$0xff] }
 0x32e   :  { %18573 = vmatpush.bf16.msra.mxu3 %v29561_v48  ;;  %18535 = vmatmul.bf16.vlgmr.msra.gmra.mxu0 %v861_v50  ;;  %v18342_v5 = vadd.f32 %v18341_v2, %v18329_v0  ;;  %v29606_v48 = vld [vmem:[#allocation5 + $0x1a28] sm:$0xff] }
 0x32f   :  { %18579 = vmatpush.bf16.msrb.mxu0 %v29576_v44  ;;  %18548 = vmatmul.bf16.vlgmr.msra.gmra.mxu1 %v862_v53  ;;  %v29607_v44 = vld [vmem:[#allocation5 + $0x1a30] sm:$0xff]  ;;  %v29622_v50 = vld [vmem:[#allocation5 + $0x1aa8] sm:$0xff] }
 0x330   :  { %18592 = vmatpush.bf16.msrb.mxu1 %v29584_v45  ;;  %18561 = vmatmul.bf16.vlgmr.msra.gmra.mxu2 %v863_v51  ;;  %v29615_v45 = vld [vmem:[#allocation5 + $0x1a70] sm:$0xff]  ;;  %v29630_v51 = vld [vmem:[#allocation5 + $0x1ae8] sm:$0xff] }
 0x331   :  { %18605 = vmatpush.bf16.msrb.mxu2 %v29592_v47  ;;  %18574 = vmatmul.bf16.vlgmr.msra.gmra.mxu3 %v864_v54  ;;  %v29631_v47 = vld [vmem:[#allocation5 + $0x1af0] sm:$0xff]  ;;  %v29605_v54 = vld [vmem:[#allocation5 + $0x1a20] sm:$0xff] }
 0x332   :  { %18618 = vmatpush.bf16.msrb.mxu3 %v29600_v52 }
 0x333   :  { %18580 = vmatpush.bf16.msrb.mxu0 %v29575_v55  ;;  %v18354_v10 = vpop.f32.mrf.mxu2  ;;  %v18330_v14 = vpop.f32.mrf.mxu0 }
 0x334   :  { %18593 = vmatpush.bf16.msrb.mxu1 %v29583_v56  ;;  %v18355_v11 = vadd.f32 %v18354_v10, %v18342_v5  ;;  %v18367_v13 = vpop.f32.mrf.mxu3  ;;  %v18343_v17 = vpop.f32.mrf.mxu1  ;;  %v29613_v56 = vld [vmem:[#allocation5 + $0x1a60] sm:$0xff]  ;;  %v29603_v5 = vld [vmem:[#allocation5 + $0x1a10] sm:$0xff]  ;;  %v29602_v10 = vld [vmem:[#allocation5 + $0x1a08] sm:$0xff] }
 0x335   :  { %18606 = vmatpush.bf16.msrb.mxu2 %v29591_v57  ;;  %v29621_v57 = vld [vmem:[#allocation5 + $0x1aa0] sm:$0xff] }
 0x336   :  { %18619 = vmatpush.bf16.msrb.mxu3 %v29599_v58  ;;  %v31013_v15 = vadd.f32 %v18367_v13, %v18355_v11  ;;  %v91_v11 = vld [vmem:[#allocation2 + $0xd8] sm:$0xff]  ;;  %v29618_v13 = vld [vmem:[#allocation5 + $0x1a88] sm:$0xff] }
 0x337   :  { %18581 = vmatpush.bf16.msrb.mxu0 %v29574_v59  ;;  %v29629_v59 = vld [vmem:[#allocation5 + $0x1ae0] sm:$0xff]  ;;  %324 = vst [vmem:[#allocation1 + $0x20] ss:$4 sm:$0xff] %v91_v11  ;;  %v29672_v11 = vld [vmem:[#allocation5 + $0x1c38] sm:$0xff] }
 0x338   :  { %18594 = vmatpush.bf16.msrb.mxu1 %v29582_v60  ;;  %v29604_v60 = vld [vmem:[#allocation5 + $0x1a18] sm:$0xff]  ;;  %v29601_v17 = vld [vmem:[#allocation5 + $0x1a00] sm:$0xff] }
 0x339   :  { %18607 = vmatpush.bf16.msrb.mxu2 %v29590_v61  ;;  %v29612_v61 = vld [vmem:[#allocation5 + $0x1a58] sm:$0xff] }
 0x33a   :  { %18620 = vmatpush.bf16.msrb.mxu3 %v29598_v62  ;;  %v29620_v62 = vld [vmem:[#allocation5 + $0x1a98] sm:$0xff] }
 0x33b   :  { %18582 = vmatpush.bf16.msrb.mxu0 %v29573_v1  ;;  %v18356_v25 = vpop.f32.mrf.mxu2  ;;  %v29628_v1 = vld [vmem:[#allocation5 + $0x1ad8] sm:$0xff] }
 0x33c   :  { %18595 = vmatpush.bf16.msrb.mxu1 %v29581_v3  ;;  %v18369_v27 = vpop.f32.mrf.mxu3  ;;  %v29656_v25 = vld [vmem:[#allocation5 + $0x1bb8] sm:$0xff] }
 0x33d   :  { %18608 = vmatpush.bf16.msrb.mxu2 %v29589_v4  ;;  %v328_v27 = vld.sshfl [vmem:[#allocation1 + $0x18] sm:$0xff pattern:$0x73625140] }
 0x33e   :  { %18621 = vmatpush.bf16.msrb.mxu3 %v29597_v6  ;;  %v872_v32 = vpack.c.bf16 %v328_v27, %v328_v27  ;;  %v29678_v27 = vld [vmem:[#allocation5 + $0x1c68] sm:$0xff] }
 0x33f   :  { %18583 = vmatpush.bf16.msrb.mxu0 %v29572_v7  ;;  %v29611_v7 = vld [vmem:[#allocation5 + $0x1a50] sm:$0xff] }
 0x340   :  { %18596 = vmatpush.bf16.msrb.mxu1 %v29580_v8  ;;  %v29619_v8 = vld [vmem:[#allocation5 + $0x1a90] sm:$0xff] }
 0x341   :  { %18609 = vmatpush.bf16.msrb.mxu2 %v29588_v9  ;;  %v29627_v9 = vld [vmem:[#allocation5 + $0x1ad0] sm:$0xff] }
 0x342   :  { %18622 = vmatpush.bf16.msrb.mxu3 %v29596_v12  ;;  %v29610_v12 = vld [vmem:[#allocation5 + $0x1a48] sm:$0xff] }
 0x343   :  { %18584 = vmatpush.bf16.msrb.mxu0 %v29571_v16 }
 0x344   :  { %18597 = vmatpush.bf16.msrb.mxu1 %v29579_v18  ;;  %v29609_v18 = vld [vmem:[#allocation5 + $0x1a40] sm:$0xff] }
 0x345   :  { %18610 = vmatpush.bf16.msrb.mxu2 %v29587_v19  ;;  %v29617_v19 = vld [vmem:[#allocation5 + $0x1a80] sm:$0xff] }
 0x346   :  { %18623 = vmatpush.bf16.msrb.mxu3 %v29595_v20  ;;  %v325_v20 = vld.sshfl [vmem:[#allocation1] sm:$0xff pattern:$0x73625140] }
 0x347   :  { %18585 = vmatpush.bf16.msrb.mxu0 %v29570_v21  ;;  %v327_v21 = vld.sshfl [vmem:[#allocation1 + $0x10] sm:$0xff pattern:$0x73625140] }
 0x348   :  { %18598 = vmatpush.bf16.msrb.mxu1 %v29578_v23  ;;  %v29648_v23 = vld [vmem:[#allocation5 + $0x1b78] sm:$0xff] }
 0x349   :  { %18611 = vmatpush.bf16.msrb.mxu2 %v29586_v24  ;;  %v326_v24 = vld.sshfl [vmem:[#allocation1 + $0x8] sm:$0xff pattern:$0x73625140] }
 0x34a   :  { %18624 = vmatpush.bf16.msrb.mxu3 %v29594_v26  ;;  %v29625_v26 = vld [vmem:[#allocation5 + $0x1ac0] sm:$0xff]  ;;  %v870_v31 = vpack.c.bf16 %v326_v24, %v326_v24  ;;  %v29687_v24 = vld [vmem:[#allocation5 + $0x1cb0] sm:$0xff] }
 0x34b   :  { %18586 = vmatpush.bf16.msrb.mxu0 %v29569_v28  ;;  %v18380_v52 = vpop.f32.mrf.mxu0  ;;  %v869_v28 = vpack.c.bf16 %v325_v20, %v325_v20 }
 0x34c   :  { %18599 = vmatpush.bf16.msrb.mxu1 %v29577_v29  ;;  %v18381_v53 = vadd.f32 %v18380_v52, %v31013_v15  ;;  %v18393_v55 = vpop.f32.mrf.mxu1  ;;  %v29626_v15 = vld [vmem:[#allocation5 + $0x1ac8] sm:$0xff]  ;;  %v871_v29 = vpack.c.bf16 %v327_v21, %v327_v21 }
 0x34d   :  { %18612 = vmatpush.bf16.msrb.mxu2 %v29585_v30  ;;  %v29664_v30 = vld [vmem:[#allocation5 + $0x1bf8] sm:$0xff] }
 0x34e   :  { %18625 = vmatpush.bf16.msrb.mxu3 %v29593_v37  ;;  %18587 = vmatmul.bf16.vlgmr.msrb.gmra.mxu0 %v865_v39  ;;  %v18394_v58 = vadd.f32 %v18393_v55, %v18381_v53  ;;  %v29638_v37 = vld [vmem:[#allocation5 + $0x1b28] sm:$0xff] }
 0x34f   :  { %18631 = vmatpush.bf16.msra.mxu0 %v29608_v33  ;;  %18600 = vmatmul.bf16.vlgmr.msrb.gmra.mxu1 %v866_v42  ;;  %v29639_v33 = vld [vmem:[#allocation5 + $0x1b30] sm:$0xff]  ;;  %v29654_v39 = vld [vmem:[#allocation5 + $0x1ba8] sm:$0xff] }
 0x350   :  { %18644 = vmatpush.bf16.msra.mxu1 %v29616_v34  ;;  %18613 = vmatmul.bf16.vlgmr.msrb.gmra.mxu2 %v867_v40  ;;  %v29647_v34 = vld [vmem:[#allocation5 + $0x1b70] sm:$0xff]  ;;  %v29662_v40 = vld [vmem:[#allocation5 + $0x1be8] sm:$0xff] }
 0x351   :  { %18657 = vmatpush.bf16.msra.mxu2 %v29624_v36  ;;  %18626 = vmatmul.bf16.vlgmr.msrb.gmra.mxu3 %v868_v43  ;;  %v29663_v36 = vld [vmem:[#allocation5 + $0x1bf0] sm:$0xff]  ;;  %v29637_v43 = vld [vmem:[#allocation5 + $0x1b20] sm:$0xff] }
 0x352   :  { %18670 = vmatpush.bf16.msra.mxu3 %v29632_v41 }
 0x353   :  { %18632 = vmatpush.bf16.msra.mxu0 %v29607_v44  ;;  %v18406_v63 = vpop.f32.mrf.mxu2  ;;  %v18382_v3 = vpop.f32.mrf.mxu0 }
 0x354   :  { %18645 = vmatpush.bf16.msra.mxu1 %v29615_v45  ;;  %v18407_v0 = vadd.f32 %v18406_v63, %v18394_v58  ;;  %v18419_v2 = vpop.f32.mrf.mxu3  ;;  %v18395_v6 = vpop.f32.mrf.mxu1  ;;  %v29645_v45 = vld [vmem:[#allocation5 + $0x1b60] sm:$0xff]  ;;  %v29635_v58 = vld [vmem:[#allocation5 + $0x1b10] sm:$0xff]  ;;  %v29634_v63 = vld [vmem:[#allocation5 + $0x1b08] sm:$0xff] }
 0x355   :  { %18658 = vmatpush.bf16.msra.mxu2 %v29623_v46  ;;  %v29653_v46 = vld [vmem:[#allocation5 + $0x1ba0] sm:$0xff] }
 0x356   :  { %18671 = vmatpush.bf16.msra.mxu3 %v29631_v47  ;;  %v31016_v4 = vadd.f32 %v18419_v2, %v18407_v0  ;;  %v92_v0 = vld [vmem:[#allocation2 + $0xe0] sm:$0xff] }
 0x357   :  { %18633 = vmatpush.bf16.msra.mxu0 %v29606_v48  ;;  %v29661_v48 = vld [vmem:[#allocation5 + $0x1be0] sm:$0xff]  ;;  %v29650_v2 = vld [vmem:[#allocation5 + $0x1b88] sm:$0xff]  ;;  %333 = vst [vmem:[#allocation1] ss:$4 sm:$0xff] %v92_v0  ;;  %v29704_v0 = vld [vmem:[#allocation5 + $0x1d38] sm:$0xff] }
 0x358   :  { %18646 = vmatpush.bf16.msra.mxu1 %v29614_v49  ;;  %v29636_v49 = vld [vmem:[#allocation5 + $0x1b18] sm:$0xff]  ;;  %v29633_v6 = vld [vmem:[#allocation5 + $0x1b00] sm:$0xff] }
 0x359   :  { %18659 = vmatpush.bf16.msra.mxu2 %v29622_v50  ;;  %v29644_v50 = vld [vmem:[#allocation5 + $0x1b58] sm:$0xff] }
 0x35a   :  { %18672 = vmatpush.bf16.msra.mxu3 %v29630_v51  ;;  %v29652_v51 = vld [vmem:[#allocation5 + $0x1b98] sm:$0xff] }
 0x35b   :  { %18634 = vmatpush.bf16.msra.mxu0 %v29605_v54  ;;  %v18408_v14 = vpop.f32.mrf.mxu2  ;;  %v29660_v54 = vld [vmem:[#allocation5 + $0x1bd8] sm:$0xff] }
 0x35c   :  { %18647 = vmatpush.bf16.msra.mxu1 %v29613_v56  ;;  %v18421_v16 = vpop.f32.mrf.mxu3  ;;  %v29688_v14 = vld [vmem:[#allocation5 + $0x1cb8] sm:$0xff] }
 0x35d   :  { %18660 = vmatpush.bf16.msra.mxu2 %v29621_v57  ;;  %v332_v16 = vld.sshfl [vmem:[#allocation1 + $0x38] sm:$0xff pattern:$0x73625140] }
 0x35e   :  { %18673 = vmatpush.bf16.msra.mxu3 %v29629_v59  ;;  %v876_v21 = vpack.c.bf16 %v332_v16, %v332_v16  ;;  %v29710_v16 = vld [vmem:[#allocation5 + $0x1d68] sm:$0xff] }
 0x35f   :  { %18635 = vmatpush.bf16.msra.mxu0 %v29604_v60  ;;  %v29643_v60 = vld [vmem:[#allocation5 + $0x1b50] sm:$0xff] }
 0x360   :  { %18648 = vmatpush.bf16.msra.mxu1 %v29612_v61  ;;  %v29651_v61 = vld [vmem:[#allocation5 + $0x1b90] sm:$0xff] }
 0x361   :  { %18661 = vmatpush.bf16.msra.mxu2 %v29620_v62  ;;  %v29659_v62 = vld [vmem:[#allocation5 + $0x1bd0] sm:$0xff] }
 0x362   :  { %18674 = vmatpush.bf16.msra.mxu3 %v29628_v1  ;;  %v29642_v1 = vld [vmem:[#allocation5 + $0x1b48] sm:$0xff] }
 0x363   :  { %18636 = vmatpush.bf16.msra.mxu0 %v29603_v5 }
 0x364   :  { %18649 = vmatpush.bf16.msra.mxu1 %v29611_v7  ;;  %v29641_v7 = vld [vmem:[#allocation5 + $0x1b40] sm:$0xff] }
 0x365   :  { %18662 = vmatpush.bf16.msra.mxu2 %v29619_v8  ;;  %v29649_v8 = vld [vmem:[#allocation5 + $0x1b80] sm:$0xff] }
 0x366   :  { %18675 = vmatpush.bf16.msra.mxu3 %v29627_v9  ;;  %v329_v9 = vld.sshfl [vmem:[#allocation1 + $0x20] sm:$0xff pattern:$0x73625140] }
 0x367   :  { %18637 = vmatpush.bf16.msra.mxu0 %v29602_v10  ;;  %v331_v10 = vld.sshfl [vmem:[#allocation1 + $0x30] sm:$0xff pattern:$0x73625140] }
 0x368   :  { %18650 = vmatpush.bf16.msra.mxu1 %v29610_v12  ;;  %v29680_v12 = vld [vmem:[#allocation5 + $0x1c78] sm:$0xff] }
 0x369   :  { %18663 = vmatpush.bf16.msra.mxu2 %v29618_v13  ;;  %v330_v13 = vld.sshfl [vmem:[#allocation1 + $0x28] sm:$0xff pattern:$0x73625140] }
 0x36a   :  { %18676 = vmatpush.bf16.msra.mxu3 %v29626_v15  ;;  %v29657_v15 = vld [vmem:[#allocation5 + $0x1bc0] sm:$0xff]  ;;  %v874_v20 = vpack.c.bf16 %v330_v13, %v330_v13  ;;  %v29719_v13 = vld [vmem:[#allocation5 + $0x1db0] sm:$0xff] }
 0x36b   :  { %18638 = vmatpush.bf16.msra.mxu0 %v29601_v17  ;;  %v18432_v41 = vpop.f32.mrf.mxu0  ;;  %v873_v17 = vpack.c.bf16 %v329_v9, %v329_v9 }
 0x36c   :  { %18651 = vmatpush.bf16.msra.mxu1 %v29609_v18  ;;  %v18433_v42 = vadd.f32 %v18432_v41, %v31016_v4  ;;  %v18445_v44 = vpop.f32.mrf.mxu1  ;;  %v29658_v4 = vld [vmem:[#allocation5 + $0x1bc8] sm:$0xff]  ;;  %v875_v18 = vpack.c.bf16 %v331_v10, %v331_v10 }
 0x36d   :  { %18664 = vmatpush.bf16.msra.mxu2 %v29617_v19  ;;  %v29696_v19 = vld [vmem:[#allocation5 + $0x1cf8] sm:$0xff] }
 0x36e   :  { %18677 = vmatpush.bf16.msra.mxu3 %v29625_v26  ;;  %18639 = vmatmul.bf16.vlgmr.msra.gmra.mxu0 %v869_v28  ;;  %v18446_v47 = vadd.f32 %v18445_v44, %v18433_v42  ;;  %v29670_v26 = vld [vmem:[#allocation5 + $0x1c28] sm:$0xff] }
 0x36f   :  { %18683 = vmatpush.bf16.msrb.mxu0 %v29640_v22  ;;  %18652 = vmatmul.bf16.vlgmr.msra.gmra.mxu1 %v870_v31  ;;  %v29671_v22 = vld [vmem:[#allocation5 + $0x1c30] sm:$0xff]  ;;  %v29686_v28 = vld [vmem:[#allocation5 + $0x1ca8] sm:$0xff] }
 0x370   :  { %18696 = vmatpush.bf16.msrb.mxu1 %v29648_v23  ;;  %18665 = vmatmul.bf16.vlgmr.msra.gmra.mxu2 %v871_v29  ;;  %v29679_v23 = vld [vmem:[#allocation5 + $0x1c70] sm:$0xff]  ;;  %v29694_v29 = vld [vmem:[#allocation5 + $0x1ce8] sm:$0xff] }
 0x371   :  { %18709 = vmatpush.bf16.msrb.mxu2 %v29656_v25  ;;  %18678 = vmatmul.bf16.vlgmr.msra.gmra.mxu3 %v872_v32  ;;  %v29695_v25 = vld [vmem:[#allocation5 + $0x1cf0] sm:$0xff]  ;;  %v29669_v32 = vld [vmem:[#allocation5 + $0x1c20] sm:$0xff] }
 0x372   :  { %18722 = vmatpush.bf16.msrb.mxu3 %v29664_v30 }
 0x373   :  { %18684 = vmatpush.bf16.msrb.mxu0 %v29639_v33  ;;  %v18458_v52 = vpop.f32.mrf.mxu2  ;;  %v18434_v56 = vpop.f32.mrf.mxu0 }
 0x374   :  { %18697 = vmatpush.bf16.msrb.mxu1 %v29647_v34  ;;  %v18459_v53 = vadd.f32 %v18458_v52, %v18446_v47  ;;  %v18471_v55 = vpop.f32.mrf.mxu3  ;;  %v18447_v59 = vpop.f32.mrf.mxu1  ;;  %v29677_v34 = vld [vmem:[#allocation5 + $0x1c60] sm:$0xff]  ;;  %v29667_v47 = vld [vmem:[#allocation5 + $0x1c10] sm:$0xff]  ;;  %v29666_v52 = vld [vmem:[#allocation5 + $0x1c08] sm:$0xff] }
 0x375   :  { %18710 = vmatpush.bf16.msrb.mxu2 %v29655_v35  ;;  %v29685_v35 = vld [vmem:[#allocation5 + $0x1ca0] sm:$0xff] }
 0x376   :  { %18723 = vmatpush.bf16.msrb.mxu3 %v29663_v36  ;;  %v31019_v57 = vadd.f32 %v18471_v55, %v18459_v53  ;;  %v93_v53 = vld [vmem:[#allocation2 + $0xe8] sm:$0xff]  ;;  %v29665_v59 = vld [vmem:[#allocation5 + $0x1c00] sm:$0xff] }
 0x377   :  { %18685 = vmatpush.bf16.msrb.mxu0 %v29638_v37  ;;  %v29693_v37 = vld [vmem:[#allocation5 + $0x1ce0] sm:$0xff]  ;;  %v29682_v55 = vld [vmem:[#allocation5 + $0x1c88] sm:$0xff]  ;;  %334 = vst [vmem:[#allocation1 + $0x20] ss:$4 sm:$0xff] %v93_v53  ;;  %v29736_v53 = vld [vmem:[#allocation5 + $0x1e38] sm:$0xff] }
 0x378   :  { %18698 = vmatpush.bf16.msrb.mxu1 %v29646_v38  ;;  %v29668_v38 = vld [vmem:[#allocation5 + $0x1c18] sm:$0xff] }
 0x379   :  { %18711 = vmatpush.bf16.msrb.mxu2 %v29654_v39  ;;  %v29676_v39 = vld [vmem:[#allocation5 + $0x1c58] sm:$0xff] }
 0x37a   :  { %18724 = vmatpush.bf16.msrb.mxu3 %v29662_v40  ;;  %v29684_v40 = vld [vmem:[#allocation5 + $0x1c98] sm:$0xff] }
 0x37b   :  { %18686 = vmatpush.bf16.msrb.mxu0 %v29637_v43  ;;  %v18460_v3 = vpop.f32.mrf.mxu2  ;;  %v29692_v43 = vld [vmem:[#allocation5 + $0x1cd8] sm:$0xff] }
 0x37c   :  { %18699 = vmatpush.bf16.msrb.mxu1 %v29645_v45  ;;  %v18473_v5 = vpop.f32.mrf.mxu3  ;;  %v29720_v3 = vld [vmem:[#allocation5 + $0x1db8] sm:$0xff] }
 0x37d   :  { %18712 = vmatpush.bf16.msrb.mxu2 %v29653_v46  ;;  %v338_v5 = vld.sshfl [vmem:[#allocation1 + $0x18] sm:$0xff pattern:$0x73625140] }
 0x37e   :  { %18725 = vmatpush.bf16.msrb.mxu3 %v29661_v48  ;;  %v880_v10 = vpack.c.bf16 %v338_v5, %v338_v5  ;;  %v29742_v5 = vld [vmem:[#allocation5 + $0x1e68] sm:$0xff] }
 0x37f   :  { %18687 = vmatpush.bf16.msrb.mxu0 %v29636_v49  ;;  %v29675_v49 = vld [vmem:[#allocation5 + $0x1c50] sm:$0xff] }
 0x380   :  { %18700 = vmatpush.bf16.msrb.mxu1 %v29644_v50  ;;  %v29683_v50 = vld [vmem:[#allocation5 + $0x1c90] sm:$0xff] }
 0x381   :  { %18713 = vmatpush.bf16.msrb.mxu2 %v29652_v51  ;;  %v29691_v51 = vld [vmem:[#allocation5 + $0x1cd0] sm:$0xff] }
 0x382   :  { %18726 = vmatpush.bf16.msrb.mxu3 %v29660_v54  ;;  %v29674_v54 = vld [vmem:[#allocation5 + $0x1c48] sm:$0xff] }
 0x383   :  { %18688 = vmatpush.bf16.msrb.mxu0 %v29635_v58 }
 0x384   :  { %18701 = vmatpush.bf16.msrb.mxu1 %v29643_v60  ;;  %v29673_v60 = vld [vmem:[#allocation5 + $0x1c40] sm:$0xff] }
 0x385   :  { %18714 = vmatpush.bf16.msrb.mxu2 %v29651_v61  ;;  %v29681_v61 = vld [vmem:[#allocation5 + $0x1c80] sm:$0xff] }
 0x386   :  { %18727 = vmatpush.bf16.msrb.mxu3 %v29659_v62  ;;  %v335_v62 = vld.sshfl [vmem:[#allocation1] sm:$0xff pattern:$0x73625140] }
 0x387   :  { %18689 = vmatpush.bf16.msrb.mxu0 %v29634_v63  ;;  %v337_v63 = vld.sshfl [vmem:[#allocation1 + $0x10] sm:$0xff pattern:$0x73625140] }
 0x388   :  { %18702 = vmatpush.bf16.msrb.mxu1 %v29642_v1  ;;  %v29712_v1 = vld [vmem:[#allocation5 + $0x1d78] sm:$0xff] }
 0x389   :  { %18715 = vmatpush.bf16.msrb.mxu2 %v29650_v2  ;;  %v336_v2 = vld.sshfl [vmem:[#allocation1 + $0x8] sm:$0xff pattern:$0x73625140] }
 0x38a   :  { %18728 = vmatpush.bf16.msrb.mxu3 %v29658_v4  ;;  %v29689_v4 = vld [vmem:[#allocation5 + $0x1cc0] sm:$0xff]  ;;  %v878_v9 = vpack.c.bf16 %v336_v2, %v336_v2  ;;  %v29751_v2 = vld [vmem:[#allocation5 + $0x1eb0] sm:$0xff] }
 0x38b   :  { %18690 = vmatpush.bf16.msrb.mxu0 %v29633_v6  ;;  %v18484_v30 = vpop.f32.mrf.mxu0  ;;  %v877_v6 = vpack.c.bf16 %v335_v62, %v335_v62 }
 0x38c   :  { %18703 = vmatpush.bf16.msrb.mxu1 %v29641_v7  ;;  %v18485_v31 = vadd.f32 %v18484_v30, %v31019_v57  ;;  %v18497_v33 = vpop.f32.mrf.mxu1  ;;  %v29690_v57 = vld [vmem:[#allocation5 + $0x1cc8] sm:$0xff]  ;;  %v879_v7 = vpack.c.bf16 %v337_v63, %v337_v63 }
 0x38d   :  { %18716 = vmatpush.bf16.msrb.mxu2 %v29649_v8  ;;  %v29728_v8 = vld [vmem:[#allocation5 + $0x1df8] sm:$0xff] }
 0x38e   :  { %18729 = vmatpush.bf16.msrb.mxu3 %v29657_v15  ;;  %18691 = vmatmul.bf16.vlgmr.msrb.gmra.mxu0 %v873_v17  ;;  %v18498_v36 = vadd.f32 %v18497_v33, %v18485_v31  ;;  %v29702_v15 = vld [vmem:[#allocation5 + $0x1d28] sm:$0xff] }
 0x38f   :  { %18735 = vmatpush.bf16.msra.mxu0 %v29672_v11  ;;  %18704 = vmatmul.bf16.vlgmr.msrb.gmra.mxu1 %v874_v20  ;;  %v29703_v11 = vld [vmem:[#allocation5 + $0x1d30] sm:$0xff]  ;;  %v29718_v17 = vld [vmem:[#allocation5 + $0x1da8] sm:$0xff] }
 0x390   :  { %18748 = vmatpush.bf16.msra.mxu1 %v29680_v12  ;;  %18717 = vmatmul.bf16.vlgmr.msrb.gmra.mxu2 %v875_v18  ;;  %v29711_v12 = vld [vmem:[#allocation5 + $0x1d70] sm:$0xff]  ;;  %v29726_v18 = vld [vmem:[#allocation5 + $0x1de8] sm:$0xff] }
 0x391   :  { %18761 = vmatpush.bf16.msra.mxu2 %v29688_v14  ;;  %18730 = vmatmul.bf16.vlgmr.msrb.gmra.mxu3 %v876_v21  ;;  %v29727_v14 = vld [vmem:[#allocation5 + $0x1df0] sm:$0xff]  ;;  %v29701_v21 = vld [vmem:[#allocation5 + $0x1d20] sm:$0xff] }
 0x392   :  { %18774 = vmatpush.bf16.msra.mxu3 %v29696_v19 }
 0x393   :  { %18736 = vmatpush.bf16.msra.mxu0 %v29671_v22  ;;  %v18510_v41 = vpop.f32.mrf.mxu2  ;;  %v18486_v45 = vpop.f32.mrf.mxu0 }
 0x394   :  { %18749 = vmatpush.bf16.msra.mxu1 %v29679_v23  ;;  %v18511_v42 = vadd.f32 %v18510_v41, %v18498_v36  ;;  %v18523_v44 = vpop.f32.mrf.mxu3  ;;  %v18499_v48 = vpop.f32.mrf.mxu1  ;;  %v29709_v23 = vld [vmem:[#allocation5 + $0x1d60] sm:$0xff]  ;;  %v29699_v36 = vld [vmem:[#allocation5 + $0x1d10] sm:$0xff]  ;;  %v29698_v41 = vld [vmem:[#allocation5 + $0x1d08] sm:$0xff] }
 0x395   :  { %18762 = vmatpush.bf16.msra.mxu2 %v29687_v24  ;;  %v29717_v24 = vld [vmem:[#allocation5 + $0x1da0] sm:$0xff] }
 0x396   :  { %18775 = vmatpush.bf16.msra.mxu3 %v29695_v25  ;;  %v31022_v46 = vadd.f32 %v18523_v44, %v18511_v42  ;;  %v94_v42 = vld [vmem:[#allocation2 + $0xf0] sm:$0xff]  ;;  %v29714_v44 = vld [vmem:[#allocation5 + $0x1d88] sm:$0xff]  ;;  %v29697_v48 = vld [vmem:[#allocation5 + $0x1d00] sm:$0xff] }
 0x397   :  { %18737 = vmatpush.bf16.msra.mxu0 %v29670_v26  ;;  %v29725_v26 = vld [vmem:[#allocation5 + $0x1de0] sm:$0xff]  ;;  %343 = vst [vmem:[#allocation1] ss:$4 sm:$0xff] %v94_v42  ;;  %v29768_v42 = vld [vmem:[#allocation5 + $0x1f38] sm:$0xff] }
 0x398   :  { %18750 = vmatpush.bf16.msra.mxu1 %v29678_v27  ;;  %v29700_v27 = vld [vmem:[#allocation5 + $0x1d18] sm:$0xff] }
 0x399   :  { %18763 = vmatpush.bf16.msra.mxu2 %v29686_v28  ;;  %v29708_v28 = vld [vmem:[#allocation5 + $0x1d58] sm:$0xff] }
 0x39a   :  { %18776 = vmatpush.bf16.msra.mxu3 %v29694_v29  ;;  %v29716_v29 = vld [vmem:[#allocation5 + $0x1d98] sm:$0xff] }
 0x39b   :  { %18738 = vmatpush.bf16.msra.mxu0 %v29669_v32  ;;  %v18512_v56 = vpop.f32.mrf.mxu2  ;;  %v29724_v32 = vld [vmem:[#allocation5 + $0x1dd8] sm:$0xff] }
 0x39c   :  { %18751 = vmatpush.bf16.msra.mxu1 %v29677_v34  ;;  %v18525_v58 = vpop.f32.mrf.mxu3  ;;  %v29752_v56 = vld [vmem:[#allocation5 + $0x1eb8] sm:$0xff] }
 0x39d   :  { %18764 = vmatpush.bf16.msra.mxu2 %v29685_v35  ;;  %v342_v58 = vld.sshfl [vmem:[#allocation1 + $0x38] sm:$0xff pattern:$0x73625140] }
 0x39e   :  { %18777 = vmatpush.bf16.msra.mxu3 %v29693_v37  ;;  %v884_v63 = vpack.c.bf16 %v342_v58, %v342_v58  ;;  %v29774_v58 = vld [vmem:[#allocation5 + $0x1f68] sm:$0xff] }
 0x39f   :  { %18739 = vmatpush.bf16.msra.mxu0 %v29668_v38  ;;  %v29707_v38 = vld [vmem:[#allocation5 + $0x1d50] sm:$0xff] }
 0x3a0   :  { %18752 = vmatpush.bf16.msra.mxu1 %v29676_v39  ;;  %v29715_v39 = vld [vmem:[#allocation5 + $0x1d90] sm:$0xff] }
 0x3a1   :  { %18765 = vmatpush.bf16.msra.mxu2 %v29684_v40  ;;  %v29723_v40 = vld [vmem:[#allocation5 + $0x1dd0] sm:$0xff] }
 0x3a2   :  { %18778 = vmatpush.bf16.msra.mxu3 %v29692_v43  ;;  %v29706_v43 = vld [vmem:[#allocation5 + $0x1d48] sm:$0xff] }
 0x3a3   :  { %18740 = vmatpush.bf16.msra.mxu0 %v29667_v47 }
 0x3a4   :  { %18753 = vmatpush.bf16.msra.mxu1 %v29675_v49  ;;  %v29705_v49 = vld [vmem:[#allocation5 + $0x1d40] sm:$0xff] }
 0x3a5   :  { %18766 = vmatpush.bf16.msra.mxu2 %v29683_v50  ;;  %v29713_v50 = vld [vmem:[#allocation5 + $0x1d80] sm:$0xff] }
 0x3a6   :  { %18779 = vmatpush.bf16.msra.mxu3 %v29691_v51  ;;  %v339_v51 = vld.sshfl [vmem:[#allocation1 + $0x20] sm:$0xff pattern:$0x73625140] }
 0x3a7   :  { %18741 = vmatpush.bf16.msra.mxu0 %v29666_v52  ;;  %v341_v52 = vld.sshfl [vmem:[#allocation1 + $0x30] sm:$0xff pattern:$0x73625140] }
 0x3a8   :  { %18754 = vmatpush.bf16.msra.mxu1 %v29674_v54  ;;  %v29744_v54 = vld [vmem:[#allocation5 + $0x1e78] sm:$0xff] }
 0x3a9   :  { %18767 = vmatpush.bf16.msra.mxu2 %v29682_v55  ;;  %v340_v55 = vld.sshfl [vmem:[#allocation1 + $0x28] sm:$0xff pattern:$0x73625140] }
 0x3aa   :  { %18780 = vmatpush.bf16.msra.mxu3 %v29690_v57  ;;  %v29721_v57 = vld [vmem:[#allocation5 + $0x1dc0] sm:$0xff]  ;;  %v882_v62 = vpack.c.bf16 %v340_v55, %v340_v55  ;;  %v29783_v55 = vld [vmem:[#allocation5 + $0x1fb0] sm:$0xff] }
 0x3ab   :  { %18742 = vmatpush.bf16.msra.mxu0 %v29665_v59  ;;  %v18536_v19 = vpop.f32.mrf.mxu0  ;;  %v881_v59 = vpack.c.bf16 %v339_v51, %v339_v51 }
 0x3ac   :  { %18755 = vmatpush.bf16.msra.mxu1 %v29673_v60  ;;  %v18537_v20 = vadd.f32 %v18536_v19, %v31022_v46  ;;  %v18549_v22 = vpop.f32.mrf.mxu1  ;;  %v29722_v46 = vld [vmem:[#allocation5 + $0x1dc8] sm:$0xff]  ;;  %v883_v60 = vpack.c.bf16 %v341_v52, %v341_v52 }
 0x3ad   :  { %18768 = vmatpush.bf16.msra.mxu2 %v29681_v61  ;;  %v29760_v61 = vld [vmem:[#allocation5 + $0x1ef8] sm:$0xff] }
 0x3ae   :  { %18781 = vmatpush.bf16.msra.mxu3 %v29689_v4  ;;  %18743 = vmatmul.bf16.vlgmr.msra.gmra.mxu0 %v877_v6  ;;  %v18550_v25 = vadd.f32 %v18549_v22, %v18537_v20  ;;  %v29734_v4 = vld [vmem:[#allocation5 + $0x1e28] sm:$0xff] }
 0x3af   :  { %18787 = vmatpush.bf16.msrb.mxu0 %v29704_v0  ;;  %18756 = vmatmul.bf16.vlgmr.msra.gmra.mxu1 %v878_v9  ;;  %v29735_v0 = vld [vmem:[#allocation5 + $0x1e30] sm:$0xff]  ;;  %v29750_v6 = vld [vmem:[#allocation5 + $0x1ea8] sm:$0xff] }
 0x3b0   :  { %18800 = vmatpush.bf16.msrb.mxu1 %v29712_v1  ;;  %18769 = vmatmul.bf16.vlgmr.msra.gmra.mxu2 %v879_v7  ;;  %v29743_v1 = vld [vmem:[#allocation5 + $0x1e70] sm:$0xff]  ;;  %v29758_v7 = vld [vmem:[#allocation5 + $0x1ee8] sm:$0xff] }
 0x3b1   :  { %18813 = vmatpush.bf16.msrb.mxu2 %v29720_v3  ;;  %18782 = vmatmul.bf16.vlgmr.msra.gmra.mxu3 %v880_v10  ;;  %v29759_v3 = vld [vmem:[#allocation5 + $0x1ef0] sm:$0xff]  ;;  %v29733_v10 = vld [vmem:[#allocation5 + $0x1e20] sm:$0xff] }
 0x3b2   :  { %18826 = vmatpush.bf16.msrb.mxu3 %v29728_v8 }
 0x3b3   :  { %18788 = vmatpush.bf16.msrb.mxu0 %v29703_v11  ;;  %v18562_v30 = vpop.f32.mrf.mxu2  ;;  %v18538_v34 = vpop.f32.mrf.mxu0 }
 0x3b4   :  { %18801 = vmatpush.bf16.msrb.mxu1 %v29711_v12  ;;  %v18563_v31 = vadd.f32 %v18562_v30, %v18550_v25  ;;  %v18575_v33 = vpop.f32.mrf.mxu3  ;;  %v18551_v37 = vpop.f32.mrf.mxu1  ;;  %v29741_v12 = vld [vmem:[#allocation5 + $0x1e60] sm:$0xff]  ;;  %v29731_v25 = vld [vmem:[#allocation5 + $0x1e10] sm:$0xff]  ;;  %v29730_v30 = vld [vmem:[#allocation5 + $0x1e08] sm:$0xff] }
 0x3b5   :  { %18814 = vmatpush.bf16.msrb.mxu2 %v29719_v13  ;;  %v29749_v13 = vld [vmem:[#allocation5 + $0x1ea0] sm:$0xff] }
 0x3b6   :  { %18827 = vmatpush.bf16.msrb.mxu3 %v29727_v14  ;;  %v31025_v35 = vadd.f32 %v18575_v33, %v18563_v31  ;;  %v95_v31 = vld [vmem:[#allocation2 + $0xf8] sm:$0xff]  ;;  %v29746_v33 = vld [vmem:[#allocation5 + $0x1e88] sm:$0xff] }
 0x3b7   :  { %18789 = vmatpush.bf16.msrb.mxu0 %v29702_v15  ;;  %v29757_v15 = vld [vmem:[#allocation5 + $0x1ee0] sm:$0xff]  ;;  %344 = vst [vmem:[#allocation1 + $0x20] ss:$4 sm:$0xff] %v95_v31  ;;  %v29800_v31 = vld [vmem:[#allocation5 + $0x2038] sm:$0xff] }
 0x3b8   :  { %18802 = vmatpush.bf16.msrb.mxu1 %v29710_v16  ;;  %v29732_v16 = vld [vmem:[#allocation5 + $0x1e18] sm:$0xff]  ;;  %v29729_v37 = vld [vmem:[#allocation5 + $0x1e00] sm:$0xff] }
 0x3b9   :  { %18815 = vmatpush.bf16.msrb.mxu2 %v29718_v17  ;;  %v29740_v17 = vld [vmem:[#allocation5 + $0x1e58] sm:$0xff] }
 0x3ba   :  { %18828 = vmatpush.bf16.msrb.mxu3 %v29726_v18  ;;  %v29748_v18 = vld [vmem:[#allocation5 + $0x1e98] sm:$0xff] }
 0x3bb   :  { %18790 = vmatpush.bf16.msrb.mxu0 %v29701_v21  ;;  %v18564_v45 = vpop.f32.mrf.mxu2  ;;  %v29756_v21 = vld [vmem:[#allocation5 + $0x1ed8] sm:$0xff] }
 0x3bc   :  { %18803 = vmatpush.bf16.msrb.mxu1 %v29709_v23  ;;  %v18577_v47 = vpop.f32.mrf.mxu3  ;;  %v29784_v45 = vld [vmem:[#allocation5 + $0x1fb8] sm:$0xff] }
 0x3bd   :  { %18816 = vmatpush.bf16.msrb.mxu2 %v29717_v24  ;;  %v348_v47 = vld.sshfl [vmem:[#allocation1 + $0x18] sm:$0xff pattern:$0x73625140] }
 0x3be   :  { %18829 = vmatpush.bf16.msrb.mxu3 %v29725_v26  ;;  %v888_v52 = vpack.c.bf16 %v348_v47, %v348_v47  ;;  %v29806_v47 = vld [vmem:[#allocation5 + $0x2068] sm:$0xff] }
 0x3bf   :  { %18791 = vmatpush.bf16.msrb.mxu0 %v29700_v27  ;;  %v29739_v27 = vld [vmem:[#allocation5 + $0x1e50] sm:$0xff] }
 0x3c0   :  { %18804 = vmatpush.bf16.msrb.mxu1 %v29708_v28  ;;  %v29747_v28 = vld [vmem:[#allocation5 + $0x1e90] sm:$0xff] }
 0x3c1   :  { %18817 = vmatpush.bf16.msrb.mxu2 %v29716_v29  ;;  %v29755_v29 = vld [vmem:[#allocation5 + $0x1ed0] sm:$0xff] }
 0x3c2   :  { %18830 = vmatpush.bf16.msrb.mxu3 %v29724_v32  ;;  %v29738_v32 = vld [vmem:[#allocation5 + $0x1e48] sm:$0xff] }
 0x3c3   :  { %18792 = vmatpush.bf16.msrb.mxu0 %v29699_v36 }
 0x3c4   :  { %18805 = vmatpush.bf16.msrb.mxu1 %v29707_v38  ;;  %v29737_v38 = vld [vmem:[#allocation5 + $0x1e40] sm:$0xff] }
 0x3c5   :  { %18818 = vmatpush.bf16.msrb.mxu2 %v29715_v39  ;;  %v29745_v39 = vld [vmem:[#allocation5 + $0x1e80] sm:$0xff] }
 0x3c6   :  { %18831 = vmatpush.bf16.msrb.mxu3 %v29723_v40  ;;  %v345_v40 = vld.sshfl [vmem:[#allocation1] sm:$0xff pattern:$0x73625140] }
 0x3c7   :  { %18793 = vmatpush.bf16.msrb.mxu0 %v29698_v41  ;;  %v347_v41 = vld.sshfl [vmem:[#allocation1 + $0x10] sm:$0xff pattern:$0x73625140] }
 0x3c8   :  { %18806 = vmatpush.bf16.msrb.mxu1 %v29706_v43  ;;  %v29776_v43 = vld [vmem:[#allocation5 + $0x1f78] sm:$0xff] }
 0x3c9   :  { %18819 = vmatpush.bf16.msrb.mxu2 %v29714_v44  ;;  %v346_v44 = vld.sshfl [vmem:[#allocation1 + $0x8] sm:$0xff pattern:$0x73625140] }
 0x3ca   :  { %18832 = vmatpush.bf16.msrb.mxu3 %v29722_v46  ;;  %v29753_v46 = vld [vmem:[#allocation5 + $0x1ec0] sm:$0xff]  ;;  %v886_v51 = vpack.c.bf16 %v346_v44, %v346_v44  ;;  %v29815_v44 = vld [vmem:[#allocation5 + $0x20b0] sm:$0xff] }
 0x3cb   :  { %18794 = vmatpush.bf16.msrb.mxu0 %v29697_v48  ;;  %v18588_v8 = vpop.f32.mrf.mxu0  ;;  %v885_v48 = vpack.c.bf16 %v345_v40, %v345_v40 }
 0x3cc   :  { %18807 = vmatpush.bf16.msrb.mxu1 %v29705_v49  ;;  %v18589_v9 = vadd.f32 %v18588_v8, %v31025_v35  ;;  %v18601_v11 = vpop.f32.mrf.mxu1  ;;  %v29754_v35 = vld [vmem:[#allocation5 + $0x1ec8] sm:$0xff]  ;;  %v887_v49 = vpack.c.bf16 %v347_v41, %v347_v41 }
 0x3cd   :  { %18820 = vmatpush.bf16.msrb.mxu2 %v29713_v50  ;;  %v29792_v50 = vld [vmem:[#allocation5 + $0x1ff8] sm:$0xff] }
 0x3ce   :  { %18833 = vmatpush.bf16.msrb.mxu3 %v29721_v57  ;;  %18795 = vmatmul.bf16.vlgmr.msrb.gmra.mxu0 %v881_v59  ;;  %v18602_v14 = vadd.f32 %v18601_v11, %v18589_v9  ;;  %v29766_v57 = vld [vmem:[#allocation5 + $0x1f28] sm:$0xff] }
 0x3cf   :  { %18839 = vmatpush.bf16.msra.mxu0 %v29736_v53  ;;  %18808 = vmatmul.bf16.vlgmr.msrb.gmra.mxu1 %v882_v62  ;;  %v29767_v53 = vld [vmem:[#allocation5 + $0x1f30] sm:$0xff]  ;;  %v29782_v59 = vld [vmem:[#allocation5 + $0x1fa8] sm:$0xff] }
 0x3d0   :  { %18852 = vmatpush.bf16.msra.mxu1 %v29744_v54  ;;  %18821 = vmatmul.bf16.vlgmr.msrb.gmra.mxu2 %v883_v60  ;;  %v29775_v54 = vld [vmem:[#allocation5 + $0x1f70] sm:$0xff]  ;;  %v29790_v60 = vld [vmem:[#allocation5 + $0x1fe8] sm:$0xff] }
 0x3d1   :  { %18865 = vmatpush.bf16.msra.mxu2 %v29752_v56  ;;  %18834 = vmatmul.bf16.vlgmr.msrb.gmra.mxu3 %v884_v63  ;;  %v29791_v56 = vld [vmem:[#allocation5 + $0x1ff0] sm:$0xff]  ;;  %v29765_v63 = vld [vmem:[#allocation5 + $0x1f20] sm:$0xff] }
 0x3d2   :  { %18878 = vmatpush.bf16.msra.mxu3 %v29760_v61 }
 0x3d3   :  { %18840 = vmatpush.bf16.msra.mxu0 %v29735_v0  ;;  %v18614_v19 = vpop.f32.mrf.mxu2  ;;  %v18590_v23 = vpop.f32.mrf.mxu0 }
 0x3d4   :  { %18853 = vmatpush.bf16.msra.mxu1 %v29743_v1  ;;  %v18615_v20 = vadd.f32 %v18614_v19, %v18602_v14  ;;  %v18627_v22 = vpop.f32.mrf.mxu3  ;;  %v18603_v26 = vpop.f32.mrf.mxu1  ;;  %v29773_v1 = vld [vmem:[#allocation5 + $0x1f60] sm:$0xff]  ;;  %v29763_v14 = vld [vmem:[#allocation5 + $0x1f10] sm:$0xff]  ;;  %v29762_v19 = vld [vmem:[#allocation5 + $0x1f08] sm:$0xff] }
 0x3d5   :  { %18866 = vmatpush.bf16.msra.mxu2 %v29751_v2  ;;  %v29781_v2 = vld [vmem:[#allocation5 + $0x1fa0] sm:$0xff] }
 0x3d6   :  { %18879 = vmatpush.bf16.msra.mxu3 %v29759_v3  ;;  %v31028_v24 = vadd.f32 %v18627_v22, %v18615_v20  ;;  %v96_v20 = vld [vmem:[#allocation2 + $0x100] sm:$0xff] }
 0x3d7   :  { %18841 = vmatpush.bf16.msra.mxu0 %v29734_v4  ;;  %v29789_v4 = vld [vmem:[#allocation5 + $0x1fe0] sm:$0xff]  ;;  %v29778_v22 = vld [vmem:[#allocation5 + $0x1f88] sm:$0xff]  ;;  %353 = vst [vmem:[#allocation1] ss:$4 sm:$0xff] %v96_v20  ;;  %v29832_v20 = vld [vmem:[#allocation5 + $0x2138] sm:$0xff] }
 0x3d8   :  { %18854 = vmatpush.bf16.msra.mxu1 %v29742_v5  ;;  %v29764_v5 = vld [vmem:[#allocation5 + $0x1f18] sm:$0xff]  ;;  %v29761_v26 = vld [vmem:[#allocation5 + $0x1f00] sm:$0xff] }
 0x3d9   :  { %18867 = vmatpush.bf16.msra.mxu2 %v29750_v6  ;;  %v29772_v6 = vld [vmem:[#allocation5 + $0x1f58] sm:$0xff] }
 0x3da   :  { %18880 = vmatpush.bf16.msra.mxu3 %v29758_v7  ;;  %v29780_v7 = vld [vmem:[#allocation5 + $0x1f98] sm:$0xff] }
 0x3db   :  { %18842 = vmatpush.bf16.msra.mxu0 %v29733_v10  ;;  %v18616_v34 = vpop.f32.mrf.mxu2  ;;  %v29788_v10 = vld [vmem:[#allocation5 + $0x1fd8] sm:$0xff] }
 0x3dc   :  { %18855 = vmatpush.bf16.msra.mxu1 %v29741_v12  ;;  %v18629_v36 = vpop.f32.mrf.mxu3  ;;  %v29816_v34 = vld [vmem:[#allocation5 + $0x20b8] sm:$0xff] }
 0x3dd   :  { %18868 = vmatpush.bf16.msra.mxu2 %v29749_v13  ;;  %v352_v36 = vld.sshfl [vmem:[#allocation1 + $0x38] sm:$0xff pattern:$0x73625140] }
 0x3de   :  { %18881 = vmatpush.bf16.msra.mxu3 %v29757_v15  ;;  %v892_v41 = vpack.c.bf16 %v352_v36, %v352_v36  ;;  %v29838_v36 = vld [vmem:[#allocation5 + $0x2168] sm:$0xff] }
 0x3df   :  { %18843 = vmatpush.bf16.msra.mxu0 %v29732_v16  ;;  %v29771_v16 = vld [vmem:[#allocation5 + $0x1f50] sm:$0xff] }
 0x3e0   :  { %18856 = vmatpush.bf16.msra.mxu1 %v29740_v17  ;;  %v29779_v17 = vld [vmem:[#allocation5 + $0x1f90] sm:$0xff] }
 0x3e1   :  { %18869 = vmatpush.bf16.msra.mxu2 %v29748_v18  ;;  %v29787_v18 = vld [vmem:[#allocation5 + $0x1fd0] sm:$0xff] }
 0x3e2   :  { %18882 = vmatpush.bf16.msra.mxu3 %v29756_v21  ;;  %v29770_v21 = vld [vmem:[#allocation5 + $0x1f48] sm:$0xff] }
 0x3e3   :  { %18844 = vmatpush.bf16.msra.mxu0 %v29731_v25 }
 0x3e4   :  { %18857 = vmatpush.bf16.msra.mxu1 %v29739_v27  ;;  %v29769_v27 = vld [vmem:[#allocation5 + $0x1f40] sm:$0xff] }
 0x3e5   :  { %18870 = vmatpush.bf16.msra.mxu2 %v29747_v28  ;;  %v29777_v28 = vld [vmem:[#allocation5 + $0x1f80] sm:$0xff] }
 0x3e6   :  { %18883 = vmatpush.bf16.msra.mxu3 %v29755_v29  ;;  %v349_v29 = vld.sshfl [vmem:[#allocation1 + $0x20] sm:$0xff pattern:$0x73625140] }
 0x3e7   :  { %18845 = vmatpush.bf16.msra.mxu0 %v29730_v30  ;;  %v351_v30 = vld.sshfl [vmem:[#allocation1 + $0x30] sm:$0xff pattern:$0x73625140] }
 0x3e8   :  { %18858 = vmatpush.bf16.msra.mxu1 %v29738_v32  ;;  %v29808_v32 = vld [vmem:[#allocation5 + $0x2078] sm:$0xff] }
 0x3e9   :  { %18871 = vmatpush.bf16.msra.mxu2 %v29746_v33  ;;  %v350_v33 = vld.sshfl [vmem:[#allocation1 + $0x28] sm:$0xff pattern:$0x73625140] }
 0x3ea   :  { %18884 = vmatpush.bf16.msra.mxu3 %v29754_v35  ;;  %v29785_v35 = vld [vmem:[#allocation5 + $0x1fc0] sm:$0xff]  ;;  %v890_v40 = vpack.c.bf16 %v350_v33, %v350_v33  ;;  %v29847_v33 = vld [vmem:[#allocation5 + $0x21b0] sm:$0xff] }
 0x3eb   :  { %18846 = vmatpush.bf16.msra.mxu0 %v29729_v37  ;;  %v18640_v61 = vpop.f32.mrf.mxu0  ;;  %v889_v37 = vpack.c.bf16 %v349_v29, %v349_v29 }
 0x3ec   :  { %18859 = vmatpush.bf16.msra.mxu1 %v29737_v38  ;;  %v18641_v62 = vadd.f32 %v18640_v61, %v31028_v24  ;;  %v18653_v0 = vpop.f32.mrf.mxu1  ;;  %v29786_v24 = vld [vmem:[#allocation5 + $0x1fc8] sm:$0xff]  ;;  %v891_v38 = vpack.c.bf16 %v351_v30, %v351_v30 }
 0x3ed   :  { %18872 = vmatpush.bf16.msra.mxu2 %v29745_v39  ;;  %v29824_v39 = vld [vmem:[#allocation5 + $0x20f8] sm:$0xff] }
 0x3ee   :  { %18885 = vmatpush.bf16.msra.mxu3 %v29753_v46  ;;  %18847 = vmatmul.bf16.vlgmr.msra.gmra.mxu0 %v885_v48  ;;  %v18654_v3 = vadd.f32 %v18653_v0, %v18641_v62  ;;  %v29798_v46 = vld [vmem:[#allocation5 + $0x2028] sm:$0xff] }
 0x3ef   :  { %18891 = vmatpush.bf16.msrb.mxu0 %v29768_v42  ;;  %18860 = vmatmul.bf16.vlgmr.msra.gmra.mxu1 %v886_v51  ;;  %v29799_v42 = vld [vmem:[#allocation5 + $0x2030] sm:$0xff]  ;;  %v29814_v48 = vld [vmem:[#allocation5 + $0x20a8] sm:$0xff] }
 0x3f0   :  { %18904 = vmatpush.bf16.msrb.mxu1 %v29776_v43  ;;  %18873 = vmatmul.bf16.vlgmr.msra.gmra.mxu2 %v887_v49  ;;  %v29807_v43 = vld [vmem:[#allocation5 + $0x2070] sm:$0xff]  ;;  %v29822_v49 = vld [vmem:[#allocation5 + $0x20e8] sm:$0xff] }
 0x3f1   :  { %18917 = vmatpush.bf16.msrb.mxu2 %v29784_v45  ;;  %18886 = vmatmul.bf16.vlgmr.msra.gmra.mxu3 %v888_v52  ;;  %v29823_v45 = vld [vmem:[#allocation5 + $0x20f0] sm:$0xff]  ;;  %v29797_v52 = vld [vmem:[#allocation5 + $0x2020] sm:$0xff] }
 0x3f2   :  { %18930 = vmatpush.bf16.msrb.mxu3 %v29792_v50 }
 0x3f3   :  { %18892 = vmatpush.bf16.msrb.mxu0 %v29767_v53  ;;  %v18666_v8 = vpop.f32.mrf.mxu2  ;;  %v18642_v12 = vpop.f32.mrf.mxu0 }
 0x3f4   :  { %18905 = vmatpush.bf16.msrb.mxu1 %v29775_v54  ;;  %v18667_v9 = vadd.f32 %v18666_v8, %v18654_v3  ;;  %v18679_v11 = vpop.f32.mrf.mxu3  ;;  %v18655_v15 = vpop.f32.mrf.mxu1  ;;  %v29805_v54 = vld [vmem:[#allocation5 + $0x2060] sm:$0xff]  ;;  %v29795_v3 = vld [vmem:[#allocation5 + $0x2010] sm:$0xff]  ;;  %v29794_v8 = vld [vmem:[#allocation5 + $0x2008] sm:$0xff] }
 0x3f5   :  { %18918 = vmatpush.bf16.msrb.mxu2 %v29783_v55  ;;  %v29813_v55 = vld [vmem:[#allocation5 + $0x20a0] sm:$0xff] }
 0x3f6   :  { %18931 = vmatpush.bf16.msrb.mxu3 %v29791_v56  ;;  %v31031_v13 = vadd.f32 %v18679_v11, %v18667_v9  ;;  %v97_v9 = vld [vmem:[#allocation2 + $0x108] sm:$0xff]  ;;  %v29793_v15 = vld [vmem:[#allocation5 + $0x2000] sm:$0xff] }
 0x3f7   :  { %18893 = vmatpush.bf16.msrb.mxu0 %v29766_v57  ;;  %v29821_v57 = vld [vmem:[#allocation5 + $0x20e0] sm:$0xff]  ;;  %v29810_v11 = vld [vmem:[#allocation5 + $0x2088] sm:$0xff]  ;;  %354 = vst [vmem:[#allocation1 + $0x20] ss:$4 sm:$0xff] %v97_v9  ;;  %v29864_v9 = vld [vmem:[#allocation5 + $0x2238] sm:$0xff] }
 0x3f8   :  { %18906 = vmatpush.bf16.msrb.mxu1 %v29774_v58  ;;  %v29796_v58 = vld [vmem:[#allocation5 + $0x2018] sm:$0xff] }
 0x3f9   :  { %18919 = vmatpush.bf16.msrb.mxu2 %v29782_v59  ;;  %v29804_v59 = vld [vmem:[#allocation5 + $0x2058] sm:$0xff] }
 0x3fa   :  { %18932 = vmatpush.bf16.msrb.mxu3 %v29790_v60  ;;  %v29812_v60 = vld [vmem:[#allocation5 + $0x2098] sm:$0xff] }
 0x3fb   :  { %18894 = vmatpush.bf16.msrb.mxu0 %v29765_v63  ;;  %v18668_v23 = vpop.f32.mrf.mxu2  ;;  %v29820_v63 = vld [vmem:[#allocation5 + $0x20d8] sm:$0xff] }
 0x3fc   :  { %18907 = vmatpush.bf16.msrb.mxu1 %v29773_v1  ;;  %v18681_v25 = vpop.f32.mrf.mxu3  ;;  %v29848_v23 = vld [vmem:[#allocation5 + $0x21b8] sm:$0xff] }
 0x3fd   :  { %18920 = vmatpush.bf16.msrb.mxu2 %v29781_v2  ;;  %v358_v25 = vld.sshfl [vmem:[#allocation1 + $0x18] sm:$0xff pattern:$0x73625140] }
 0x3fe   :  { %18933 = vmatpush.bf16.msrb.mxu3 %v29789_v4  ;;  %v896_v30 = vpack.c.bf16 %v358_v25, %v358_v25  ;;  %v29870_v25 = vld [vmem:[#allocation5 + $0x2268] sm:$0xff] }
 0x3ff   :  { %18895 = vmatpush.bf16.msrb.mxu0 %v29764_v5  ;;  %v29803_v5 = vld [vmem:[#allocation5 + $0x2050] sm:$0xff] }
 0x400   :  { %18908 = vmatpush.bf16.msrb.mxu1 %v29772_v6  ;;  %v29811_v6 = vld [vmem:[#allocation5 + $0x2090] sm:$0xff] }
 0x401   :  { %18921 = vmatpush.bf16.msrb.mxu2 %v29780_v7  ;;  %v29819_v7 = vld [vmem:[#allocation5 + $0x20d0] sm:$0xff] }
 0x402   :  { %18934 = vmatpush.bf16.msrb.mxu3 %v29788_v10  ;;  %v29802_v10 = vld [vmem:[#allocation5 + $0x2048] sm:$0xff] }
 0x403   :  { %18896 = vmatpush.bf16.msrb.mxu0 %v29763_v14 }
 0x404   :  { %18909 = vmatpush.bf16.msrb.mxu1 %v29771_v16  ;;  %v29801_v16 = vld [vmem:[#allocation5 + $0x2040] sm:$0xff] }
 0x405   :  { %18922 = vmatpush.bf16.msrb.mxu2 %v29779_v17  ;;  %v29809_v17 = vld [vmem:[#allocation5 + $0x2080] sm:$0xff] }
 0x406   :  { %18935 = vmatpush.bf16.msrb.mxu3 %v29787_v18  ;;  %v355_v18 = vld.sshfl [vmem:[#allocation1] sm:$0xff pattern:$0x73625140] }
 0x407   :  { %18897 = vmatpush.bf16.msrb.mxu0 %v29762_v19  ;;  %v357_v19 = vld.sshfl [vmem:[#allocation1 + $0x10] sm:$0xff pattern:$0x73625140] }
 0x408   :  { %18910 = vmatpush.bf16.msrb.mxu1 %v29770_v21  ;;  %v29840_v21 = vld [vmem:[#allocation5 + $0x2178] sm:$0xff] }
 0x409   :  { %18923 = vmatpush.bf16.msrb.mxu2 %v29778_v22  ;;  %v356_v22 = vld.sshfl [vmem:[#allocation1 + $0x8] sm:$0xff pattern:$0x73625140] }
 0x40a   :  { %18936 = vmatpush.bf16.msrb.mxu3 %v29786_v24  ;;  %v29817_v24 = vld [vmem:[#allocation5 + $0x20c0] sm:$0xff]  ;;  %v894_v29 = vpack.c.bf16 %v356_v22, %v356_v22  ;;  %v29879_v22 = vld [vmem:[#allocation5 + $0x22b0] sm:$0xff] }
 0x40b   :  { %18898 = vmatpush.bf16.msrb.mxu0 %v29761_v26  ;;  %v18692_v50 = vpop.f32.mrf.mxu0  ;;  %v893_v26 = vpack.c.bf16 %v355_v18, %v355_v18 }
 0x40c   :  { %18911 = vmatpush.bf16.msrb.mxu1 %v29769_v27  ;;  %v18693_v51 = vadd.f32 %v18692_v50, %v31031_v13  ;;  %v18705_v53 = vpop.f32.mrf.mxu1  ;;  %v29818_v13 = vld [vmem:[#allocation5 + $0x20c8] sm:$0xff]  ;;  %v895_v27 = vpack.c.bf16 %v357_v19, %v357_v19 }
 0x40d   :  { %18924 = vmatpush.bf16.msrb.mxu2 %v29777_v28  ;;  %v29856_v28 = vld [vmem:[#allocation5 + $0x21f8] sm:$0xff] }
 0x40e   :  { %18937 = vmatpush.bf16.msrb.mxu3 %v29785_v35  ;;  %18899 = vmatmul.bf16.vlgmr.msrb.gmra.mxu0 %v889_v37  ;;  %v18706_v56 = vadd.f32 %v18705_v53, %v18693_v51  ;;  %v29830_v35 = vld [vmem:[#allocation5 + $0x2128] sm:$0xff] }
 0x40f   :  { %18943 = vmatpush.bf16.msra.mxu0 %v29800_v31  ;;  %18912 = vmatmul.bf16.vlgmr.msrb.gmra.mxu1 %v890_v40  ;;  %v29831_v31 = vld [vmem:[#allocation5 + $0x2130] sm:$0xff]  ;;  %v29846_v37 = vld [vmem:[#allocation5 + $0x21a8] sm:$0xff] }
 0x410   :  { %18956 = vmatpush.bf16.msra.mxu1 %v29808_v32  ;;  %18925 = vmatmul.bf16.vlgmr.msrb.gmra.mxu2 %v891_v38  ;;  %v29839_v32 = vld [vmem:[#allocation5 + $0x2170] sm:$0xff]  ;;  %v29854_v38 = vld [vmem:[#allocation5 + $0x21e8] sm:$0xff] }
 0x411   :  { %18969 = vmatpush.bf16.msra.mxu2 %v29816_v34  ;;  %18938 = vmatmul.bf16.vlgmr.msrb.gmra.mxu3 %v892_v41  ;;  %v29855_v34 = vld [vmem:[#allocation5 + $0x21f0] sm:$0xff]  ;;  %v29829_v41 = vld [vmem:[#allocation5 + $0x2120] sm:$0xff] }
 0x412   :  { %18982 = vmatpush.bf16.msra.mxu3 %v29824_v39 }
 0x413   :  { %18944 = vmatpush.bf16.msra.mxu0 %v29799_v42  ;;  %v18718_v61 = vpop.f32.mrf.mxu2  ;;  %v18694_v1 = vpop.f32.mrf.mxu0 }
 0x414   :  { %18957 = vmatpush.bf16.msra.mxu1 %v29807_v43  ;;  %v18719_v62 = vadd.f32 %v18718_v61, %v18706_v56  ;;  %v18731_v0 = vpop.f32.mrf.mxu3  ;;  %v18707_v4 = vpop.f32.mrf.mxu1  ;;  %v29837_v43 = vld [vmem:[#allocation5 + $0x2160] sm:$0xff]  ;;  %v29827_v56 = vld [vmem:[#allocation5 + $0x2110] sm:$0xff]  ;;  %v29826_v61 = vld [vmem:[#allocation5 + $0x2108] sm:$0xff] }
 0x415   :  { %18970 = vmatpush.bf16.msra.mxu2 %v29815_v44  ;;  %v29845_v44 = vld [vmem:[#allocation5 + $0x21a0] sm:$0xff] }
 0x416   :  { %18983 = vmatpush.bf16.msra.mxu3 %v29823_v45  ;;  %v31034_v2 = vadd.f32 %v18731_v0, %v18719_v62  ;;  %v98_v62 = vld [vmem:[#allocation2 + $0x110] sm:$0xff]  ;;  %v29842_v0 = vld [vmem:[#allocation5 + $0x2188] sm:$0xff]  ;;  %v29825_v4 = vld [vmem:[#allocation5 + $0x2100] sm:$0xff] }
 0x417   :  { %18945 = vmatpush.bf16.msra.mxu0 %v29798_v46  ;;  %v29853_v46 = vld [vmem:[#allocation5 + $0x21e0] sm:$0xff]  ;;  %363 = vst [vmem:[#allocation1] ss:$4 sm:$0xff] %v98_v62  ;;  %v29896_v62 = vld [vmem:[#allocation5 + $0x2338] sm:$0xff] }
 0x418   :  { %18958 = vmatpush.bf16.msra.mxu1 %v29806_v47  ;;  %v29828_v47 = vld [vmem:[#allocation5 + $0x2118] sm:$0xff] }
 0x419   :  { %18971 = vmatpush.bf16.msra.mxu2 %v29814_v48  ;;  %v29836_v48 = vld [vmem:[#allocation5 + $0x2158] sm:$0xff] }
 0x41a   :  { %18984 = vmatpush.bf16.msra.mxu3 %v29822_v49  ;;  %v29844_v49 = vld [vmem:[#allocation5 + $0x2198] sm:$0xff] }
 0x41b   :  { %18946 = vmatpush.bf16.msra.mxu0 %v29797_v52  ;;  %v18720_v12 = vpop.f32.mrf.mxu2  ;;  %v29852_v52 = vld [vmem:[#allocation5 + $0x21d8] sm:$0xff] }
 0x41c   :  { %18959 = vmatpush.bf16.msra.mxu1 %v29805_v54  ;;  %v18733_v14 = vpop.f32.mrf.mxu3  ;;  %v29880_v12 = vld [vmem:[#allocation5 + $0x22b8] sm:$0xff] }
 0x41d   :  { %18972 = vmatpush.bf16.msra.mxu2 %v29813_v55  ;;  %v362_v14 = vld.sshfl [vmem:[#allocation1 + $0x38] sm:$0xff pattern:$0x73625140] }
 0x41e   :  { %18985 = vmatpush.bf16.msra.mxu3 %v29821_v57  ;;  %v900_v19 = vpack.c.bf16 %v362_v14, %v362_v14  ;;  %v29902_v14 = vld [vmem:[#allocation5 + $0x2368] sm:$0xff] }
 0x41f   :  { %18947 = vmatpush.bf16.msra.mxu0 %v29796_v58  ;;  %v29835_v58 = vld [vmem:[#allocation5 + $0x2150] sm:$0xff] }
 0x420   :  { %18960 = vmatpush.bf16.msra.mxu1 %v29804_v59  ;;  %v29843_v59 = vld [vmem:[#allocation5 + $0x2190] sm:$0xff] }
 0x421   :  { %18973 = vmatpush.bf16.msra.mxu2 %v29812_v60  ;;  %v29851_v60 = vld [vmem:[#allocation5 + $0x21d0] sm:$0xff] }
 0x422   :  { %18986 = vmatpush.bf16.msra.mxu3 %v29820_v63  ;;  %v29834_v63 = vld [vmem:[#allocation5 + $0x2148] sm:$0xff] }
 0x423   :  { %18948 = vmatpush.bf16.msra.mxu0 %v29795_v3 }
 0x424   :  { %18961 = vmatpush.bf16.msra.mxu1 %v29803_v5  ;;  %v29833_v5 = vld [vmem:[#allocation5 + $0x2140] sm:$0xff] }
 0x425   :  { %18974 = vmatpush.bf16.msra.mxu2 %v29811_v6  ;;  %v29841_v6 = vld [vmem:[#allocation5 + $0x2180] sm:$0xff] }
 0x426   :  { %18987 = vmatpush.bf16.msra.mxu3 %v29819_v7  ;;  %v359_v7 = vld.sshfl [vmem:[#allocation1 + $0x20] sm:$0xff pattern:$0x73625140] }
 0x427   :  { %18949 = vmatpush.bf16.msra.mxu0 %v29794_v8  ;;  %v361_v8 = vld.sshfl [vmem:[#allocation1 + $0x30] sm:$0xff pattern:$0x73625140] }
 0x428   :  { %18962 = vmatpush.bf16.msra.mxu1 %v29802_v10  ;;  %v29872_v10 = vld [vmem:[#allocation5 + $0x2278] sm:$0xff] }
 0x429   :  { %18975 = vmatpush.bf16.msra.mxu2 %v29810_v11  ;;  %v360_v11 = vld.sshfl [vmem:[#allocation1 + $0x28] sm:$0xff pattern:$0x73625140] }
 0x42a   :  { %18988 = vmatpush.bf16.msra.mxu3 %v29818_v13  ;;  %v29849_v13 = vld [vmem:[#allocation5 + $0x21c0] sm:$0xff]  ;;  %v898_v18 = vpack.c.bf16 %v360_v11, %v360_v11  ;;  %v29911_v11 = vld [vmem:[#allocation5 + $0x23b0] sm:$0xff] }
 0x42b   :  { %18950 = vmatpush.bf16.msra.mxu0 %v29793_v15  ;;  %v18744_v39 = vpop.f32.mrf.mxu0  ;;  %v897_v15 = vpack.c.bf16 %v359_v7, %v359_v7 }
 0x42c   :  { %18963 = vmatpush.bf16.msra.mxu1 %v29801_v16  ;;  %v18745_v40 = vadd.f32 %v18744_v39, %v31034_v2  ;;  %v18757_v42 = vpop.f32.mrf.mxu1  ;;  %v29850_v2 = vld [vmem:[#allocation5 + $0x21c8] sm:$0xff]  ;;  %v899_v16 = vpack.c.bf16 %v361_v8, %v361_v8 }
 0x42d   :  { %18976 = vmatpush.bf16.msra.mxu2 %v29809_v17  ;;  %v29888_v17 = vld [vmem:[#allocation5 + $0x22f8] sm:$0xff] }
 0x42e   :  { %18989 = vmatpush.bf16.msra.mxu3 %v29817_v24  ;;  %18951 = vmatmul.bf16.vlgmr.msra.gmra.mxu0 %v893_v26  ;;  %v18758_v45 = vadd.f32 %v18757_v42, %v18745_v40  ;;  %v29862_v24 = vld [vmem:[#allocation5 + $0x2228] sm:$0xff] }
 0x42f   :  { %18995 = vmatpush.bf16.msrb.mxu0 %v29832_v20  ;;  %18964 = vmatmul.bf16.vlgmr.msra.gmra.mxu1 %v894_v29  ;;  %v29863_v20 = vld [vmem:[#allocation5 + $0x2230] sm:$0xff]  ;;  %v29878_v26 = vld [vmem:[#allocation5 + $0x22a8] sm:$0xff] }
 0x430   :  { %19008 = vmatpush.bf16.msrb.mxu1 %v29840_v21  ;;  %18977 = vmatmul.bf16.vlgmr.msra.gmra.mxu2 %v895_v27  ;;  %v29871_v21 = vld [vmem:[#allocation5 + $0x2270] sm:$0xff]  ;;  %v29886_v27 = vld [vmem:[#allocation5 + $0x22e8] sm:$0xff] }
 0x431   :  { %19021 = vmatpush.bf16.msrb.mxu2 %v29848_v23  ;;  %18990 = vmatmul.bf16.vlgmr.msra.gmra.mxu3 %v896_v30  ;;  %v29887_v23 = vld [vmem:[#allocation5 + $0x22f0] sm:$0xff]  ;;  %v29861_v30 = vld [vmem:[#allocation5 + $0x2220] sm:$0xff] }
 0x432   :  { %19034 = vmatpush.bf16.msrb.mxu3 %v29856_v28 }
 0x433   :  { %18996 = vmatpush.bf16.msrb.mxu0 %v29831_v31  ;;  %v18770_v50 = vpop.f32.mrf.mxu2  ;;  %v18746_v54 = vpop.f32.mrf.mxu0 }
 0x434   :  { %19009 = vmatpush.bf16.msrb.mxu1 %v29839_v32  ;;  %v18771_v51 = vadd.f32 %v18770_v50, %v18758_v45  ;;  %v18783_v53 = vpop.f32.mrf.mxu3  ;;  %v18759_v57 = vpop.f32.mrf.mxu1  ;;  %v29869_v32 = vld [vmem:[#allocation5 + $0x2260] sm:$0xff]  ;;  %v29859_v45 = vld [vmem:[#allocation5 + $0x2210] sm:$0xff]  ;;  %v29858_v50 = vld [vmem:[#allocation5 + $0x2208] sm:$0xff] }
 0x435   :  { %19022 = vmatpush.bf16.msrb.mxu2 %v29847_v33  ;;  %v29877_v33 = vld [vmem:[#allocation5 + $0x22a0] sm:$0xff] }
 0x436   :  { %19035 = vmatpush.bf16.msrb.mxu3 %v29855_v34  ;;  %v31037_v55 = vadd.f32 %v18783_v53, %v18771_v51  ;;  %v99_v51 = vld [vmem:[#allocation2 + $0x118] sm:$0xff]  ;;  %v29874_v53 = vld [vmem:[#allocation5 + $0x2288] sm:$0xff] }
 0x437   :  { %18997 = vmatpush.bf16.msrb.mxu0 %v29830_v35  ;;  %v29885_v35 = vld [vmem:[#allocation5 + $0x22e0] sm:$0xff]  ;;  %364 = vst [vmem:[#allocation1 + $0x20] ss:$4 sm:$0xff] %v99_v51  ;;  %v29928_v51 = vld [vmem:[#allocation5 + $0x2438] sm:$0xff] }
 0x438   :  { %19010 = vmatpush.bf16.msrb.mxu1 %v29838_v36  ;;  %v29860_v36 = vld [vmem:[#allocation5 + $0x2218] sm:$0xff]  ;;  %v29857_v57 = vld [vmem:[#allocation5 + $0x2200] sm:$0xff] }
 0x439   :  { %19023 = vmatpush.bf16.msrb.mxu2 %v29846_v37  ;;  %v29868_v37 = vld [vmem:[#allocation5 + $0x2258] sm:$0xff] }
 0x43a   :  { %19036 = vmatpush.bf16.msrb.mxu3 %v29854_v38  ;;  %v29876_v38 = vld [vmem:[#allocation5 + $0x2298] sm:$0xff] }
 0x43b   :  { %18998 = vmatpush.bf16.msrb.mxu0 %v29829_v41  ;;  %v18772_v1 = vpop.f32.mrf.mxu2  ;;  %v29884_v41 = vld [vmem:[#allocation5 + $0x22d8] sm:$0xff] }
 0x43c   :  { %19011 = vmatpush.bf16.msrb.mxu1 %v29837_v43  ;;  %v18785_v3 = vpop.f32.mrf.mxu3  ;;  %v29912_v1 = vld [vmem:[#allocation5 + $0x23b8] sm:$0xff] }
 0x43d   :  { %19024 = vmatpush.bf16.msrb.mxu2 %v29845_v44  ;;  %v368_v3 = vld.sshfl [vmem:[#allocation1 + $0x18] sm:$0xff pattern:$0x73625140] }
 0x43e   :  { %19037 = vmatpush.bf16.msrb.mxu3 %v29853_v46  ;;  %v904_v8 = vpack.c.bf16 %v368_v3, %v368_v3  ;;  %v29934_v3 = vld [vmem:[#allocation5 + $0x2468] sm:$0xff] }
 0x43f   :  { %18999 = vmatpush.bf16.msrb.mxu0 %v29828_v47  ;;  %v29867_v47 = vld [vmem:[#allocation5 + $0x2250] sm:$0xff] }
 0x440   :  { %19012 = vmatpush.bf16.msrb.mxu1 %v29836_v48  ;;  %v29875_v48 = vld [vmem:[#allocation5 + $0x2290] sm:$0xff] }
 0x441   :  { %19025 = vmatpush.bf16.msrb.mxu2 %v29844_v49  ;;  %v29883_v49 = vld [vmem:[#allocation5 + $0x22d0] sm:$0xff] }
 0x442   :  { %19038 = vmatpush.bf16.msrb.mxu3 %v29852_v52  ;;  %v29866_v52 = vld [vmem:[#allocation5 + $0x2248] sm:$0xff] }
 0x443   :  { %19000 = vmatpush.bf16.msrb.mxu0 %v29827_v56 }
 0x444   :  { %19013 = vmatpush.bf16.msrb.mxu1 %v29835_v58  ;;  %v29865_v58 = vld [vmem:[#allocation5 + $0x2240] sm:$0xff] }
 0x445   :  { %19026 = vmatpush.bf16.msrb.mxu2 %v29843_v59  ;;  %v29873_v59 = vld [vmem:[#allocation5 + $0x2280] sm:$0xff] }
 0x446   :  { %19039 = vmatpush.bf16.msrb.mxu3 %v29851_v60  ;;  %v365_v60 = vld.sshfl [vmem:[#allocation1] sm:$0xff pattern:$0x73625140] }
 0x447   :  { %19001 = vmatpush.bf16.msrb.mxu0 %v29826_v61  ;;  %v367_v61 = vld.sshfl [vmem:[#allocation1 + $0x10] sm:$0xff pattern:$0x73625140] }
 0x448   :  { %19014 = vmatpush.bf16.msrb.mxu1 %v29834_v63  ;;  %v29904_v63 = vld [vmem:[#allocation5 + $0x2378] sm:$0xff] }
 0x449   :  { %19027 = vmatpush.bf16.msrb.mxu2 %v29842_v0  ;;  %v366_v0 = vld.sshfl [vmem:[#allocation1 + $0x8] sm:$0xff pattern:$0x73625140] }
 0x44a   :  { %19040 = vmatpush.bf16.msrb.mxu3 %v29850_v2  ;;  %v29881_v2 = vld [vmem:[#allocation5 + $0x22c0] sm:$0xff]  ;;  %v902_v7 = vpack.c.bf16 %v366_v0, %v366_v0  ;;  %v29943_v0 = vld [vmem:[#allocation5 + $0x24b0] sm:$0xff] }
 0x44b   :  { %19002 = vmatpush.bf16.msrb.mxu0 %v29825_v4  ;;  %v18796_v28 = vpop.f32.mrf.mxu0  ;;  %v901_v4 = vpack.c.bf16 %v365_v60, %v365_v60 }
 0x44c   :  { %19015 = vmatpush.bf16.msrb.mxu1 %v29833_v5  ;;  %v18797_v29 = vadd.f32 %v18796_v28, %v31037_v55  ;;  %v18809_v31 = vpop.f32.mrf.mxu1  ;;  %v29882_v55 = vld [vmem:[#allocation5 + $0x22c8] sm:$0xff]  ;;  %v903_v5 = vpack.c.bf16 %v367_v61, %v367_v61 }
 0x44d   :  { %19028 = vmatpush.bf16.msrb.mxu2 %v29841_v6  ;;  %v29920_v6 = vld [vmem:[#allocation5 + $0x23f8] sm:$0xff] }
 0x44e   :  { %19041 = vmatpush.bf16.msrb.mxu3 %v29849_v13  ;;  %19003 = vmatmul.bf16.vlgmr.msrb.gmra.mxu0 %v897_v15  ;;  %v18810_v34 = vadd.f32 %v18809_v31, %v18797_v29  ;;  %v29894_v13 = vld [vmem:[#allocation5 + $0x2328] sm:$0xff] }
 0x44f   :  { %19047 = vmatpush.bf16.msra.mxu0 %v29864_v9  ;;  %19016 = vmatmul.bf16.vlgmr.msrb.gmra.mxu1 %v898_v18  ;;  %v29895_v9 = vld [vmem:[#allocation5 + $0x2330] sm:$0xff]  ;;  %v29910_v15 = vld [vmem:[#allocation5 + $0x23a8] sm:$0xff] }
 0x450   :  { %19060 = vmatpush.bf16.msra.mxu1 %v29872_v10  ;;  %19029 = vmatmul.bf16.vlgmr.msrb.gmra.mxu2 %v899_v16  ;;  %v29903_v10 = vld [vmem:[#allocation5 + $0x2370] sm:$0xff]  ;;  %v29918_v16 = vld [vmem:[#allocation5 + $0x23e8] sm:$0xff] }
 0x451   :  { %19073 = vmatpush.bf16.msra.mxu2 %v29880_v12  ;;  %19042 = vmatmul.bf16.vlgmr.msrb.gmra.mxu3 %v900_v19  ;;  %v29919_v12 = vld [vmem:[#allocation5 + $0x23f0] sm:$0xff]  ;;  %v29893_v19 = vld [vmem:[#allocation5 + $0x2320] sm:$0xff] }
 0x452   :  { %19086 = vmatpush.bf16.msra.mxu3 %v29888_v17 }
 0x453   :  { %19048 = vmatpush.bf16.msra.mxu0 %v29863_v20  ;;  %v18822_v39 = vpop.f32.mrf.mxu2  ;;  %v18798_v43 = vpop.f32.mrf.mxu0 }
 0x454   :  { %19061 = vmatpush.bf16.msra.mxu1 %v29871_v21  ;;  %v18823_v40 = vadd.f32 %v18822_v39, %v18810_v34  ;;  %v18835_v42 = vpop.f32.mrf.mxu3  ;;  %v18811_v46 = vpop.f32.mrf.mxu1  ;;  %v29901_v21 = vld [vmem:[#allocation5 + $0x2360] sm:$0xff]  ;;  %v29891_v34 = vld [vmem:[#allocation5 + $0x2310] sm:$0xff]  ;;  %v29890_v39 = vld [vmem:[#allocation5 + $0x2308] sm:$0xff] }
 0x455   :  { %19074 = vmatpush.bf16.msra.mxu2 %v29879_v22  ;;  %v29909_v22 = vld [vmem:[#allocation5 + $0x23a0] sm:$0xff] }
 0x456   :  { %19087 = vmatpush.bf16.msra.mxu3 %v29887_v23  ;;  %v31040_v44 = vadd.f32 %v18835_v42, %v18823_v40  ;;  %v100_v40 = vld [vmem:[#allocation2 + $0x120] sm:$0xff] }
 0x457   :  { %19049 = vmatpush.bf16.msra.mxu0 %v29862_v24  ;;  %v29917_v24 = vld [vmem:[#allocation5 + $0x23e0] sm:$0xff]  ;;  %v29906_v42 = vld [vmem:[#allocation5 + $0x2388] sm:$0xff]  ;;  %373 = vst [vmem:[#allocation1] ss:$4 sm:$0xff] %v100_v40  ;;  %v29960_v40 = vld [vmem:[#allocation5 + $0x2538] sm:$0xff] }
 0x458   :  { %19062 = vmatpush.bf16.msra.mxu1 %v29870_v25  ;;  %v29892_v25 = vld [vmem:[#allocation5 + $0x2318] sm:$0xff]  ;;  %v29889_v46 = vld [vmem:[#allocation5 + $0x2300] sm:$0xff] }
 0x459   :  { %19075 = vmatpush.bf16.msra.mxu2 %v29878_v26  ;;  %v29900_v26 = vld [vmem:[#allocation5 + $0x2358] sm:$0xff] }
 0x45a   :  { %19088 = vmatpush.bf16.msra.mxu3 %v29886_v27  ;;  %v29908_v27 = vld [vmem:[#allocation5 + $0x2398] sm:$0xff] }
 0x45b   :  { %19050 = vmatpush.bf16.msra.mxu0 %v29861_v30  ;;  %v18824_v54 = vpop.f32.mrf.mxu2  ;;  %v29916_v30 = vld [vmem:[#allocation5 + $0x23d8] sm:$0xff] }
 0x45c   :  { %19063 = vmatpush.bf16.msra.mxu1 %v29869_v32  ;;  %v18837_v56 = vpop.f32.mrf.mxu3  ;;  %v29944_v54 = vld [vmem:[#allocation5 + $0x24b8] sm:$0xff] }
 0x45d   :  { %19076 = vmatpush.bf16.msra.mxu2 %v29877_v33  ;;  %v372_v56 = vld.sshfl [vmem:[#allocation1 + $0x38] sm:$0xff pattern:$0x73625140] }
 0x45e   :  { %19089 = vmatpush.bf16.msra.mxu3 %v29885_v35  ;;  %v908_v61 = vpack.c.bf16 %v372_v56, %v372_v56  ;;  %v29966_v56 = vld [vmem:[#allocation5 + $0x2568] sm:$0xff] }
 0x45f   :  { %19051 = vmatpush.bf16.msra.mxu0 %v29860_v36  ;;  %v29899_v36 = vld [vmem:[#allocation5 + $0x2350] sm:$0xff] }
 0x460   :  { %19064 = vmatpush.bf16.msra.mxu1 %v29868_v37  ;;  %v29907_v37 = vld [vmem:[#allocation5 + $0x2390] sm:$0xff] }
 0x461   :  { %19077 = vmatpush.bf16.msra.mxu2 %v29876_v38  ;;  %v29915_v38 = vld [vmem:[#allocation5 + $0x23d0] sm:$0xff] }
 0x462   :  { %19090 = vmatpush.bf16.msra.mxu3 %v29884_v41  ;;  %v29898_v41 = vld [vmem:[#allocation5 + $0x2348] sm:$0xff] }
 0x463   :  { %19052 = vmatpush.bf16.msra.mxu0 %v29859_v45 }
 0x464   :  { %19065 = vmatpush.bf16.msra.mxu1 %v29867_v47  ;;  %v29897_v47 = vld [vmem:[#allocation5 + $0x2340] sm:$0xff] }
 0x465   :  { %19078 = vmatpush.bf16.msra.mxu2 %v29875_v48  ;;  %v29905_v48 = vld [vmem:[#allocation5 + $0x2380] sm:$0xff] }
 0x466   :  { %19091 = vmatpush.bf16.msra.mxu3 %v29883_v49  ;;  %v369_v49 = vld.sshfl [vmem:[#allocation1 + $0x20] sm:$0xff pattern:$0x73625140] }
 0x467   :  { %19053 = vmatpush.bf16.msra.mxu0 %v29858_v50  ;;  %v371_v50 = vld.sshfl [vmem:[#allocation1 + $0x30] sm:$0xff pattern:$0x73625140] }
 0x468   :  { %19066 = vmatpush.bf16.msra.mxu1 %v29866_v52  ;;  %v29936_v52 = vld [vmem:[#allocation5 + $0x2478] sm:$0xff] }
 0x469   :  { %19079 = vmatpush.bf16.msra.mxu2 %v29874_v53  ;;  %v370_v53 = vld.sshfl [vmem:[#allocation1 + $0x28] sm:$0xff pattern:$0x73625140] }
 0x46a   :  { %19092 = vmatpush.bf16.msra.mxu3 %v29882_v55  ;;  %v29913_v55 = vld [vmem:[#allocation5 + $0x23c0] sm:$0xff]  ;;  %v906_v60 = vpack.c.bf16 %v370_v53, %v370_v53  ;;  %v29975_v53 = vld [vmem:[#allocation5 + $0x25b0] sm:$0xff] }
 0x46b   :  { %19054 = vmatpush.bf16.msra.mxu0 %v29857_v57  ;;  %v18848_v17 = vpop.f32.mrf.mxu0  ;;  %v905_v57 = vpack.c.bf16 %v369_v49, %v369_v49 }
 0x46c   :  { %19067 = vmatpush.bf16.msra.mxu1 %v29865_v58  ;;  %v18849_v18 = vadd.f32 %v18848_v17, %v31040_v44  ;;  %v18861_v20 = vpop.f32.mrf.mxu1  ;;  %v29914_v44 = vld [vmem:[#allocation5 + $0x23c8] sm:$0xff]  ;;  %v907_v58 = vpack.c.bf16 %v371_v50, %v371_v50 }
 0x46d   :  { %19080 = vmatpush.bf16.msra.mxu2 %v29873_v59  ;;  %v29952_v59 = vld [vmem:[#allocation5 + $0x24f8] sm:$0xff] }
 0x46e   :  { %19093 = vmatpush.bf16.msra.mxu3 %v29881_v2  ;;  %19055 = vmatmul.bf16.vlgmr.msra.gmra.mxu0 %v901_v4  ;;  %v18862_v23 = vadd.f32 %v18861_v20, %v18849_v18  ;;  %v29926_v2 = vld [vmem:[#allocation5 + $0x2428] sm:$0xff] }
 0x46f   :  { %19099 = vmatpush.bf16.msrb.mxu0 %v29896_v62  ;;  %19068 = vmatmul.bf16.vlgmr.msra.gmra.mxu1 %v902_v7  ;;  %v29927_v62 = vld [vmem:[#allocation5 + $0x2430] sm:$0xff]  ;;  %v29942_v4 = vld [vmem:[#allocation5 + $0x24a8] sm:$0xff] }
 0x470   :  { %19112 = vmatpush.bf16.msrb.mxu1 %v29904_v63  ;;  %19081 = vmatmul.bf16.vlgmr.msra.gmra.mxu2 %v903_v5  ;;  %v29935_v63 = vld [vmem:[#allocation5 + $0x2470] sm:$0xff]  ;;  %v29950_v5 = vld [vmem:[#allocation5 + $0x24e8] sm:$0xff] }
 0x471   :  { %19125 = vmatpush.bf16.msrb.mxu2 %v29912_v1  ;;  %19094 = vmatmul.bf16.vlgmr.msra.gmra.mxu3 %v904_v8  ;;  %v29951_v1 = vld [vmem:[#allocation5 + $0x24f0] sm:$0xff]  ;;  %v29925_v8 = vld [vmem:[#allocation5 + $0x2420] sm:$0xff] }
 0x472   :  { %19138 = vmatpush.bf16.msrb.mxu3 %v29920_v6 }
 0x473   :  { %19100 = vmatpush.bf16.msrb.mxu0 %v29895_v9  ;;  %v18874_v28 = vpop.f32.mrf.mxu2  ;;  %v18850_v32 = vpop.f32.mrf.mxu0 }
 0x474   :  { %19113 = vmatpush.bf16.msrb.mxu1 %v29903_v10  ;;  %v18875_v29 = vadd.f32 %v18874_v28, %v18862_v23  ;;  %v18887_v31 = vpop.f32.mrf.mxu3  ;;  %v18863_v35 = vpop.f32.mrf.mxu1  ;;  %v29933_v10 = vld [vmem:[#allocation5 + $0x2460] sm:$0xff]  ;;  %v29923_v23 = vld [vmem:[#allocation5 + $0x2410] sm:$0xff]  ;;  %v29922_v28 = vld [vmem:[#allocation5 + $0x2408] sm:$0xff] }
 0x475   :  { %19126 = vmatpush.bf16.msrb.mxu2 %v29911_v11  ;;  %v29941_v11 = vld [vmem:[#allocation5 + $0x24a0] sm:$0xff] }
 0x476   :  { %19139 = vmatpush.bf16.msrb.mxu3 %v29919_v12  ;;  %v31043_v33 = vadd.f32 %v18887_v31, %v18875_v29  ;;  %v101_v29 = vld [vmem:[#allocation2 + $0x128] sm:$0xff]  ;;  %v29921_v35 = vld [vmem:[#allocation5 + $0x2400] sm:$0xff] }
 0x477   :  { %19101 = vmatpush.bf16.msrb.mxu0 %v29894_v13  ;;  %v29949_v13 = vld [vmem:[#allocation5 + $0x24e0] sm:$0xff]  ;;  %v29938_v31 = vld [vmem:[#allocation5 + $0x2488] sm:$0xff]  ;;  %374 = vst [vmem:[#allocation1 + $0x20] ss:$4 sm:$0xff] %v101_v29  ;;  %v29992_v29 = vld [vmem:[#allocation5 + $0x2638] sm:$0xff] }
 0x478   :  { %19114 = vmatpush.bf16.msrb.mxu1 %v29902_v14  ;;  %v29924_v14 = vld [vmem:[#allocation5 + $0x2418] sm:$0xff] }
 0x479   :  { %19127 = vmatpush.bf16.msrb.mxu2 %v29910_v15  ;;  %v29932_v15 = vld [vmem:[#allocation5 + $0x2458] sm:$0xff] }
 0x47a   :  { %19140 = vmatpush.bf16.msrb.mxu3 %v29918_v16  ;;  %v29940_v16 = vld [vmem:[#allocation5 + $0x2498] sm:$0xff] }
 0x47b   :  { %19102 = vmatpush.bf16.msrb.mxu0 %v29893_v19  ;;  %v18876_v43 = vpop.f32.mrf.mxu2  ;;  %v29948_v19 = vld [vmem:[#allocation5 + $0x24d8] sm:$0xff] }
 0x47c   :  { %19115 = vmatpush.bf16.msrb.mxu1 %v29901_v21  ;;  %v18889_v45 = vpop.f32.mrf.mxu3  ;;  %v29976_v43 = vld [vmem:[#allocation5 + $0x25b8] sm:$0xff] }
 0x47d   :  { %19128 = vmatpush.bf16.msrb.mxu2 %v29909_v22  ;;  %v378_v45 = vld.sshfl [vmem:[#allocation1 + $0x18] sm:$0xff pattern:$0x73625140] }
 0x47e   :  { %19141 = vmatpush.bf16.msrb.mxu3 %v29917_v24  ;;  %v912_v50 = vpack.c.bf16 %v378_v45, %v378_v45  ;;  %v29998_v45 = vld [vmem:[#allocation5 + $0x2668] sm:$0xff] }
 0x47f   :  { %19103 = vmatpush.bf16.msrb.mxu0 %v29892_v25  ;;  %v29931_v25 = vld [vmem:[#allocation5 + $0x2450] sm:$0xff] }
 0x480   :  { %19116 = vmatpush.bf16.msrb.mxu1 %v29900_v26  ;;  %v29939_v26 = vld [vmem:[#allocation5 + $0x2490] sm:$0xff] }
 0x481   :  { %19129 = vmatpush.bf16.msrb.mxu2 %v29908_v27  ;;  %v29947_v27 = vld [vmem:[#allocation5 + $0x24d0] sm:$0xff] }
 0x482   :  { %19142 = vmatpush.bf16.msrb.mxu3 %v29916_v30  ;;  %v29930_v30 = vld [vmem:[#allocation5 + $0x2448] sm:$0xff] }
 0x483   :  { %19104 = vmatpush.bf16.msrb.mxu0 %v29891_v34 }
 0x484   :  { %19117 = vmatpush.bf16.msrb.mxu1 %v29899_v36  ;;  %v29929_v36 = vld [vmem:[#allocation5 + $0x2440] sm:$0xff] }
 0x485   :  { %19130 = vmatpush.bf16.msrb.mxu2 %v29907_v37  ;;  %v29937_v37 = vld [vmem:[#allocation5 + $0x2480] sm:$0xff] }
 0x486   :  { %19143 = vmatpush.bf16.msrb.mxu3 %v29915_v38  ;;  %v375_v38 = vld.sshfl [vmem:[#allocation1] sm:$0xff pattern:$0x73625140] }
 0x487   :  { %19105 = vmatpush.bf16.msrb.mxu0 %v29890_v39  ;;  %v377_v39 = vld.sshfl [vmem:[#allocation1 + $0x10] sm:$0xff pattern:$0x73625140] }
 0x488   :  { %19118 = vmatpush.bf16.msrb.mxu1 %v29898_v41  ;;  %v29968_v41 = vld [vmem:[#allocation5 + $0x2578] sm:$0xff] }
 0x489   :  { %19131 = vmatpush.bf16.msrb.mxu2 %v29906_v42  ;;  %v376_v42 = vld.sshfl [vmem:[#allocation1 + $0x8] sm:$0xff pattern:$0x73625140] }
 0x48a   :  { %19144 = vmatpush.bf16.msrb.mxu3 %v29914_v44  ;;  %v29945_v44 = vld [vmem:[#allocation5 + $0x24c0] sm:$0xff]  ;;  %v910_v49 = vpack.c.bf16 %v376_v42, %v376_v42  ;;  %v30007_v42 = vld [vmem:[#allocation5 + $0x26b0] sm:$0xff] }
 0x48b   :  { %19106 = vmatpush.bf16.msrb.mxu0 %v29889_v46  ;;  %v18900_v6 = vpop.f32.mrf.mxu0  ;;  %v909_v46 = vpack.c.bf16 %v375_v38, %v375_v38 }
 0x48c   :  { %19119 = vmatpush.bf16.msrb.mxu1 %v29897_v47  ;;  %v18901_v7 = vadd.f32 %v18900_v6, %v31043_v33  ;;  %v18913_v9 = vpop.f32.mrf.mxu1  ;;  %v29946_v33 = vld [vmem:[#allocation5 + $0x24c8] sm:$0xff]  ;;  %v911_v47 = vpack.c.bf16 %v377_v39, %v377_v39 }
 0x48d   :  { %19132 = vmatpush.bf16.msrb.mxu2 %v29905_v48  ;;  %v29984_v48 = vld [vmem:[#allocation5 + $0x25f8] sm:$0xff] }
 0x48e   :  { %19145 = vmatpush.bf16.msrb.mxu3 %v29913_v55  ;;  %19107 = vmatmul.bf16.vlgmr.msrb.gmra.mxu0 %v905_v57  ;;  %v18914_v12 = vadd.f32 %v18913_v9, %v18901_v7  ;;  %v29958_v55 = vld [vmem:[#allocation5 + $0x2528] sm:$0xff] }
 0x48f   :  { %19151 = vmatpush.bf16.msra.mxu0 %v29928_v51  ;;  %19120 = vmatmul.bf16.vlgmr.msrb.gmra.mxu1 %v906_v60  ;;  %v29959_v51 = vld [vmem:[#allocation5 + $0x2530] sm:$0xff]  ;;  %v29974_v57 = vld [vmem:[#allocation5 + $0x25a8] sm:$0xff] }
 0x490   :  { %19164 = vmatpush.bf16.msra.mxu1 %v29936_v52  ;;  %19133 = vmatmul.bf16.vlgmr.msrb.gmra.mxu2 %v907_v58  ;;  %v29967_v52 = vld [vmem:[#allocation5 + $0x2570] sm:$0xff]  ;;  %v29982_v58 = vld [vmem:[#allocation5 + $0x25e8] sm:$0xff] }
 0x491   :  { %19177 = vmatpush.bf16.msra.mxu2 %v29944_v54  ;;  %19146 = vmatmul.bf16.vlgmr.msrb.gmra.mxu3 %v908_v61  ;;  %v29983_v54 = vld [vmem:[#allocation5 + $0x25f0] sm:$0xff]  ;;  %v29957_v61 = vld [vmem:[#allocation5 + $0x2520] sm:$0xff] }
 0x492   :  { %19190 = vmatpush.bf16.msra.mxu3 %v29952_v59 }
 0x493   :  { %19152 = vmatpush.bf16.msra.mxu0 %v29927_v62  ;;  %v18926_v17 = vpop.f32.mrf.mxu2  ;;  %v18902_v21 = vpop.f32.mrf.mxu0 }
 0x494   :  { %19165 = vmatpush.bf16.msra.mxu1 %v29935_v63  ;;  %v18927_v18 = vadd.f32 %v18926_v17, %v18914_v12  ;;  %v18939_v20 = vpop.f32.mrf.mxu3  ;;  %v18915_v24 = vpop.f32.mrf.mxu1  ;;  %v29965_v63 = vld [vmem:[#allocation5 + $0x2560] sm:$0xff]  ;;  %v29955_v12 = vld [vmem:[#allocation5 + $0x2510] sm:$0xff]  ;;  %v29954_v17 = vld [vmem:[#allocation5 + $0x2508] sm:$0xff] }
 0x495   :  { %19178 = vmatpush.bf16.msra.mxu2 %v29943_v0  ;;  %v29973_v0 = vld [vmem:[#allocation5 + $0x25a0] sm:$0xff] }
 0x496   :  { %19191 = vmatpush.bf16.msra.mxu3 %v29951_v1  ;;  %v31046_v22 = vadd.f32 %v18939_v20, %v18927_v18  ;;  %v102_v18 = vld [vmem:[#allocation2 + $0x130] sm:$0xff]  ;;  %v29970_v20 = vld [vmem:[#allocation5 + $0x2588] sm:$0xff]  ;;  %v29953_v24 = vld [vmem:[#allocation5 + $0x2500] sm:$0xff] }
 0x497   :  { %19153 = vmatpush.bf16.msra.mxu0 %v29926_v2  ;;  %v29981_v2 = vld [vmem:[#allocation5 + $0x25e0] sm:$0xff]  ;;  %383 = vst [vmem:[#allocation1] ss:$4 sm:$0xff] %v102_v18  ;;  %v30024_v18 = vld [vmem:[#allocation5 + $0x2738] sm:$0xff] }
 0x498   :  { %19166 = vmatpush.bf16.msra.mxu1 %v29934_v3  ;;  %v29956_v3 = vld [vmem:[#allocation5 + $0x2518] sm:$0xff] }
 0x499   :  { %19179 = vmatpush.bf16.msra.mxu2 %v29942_v4  ;;  %v29964_v4 = vld [vmem:[#allocation5 + $0x2558] sm:$0xff] }
 0x49a   :  { %19192 = vmatpush.bf16.msra.mxu3 %v29950_v5  ;;  %v29972_v5 = vld [vmem:[#allocation5 + $0x2598] sm:$0xff] }
 0x49b   :  { %19154 = vmatpush.bf16.msra.mxu0 %v29925_v8  ;;  %v18928_v32 = vpop.f32.mrf.mxu2  ;;  %v29980_v8 = vld [vmem:[#allocation5 + $0x25d8] sm:$0xff] }
 0x49c   :  { %19167 = vmatpush.bf16.msra.mxu1 %v29933_v10  ;;  %v18941_v34 = vpop.f32.mrf.mxu3  ;;  %v30008_v32 = vld [vmem:[#allocation5 + $0x26b8] sm:$0xff] }
 0x49d   :  { %19180 = vmatpush.bf16.msra.mxu2 %v29941_v11  ;;  %v382_v34 = vld.sshfl [vmem:[#allocation1 + $0x38] sm:$0xff pattern:$0x73625140] }
 0x49e   :  { %19193 = vmatpush.bf16.msra.mxu3 %v29949_v13  ;;  %v916_v39 = vpack.c.bf16 %v382_v34, %v382_v34  ;;  %v30030_v34 = vld [vmem:[#allocation5 + $0x2768] sm:$0xff] }
 0x49f   :  { %19155 = vmatpush.bf16.msra.mxu0 %v29924_v14  ;;  %v29963_v14 = vld [vmem:[#allocation5 + $0x2550] sm:$0xff] }
 0x4a0   :  { %19168 = vmatpush.bf16.msra.mxu1 %v29932_v15  ;;  %v29971_v15 = vld [vmem:[#allocation5 + $0x2590] sm:$0xff] }
 0x4a1   :  { %19181 = vmatpush.bf16.msra.mxu2 %v29940_v16  ;;  %v29979_v16 = vld [vmem:[#allocation5 + $0x25d0] sm:$0xff] }
 0x4a2   :  { %19194 = vmatpush.bf16.msra.mxu3 %v29948_v19  ;;  %v29962_v19 = vld [vmem:[#allocation5 + $0x2548] sm:$0xff] }
 0x4a3   :  { %19156 = vmatpush.bf16.msra.mxu0 %v29923_v23 }
 0x4a4   :  { %19169 = vmatpush.bf16.msra.mxu1 %v29931_v25  ;;  %v29961_v25 = vld [vmem:[#allocation5 + $0x2540] sm:$0xff] }
 0x4a5   :  { %19182 = vmatpush.bf16.msra.mxu2 %v29939_v26  ;;  %v29969_v26 = vld [vmem:[#allocation5 + $0x2580] sm:$0xff] }
 0x4a6   :  { %19195 = vmatpush.bf16.msra.mxu3 %v29947_v27  ;;  %v379_v27 = vld.sshfl [vmem:[#allocation1 + $0x20] sm:$0xff pattern:$0x73625140] }
 0x4a7   :  { %19157 = vmatpush.bf16.msra.mxu0 %v29922_v28  ;;  %v381_v28 = vld.sshfl [vmem:[#allocation1 + $0x30] sm:$0xff pattern:$0x73625140] }
 0x4a8   :  { %19170 = vmatpush.bf16.msra.mxu1 %v29930_v30  ;;  %v30000_v30 = vld [vmem:[#allocation5 + $0x2678] sm:$0xff] }
 0x4a9   :  { %19183 = vmatpush.bf16.msra.mxu2 %v29938_v31  ;;  %v380_v31 = vld.sshfl [vmem:[#allocation1 + $0x28] sm:$0xff pattern:$0x73625140] }
 0x4aa   :  { %19196 = vmatpush.bf16.msra.mxu3 %v29946_v33  ;;  %v29977_v33 = vld [vmem:[#allocation5 + $0x25c0] sm:$0xff]  ;;  %v914_v38 = vpack.c.bf16 %v380_v31, %v380_v31  ;;  %v30039_v31 = vld [vmem:[#allocation5 + $0x27b0] sm:$0xff] }
 0x4ab   :  { %19158 = vmatpush.bf16.msra.mxu0 %v29921_v35  ;;  %v18952_v59 = vpop.f32.mrf.mxu0  ;;  %v913_v35 = vpack.c.bf16 %v379_v27, %v379_v27 }
 0x4ac   :  { %19171 = vmatpush.bf16.msra.mxu1 %v29929_v36  ;;  %v18953_v60 = vadd.f32 %v18952_v59, %v31046_v22  ;;  %v18965_v62 = vpop.f32.mrf.mxu1  ;;  %v29978_v22 = vld [vmem:[#allocation5 + $0x25c8] sm:$0xff]  ;;  %v915_v36 = vpack.c.bf16 %v381_v28, %v381_v28 }
 0x4ad   :  { %19184 = vmatpush.bf16.msra.mxu2 %v29937_v37  ;;  %v30016_v37 = vld [vmem:[#allocation5 + $0x26f8] sm:$0xff] }
 0x4ae   :  { %19197 = vmatpush.bf16.msra.mxu3 %v29945_v44  ;;  %19159 = vmatmul.bf16.vlgmr.msra.gmra.mxu0 %v909_v46  ;;  %v18966_v1 = vadd.f32 %v18965_v62, %v18953_v60  ;;  %v29990_v44 = vld [vmem:[#allocation5 + $0x2628] sm:$0xff] }
 0x4af   :  { %19203 = vmatpush.bf16.msrb.mxu0 %v29960_v40  ;;  %19172 = vmatmul.bf16.vlgmr.msra.gmra.mxu1 %v910_v49  ;;  %v29991_v40 = vld [vmem:[#allocation5 + $0x2630] sm:$0xff]  ;;  %v30006_v46 = vld [vmem:[#allocation5 + $0x26a8] sm:$0xff] }
 0x4b0   :  { %19216 = vmatpush.bf16.msrb.mxu1 %v29968_v41  ;;  %19185 = vmatmul.bf16.vlgmr.msra.gmra.mxu2 %v911_v47  ;;  %v29999_v41 = vld [vmem:[#allocation5 + $0x2670] sm:$0xff]  ;;  %v30014_v47 = vld [vmem:[#allocation5 + $0x26e8] sm:$0xff] }
 0x4b1   :  { %19229 = vmatpush.bf16.msrb.mxu2 %v29976_v43  ;;  %19198 = vmatmul.bf16.vlgmr.msra.gmra.mxu3 %v912_v50  ;;  %v30015_v43 = vld [vmem:[#allocation5 + $0x26f0] sm:$0xff]  ;;  %v29989_v50 = vld [vmem:[#allocation5 + $0x2620] sm:$0xff] }
 0x4b2   :  { %19242 = vmatpush.bf16.msrb.mxu3 %v29984_v48 }
 0x4b3   :  { %19204 = vmatpush.bf16.msrb.mxu0 %v29959_v51  ;;  %v18978_v6 = vpop.f32.mrf.mxu2  ;;  %v18954_v10 = vpop.f32.mrf.mxu0 }
 0x4b4   :  { %19217 = vmatpush.bf16.msrb.mxu1 %v29967_v52  ;;  %v18979_v7 = vadd.f32 %v18978_v6, %v18966_v1  ;;  %v18991_v9 = vpop.f32.mrf.mxu3  ;;  %v18967_v13 = vpop.f32.mrf.mxu1  ;;  %v29997_v52 = vld [vmem:[#allocation5 + $0x2660] sm:$0xff]  ;;  %v29987_v1 = vld [vmem:[#allocation5 + $0x2610] sm:$0xff]  ;;  %v29986_v6 = vld [vmem:[#allocation5 + $0x2608] sm:$0xff] }
 0x4b5   :  { %19230 = vmatpush.bf16.msrb.mxu2 %v29975_v53  ;;  %v30005_v53 = vld [vmem:[#allocation5 + $0x26a0] sm:$0xff] }
 0x4b6   :  { %19243 = vmatpush.bf16.msrb.mxu3 %v29983_v54  ;;  %v31049_v11 = vadd.f32 %v18991_v9, %v18979_v7  ;;  %v103_v7 = vld [vmem:[#allocation2 + $0x138] sm:$0xff]  ;;  %v30002_v9 = vld [vmem:[#allocation5 + $0x2688] sm:$0xff] }
 0x4b7   :  { %19205 = vmatpush.bf16.msrb.mxu0 %v29958_v55  ;;  %v30013_v55 = vld [vmem:[#allocation5 + $0x26e0] sm:$0xff]  ;;  %384 = vst [vmem:[#allocation1 + $0x20] ss:$4 sm:$0xff] %v103_v7  ;;  %v30056_v7 = vld [vmem:[#allocation5 + $0x2838] sm:$0xff] }
 0x4b8   :  { %19218 = vmatpush.bf16.msrb.mxu1 %v29966_v56  ;;  %v29988_v56 = vld [vmem:[#allocation5 + $0x2618] sm:$0xff]  ;;  %v29985_v13 = vld [vmem:[#allocation5 + $0x2600] sm:$0xff] }
 0x4b9   :  { %19231 = vmatpush.bf16.msrb.mxu2 %v29974_v57  ;;  %v29996_v57 = vld [vmem:[#allocation5 + $0x2658] sm:$0xff] }
 0x4ba   :  { %19244 = vmatpush.bf16.msrb.mxu3 %v29982_v58  ;;  %v30004_v58 = vld [vmem:[#allocation5 + $0x2698] sm:$0xff] }
 0x4bb   :  { %19206 = vmatpush.bf16.msrb.mxu0 %v29957_v61  ;;  %v18980_v21 = vpop.f32.mrf.mxu2  ;;  %v30012_v61 = vld [vmem:[#allocation5 + $0x26d8] sm:$0xff] }
 0x4bc   :  { %19219 = vmatpush.bf16.msrb.mxu1 %v29965_v63  ;;  %v18993_v23 = vpop.f32.mrf.mxu3  ;;  %v30040_v21 = vld [vmem:[#allocation5 + $0x27b8] sm:$0xff] }
 0x4bd   :  { %19232 = vmatpush.bf16.msrb.mxu2 %v29973_v0  ;;  %v388_v23 = vld.sshfl [vmem:[#allocation1 + $0x18] sm:$0xff pattern:$0x73625140] }
 0x4be   :  { %19245 = vmatpush.bf16.msrb.mxu3 %v29981_v2  ;;  %v920_v28 = vpack.c.bf16 %v388_v23, %v388_v23  ;;  %v30062_v23 = vld [vmem:[#allocation5 + $0x2868] sm:$0xff] }
 0x4bf   :  { %19207 = vmatpush.bf16.msrb.mxu0 %v29956_v3  ;;  %v29995_v3 = vld [vmem:[#allocation5 + $0x2650] sm:$0xff] }
 0x4c0   :  { %19220 = vmatpush.bf16.msrb.mxu1 %v29964_v4  ;;  %v30003_v4 = vld [vmem:[#allocation5 + $0x2690] sm:$0xff] }
 0x4c1   :  { %19233 = vmatpush.bf16.msrb.mxu2 %v29972_v5  ;;  %v30011_v5 = vld [vmem:[#allocation5 + $0x26d0] sm:$0xff] }
 0x4c2   :  { %19246 = vmatpush.bf16.msrb.mxu3 %v29980_v8  ;;  %v29994_v8 = vld [vmem:[#allocation5 + $0x2648] sm:$0xff] }
 0x4c3   :  { %19208 = vmatpush.bf16.msrb.mxu0 %v29955_v12 }
 0x4c4   :  { %19221 = vmatpush.bf16.msrb.mxu1 %v29963_v14  ;;  %v29993_v14 = vld [vmem:[#allocation5 + $0x2640] sm:$0xff] }
 0x4c5   :  { %19234 = vmatpush.bf16.msrb.mxu2 %v29971_v15  ;;  %v30001_v15 = vld [vmem:[#allocation5 + $0x2680] sm:$0xff] }
 0x4c6   :  { %19247 = vmatpush.bf16.msrb.mxu3 %v29979_v16  ;;  %v385_v16 = vld.sshfl [vmem:[#allocation1] sm:$0xff pattern:$0x73625140] }
 0x4c7   :  { %19209 = vmatpush.bf16.msrb.mxu0 %v29954_v17  ;;  %v387_v17 = vld.sshfl [vmem:[#allocation1 + $0x10] sm:$0xff pattern:$0x73625140] }
 0x4c8   :  { %19222 = vmatpush.bf16.msrb.mxu1 %v29962_v19  ;;  %v30032_v19 = vld [vmem:[#allocation5 + $0x2778] sm:$0xff] }
 0x4c9   :  { %19235 = vmatpush.bf16.msrb.mxu2 %v29970_v20  ;;  %v386_v20 = vld.sshfl [vmem:[#allocation1 + $0x8] sm:$0xff pattern:$0x73625140] }
 0x4ca   :  { %19248 = vmatpush.bf16.msrb.mxu3 %v29978_v22  ;;  %v30009_v22 = vld [vmem:[#allocation5 + $0x26c0] sm:$0xff]  ;;  %v918_v27 = vpack.c.bf16 %v386_v20, %v386_v20  ;;  %v30071_v20 = vld [vmem:[#allocation5 + $0x28b0] sm:$0xff] }
 0x4cb   :  { %19210 = vmatpush.bf16.msrb.mxu0 %v29953_v24  ;;  %v19004_v48 = vpop.f32.mrf.mxu0  ;;  %v917_v24 = vpack.c.bf16 %v385_v16, %v385_v16 }
 0x4cc   :  { %19223 = vmatpush.bf16.msrb.mxu1 %v29961_v25  ;;  %v19005_v49 = vadd.f32 %v19004_v48, %v31049_v11  ;;  %v19017_v51 = vpop.f32.mrf.mxu1  ;;  %v30010_v11 = vld [vmem:[#allocation5 + $0x26c8] sm:$0xff]  ;;  %v919_v25 = vpack.c.bf16 %v387_v17, %v387_v17 }
 0x4cd   :  { %19236 = vmatpush.bf16.msrb.mxu2 %v29969_v26  ;;  %v30048_v26 = vld [vmem:[#allocation5 + $0x27f8] sm:$0xff] }
 0x4ce   :  { %19249 = vmatpush.bf16.msrb.mxu3 %v29977_v33  ;;  %19211 = vmatmul.bf16.vlgmr.msrb.gmra.mxu0 %v913_v35  ;;  %v19018_v54 = vadd.f32 %v19017_v51, %v19005_v49  ;;  %v30022_v33 = vld [vmem:[#allocation5 + $0x2728] sm:$0xff] }
 0x4cf   :  { %19255 = vmatpush.bf16.msra.mxu0 %v29992_v29  ;;  %19224 = vmatmul.bf16.vlgmr.msrb.gmra.mxu1 %v914_v38  ;;  %v30023_v29 = vld [vmem:[#allocation5 + $0x2730] sm:$0xff]  ;;  %v30038_v35 = vld [vmem:[#allocation5 + $0x27a8] sm:$0xff] }
 0x4d0   :  { %19268 = vmatpush.bf16.msra.mxu1 %v30000_v30  ;;  %19237 = vmatmul.bf16.vlgmr.msrb.gmra.mxu2 %v915_v36  ;;  %v30031_v30 = vld [vmem:[#allocation5 + $0x2770] sm:$0xff]  ;;  %v30046_v36 = vld [vmem:[#allocation5 + $0x27e8] sm:$0xff] }
 0x4d1   :  { %19281 = vmatpush.bf16.msra.mxu2 %v30008_v32  ;;  %19250 = vmatmul.bf16.vlgmr.msrb.gmra.mxu3 %v916_v39  ;;  %v30047_v32 = vld [vmem:[#allocation5 + $0x27f0] sm:$0xff]  ;;  %v30021_v39 = vld [vmem:[#allocation5 + $0x2720] sm:$0xff] }
 0x4d2   :  { %19294 = vmatpush.bf16.msra.mxu3 %v30016_v37 }
 0x4d3   :  { %19256 = vmatpush.bf16.msra.mxu0 %v29991_v40  ;;  %v19030_v59 = vpop.f32.mrf.mxu2  ;;  %v19006_v63 = vpop.f32.mrf.mxu0 }
 0x4d4   :  { %19269 = vmatpush.bf16.msra.mxu1 %v29999_v41  ;;  %v19031_v60 = vadd.f32 %v19030_v59, %v19018_v54  ;;  %v19043_v62 = vpop.f32.mrf.mxu3  ;;  %v19019_v2 = vpop.f32.mrf.mxu1  ;;  %v30029_v41 = vld [vmem:[#allocation5 + $0x2760] sm:$0xff]  ;;  %v30019_v54 = vld [vmem:[#allocation5 + $0x2710] sm:$0xff]  ;;  %v30018_v59 = vld [vmem:[#allocation5 + $0x2708] sm:$0xff] }
 0x4d5   :  { %19282 = vmatpush.bf16.msra.mxu2 %v30007_v42  ;;  %v30037_v42 = vld [vmem:[#allocation5 + $0x27a0] sm:$0xff] }
 0x4d6   :  { %19295 = vmatpush.bf16.msra.mxu3 %v30015_v43  ;;  %v31052_v0 = vadd.f32 %v19043_v62, %v19031_v60  ;;  %v104_v60 = vld [vmem:[#allocation2 + $0x140] sm:$0xff] }
 0x4d7   :  { %19257 = vmatpush.bf16.msra.mxu0 %v29990_v44  ;;  %v30045_v44 = vld [vmem:[#allocation5 + $0x27e0] sm:$0xff]  ;;  %v30034_v62 = vld [vmem:[#allocation5 + $0x2788] sm:$0xff]  ;;  %393 = vst [vmem:[#allocation1] ss:$4 sm:$0xff] %v104_v60  ;;  %v30088_v60 = vld [vmem:[#allocation5 + $0x2938] sm:$0xff] }
 0x4d8   :  { %19270 = vmatpush.bf16.msra.mxu1 %v29998_v45  ;;  %v30020_v45 = vld [vmem:[#allocation5 + $0x2718] sm:$0xff]  ;;  %v30017_v2 = vld [vmem:[#allocation5 + $0x2700] sm:$0xff] }
 0x4d9   :  { %19283 = vmatpush.bf16.msra.mxu2 %v30006_v46  ;;  %v30028_v46 = vld [vmem:[#allocation5 + $0x2758] sm:$0xff] }
 0x4da   :  { %19296 = vmatpush.bf16.msra.mxu3 %v30014_v47  ;;  %v30036_v47 = vld [vmem:[#allocation5 + $0x2798] sm:$0xff] }
 0x4db   :  { %19258 = vmatpush.bf16.msra.mxu0 %v29989_v50  ;;  %v19032_v10 = vpop.f32.mrf.mxu2  ;;  %v30044_v50 = vld [vmem:[#allocation5 + $0x27d8] sm:$0xff] }
 0x4dc   :  { %19271 = vmatpush.bf16.msra.mxu1 %v29997_v52  ;;  %v19045_v12 = vpop.f32.mrf.mxu3  ;;  %v30072_v10 = vld [vmem:[#allocation5 + $0x28b8] sm:$0xff] }
 0x4dd   :  { %19284 = vmatpush.bf16.msra.mxu2 %v30005_v53  ;;  %v392_v12 = vld.sshfl [vmem:[#allocation1 + $0x38] sm:$0xff pattern:$0x73625140] }
 0x4de   :  { %19297 = vmatpush.bf16.msra.mxu3 %v30013_v55  ;;  %v924_v17 = vpack.c.bf16 %v392_v12, %v392_v12  ;;  %v30094_v12 = vld [vmem:[#allocation5 + $0x2968] sm:$0xff] }
 0x4df   :  { %19259 = vmatpush.bf16.msra.mxu0 %v29988_v56  ;;  %v30027_v56 = vld [vmem:[#allocation5 + $0x2750] sm:$0xff] }
 0x4e0   :  { %19272 = vmatpush.bf16.msra.mxu1 %v29996_v57  ;;  %v30035_v57 = vld [vmem:[#allocation5 + $0x2790] sm:$0xff] }
 0x4e1   :  { %19285 = vmatpush.bf16.msra.mxu2 %v30004_v58  ;;  %v30043_v58 = vld [vmem:[#allocation5 + $0x27d0] sm:$0xff] }
 0x4e2   :  { %19298 = vmatpush.bf16.msra.mxu3 %v30012_v61  ;;  %v30026_v61 = vld [vmem:[#allocation5 + $0x2748] sm:$0xff] }
 0x4e3   :  { %19260 = vmatpush.bf16.msra.mxu0 %v29987_v1 }
 0x4e4   :  { %19273 = vmatpush.bf16.msra.mxu1 %v29995_v3  ;;  %v30025_v3 = vld [vmem:[#allocation5 + $0x2740] sm:$0xff] }
 0x4e5   :  { %19286 = vmatpush.bf16.msra.mxu2 %v30003_v4  ;;  %v30033_v4 = vld [vmem:[#allocation5 + $0x2780] sm:$0xff] }
 0x4e6   :  { %19299 = vmatpush.bf16.msra.mxu3 %v30011_v5  ;;  %v389_v5 = vld.sshfl [vmem:[#allocation1 + $0x20] sm:$0xff pattern:$0x73625140] }
 0x4e7   :  { %19261 = vmatpush.bf16.msra.mxu0 %v29986_v6  ;;  %v391_v6 = vld.sshfl [vmem:[#allocation1 + $0x30] sm:$0xff pattern:$0x73625140] }
 0x4e8   :  { %19274 = vmatpush.bf16.msra.mxu1 %v29994_v8  ;;  %v30064_v8 = vld [vmem:[#allocation5 + $0x2878] sm:$0xff] }
 0x4e9   :  { %19287 = vmatpush.bf16.msra.mxu2 %v30002_v9  ;;  %v390_v9 = vld.sshfl [vmem:[#allocation1 + $0x28] sm:$0xff pattern:$0x73625140] }
 0x4ea   :  { %19300 = vmatpush.bf16.msra.mxu3 %v30010_v11  ;;  %v30041_v11 = vld [vmem:[#allocation5 + $0x27c0] sm:$0xff]  ;;  %v922_v16 = vpack.c.bf16 %v390_v9, %v390_v9  ;;  %v30103_v9 = vld [vmem:[#allocation5 + $0x29b0] sm:$0xff] }
 0x4eb   :  { %19262 = vmatpush.bf16.msra.mxu0 %v29985_v13  ;;  %v19056_v37 = vpop.f32.mrf.mxu0  ;;  %v921_v13 = vpack.c.bf16 %v389_v5, %v389_v5 }
 0x4ec   :  { %19275 = vmatpush.bf16.msra.mxu1 %v29993_v14  ;;  %v19057_v38 = vadd.f32 %v19056_v37, %v31052_v0  ;;  %v19069_v40 = vpop.f32.mrf.mxu1  ;;  %v30042_v0 = vld [vmem:[#allocation5 + $0x27c8] sm:$0xff]  ;;  %v923_v14 = vpack.c.bf16 %v391_v6, %v391_v6 }
 0x4ed   :  { %19288 = vmatpush.bf16.msra.mxu2 %v30001_v15  ;;  %v30080_v15 = vld [vmem:[#allocation5 + $0x28f8] sm:$0xff] }
 0x4ee   :  { %19301 = vmatpush.bf16.msra.mxu3 %v30009_v22  ;;  %19263 = vmatmul.bf16.vlgmr.msra.gmra.mxu0 %v917_v24  ;;  %v19070_v43 = vadd.f32 %v19069_v40, %v19057_v38  ;;  %v30054_v22 = vld [vmem:[#allocation5 + $0x2828] sm:$0xff] }
 0x4ef   :  { %19307 = vmatpush.bf16.msrb.mxu0 %v30024_v18  ;;  %19276 = vmatmul.bf16.vlgmr.msra.gmra.mxu1 %v918_v27  ;;  %v30055_v18 = vld [vmem:[#allocation5 + $0x2830] sm:$0xff]  ;;  %v30070_v24 = vld [vmem:[#allocation5 + $0x28a8] sm:$0xff] }
 0x4f0   :  { %19320 = vmatpush.bf16.msrb.mxu1 %v30032_v19  ;;  %19289 = vmatmul.bf16.vlgmr.msra.gmra.mxu2 %v919_v25  ;;  %v30063_v19 = vld [vmem:[#allocation5 + $0x2870] sm:$0xff]  ;;  %v30078_v25 = vld [vmem:[#allocation5 + $0x28e8] sm:$0xff] }
 0x4f1   :  { %19333 = vmatpush.bf16.msrb.mxu2 %v30040_v21  ;;  %19302 = vmatmul.bf16.vlgmr.msra.gmra.mxu3 %v920_v28  ;;  %v30079_v21 = vld [vmem:[#allocation5 + $0x28f0] sm:$0xff]  ;;  %v30053_v28 = vld [vmem:[#allocation5 + $0x2820] sm:$0xff] }
 0x4f2   :  { %19346 = vmatpush.bf16.msrb.mxu3 %v30048_v26 }
 0x4f3   :  { %19308 = vmatpush.bf16.msrb.mxu0 %v30023_v29  ;;  %v19082_v48 = vpop.f32.mrf.mxu2  ;;  %v19058_v52 = vpop.f32.mrf.mxu0 }
 0x4f4   :  { %19321 = vmatpush.bf16.msrb.mxu1 %v30031_v30  ;;  %v19083_v49 = vadd.f32 %v19082_v48, %v19070_v43  ;;  %v19095_v51 = vpop.f32.mrf.mxu3  ;;  %v19071_v55 = vpop.f32.mrf.mxu1  ;;  %v30061_v30 = vld [vmem:[#allocation5 + $0x2860] sm:$0xff]  ;;  %v30051_v43 = vld [vmem:[#allocation5 + $0x2810] sm:$0xff]  ;;  %v30050_v48 = vld [vmem:[#allocation5 + $0x2808] sm:$0xff] }
 0x4f5   :  { %19334 = vmatpush.bf16.msrb.mxu2 %v30039_v31  ;;  %v30069_v31 = vld [vmem:[#allocation5 + $0x28a0] sm:$0xff] }
 0x4f6   :  { %19347 = vmatpush.bf16.msrb.mxu3 %v30047_v32  ;;  %v31055_v53 = vadd.f32 %v19095_v51, %v19083_v49  ;;  %v105_v49 = vld [vmem:[#allocation2 + $0x148] sm:$0xff]  ;;  %v30049_v55 = vld [vmem:[#allocation5 + $0x2800] sm:$0xff] }
 0x4f7   :  { %19309 = vmatpush.bf16.msrb.mxu0 %v30022_v33  ;;  %v30077_v33 = vld [vmem:[#allocation5 + $0x28e0] sm:$0xff]  ;;  %v30066_v51 = vld [vmem:[#allocation5 + $0x2888] sm:$0xff]  ;;  %394 = vst [vmem:[#allocation1 + $0x20] ss:$4 sm:$0xff] %v105_v49  ;;  %v30120_v49 = vld [vmem:[#allocation5 + $0x2a38] sm:$0xff] }
 0x4f8   :  { %19322 = vmatpush.bf16.msrb.mxu1 %v30030_v34  ;;  %v30052_v34 = vld [vmem:[#allocation5 + $0x2818] sm:$0xff] }
 0x4f9   :  { %19335 = vmatpush.bf16.msrb.mxu2 %v30038_v35  ;;  %v30060_v35 = vld [vmem:[#allocation5 + $0x2858] sm:$0xff] }
 0x4fa   :  { %19348 = vmatpush.bf16.msrb.mxu3 %v30046_v36  ;;  %v30068_v36 = vld [vmem:[#allocation5 + $0x2898] sm:$0xff] }
 0x4fb   :  { %19310 = vmatpush.bf16.msrb.mxu0 %v30021_v39  ;;  %v19084_v63 = vpop.f32.mrf.mxu2  ;;  %v30076_v39 = vld [vmem:[#allocation5 + $0x28d8] sm:$0xff] }
 0x4fc   :  { %19323 = vmatpush.bf16.msrb.mxu1 %v30029_v41  ;;  %v19097_v1 = vpop.f32.mrf.mxu3  ;;  %v30104_v63 = vld [vmem:[#allocation5 + $0x29b8] sm:$0xff] }
 0x4fd   :  { %19336 = vmatpush.bf16.msrb.mxu2 %v30037_v42  ;;  %v398_v1 = vld.sshfl [vmem:[#allocation1 + $0x18] sm:$0xff pattern:$0x73625140] }
 0x4fe   :  { %19349 = vmatpush.bf16.msrb.mxu3 %v30045_v44  ;;  %v928_v6 = vpack.c.bf16 %v398_v1, %v398_v1  ;;  %v30126_v1 = vld [vmem:[#allocation5 + $0x2a68] sm:$0xff] }
 0x4ff   :  { %19311 = vmatpush.bf16.msrb.mxu0 %v30020_v45  ;;  %v30059_v45 = vld [vmem:[#allocation5 + $0x2850] sm:$0xff] }
 0x500   :  { %19324 = vmatpush.bf16.msrb.mxu1 %v30028_v46  ;;  %v30067_v46 = vld [vmem:[#allocation5 + $0x2890] sm:$0xff] }
 0x501   :  { %19337 = vmatpush.bf16.msrb.mxu2 %v30036_v47  ;;  %v30075_v47 = vld [vmem:[#allocation5 + $0x28d0] sm:$0xff] }
 0x502   :  { %19350 = vmatpush.bf16.msrb.mxu3 %v30044_v50  ;;  %v30058_v50 = vld [vmem:[#allocation5 + $0x2848] sm:$0xff] }
 0x503   :  { %19312 = vmatpush.bf16.msrb.mxu0 %v30019_v54 }
 0x504   :  { %19325 = vmatpush.bf16.msrb.mxu1 %v30027_v56  ;;  %v30057_v56 = vld [vmem:[#allocation5 + $0x2840] sm:$0xff] }
 0x505   :  { %19338 = vmatpush.bf16.msrb.mxu2 %v30035_v57  ;;  %v30065_v57 = vld [vmem:[#allocation5 + $0x2880] sm:$0xff] }
 0x506   :  { %19351 = vmatpush.bf16.msrb.mxu3 %v30043_v58  ;;  %v395_v58 = vld.sshfl [vmem:[#allocation1] sm:$0xff pattern:$0x73625140] }
 0x507   :  { %19313 = vmatpush.bf16.msrb.mxu0 %v30018_v59  ;;  %v397_v59 = vld.sshfl [vmem:[#allocation1 + $0x10] sm:$0xff pattern:$0x73625140] }
 0x508   :  { %19326 = vmatpush.bf16.msrb.mxu1 %v30026_v61  ;;  %v30096_v61 = vld [vmem:[#allocation5 + $0x2978] sm:$0xff] }
 0x509   :  { %19339 = vmatpush.bf16.msrb.mxu2 %v30034_v62  ;;  %v396_v62 = vld.sshfl [vmem:[#allocation1 + $0x8] sm:$0xff pattern:$0x73625140] }
 0x50a   :  { %19352 = vmatpush.bf16.msrb.mxu3 %v30042_v0  ;;  %v30073_v0 = vld [vmem:[#allocation5 + $0x28c0] sm:$0xff]  ;;  %v926_v5 = vpack.c.bf16 %v396_v62, %v396_v62  ;;  %v30135_v62 = vld [vmem:[#allocation5 + $0x2ab0] sm:$0xff] }
 0x50b   :  { %19314 = vmatpush.bf16.msrb.mxu0 %v30017_v2  ;;  %v19108_v26 = vpop.f32.mrf.mxu0  ;;  %v925_v2 = vpack.c.bf16 %v395_v58, %v395_v58 }
 0x50c   :  { %19327 = vmatpush.bf16.msrb.mxu1 %v30025_v3  ;;  %v19109_v27 = vadd.f32 %v19108_v26, %v31055_v53  ;;  %v19121_v29 = vpop.f32.mrf.mxu1  ;;  %v30074_v53 = vld [vmem:[#allocation5 + $0x28c8] sm:$0xff]  ;;  %v927_v3 = vpack.c.bf16 %v397_v59, %v397_v59 }
 0x50d   :  { %19340 = vmatpush.bf16.msrb.mxu2 %v30033_v4  ;;  %v30112_v4 = vld [vmem:[#allocation5 + $0x29f8] sm:$0xff] }
 0x50e   :  { %19353 = vmatpush.bf16.msrb.mxu3 %v30041_v11  ;;  %19315 = vmatmul.bf16.vlgmr.msrb.gmra.mxu0 %v921_v13  ;;  %v19122_v32 = vadd.f32 %v19121_v29, %v19109_v27  ;;  %v30086_v11 = vld [vmem:[#allocation5 + $0x2928] sm:$0xff] }
 0x50f   :  { %19359 = vmatpush.bf16.msra.mxu0 %v30056_v7  ;;  %19328 = vmatmul.bf16.vlgmr.msrb.gmra.mxu1 %v922_v16  ;;  %v30087_v7 = vld [vmem:[#allocation5 + $0x2930] sm:$0xff]  ;;  %v30102_v13 = vld [vmem:[#allocation5 + $0x29a8] sm:$0xff] }
 0x510   :  { %19372 = vmatpush.bf16.msra.mxu1 %v30064_v8  ;;  %19341 = vmatmul.bf16.vlgmr.msrb.gmra.mxu2 %v923_v14  ;;  %v30095_v8 = vld [vmem:[#allocation5 + $0x2970] sm:$0xff]  ;;  %v30110_v14 = vld [vmem:[#allocation5 + $0x29e8] sm:$0xff] }
 0x511   :  { %19385 = vmatpush.bf16.msra.mxu2 %v30072_v10  ;;  %19354 = vmatmul.bf16.vlgmr.msrb.gmra.mxu3 %v924_v17  ;;  %v30111_v10 = vld [vmem:[#allocation5 + $0x29f0] sm:$0xff]  ;;  %v30085_v17 = vld [vmem:[#allocation5 + $0x2920] sm:$0xff] }
 0x512   :  { %19398 = vmatpush.bf16.msra.mxu3 %v30080_v15 }
 0x513   :  { %19360 = vmatpush.bf16.msra.mxu0 %v30055_v18  ;;  %v19134_v37 = vpop.f32.mrf.mxu2  ;;  %v19110_v41 = vpop.f32.mrf.mxu0 }
 0x514   :  { %19373 = vmatpush.bf16.msra.mxu1 %v30063_v19  ;;  %v19135_v38 = vadd.f32 %v19134_v37, %v19122_v32  ;;  %v19147_v40 = vpop.f32.mrf.mxu3  ;;  %v19123_v44 = vpop.f32.mrf.mxu1  ;;  %v30093_v19 = vld [vmem:[#allocation5 + $0x2960] sm:$0xff]  ;;  %v30083_v32 = vld [vmem:[#allocation5 + $0x2910] sm:$0xff]  ;;  %v30082_v37 = vld [vmem:[#allocation5 + $0x2908] sm:$0xff] }
 0x515   :  { %19386 = vmatpush.bf16.msra.mxu2 %v30071_v20  ;;  %v30101_v20 = vld [vmem:[#allocation5 + $0x29a0] sm:$0xff] }
 0x516   :  { %19399 = vmatpush.bf16.msra.mxu3 %v30079_v21  ;;  %v31058_v42 = vadd.f32 %v19147_v40, %v19135_v38  ;;  %v106_v38 = vld [vmem:[#allocation2 + $0x150] sm:$0xff]  ;;  %v30098_v40 = vld [vmem:[#allocation5 + $0x2988] sm:$0xff]  ;;  %v30081_v44 = vld [vmem:[#allocation5 + $0x2900] sm:$0xff] }
 0x517   :  { %19361 = vmatpush.bf16.msra.mxu0 %v30054_v22  ;;  %v30109_v22 = vld [vmem:[#allocation5 + $0x29e0] sm:$0xff]  ;;  %403 = vst [vmem:[#allocation1] ss:$4 sm:$0xff] %v106_v38  ;;  %v30152_v38 = vld [vmem:[#allocation5 + $0x2b38] sm:$0xff] }
 0x518   :  { %19374 = vmatpush.bf16.msra.mxu1 %v30062_v23  ;;  %v30084_v23 = vld [vmem:[#allocation5 + $0x2918] sm:$0xff] }
 0x519   :  { %19387 = vmatpush.bf16.msra.mxu2 %v30070_v24  ;;  %v30092_v24 = vld [vmem:[#allocation5 + $0x2958] sm:$0xff] }
 0x51a   :  { %19400 = vmatpush.bf16.msra.mxu3 %v30078_v25  ;;  %v30100_v25 = vld [vmem:[#allocation5 + $0x2998] sm:$0xff] }
 0x51b   :  { %19362 = vmatpush.bf16.msra.mxu0 %v30053_v28  ;;  %v19136_v52 = vpop.f32.mrf.mxu2  ;;  %v30108_v28 = vld [vmem:[#allocation5 + $0x29d8] sm:$0xff] }
 0x51c   :  { %19375 = vmatpush.bf16.msra.mxu1 %v30061_v30  ;;  %v19149_v54 = vpop.f32.mrf.mxu3  ;;  %v30136_v52 = vld [vmem:[#allocation5 + $0x2ab8] sm:$0xff] }
 0x51d   :  { %19388 = vmatpush.bf16.msra.mxu2 %v30069_v31  ;;  %v402_v54 = vld.sshfl [vmem:[#allocation1 + $0x38] sm:$0xff pattern:$0x73625140] }
 0x51e   :  { %19401 = vmatpush.bf16.msra.mxu3 %v30077_v33  ;;  %v932_v59 = vpack.c.bf16 %v402_v54, %v402_v54  ;;  %v30158_v54 = vld [vmem:[#allocation5 + $0x2b68] sm:$0xff] }
 0x51f   :  { %19363 = vmatpush.bf16.msra.mxu0 %v30052_v34  ;;  %v30091_v34 = vld [vmem:[#allocation5 + $0x2950] sm:$0xff] }
 0x520   :  { %19376 = vmatpush.bf16.msra.mxu1 %v30060_v35  ;;  %v30099_v35 = vld [vmem:[#allocation5 + $0x2990] sm:$0xff] }
 0x521   :  { %19389 = vmatpush.bf16.msra.mxu2 %v30068_v36  ;;  %v30107_v36 = vld [vmem:[#allocation5 + $0x29d0] sm:$0xff] }
 0x522   :  { %19402 = vmatpush.bf16.msra.mxu3 %v30076_v39  ;;  %v30090_v39 = vld [vmem:[#allocation5 + $0x2948] sm:$0xff] }
 0x523   :  { %19364 = vmatpush.bf16.msra.mxu0 %v30051_v43 }
 0x524   :  { %19377 = vmatpush.bf16.msra.mxu1 %v30059_v45  ;;  %v30089_v45 = vld [vmem:[#allocation5 + $0x2940] sm:$0xff] }
 0x525   :  { %19390 = vmatpush.bf16.msra.mxu2 %v30067_v46  ;;  %v30097_v46 = vld [vmem:[#allocation5 + $0x2980] sm:$0xff] }
 0x526   :  { %19403 = vmatpush.bf16.msra.mxu3 %v30075_v47  ;;  %v399_v47 = vld.sshfl [vmem:[#allocation1 + $0x20] sm:$0xff pattern:$0x73625140] }
 0x527   :  { %19365 = vmatpush.bf16.msra.mxu0 %v30050_v48  ;;  %v401_v48 = vld.sshfl [vmem:[#allocation1 + $0x30] sm:$0xff pattern:$0x73625140] }
 0x528   :  { %19378 = vmatpush.bf16.msra.mxu1 %v30058_v50  ;;  %v30128_v50 = vld [vmem:[#allocation5 + $0x2a78] sm:$0xff] }
 0x529   :  { %19391 = vmatpush.bf16.msra.mxu2 %v30066_v51  ;;  %v400_v51 = vld.sshfl [vmem:[#allocation1 + $0x28] sm:$0xff pattern:$0x73625140] }
 0x52a   :  { %19404 = vmatpush.bf16.msra.mxu3 %v30074_v53  ;;  %v30105_v53 = vld [vmem:[#allocation5 + $0x29c0] sm:$0xff]  ;;  %v930_v58 = vpack.c.bf16 %v400_v51, %v400_v51  ;;  %v30167_v51 = vld [vmem:[#allocation5 + $0x2bb0] sm:$0xff] }
 0x52b   :  { %19366 = vmatpush.bf16.msra.mxu0 %v30049_v55  ;;  %v19160_v15 = vpop.f32.mrf.mxu0  ;;  %v929_v55 = vpack.c.bf16 %v399_v47, %v399_v47 }
 0x52c   :  { %19379 = vmatpush.bf16.msra.mxu1 %v30057_v56  ;;  %v19161_v16 = vadd.f32 %v19160_v15, %v31058_v42  ;;  %v19173_v18 = vpop.f32.mrf.mxu1  ;;  %v30106_v42 = vld [vmem:[#allocation5 + $0x29c8] sm:$0xff]  ;;  %v931_v56 = vpack.c.bf16 %v401_v48, %v401_v48 }
 0x52d   :  { %19392 = vmatpush.bf16.msra.mxu2 %v30065_v57  ;;  %v30144_v57 = vld [vmem:[#allocation5 + $0x2af8] sm:$0xff] }
 0x52e   :  { %19405 = vmatpush.bf16.msra.mxu3 %v30073_v0  ;;  %19367 = vmatmul.bf16.vlgmr.msra.gmra.mxu0 %v925_v2  ;;  %v19174_v21 = vadd.f32 %v19173_v18, %v19161_v16  ;;  %v30118_v0 = vld [vmem:[#allocation5 + $0x2a28] sm:$0xff] }
 0x52f   :  { %19411 = vmatpush.bf16.msrb.mxu0 %v30088_v60  ;;  %19380 = vmatmul.bf16.vlgmr.msra.gmra.mxu1 %v926_v5  ;;  %v30119_v60 = vld [vmem:[#allocation5 + $0x2a30] sm:$0xff]  ;;  %v30134_v2 = vld [vmem:[#allocation5 + $0x2aa8] sm:$0xff] }
 0x530   :  { %19424 = vmatpush.bf16.msrb.mxu1 %v30096_v61  ;;  %19393 = vmatmul.bf16.vlgmr.msra.gmra.mxu2 %v927_v3  ;;  %v30127_v61 = vld [vmem:[#allocation5 + $0x2a70] sm:$0xff]  ;;  %v30142_v3 = vld [vmem:[#allocation5 + $0x2ae8] sm:$0xff] }
 0x531   :  { %19437 = vmatpush.bf16.msrb.mxu2 %v30104_v63  ;;  %19406 = vmatmul.bf16.vlgmr.msra.gmra.mxu3 %v928_v6  ;;  %v30143_v63 = vld [vmem:[#allocation5 + $0x2af0] sm:$0xff]  ;;  %v30117_v6 = vld [vmem:[#allocation5 + $0x2a20] sm:$0xff] }
 0x532   :  { %19450 = vmatpush.bf16.msrb.mxu3 %v30112_v4 }
 0x533   :  { %19412 = vmatpush.bf16.msrb.mxu0 %v30087_v7  ;;  %v19186_v26 = vpop.f32.mrf.mxu2  ;;  %v19162_v30 = vpop.f32.mrf.mxu0 }
 0x534   :  { %19425 = vmatpush.bf16.msrb.mxu1 %v30095_v8  ;;  %v19187_v27 = vadd.f32 %v19186_v26, %v19174_v21  ;;  %v19199_v29 = vpop.f32.mrf.mxu3  ;;  %v19175_v33 = vpop.f32.mrf.mxu1  ;;  %v30125_v8 = vld [vmem:[#allocation5 + $0x2a60] sm:$0xff]  ;;  %v30115_v21 = vld [vmem:[#allocation5 + $0x2a10] sm:$0xff]  ;;  %v30114_v26 = vld [vmem:[#allocation5 + $0x2a08] sm:$0xff] }
 0x535   :  { %19438 = vmatpush.bf16.msrb.mxu2 %v30103_v9  ;;  %v30133_v9 = vld [vmem:[#allocation5 + $0x2aa0] sm:$0xff] }
 0x536   :  { %19451 = vmatpush.bf16.msrb.mxu3 %v30111_v10  ;;  %v31061_v31 = vadd.f32 %v19199_v29, %v19187_v27  ;;  %v107_v27 = vld [vmem:[#allocation2 + $0x158] sm:$0xff]  ;;  %v30130_v29 = vld [vmem:[#allocation5 + $0x2a88] sm:$0xff] }
 0x537   :  { %19413 = vmatpush.bf16.msrb.mxu0 %v30086_v11  ;;  %v30141_v11 = vld [vmem:[#allocation5 + $0x2ae0] sm:$0xff]  ;;  %404 = vst [vmem:[#allocation1 + $0x20] ss:$4 sm:$0xff] %v107_v27  ;;  %v30184_v27 = vld [vmem:[#allocation5 + $0x2c38] sm:$0xff] }
 0x538   :  { %19426 = vmatpush.bf16.msrb.mxu1 %v30094_v12  ;;  %v30116_v12 = vld [vmem:[#allocation5 + $0x2a18] sm:$0xff]  ;;  %v30113_v33 = vld [vmem:[#allocation5 + $0x2a00] sm:$0xff] }
 0x539   :  { %19439 = vmatpush.bf16.msrb.mxu2 %v30102_v13  ;;  %v30124_v13 = vld [vmem:[#allocation5 + $0x2a58] sm:$0xff] }
 0x53a   :  { %19452 = vmatpush.bf16.msrb.mxu3 %v30110_v14  ;;  %v30132_v14 = vld [vmem:[#allocation5 + $0x2a98] sm:$0xff] }
 0x53b   :  { %19414 = vmatpush.bf16.msrb.mxu0 %v30085_v17  ;;  %v19188_v41 = vpop.f32.mrf.mxu2  ;;  %v30140_v17 = vld [vmem:[#allocation5 + $0x2ad8] sm:$0xff] }
 0x53c   :  { %19427 = vmatpush.bf16.msrb.mxu1 %v30093_v19  ;;  %v19201_v43 = vpop.f32.mrf.mxu3  ;;  %v30168_v41 = vld [vmem:[#allocation5 + $0x2bb8] sm:$0xff] }
 0x53d   :  { %19440 = vmatpush.bf16.msrb.mxu2 %v30101_v20  ;;  %v408_v43 = vld.sshfl [vmem:[#allocation1 + $0x18] sm:$0xff pattern:$0x73625140] }
 0x53e   :  { %19453 = vmatpush.bf16.msrb.mxu3 %v30109_v22  ;;  %v936_v48 = vpack.c.bf16 %v408_v43, %v408_v43  ;;  %v30190_v43 = vld [vmem:[#allocation5 + $0x2c68] sm:$0xff] }
 0x53f   :  { %19415 = vmatpush.bf16.msrb.mxu0 %v30084_v23  ;;  %v30123_v23 = vld [vmem:[#allocation5 + $0x2a50] sm:$0xff] }
 0x540   :  { %19428 = vmatpush.bf16.msrb.mxu1 %v30092_v24  ;;  %v30131_v24 = vld [vmem:[#allocation5 + $0x2a90] sm:$0xff] }
 0x541   :  { %19441 = vmatpush.bf16.msrb.mxu2 %v30100_v25  ;;  %v30139_v25 = vld [vmem:[#allocation5 + $0x2ad0] sm:$0xff] }
 0x542   :  { %19454 = vmatpush.bf16.msrb.mxu3 %v30108_v28  ;;  %v30122_v28 = vld [vmem:[#allocation5 + $0x2a48] sm:$0xff] }
 0x543   :  { %19416 = vmatpush.bf16.msrb.mxu0 %v30083_v32 }
 0x544   :  { %19429 = vmatpush.bf16.msrb.mxu1 %v30091_v34  ;;  %v30121_v34 = vld [vmem:[#allocation5 + $0x2a40] sm:$0xff] }
 0x545   :  { %19442 = vmatpush.bf16.msrb.mxu2 %v30099_v35  ;;  %v30129_v35 = vld [vmem:[#allocation5 + $0x2a80] sm:$0xff] }
 0x546   :  { %19455 = vmatpush.bf16.msrb.mxu3 %v30107_v36  ;;  %v405_v36 = vld.sshfl [vmem:[#allocation1] sm:$0xff pattern:$0x73625140] }
 0x547   :  { %19417 = vmatpush.bf16.msrb.mxu0 %v30082_v37  ;;  %v407_v37 = vld.sshfl [vmem:[#allocation1 + $0x10] sm:$0xff pattern:$0x73625140] }
 0x548   :  { %19430 = vmatpush.bf16.msrb.mxu1 %v30090_v39  ;;  %v30160_v39 = vld [vmem:[#allocation5 + $0x2b78] sm:$0xff] }
 0x549   :  { %19443 = vmatpush.bf16.msrb.mxu2 %v30098_v40  ;;  %v406_v40 = vld.sshfl [vmem:[#allocation1 + $0x8] sm:$0xff pattern:$0x73625140] }
 0x54a   :  { %19456 = vmatpush.bf16.msrb.mxu3 %v30106_v42  ;;  %v30137_v42 = vld [vmem:[#allocation5 + $0x2ac0] sm:$0xff]  ;;  %v934_v47 = vpack.c.bf16 %v406_v40, %v406_v40  ;;  %v30199_v40 = vld [vmem:[#allocation5 + $0x2cb0] sm:$0xff] }
 0x54b   :  { %19418 = vmatpush.bf16.msrb.mxu0 %v30081_v44  ;;  %v19212_v4 = vpop.f32.mrf.mxu0  ;;  %v933_v44 = vpack.c.bf16 %v405_v36, %v405_v36 }
 0x54c   :  { %19431 = vmatpush.bf16.msrb.mxu1 %v30089_v45  ;;  %v19213_v5 = vadd.f32 %v19212_v4, %v31061_v31  ;;  %v19225_v7 = vpop.f32.mrf.mxu1  ;;  %v30138_v31 = vld [vmem:[#allocation5 + $0x2ac8] sm:$0xff]  ;;  %v935_v45 = vpack.c.bf16 %v407_v37, %v407_v37 }
 0x54d   :  { %19444 = vmatpush.bf16.msrb.mxu2 %v30097_v46  ;;  %v30176_v46 = vld [vmem:[#allocation5 + $0x2bf8] sm:$0xff] }
 0x54e   :  { %19457 = vmatpush.bf16.msrb.mxu3 %v30105_v53  ;;  %19419 = vmatmul.bf16.vlgmr.msrb.gmra.mxu0 %v929_v55  ;;  %v19226_v10 = vadd.f32 %v19225_v7, %v19213_v5  ;;  %v30150_v53 = vld [vmem:[#allocation5 + $0x2b28] sm:$0xff] }
 0x54f   :  { %19463 = vmatpush.bf16.msra.mxu0 %v30120_v49  ;;  %19432 = vmatmul.bf16.vlgmr.msrb.gmra.mxu1 %v930_v58  ;;  %v30151_v49 = vld [vmem:[#allocation5 + $0x2b30] sm:$0xff]  ;;  %v30166_v55 = vld [vmem:[#allocation5 + $0x2ba8] sm:$0xff] }
 0x550   :  { %19476 = vmatpush.bf16.msra.mxu1 %v30128_v50  ;;  %19445 = vmatmul.bf16.vlgmr.msrb.gmra.mxu2 %v931_v56  ;;  %v30159_v50 = vld [vmem:[#allocation5 + $0x2b70] sm:$0xff]  ;;  %v30174_v56 = vld [vmem:[#allocation5 + $0x2be8] sm:$0xff] }
 0x551   :  { %19489 = vmatpush.bf16.msra.mxu2 %v30136_v52  ;;  %19458 = vmatmul.bf16.vlgmr.msrb.gmra.mxu3 %v932_v59  ;;  %v30175_v52 = vld [vmem:[#allocation5 + $0x2bf0] sm:$0xff]  ;;  %v30149_v59 = vld [vmem:[#allocation5 + $0x2b20] sm:$0xff] }
 0x552   :  { %19502 = vmatpush.bf16.msra.mxu3 %v30144_v57 }
 0x553   :  { %19464 = vmatpush.bf16.msra.mxu0 %v30119_v60  ;;  %v19238_v15 = vpop.f32.mrf.mxu2  ;;  %v19214_v19 = vpop.f32.mrf.mxu0 }
 0x554   :  { %19477 = vmatpush.bf16.msra.mxu1 %v30127_v61  ;;  %v19239_v16 = vadd.f32 %v19238_v15, %v19226_v10  ;;  %v19251_v18 = vpop.f32.mrf.mxu3  ;;  %v19227_v22 = vpop.f32.mrf.mxu1  ;;  %v30157_v61 = vld [vmem:[#allocation5 + $0x2b60] sm:$0xff]  ;;  %v30147_v10 = vld [vmem:[#allocation5 + $0x2b10] sm:$0xff]  ;;  %v30146_v15 = vld [vmem:[#allocation5 + $0x2b08] sm:$0xff] }
 0x555   :  { %19490 = vmatpush.bf16.msra.mxu2 %v30135_v62  ;;  %v30165_v62 = vld [vmem:[#allocation5 + $0x2ba0] sm:$0xff] }
 0x556   :  { %19503 = vmatpush.bf16.msra.mxu3 %v30143_v63  ;;  %v31064_v20 = vadd.f32 %v19251_v18, %v19239_v16  ;;  %v108_v16 = vld [vmem:[#allocation2 + $0x160] sm:$0xff] }
 0x557   :  { %19465 = vmatpush.bf16.msra.mxu0 %v30118_v0  ;;  %v30173_v0 = vld [vmem:[#allocation5 + $0x2be0] sm:$0xff]  ;;  %v30162_v18 = vld [vmem:[#allocation5 + $0x2b88] sm:$0xff]  ;;  %413 = vst [vmem:[#allocation1] ss:$4 sm:$0xff] %v108_v16  ;;  %v30216_v16 = vld [vmem:[#allocation5 + $0x2d38] sm:$0xff] }
 0x558   :  { %19478 = vmatpush.bf16.msra.mxu1 %v30126_v1  ;;  %v30148_v1 = vld [vmem:[#allocation5 + $0x2b18] sm:$0xff]  ;;  %v30145_v22 = vld [vmem:[#allocation5 + $0x2b00] sm:$0xff] }
 0x559   :  { %19491 = vmatpush.bf16.msra.mxu2 %v30134_v2  ;;  %v30156_v2 = vld [vmem:[#allocation5 + $0x2b58] sm:$0xff] }
 0x55a   :  { %19504 = vmatpush.bf16.msra.mxu3 %v30142_v3  ;;  %v30164_v3 = vld [vmem:[#allocation5 + $0x2b98] sm:$0xff] }
 0x55b   :  { %19466 = vmatpush.bf16.msra.mxu0 %v30117_v6  ;;  %v19240_v30 = vpop.f32.mrf.mxu2  ;;  %v30172_v6 = vld [vmem:[#allocation5 + $0x2bd8] sm:$0xff] }
 0x55c   :  { %19479 = vmatpush.bf16.msra.mxu1 %v30125_v8  ;;  %v19253_v32 = vpop.f32.mrf.mxu3  ;;  %v30200_v30 = vld [vmem:[#allocation5 + $0x2cb8] sm:$0xff] }
 0x55d   :  { %19492 = vmatpush.bf16.msra.mxu2 %v30133_v9  ;;  %v412_v32 = vld.sshfl [vmem:[#allocation1 + $0x38] sm:$0xff pattern:$0x73625140] }
 0x55e   :  { %19505 = vmatpush.bf16.msra.mxu3 %v30141_v11  ;;  %v940_v37 = vpack.c.bf16 %v412_v32, %v412_v32  ;;  %v30222_v32 = vld [vmem:[#allocation5 + $0x2d68] sm:$0xff] }
 0x55f   :  { %19467 = vmatpush.bf16.msra.mxu0 %v30116_v12  ;;  %v30155_v12 = vld [vmem:[#allocation5 + $0x2b50] sm:$0xff] }
 0x560   :  { %19480 = vmatpush.bf16.msra.mxu1 %v30124_v13  ;;  %v30163_v13 = vld [vmem:[#allocation5 + $0x2b90] sm:$0xff] }
 0x561   :  { %19493 = vmatpush.bf16.msra.mxu2 %v30132_v14  ;;  %v30171_v14 = vld [vmem:[#allocation5 + $0x2bd0] sm:$0xff] }
 0x562   :  { %19506 = vmatpush.bf16.msra.mxu3 %v30140_v17  ;;  %v30154_v17 = vld [vmem:[#allocation5 + $0x2b48] sm:$0xff] }
 0x563   :  { %19468 = vmatpush.bf16.msra.mxu0 %v30115_v21 }
 0x564   :  { %19481 = vmatpush.bf16.msra.mxu1 %v30123_v23  ;;  %v30153_v23 = vld [vmem:[#allocation5 + $0x2b40] sm:$0xff] }
 0x565   :  { %19494 = vmatpush.bf16.msra.mxu2 %v30131_v24  ;;  %v30161_v24 = vld [vmem:[#allocation5 + $0x2b80] sm:$0xff] }
 0x566   :  { %19507 = vmatpush.bf16.msra.mxu3 %v30139_v25  ;;  %v409_v25 = vld.sshfl [vmem:[#allocation1 + $0x20] sm:$0xff pattern:$0x73625140] }
 0x567   :  { %19469 = vmatpush.bf16.msra.mxu0 %v30114_v26  ;;  %v411_v26 = vld.sshfl [vmem:[#allocation1 + $0x30] sm:$0xff pattern:$0x73625140] }
 0x568   :  { %19482 = vmatpush.bf16.msra.mxu1 %v30122_v28  ;;  %v30192_v28 = vld [vmem:[#allocation5 + $0x2c78] sm:$0xff] }
 0x569   :  { %19495 = vmatpush.bf16.msra.mxu2 %v30130_v29  ;;  %v410_v29 = vld.sshfl [vmem:[#allocation1 + $0x28] sm:$0xff pattern:$0x73625140] }
 0x56a   :  { %19508 = vmatpush.bf16.msra.mxu3 %v30138_v31  ;;  %v30169_v31 = vld [vmem:[#allocation5 + $0x2bc0] sm:$0xff]  ;;  %v938_v36 = vpack.c.bf16 %v410_v29, %v410_v29  ;;  %v30231_v29 = vld [vmem:[#allocation5 + $0x2db0] sm:$0xff] }
 0x56b   :  { %19470 = vmatpush.bf16.msra.mxu0 %v30113_v33  ;;  %v19264_v57 = vpop.f32.mrf.mxu0  ;;  %v937_v33 = vpack.c.bf16 %v409_v25, %v409_v25 }
 0x56c   :  { %19483 = vmatpush.bf16.msra.mxu1 %v30121_v34  ;;  %v19265_v58 = vadd.f32 %v19264_v57, %v31064_v20  ;;  %v19277_v60 = vpop.f32.mrf.mxu1  ;;  %v30170_v20 = vld [vmem:[#allocation5 + $0x2bc8] sm:$0xff]  ;;  %v939_v34 = vpack.c.bf16 %v411_v26, %v411_v26 }
 0x56d   :  { %19496 = vmatpush.bf16.msra.mxu2 %v30129_v35  ;;  %v30208_v35 = vld [vmem:[#allocation5 + $0x2cf8] sm:$0xff] }
 0x56e   :  { %19509 = vmatpush.bf16.msra.mxu3 %v30137_v42  ;;  %19471 = vmatmul.bf16.vlgmr.msra.gmra.mxu0 %v933_v44  ;;  %v19278_v63 = vadd.f32 %v19277_v60, %v19265_v58  ;;  %v30182_v42 = vld [vmem:[#allocation5 + $0x2c28] sm:$0xff] }
 0x56f   :  { %19515 = vmatpush.bf16.msrb.mxu0 %v30152_v38  ;;  %19484 = vmatmul.bf16.vlgmr.msra.gmra.mxu1 %v934_v47  ;;  %v30183_v38 = vld [vmem:[#allocation5 + $0x2c30] sm:$0xff]  ;;  %v30198_v44 = vld [vmem:[#allocation5 + $0x2ca8] sm:$0xff] }
 0x570   :  { %19528 = vmatpush.bf16.msrb.mxu1 %v30160_v39  ;;  %19497 = vmatmul.bf16.vlgmr.msra.gmra.mxu2 %v935_v45  ;;  %v30191_v39 = vld [vmem:[#allocation5 + $0x2c70] sm:$0xff]  ;;  %v30206_v45 = vld [vmem:[#allocation5 + $0x2ce8] sm:$0xff] }
 0x571   :  { %19541 = vmatpush.bf16.msrb.mxu2 %v30168_v41  ;;  %19510 = vmatmul.bf16.vlgmr.msra.gmra.mxu3 %v936_v48  ;;  %v30207_v41 = vld [vmem:[#allocation5 + $0x2cf0] sm:$0xff]  ;;  %v30181_v48 = vld [vmem:[#allocation5 + $0x2c20] sm:$0xff] }
 0x572   :  { %19554 = vmatpush.bf16.msrb.mxu3 %v30176_v46 }
 0x573   :  { %19516 = vmatpush.bf16.msrb.mxu0 %v30151_v49  ;;  %v19290_v4 = vpop.f32.mrf.mxu2  ;;  %v19266_v8 = vpop.f32.mrf.mxu0 }
 0x574   :  { %19529 = vmatpush.bf16.msrb.mxu1 %v30159_v50  ;;  %v19291_v5 = vadd.f32 %v19290_v4, %v19278_v63  ;;  %v19303_v7 = vpop.f32.mrf.mxu3  ;;  %v19279_v11 = vpop.f32.mrf.mxu1  ;;  %v30189_v50 = vld [vmem:[#allocation5 + $0x2c60] sm:$0xff]  ;;  %v30179_v63 = vld [vmem:[#allocation5 + $0x2c10] sm:$0xff]  ;;  %v30178_v4 = vld [vmem:[#allocation5 + $0x2c08] sm:$0xff] }
 0x575   :  { %19542 = vmatpush.bf16.msrb.mxu2 %v30167_v51  ;;  %v30197_v51 = vld [vmem:[#allocation5 + $0x2ca0] sm:$0xff] }
 0x576   :  { %19555 = vmatpush.bf16.msrb.mxu3 %v30175_v52  ;;  %v31067_v9 = vadd.f32 %v19303_v7, %v19291_v5  ;;  %v109_v5 = vld [vmem:[#allocation2 + $0x168] sm:$0xff]  ;;  %v30177_v11 = vld [vmem:[#allocation5 + $0x2c00] sm:$0xff] }
 0x577   :  { %19517 = vmatpush.bf16.msrb.mxu0 %v30150_v53  ;;  %v30205_v53 = vld [vmem:[#allocation5 + $0x2ce0] sm:$0xff]  ;;  %v30194_v7 = vld [vmem:[#allocation5 + $0x2c88] sm:$0xff]  ;;  %414 = vst [vmem:[#allocation1 + $0x20] ss:$4 sm:$0xff] %v109_v5  ;;  %v30248_v5 = vld [vmem:[#allocation5 + $0x2e38] sm:$0xff] }
 0x578   :  { %19530 = vmatpush.bf16.msrb.mxu1 %v30158_v54  ;;  %v30180_v54 = vld [vmem:[#allocation5 + $0x2c18] sm:$0xff] }
 0x579   :  { %19543 = vmatpush.bf16.msrb.mxu2 %v30166_v55  ;;  %v30188_v55 = vld [vmem:[#allocation5 + $0x2c58] sm:$0xff] }
 0x57a   :  { %19556 = vmatpush.bf16.msrb.mxu3 %v30174_v56  ;;  %v30196_v56 = vld [vmem:[#allocation5 + $0x2c98] sm:$0xff] }
 0x57b   :  { %19518 = vmatpush.bf16.msrb.mxu0 %v30149_v59  ;;  %v19292_v19 = vpop.f32.mrf.mxu2  ;;  %v30204_v59 = vld [vmem:[#allocation5 + $0x2cd8] sm:$0xff] }
 0x57c   :  { %19531 = vmatpush.bf16.msrb.mxu1 %v30157_v61  ;;  %v19305_v21 = vpop.f32.mrf.mxu3  ;;  %v30232_v19 = vld [vmem:[#allocation5 + $0x2db8] sm:$0xff] }
 0x57d   :  { %19544 = vmatpush.bf16.msrb.mxu2 %v30165_v62  ;;  %v418_v21 = vld.sshfl [vmem:[#allocation1 + $0x18] sm:$0xff pattern:$0x73625140] }
 0x57e   :  { %19557 = vmatpush.bf16.msrb.mxu3 %v30173_v0  ;;  %v944_v26 = vpack.c.bf16 %v418_v21, %v418_v21  ;;  %v30254_v21 = vld [vmem:[#allocation5 + $0x2e68] sm:$0xff] }
 0x57f   :  { %19519 = vmatpush.bf16.msrb.mxu0 %v30148_v1  ;;  %v30187_v1 = vld [vmem:[#allocation5 + $0x2c50] sm:$0xff] }
 0x580   :  { %19532 = vmatpush.bf16.msrb.mxu1 %v30156_v2  ;;  %v30195_v2 = vld [vmem:[#allocation5 + $0x2c90] sm:$0xff] }
 0x581   :  { %19545 = vmatpush.bf16.msrb.mxu2 %v30164_v3  ;;  %v30203_v3 = vld [vmem:[#allocation5 + $0x2cd0] sm:$0xff] }
 0x582   :  { %19558 = vmatpush.bf16.msrb.mxu3 %v30172_v6  ;;  %v30186_v6 = vld [vmem:[#allocation5 + $0x2c48] sm:$0xff] }
 0x583   :  { %19520 = vmatpush.bf16.msrb.mxu0 %v30147_v10 }
 0x584   :  { %19533 = vmatpush.bf16.msrb.mxu1 %v30155_v12  ;;  %v30185_v12 = vld [vmem:[#allocation5 + $0x2c40] sm:$0xff] }
 0x585   :  { %19546 = vmatpush.bf16.msrb.mxu2 %v30163_v13  ;;  %v30193_v13 = vld [vmem:[#allocation5 + $0x2c80] sm:$0xff] }
 0x586   :  { %19559 = vmatpush.bf16.msrb.mxu3 %v30171_v14  ;;  %v415_v14 = vld.sshfl [vmem:[#allocation1] sm:$0xff pattern:$0x73625140] }
 0x587   :  { %19521 = vmatpush.bf16.msrb.mxu0 %v30146_v15  ;;  %v417_v15 = vld.sshfl [vmem:[#allocation1 + $0x10] sm:$0xff pattern:$0x73625140] }
 0x588   :  { %19534 = vmatpush.bf16.msrb.mxu1 %v30154_v17  ;;  %v30224_v17 = vld [vmem:[#allocation5 + $0x2d78] sm:$0xff] }
 0x589   :  { %19547 = vmatpush.bf16.msrb.mxu2 %v30162_v18  ;;  %v416_v18 = vld.sshfl [vmem:[#allocation1 + $0x8] sm:$0xff pattern:$0x73625140] }
 0x58a   :  { %19560 = vmatpush.bf16.msrb.mxu3 %v30170_v20  ;;  %v30201_v20 = vld [vmem:[#allocation5 + $0x2cc0] sm:$0xff]  ;;  %v942_v25 = vpack.c.bf16 %v416_v18, %v416_v18  ;;  %v30263_v18 = vld [vmem:[#allocation5 + $0x2eb0] sm:$0xff] }
 0x58b   :  { %19522 = vmatpush.bf16.msrb.mxu0 %v30145_v22  ;;  %v19316_v46 = vpop.f32.mrf.mxu0  ;;  %v941_v22 = vpack.c.bf16 %v415_v14, %v415_v14 }
 0x58c   :  { %19535 = vmatpush.bf16.msrb.mxu1 %v30153_v23  ;;  %v19317_v47 = vadd.f32 %v19316_v46, %v31067_v9  ;;  %v19329_v49 = vpop.f32.mrf.mxu1  ;;  %v30202_v9 = vld [vmem:[#allocation5 + $0x2cc8] sm:$0xff]  ;;  %v943_v23 = vpack.c.bf16 %v417_v15, %v417_v15 }
 0x58d   :  { %19548 = vmatpush.bf16.msrb.mxu2 %v30161_v24  ;;  %v30240_v24 = vld [vmem:[#allocation5 + $0x2df8] sm:$0xff] }
 0x58e   :  { %19561 = vmatpush.bf16.msrb.mxu3 %v30169_v31  ;;  %19523 = vmatmul.bf16.vlgmr.msrb.gmra.mxu0 %v937_v33  ;;  %v19330_v52 = vadd.f32 %v19329_v49, %v19317_v47  ;;  %v30214_v31 = vld [vmem:[#allocation5 + $0x2d28] sm:$0xff] }
 0x58f   :  { %19567 = vmatpush.bf16.msra.mxu0 %v30184_v27  ;;  %19536 = vmatmul.bf16.vlgmr.msrb.gmra.mxu1 %v938_v36  ;;  %v30215_v27 = vld [vmem:[#allocation5 + $0x2d30] sm:$0xff]  ;;  %v30230_v33 = vld [vmem:[#allocation5 + $0x2da8] sm:$0xff] }
 0x590   :  { %19580 = vmatpush.bf16.msra.mxu1 %v30192_v28  ;;  %19549 = vmatmul.bf16.vlgmr.msrb.gmra.mxu2 %v939_v34  ;;  %v30223_v28 = vld [vmem:[#allocation5 + $0x2d70] sm:$0xff]  ;;  %v30238_v34 = vld [vmem:[#allocation5 + $0x2de8] sm:$0xff] }
 0x591   :  { %19593 = vmatpush.bf16.msra.mxu2 %v30200_v30  ;;  %19562 = vmatmul.bf16.vlgmr.msrb.gmra.mxu3 %v940_v37  ;;  %v30239_v30 = vld [vmem:[#allocation5 + $0x2df0] sm:$0xff]  ;;  %v30213_v37 = vld [vmem:[#allocation5 + $0x2d20] sm:$0xff] }
 0x592   :  { %19606 = vmatpush.bf16.msra.mxu3 %v30208_v35 }
 0x593   :  { %19568 = vmatpush.bf16.msra.mxu0 %v30183_v38  ;;  %v19342_v57 = vpop.f32.mrf.mxu2  ;;  %v19318_v61 = vpop.f32.mrf.mxu0 }
 0x594   :  { %19581 = vmatpush.bf16.msra.mxu1 %v30191_v39  ;;  %v19343_v58 = vadd.f32 %v19342_v57, %v19330_v52  ;;  %v19355_v60 = vpop.f32.mrf.mxu3  ;;  %v19331_v0 = vpop.f32.mrf.mxu1  ;;  %v30221_v39 = vld [vmem:[#allocation5 + $0x2d60] sm:$0xff]  ;;  %v30211_v52 = vld [vmem:[#allocation5 + $0x2d10] sm:$0xff]  ;;  %v30210_v57 = vld [vmem:[#allocation5 + $0x2d08] sm:$0xff] }
 0x595   :  { %19594 = vmatpush.bf16.msra.mxu2 %v30199_v40  ;;  %v30229_v40 = vld [vmem:[#allocation5 + $0x2da0] sm:$0xff] }
 0x596   :  { %19607 = vmatpush.bf16.msra.mxu3 %v30207_v41  ;;  %v31070_v62 = vadd.f32 %v19355_v60, %v19343_v58  ;;  %v110_v58 = vld [vmem:[#allocation2 + $0x170] sm:$0xff]  ;;  %v30226_v60 = vld [vmem:[#allocation5 + $0x2d88] sm:$0xff]  ;;  %v30209_v0 = vld [vmem:[#allocation5 + $0x2d00] sm:$0xff] }
 0x597   :  { %19569 = vmatpush.bf16.msra.mxu0 %v30182_v42  ;;  %v30237_v42 = vld [vmem:[#allocation5 + $0x2de0] sm:$0xff]  ;;  %423 = vst [vmem:[#allocation1] ss:$4 sm:$0xff] %v110_v58  ;;  %v30280_v58 = vld [vmem:[#allocation5 + $0x2f38] sm:$0xff] }
 0x598   :  { %19582 = vmatpush.bf16.msra.mxu1 %v30190_v43  ;;  %v30212_v43 = vld [vmem:[#allocation5 + $0x2d18] sm:$0xff] }
 0x599   :  { %19595 = vmatpush.bf16.msra.mxu2 %v30198_v44  ;;  %v30220_v44 = vld [vmem:[#allocation5 + $0x2d58] sm:$0xff] }
 0x59a   :  { %19608 = vmatpush.bf16.msra.mxu3 %v30206_v45  ;;  %v30228_v45 = vld [vmem:[#allocation5 + $0x2d98] sm:$0xff] }
 0x59b   :  { %19570 = vmatpush.bf16.msra.mxu0 %v30181_v48  ;;  %v19344_v8 = vpop.f32.mrf.mxu2  ;;  %v30236_v48 = vld [vmem:[#allocation5 + $0x2dd8] sm:$0xff] }
 0x59c   :  { %19583 = vmatpush.bf16.msra.mxu1 %v30189_v50  ;;  %v19357_v10 = vpop.f32.mrf.mxu3  ;;  %v30264_v8 = vld [vmem:[#allocation5 + $0x2eb8] sm:$0xff] }
 0x59d   :  { %19596 = vmatpush.bf16.msra.mxu2 %v30197_v51  ;;  %v422_v10 = vld.sshfl [vmem:[#allocation1 + $0x38] sm:$0xff pattern:$0x73625140] }
 0x59e   :  { %19609 = vmatpush.bf16.msra.mxu3 %v30205_v53  ;;  %v948_v15 = vpack.c.bf16 %v422_v10, %v422_v10  ;;  %v30286_v10 = vld [vmem:[#allocation5 + $0x2f68] sm:$0xff] }
 0x59f   :  { %19571 = vmatpush.bf16.msra.mxu0 %v30180_v54  ;;  %v30219_v54 = vld [vmem:[#allocation5 + $0x2d50] sm:$0xff] }
 0x5a0   :  { %19584 = vmatpush.bf16.msra.mxu1 %v30188_v55  ;;  %v30227_v55 = vld [vmem:[#allocation5 + $0x2d90] sm:$0xff] }
 0x5a1   :  { %19597 = vmatpush.bf16.msra.mxu2 %v30196_v56  ;;  %v30235_v56 = vld [vmem:[#allocation5 + $0x2dd0] sm:$0xff] }
 0x5a2   :  { %19610 = vmatpush.bf16.msra.mxu3 %v30204_v59  ;;  %v30218_v59 = vld [vmem:[#allocation5 + $0x2d48] sm:$0xff] }
 0x5a3   :  { %19572 = vmatpush.bf16.msra.mxu0 %v30179_v63 }
 0x5a4   :  { %19585 = vmatpush.bf16.msra.mxu1 %v30187_v1  ;;  %v30217_v1 = vld [vmem:[#allocation5 + $0x2d40] sm:$0xff] }
 0x5a5   :  { %19598 = vmatpush.bf16.msra.mxu2 %v30195_v2  ;;  %v30225_v2 = vld [vmem:[#allocation5 + $0x2d80] sm:$0xff] }
 0x5a6   :  { %19611 = vmatpush.bf16.msra.mxu3 %v30203_v3  ;;  %v419_v3 = vld.sshfl [vmem:[#allocation1 + $0x20] sm:$0xff pattern:$0x73625140] }
 0x5a7   :  { %19573 = vmatpush.bf16.msra.mxu0 %v30178_v4  ;;  %v421_v4 = vld.sshfl [vmem:[#allocation1 + $0x30] sm:$0xff pattern:$0x73625140] }
 0x5a8   :  { %19586 = vmatpush.bf16.msra.mxu1 %v30186_v6  ;;  %v30256_v6 = vld [vmem:[#allocation5 + $0x2e78] sm:$0xff] }
 0x5a9   :  { %19599 = vmatpush.bf16.msra.mxu2 %v30194_v7  ;;  %v420_v7 = vld.sshfl [vmem:[#allocation1 + $0x28] sm:$0xff pattern:$0x73625140] }
 0x5aa   :  { %19612 = vmatpush.bf16.msra.mxu3 %v30202_v9  ;;  %v30233_v9 = vld [vmem:[#allocation5 + $0x2dc0] sm:$0xff]  ;;  %v946_v14 = vpack.c.bf16 %v420_v7, %v420_v7  ;;  %v30295_v7 = vld [vmem:[#allocation5 + $0x2fb0] sm:$0xff] }
 0x5ab   :  { %19574 = vmatpush.bf16.msra.mxu0 %v30177_v11  ;;  %v19368_v35 = vpop.f32.mrf.mxu0  ;;  %v945_v11 = vpack.c.bf16 %v419_v3, %v419_v3 }
 0x5ac   :  { %19587 = vmatpush.bf16.msra.mxu1 %v30185_v12  ;;  %v19369_v36 = vadd.f32 %v19368_v35, %v31070_v62  ;;  %v19381_v38 = vpop.f32.mrf.mxu1  ;;  %v30234_v62 = vld [vmem:[#allocation5 + $0x2dc8] sm:$0xff]  ;;  %v947_v12 = vpack.c.bf16 %v421_v4, %v421_v4 }
 0x5ad   :  { %19600 = vmatpush.bf16.msra.mxu2 %v30193_v13  ;;  %v30272_v13 = vld [vmem:[#allocation5 + $0x2ef8] sm:$0xff] }
 0x5ae   :  { %19613 = vmatpush.bf16.msra.mxu3 %v30201_v20  ;;  %19575 = vmatmul.bf16.vlgmr.msra.gmra.mxu0 %v941_v22  ;;  %v19382_v41 = vadd.f32 %v19381_v38, %v19369_v36  ;;  %v30246_v20 = vld [vmem:[#allocation5 + $0x2e28] sm:$0xff] }
 0x5af   :  { %19619 = vmatpush.bf16.msrb.mxu0 %v30216_v16  ;;  %19588 = vmatmul.bf16.vlgmr.msra.gmra.mxu1 %v942_v25  ;;  %v30247_v16 = vld [vmem:[#allocation5 + $0x2e30] sm:$0xff]  ;;  %v30262_v22 = vld [vmem:[#allocation5 + $0x2ea8] sm:$0xff] }
 0x5b0   :  { %19632 = vmatpush.bf16.msrb.mxu1 %v30224_v17  ;;  %19601 = vmatmul.bf16.vlgmr.msra.gmra.mxu2 %v943_v23  ;;  %v30255_v17 = vld [vmem:[#allocation5 + $0x2e70] sm:$0xff]  ;;  %v30270_v23 = vld [vmem:[#allocation5 + $0x2ee8] sm:$0xff] }
 0x5b1   :  { %19645 = vmatpush.bf16.msrb.mxu2 %v30232_v19  ;;  %19614 = vmatmul.bf16.vlgmr.msra.gmra.mxu3 %v944_v26  ;;  %v30271_v19 = vld [vmem:[#allocation5 + $0x2ef0] sm:$0xff]  ;;  %v30245_v26 = vld [vmem:[#allocation5 + $0x2e20] sm:$0xff] }
 0x5b2   :  { %19658 = vmatpush.bf16.msrb.mxu3 %v30240_v24 }
 0x5b3   :  { %19620 = vmatpush.bf16.msrb.mxu0 %v30215_v27  ;;  %v19394_v46 = vpop.f32.mrf.mxu2  ;;  %v19370_v50 = vpop.f32.mrf.mxu0 }
 0x5b4   :  { %19633 = vmatpush.bf16.msrb.mxu1 %v30223_v28  ;;  %v19395_v47 = vadd.f32 %v19394_v46, %v19382_v41  ;;  %v19407_v49 = vpop.f32.mrf.mxu3  ;;  %v19383_v53 = vpop.f32.mrf.mxu1  ;;  %v30253_v28 = vld [vmem:[#allocation5 + $0x2e60] sm:$0xff]  ;;  %v30243_v41 = vld [vmem:[#allocation5 + $0x2e10] sm:$0xff]  ;;  %v30242_v46 = vld [vmem:[#allocation5 + $0x2e08] sm:$0xff] }
 0x5b5   :  { %19646 = vmatpush.bf16.msrb.mxu2 %v30231_v29  ;;  %v30261_v29 = vld [vmem:[#allocation5 + $0x2ea0] sm:$0xff] }
 0x5b6   :  { %19659 = vmatpush.bf16.msrb.mxu3 %v30239_v30  ;;  %v31073_v51 = vadd.f32 %v19407_v49, %v19395_v47  ;;  %v111_v47 = vld [vmem:[#allocation2 + $0x178] sm:$0xff]  ;;  %v30258_v49 = vld [vmem:[#allocation5 + $0x2e88] sm:$0xff] }
 0x5b7   :  { %19621 = vmatpush.bf16.msrb.mxu0 %v30214_v31  ;;  %v30269_v31 = vld [vmem:[#allocation5 + $0x2ee0] sm:$0xff]  ;;  %424 = vst [vmem:[#allocation1 + $0x20] ss:$4 sm:$0xff] %v111_v47  ;;  %v30312_v47 = vld [vmem:[#allocation5 + $0x3038] sm:$0xff] }
 0x5b8   :  { %19634 = vmatpush.bf16.msrb.mxu1 %v30222_v32  ;;  %v30244_v32 = vld [vmem:[#allocation5 + $0x2e18] sm:$0xff]  ;;  %v30241_v53 = vld [vmem:[#allocation5 + $0x2e00] sm:$0xff] }
 0x5b9   :  { %19647 = vmatpush.bf16.msrb.mxu2 %v30230_v33  ;;  %v30252_v33 = vld [vmem:[#allocation5 + $0x2e58] sm:$0xff] }
 0x5ba   :  { %19660 = vmatpush.bf16.msrb.mxu3 %v30238_v34  ;;  %v30260_v34 = vld [vmem:[#allocation5 + $0x2e98] sm:$0xff] }
 0x5bb   :  { %19622 = vmatpush.bf16.msrb.mxu0 %v30213_v37  ;;  %v19396_v61 = vpop.f32.mrf.mxu2  ;;  %v30268_v37 = vld [vmem:[#allocation5 + $0x2ed8] sm:$0xff] }
 0x5bc   :  { %19635 = vmatpush.bf16.msrb.mxu1 %v30221_v39  ;;  %v19409_v63 = vpop.f32.mrf.mxu3  ;;  %v30296_v61 = vld [vmem:[#allocation5 + $0x2fb8] sm:$0xff] }
 0x5bd   :  { %19648 = vmatpush.bf16.msrb.mxu2 %v30229_v40  ;;  %v428_v63 = vld.sshfl [vmem:[#allocation1 + $0x18] sm:$0xff pattern:$0x73625140] }
 0x5be   :  { %19661 = vmatpush.bf16.msrb.mxu3 %v30237_v42  ;;  %v952_v4 = vpack.c.bf16 %v428_v63, %v428_v63  ;;  %v30318_v63 = vld [vmem:[#allocation5 + $0x3068] sm:$0xff] }
 0x5bf   :  { %19623 = vmatpush.bf16.msrb.mxu0 %v30212_v43  ;;  %v30251_v43 = vld [vmem:[#allocation5 + $0x2e50] sm:$0xff] }
 0x5c0   :  { %19636 = vmatpush.bf16.msrb.mxu1 %v30220_v44  ;;  %v30259_v44 = vld [vmem:[#allocation5 + $0x2e90] sm:$0xff] }
 0x5c1   :  { %19649 = vmatpush.bf16.msrb.mxu2 %v30228_v45  ;;  %v30267_v45 = vld [vmem:[#allocation5 + $0x2ed0] sm:$0xff] }
 0x5c2   :  { %19662 = vmatpush.bf16.msrb.mxu3 %v30236_v48  ;;  %v30250_v48 = vld [vmem:[#allocation5 + $0x2e48] sm:$0xff] }
 0x5c3   :  { %19624 = vmatpush.bf16.msrb.mxu0 %v30211_v52 }
 0x5c4   :  { %19637 = vmatpush.bf16.msrb.mxu1 %v30219_v54  ;;  %v30249_v54 = vld [vmem:[#allocation5 + $0x2e40] sm:$0xff] }
 0x5c5   :  { %19650 = vmatpush.bf16.msrb.mxu2 %v30227_v55  ;;  %v30257_v55 = vld [vmem:[#allocation5 + $0x2e80] sm:$0xff] }
 0x5c6   :  { %19663 = vmatpush.bf16.msrb.mxu3 %v30235_v56  ;;  %v425_v56 = vld.sshfl [vmem:[#allocation1] sm:$0xff pattern:$0x73625140] }
 0x5c7   :  { %19625 = vmatpush.bf16.msrb.mxu0 %v30210_v57  ;;  %v427_v57 = vld.sshfl [vmem:[#allocation1 + $0x10] sm:$0xff pattern:$0x73625140] }
 0x5c8   :  { %19638 = vmatpush.bf16.msrb.mxu1 %v30218_v59  ;;  %v30288_v59 = vld [vmem:[#allocation5 + $0x2f78] sm:$0xff] }
 0x5c9   :  { %19651 = vmatpush.bf16.msrb.mxu2 %v30226_v60  ;;  %v426_v60 = vld.sshfl [vmem:[#allocation1 + $0x8] sm:$0xff pattern:$0x73625140] }
 0x5ca   :  { %19664 = vmatpush.bf16.msrb.mxu3 %v30234_v62  ;;  %v30265_v62 = vld [vmem:[#allocation5 + $0x2ec0] sm:$0xff]  ;;  %v950_v3 = vpack.c.bf16 %v426_v60, %v426_v60  ;;  %v30327_v60 = vld [vmem:[#allocation5 + $0x30b0] sm:$0xff] }
 0x5cb   :  { %19626 = vmatpush.bf16.msrb.mxu0 %v30209_v0  ;;  %v19420_v24 = vpop.f32.mrf.mxu0  ;;  %v949_v0 = vpack.c.bf16 %v425_v56, %v425_v56 }
 0x5cc   :  { %19639 = vmatpush.bf16.msrb.mxu1 %v30217_v1  ;;  %v19421_v25 = vadd.f32 %v19420_v24, %v31073_v51  ;;  %v19433_v27 = vpop.f32.mrf.mxu1  ;;  %v30266_v51 = vld [vmem:[#allocation5 + $0x2ec8] sm:$0xff]  ;;  %v951_v1 = vpack.c.bf16 %v427_v57, %v427_v57 }
 0x5cd   :  { %19652 = vmatpush.bf16.msrb.mxu2 %v30225_v2  ;;  %v30304_v2 = vld [vmem:[#allocation5 + $0x2ff8] sm:$0xff] }
 0x5ce   :  { %19665 = vmatpush.bf16.msrb.mxu3 %v30233_v9  ;;  %19627 = vmatmul.bf16.vlgmr.msrb.gmra.mxu0 %v945_v11  ;;  %v19434_v30 = vadd.f32 %v19433_v27, %v19421_v25  ;;  %v30278_v9 = vld [vmem:[#allocation5 + $0x2f28] sm:$0xff] }
 0x5cf   :  { %19671 = vmatpush.bf16.msra.mxu0 %v30248_v5  ;;  %19640 = vmatmul.bf16.vlgmr.msrb.gmra.mxu1 %v946_v14  ;;  %v30279_v5 = vld [vmem:[#allocation5 + $0x2f30] sm:$0xff]  ;;  %v30294_v11 = vld [vmem:[#allocation5 + $0x2fa8] sm:$0xff] }
 0x5d0   :  { %19684 = vmatpush.bf16.msra.mxu1 %v30256_v6  ;;  %19653 = vmatmul.bf16.vlgmr.msrb.gmra.mxu2 %v947_v12  ;;  %v30287_v6 = vld [vmem:[#allocation5 + $0x2f70] sm:$0xff]  ;;  %v30302_v12 = vld [vmem:[#allocation5 + $0x2fe8] sm:$0xff] }
 0x5d1   :  { %19697 = vmatpush.bf16.msra.mxu2 %v30264_v8  ;;  %19666 = vmatmul.bf16.vlgmr.msrb.gmra.mxu3 %v948_v15  ;;  %v30303_v8 = vld [vmem:[#allocation5 + $0x2ff0] sm:$0xff]  ;;  %v30277_v15 = vld [vmem:[#allocation5 + $0x2f20] sm:$0xff] }
 0x5d2   :  { %19710 = vmatpush.bf16.msra.mxu3 %v30272_v13 }
 0x5d3   :  { %19672 = vmatpush.bf16.msra.mxu0 %v30247_v16  ;;  %v19446_v35 = vpop.f32.mrf.mxu2  ;;  %v19422_v39 = vpop.f32.mrf.mxu0 }
 0x5d4   :  { %19685 = vmatpush.bf16.msra.mxu1 %v30255_v17  ;;  %v19447_v36 = vadd.f32 %v19446_v35, %v19434_v30  ;;  %v19459_v38 = vpop.f32.mrf.mxu3  ;;  %v19435_v42 = vpop.f32.mrf.mxu1  ;;  %v30285_v17 = vld [vmem:[#allocation5 + $0x2f60] sm:$0xff]  ;;  %v30275_v30 = vld [vmem:[#allocation5 + $0x2f10] sm:$0xff]  ;;  %v30274_v35 = vld [vmem:[#allocation5 + $0x2f08] sm:$0xff] }
 0x5d5   :  { %19698 = vmatpush.bf16.msra.mxu2 %v30263_v18  ;;  %v30293_v18 = vld [vmem:[#allocation5 + $0x2fa0] sm:$0xff] }
 0x5d6   :  { %19711 = vmatpush.bf16.msra.mxu3 %v30271_v19  ;;  %v31076_v40 = vadd.f32 %v19459_v38, %v19447_v36  ;;  %v112_v36 = vld [vmem:[#allocation2 + $0x180] sm:$0xff] }
 0x5d7   :  { %19673 = vmatpush.bf16.msra.mxu0 %v30246_v20  ;;  %v30301_v20 = vld [vmem:[#allocation5 + $0x2fe0] sm:$0xff]  ;;  %v30290_v38 = vld [vmem:[#allocation5 + $0x2f88] sm:$0xff]  ;;  %433 = vst [vmem:[#allocation1] ss:$4 sm:$0xff] %v112_v36  ;;  %v30344_v36 = vld [vmem:[#allocation5 + $0x3138] sm:$0xff] }
 0x5d8   :  { %19686 = vmatpush.bf16.msra.mxu1 %v30254_v21  ;;  %v30276_v21 = vld [vmem:[#allocation5 + $0x2f18] sm:$0xff]  ;;  %v30273_v42 = vld [vmem:[#allocation5 + $0x2f00] sm:$0xff] }
 0x5d9   :  { %19699 = vmatpush.bf16.msra.mxu2 %v30262_v22  ;;  %v30284_v22 = vld [vmem:[#allocation5 + $0x2f58] sm:$0xff] }
 0x5da   :  { %19712 = vmatpush.bf16.msra.mxu3 %v30270_v23  ;;  %v30292_v23 = vld [vmem:[#allocation5 + $0x2f98] sm:$0xff] }
 0x5db   :  { %19674 = vmatpush.bf16.msra.mxu0 %v30245_v26  ;;  %v19448_v50 = vpop.f32.mrf.mxu2  ;;  %v30300_v26 = vld [vmem:[#allocation5 + $0x2fd8] sm:$0xff] }
 0x5dc   :  { %19687 = vmatpush.bf16.msra.mxu1 %v30253_v28  ;;  %v19461_v52 = vpop.f32.mrf.mxu3  ;;  %v30328_v50 = vld [vmem:[#allocation5 + $0x30b8] sm:$0xff] }
 0x5dd   :  { %19700 = vmatpush.bf16.msra.mxu2 %v30261_v29  ;;  %v432_v52 = vld.sshfl [vmem:[#allocation1 + $0x38] sm:$0xff pattern:$0x73625140] }
 0x5de   :  { %19713 = vmatpush.bf16.msra.mxu3 %v30269_v31  ;;  %v956_v57 = vpack.c.bf16 %v432_v52, %v432_v52  ;;  %v30350_v52 = vld [vmem:[#allocation5 + $0x3168] sm:$0xff] }
 0x5df   :  { %19675 = vmatpush.bf16.msra.mxu0 %v30244_v32  ;;  %v30283_v32 = vld [vmem:[#allocation5 + $0x2f50] sm:$0xff] }
 0x5e0   :  { %19688 = vmatpush.bf16.msra.mxu1 %v30252_v33  ;;  %v30291_v33 = vld [vmem:[#allocation5 + $0x2f90] sm:$0xff] }
 0x5e1   :  { %19701 = vmatpush.bf16.msra.mxu2 %v30260_v34  ;;  %v30299_v34 = vld [vmem:[#allocation5 + $0x2fd0] sm:$0xff] }
 0x5e2   :  { %19714 = vmatpush.bf16.msra.mxu3 %v30268_v37  ;;  %v30282_v37 = vld [vmem:[#allocation5 + $0x2f48] sm:$0xff] }
 0x5e3   :  { %19676 = vmatpush.bf16.msra.mxu0 %v30243_v41 }
 0x5e4   :  { %19689 = vmatpush.bf16.msra.mxu1 %v30251_v43  ;;  %v30281_v43 = vld [vmem:[#allocation5 + $0x2f40] sm:$0xff] }
 0x5e5   :  { %19702 = vmatpush.bf16.msra.mxu2 %v30259_v44  ;;  %v30289_v44 = vld [vmem:[#allocation5 + $0x2f80] sm:$0xff] }
 0x5e6   :  { %19715 = vmatpush.bf16.msra.mxu3 %v30267_v45  ;;  %v429_v45 = vld.sshfl [vmem:[#allocation1 + $0x20] sm:$0xff pattern:$0x73625140] }
 0x5e7   :  { %19677 = vmatpush.bf16.msra.mxu0 %v30242_v46  ;;  %v431_v46 = vld.sshfl [vmem:[#allocation1 + $0x30] sm:$0xff pattern:$0x73625140] }
 0x5e8   :  { %19690 = vmatpush.bf16.msra.mxu1 %v30250_v48  ;;  %v30320_v48 = vld [vmem:[#allocation5 + $0x3078] sm:$0xff] }
 0x5e9   :  { %19703 = vmatpush.bf16.msra.mxu2 %v30258_v49  ;;  %v430_v49 = vld.sshfl [vmem:[#allocation1 + $0x28] sm:$0xff pattern:$0x73625140] }
 0x5ea   :  { %19716 = vmatpush.bf16.msra.mxu3 %v30266_v51  ;;  %v30297_v51 = vld [vmem:[#allocation5 + $0x2fc0] sm:$0xff]  ;;  %v954_v56 = vpack.c.bf16 %v430_v49, %v430_v49  ;;  %v30359_v49 = vld [vmem:[#allocation5 + $0x31b0] sm:$0xff] }
 0x5eb   :  { %19678 = vmatpush.bf16.msra.mxu0 %v30241_v53  ;;  %v19472_v13 = vpop.f32.mrf.mxu0  ;;  %v953_v53 = vpack.c.bf16 %v429_v45, %v429_v45 }
 0x5ec   :  { %19691 = vmatpush.bf16.msra.mxu1 %v30249_v54  ;;  %v19473_v14 = vadd.f32 %v19472_v13, %v31076_v40  ;;  %v19485_v16 = vpop.f32.mrf.mxu1  ;;  %v30298_v40 = vld [vmem:[#allocation5 + $0x2fc8] sm:$0xff]  ;;  %v955_v54 = vpack.c.bf16 %v431_v46, %v431_v46 }
 0x5ed   :  { %19704 = vmatpush.bf16.msra.mxu2 %v30257_v55  ;;  %v30336_v55 = vld [vmem:[#allocation5 + $0x30f8] sm:$0xff] }
 0x5ee   :  { %19717 = vmatpush.bf16.msra.mxu3 %v30265_v62  ;;  %19679 = vmatmul.bf16.vlgmr.msra.gmra.mxu0 %v949_v0  ;;  %v19486_v19 = vadd.f32 %v19485_v16, %v19473_v14  ;;  %v30310_v62 = vld [vmem:[#allocation5 + $0x3028] sm:$0xff] }
 0x5ef   :  { %19723 = vmatpush.bf16.msrb.mxu0 %v30280_v58  ;;  %19692 = vmatmul.bf16.vlgmr.msra.gmra.mxu1 %v950_v3  ;;  %v30311_v58 = vld [vmem:[#allocation5 + $0x3030] sm:$0xff]  ;;  %v30326_v0 = vld [vmem:[#allocation5 + $0x30a8] sm:$0xff] }
 0x5f0   :  { %19736 = vmatpush.bf16.msrb.mxu1 %v30288_v59  ;;  %19705 = vmatmul.bf16.vlgmr.msra.gmra.mxu2 %v951_v1  ;;  %v30319_v59 = vld [vmem:[#allocation5 + $0x3070] sm:$0xff]  ;;  %v30334_v1 = vld [vmem:[#allocation5 + $0x30e8] sm:$0xff] }
 0x5f1   :  { %19749 = vmatpush.bf16.msrb.mxu2 %v30296_v61  ;;  %19718 = vmatmul.bf16.vlgmr.msra.gmra.mxu3 %v952_v4  ;;  %v30335_v61 = vld [vmem:[#allocation5 + $0x30f0] sm:$0xff]  ;;  %v30309_v4 = vld [vmem:[#allocation5 + $0x3020] sm:$0xff] }
 0x5f2   :  { %19762 = vmatpush.bf16.msrb.mxu3 %v30304_v2 }
 0x5f3   :  { %19724 = vmatpush.bf16.msrb.mxu0 %v30279_v5  ;;  %v19498_v24 = vpop.f32.mrf.mxu2  ;;  %v19474_v28 = vpop.f32.mrf.mxu0 }
 0x5f4   :  { %19737 = vmatpush.bf16.msrb.mxu1 %v30287_v6  ;;  %v19499_v25 = vadd.f32 %v19498_v24, %v19486_v19  ;;  %v19511_v27 = vpop.f32.mrf.mxu3  ;;  %v19487_v31 = vpop.f32.mrf.mxu1  ;;  %v30317_v6 = vld [vmem:[#allocation5 + $0x3060] sm:$0xff]  ;;  %v30307_v19 = vld [vmem:[#allocation5 + $0x3010] sm:$0xff]  ;;  %v30306_v24 = vld [vmem:[#allocation5 + $0x3008] sm:$0xff] }
 0x5f5   :  { %19750 = vmatpush.bf16.msrb.mxu2 %v30295_v7  ;;  %v30325_v7 = vld [vmem:[#allocation5 + $0x30a0] sm:$0xff] }
 0x5f6   :  { %19763 = vmatpush.bf16.msrb.mxu3 %v30303_v8  ;;  %v31079_v29 = vadd.f32 %v19511_v27, %v19499_v25  ;;  %v113_v25 = vld [vmem:[#allocation2 + $0x188] sm:$0xff]  ;;  %v30305_v31 = vld [vmem:[#allocation5 + $0x3000] sm:$0xff] }
 0x5f7   :  { %19725 = vmatpush.bf16.msrb.mxu0 %v30278_v9  ;;  %v30333_v9 = vld [vmem:[#allocation5 + $0x30e0] sm:$0xff]  ;;  %v30322_v27 = vld [vmem:[#allocation5 + $0x3088] sm:$0xff]  ;;  %434 = vst [vmem:[#allocation1 + $0x20] ss:$4 sm:$0xff] %v113_v25  ;;  %v30376_v25 = vld [vmem:[#allocation5 + $0x3238] sm:$0xff] }
 0x5f8   :  { %19738 = vmatpush.bf16.msrb.mxu1 %v30286_v10  ;;  %v30308_v10 = vld [vmem:[#allocation5 + $0x3018] sm:$0xff] }
 0x5f9   :  { %19751 = vmatpush.bf16.msrb.mxu2 %v30294_v11  ;;  %v30316_v11 = vld [vmem:[#allocation5 + $0x3058] sm:$0xff] }
 0x5fa   :  { %19764 = vmatpush.bf16.msrb.mxu3 %v30302_v12  ;;  %v30324_v12 = vld [vmem:[#allocation5 + $0x3098] sm:$0xff] }
 0x5fb   :  { %19726 = vmatpush.bf16.msrb.mxu0 %v30277_v15  ;;  %v19500_v39 = vpop.f32.mrf.mxu2  ;;  %v30332_v15 = vld [vmem:[#allocation5 + $0x30d8] sm:$0xff] }
 0x5fc   :  { %19739 = vmatpush.bf16.msrb.mxu1 %v30285_v17  ;;  %v19513_v41 = vpop.f32.mrf.mxu3  ;;  %v30360_v39 = vld [vmem:[#allocation5 + $0x31b8] sm:$0xff] }
 0x5fd   :  { %19752 = vmatpush.bf16.msrb.mxu2 %v30293_v18  ;;  %v438_v41 = vld.sshfl [vmem:[#allocation1 + $0x18] sm:$0xff pattern:$0x73625140] }
 0x5fe   :  { %19765 = vmatpush.bf16.msrb.mxu3 %v30301_v20  ;;  %v960_v46 = vpack.c.bf16 %v438_v41, %v438_v41  ;;  %v30382_v41 = vld [vmem:[#allocation5 + $0x3268] sm:$0xff] }
 0x5ff   :  { %19727 = vmatpush.bf16.msrb.mxu0 %v30276_v21  ;;  %v30315_v21 = vld [vmem:[#allocation5 + $0x3050] sm:$0xff] }
 0x600   :  { %19740 = vmatpush.bf16.msrb.mxu1 %v30284_v22  ;;  %v30323_v22 = vld [vmem:[#allocation5 + $0x3090] sm:$0xff] }
 0x601   :  { %19753 = vmatpush.bf16.msrb.mxu2 %v30292_v23  ;;  %v30331_v23 = vld [vmem:[#allocation5 + $0x30d0] sm:$0xff] }
 0x602   :  { %19766 = vmatpush.bf16.msrb.mxu3 %v30300_v26  ;;  %v30314_v26 = vld [vmem:[#allocation5 + $0x3048] sm:$0xff] }
 0x603   :  { %19728 = vmatpush.bf16.msrb.mxu0 %v30275_v30 }
 0x604   :  { %19741 = vmatpush.bf16.msrb.mxu1 %v30283_v32  ;;  %v30313_v32 = vld [vmem:[#allocation5 + $0x3040] sm:$0xff] }
 0x605   :  { %19754 = vmatpush.bf16.msrb.mxu2 %v30291_v33  ;;  %v30321_v33 = vld [vmem:[#allocation5 + $0x3080] sm:$0xff] }
 0x606   :  { %19767 = vmatpush.bf16.msrb.mxu3 %v30299_v34  ;;  %v435_v34 = vld.sshfl [vmem:[#allocation1] sm:$0xff pattern:$0x73625140] }
 0x607   :  { %19729 = vmatpush.bf16.msrb.mxu0 %v30274_v35  ;;  %v437_v35 = vld.sshfl [vmem:[#allocation1 + $0x10] sm:$0xff pattern:$0x73625140] }
 0x608   :  { %19742 = vmatpush.bf16.msrb.mxu1 %v30282_v37  ;;  %v30352_v37 = vld [vmem:[#allocation5 + $0x3178] sm:$0xff] }
 0x609   :  { %19755 = vmatpush.bf16.msrb.mxu2 %v30290_v38  ;;  %v436_v38 = vld.sshfl [vmem:[#allocation1 + $0x8] sm:$0xff pattern:$0x73625140] }
 0x60a   :  { %19768 = vmatpush.bf16.msrb.mxu3 %v30298_v40  ;;  %v30329_v40 = vld [vmem:[#allocation5 + $0x30c0] sm:$0xff]  ;;  %v958_v45 = vpack.c.bf16 %v436_v38, %v436_v38  ;;  %v30391_v38 = vld [vmem:[#allocation5 + $0x32b0] sm:$0xff] }
 0x60b   :  { %19730 = vmatpush.bf16.msrb.mxu0 %v30273_v42  ;;  %v19524_v2 = vpop.f32.mrf.mxu0  ;;  %v957_v42 = vpack.c.bf16 %v435_v34, %v435_v34 }
 0x60c   :  { %19743 = vmatpush.bf16.msrb.mxu1 %v30281_v43  ;;  %v19525_v3 = vadd.f32 %v19524_v2, %v31079_v29  ;;  %v19537_v5 = vpop.f32.mrf.mxu1  ;;  %v30330_v29 = vld [vmem:[#allocation5 + $0x30c8] sm:$0xff]  ;;  %v959_v43 = vpack.c.bf16 %v437_v35, %v437_v35 }
 0x60d   :  { %19756 = vmatpush.bf16.msrb.mxu2 %v30289_v44  ;;  %v30368_v44 = vld [vmem:[#allocation5 + $0x31f8] sm:$0xff] }
 0x60e   :  { %19769 = vmatpush.bf16.msrb.mxu3 %v30297_v51  ;;  %19731 = vmatmul.bf16.vlgmr.msrb.gmra.mxu0 %v953_v53  ;;  %v19538_v8 = vadd.f32 %v19537_v5, %v19525_v3  ;;  %v30342_v51 = vld [vmem:[#allocation5 + $0x3128] sm:$0xff] }
 0x60f   :  { %19775 = vmatpush.bf16.msra.mxu0 %v30312_v47  ;;  %19744 = vmatmul.bf16.vlgmr.msrb.gmra.mxu1 %v954_v56  ;;  %v30343_v47 = vld [vmem:[#allocation5 + $0x3130] sm:$0xff]  ;;  %v30358_v53 = vld [vmem:[#allocation5 + $0x31a8] sm:$0xff] }
 0x610   :  { %19788 = vmatpush.bf16.msra.mxu1 %v30320_v48  ;;  %19757 = vmatmul.bf16.vlgmr.msrb.gmra.mxu2 %v955_v54  ;;  %v30351_v48 = vld [vmem:[#allocation5 + $0x3170] sm:$0xff]  ;;  %v30366_v54 = vld [vmem:[#allocation5 + $0x31e8] sm:$0xff] }
 0x611   :  { %19801 = vmatpush.bf16.msra.mxu2 %v30328_v50  ;;  %19770 = vmatmul.bf16.vlgmr.msrb.gmra.mxu3 %v956_v57  ;;  %v30367_v50 = vld [vmem:[#allocation5 + $0x31f0] sm:$0xff]  ;;  %v30341_v57 = vld [vmem:[#allocation5 + $0x3120] sm:$0xff] }
 0x612   :  { %19814 = vmatpush.bf16.msra.mxu3 %v30336_v55 }
 0x613   :  { %19776 = vmatpush.bf16.msra.mxu0 %v30311_v58  ;;  %v19550_v13 = vpop.f32.mrf.mxu2  ;;  %v19526_v17 = vpop.f32.mrf.mxu0 }
 0x614   :  { %19789 = vmatpush.bf16.msra.mxu1 %v30319_v59  ;;  %v19551_v14 = vadd.f32 %v19550_v13, %v19538_v8  ;;  %v19563_v16 = vpop.f32.mrf.mxu3  ;;  %v19539_v20 = vpop.f32.mrf.mxu1  ;;  %v30349_v59 = vld [vmem:[#allocation5 + $0x3160] sm:$0xff]  ;;  %v30339_v8 = vld [vmem:[#allocation5 + $0x3110] sm:$0xff]  ;;  %v30338_v13 = vld [vmem:[#allocation5 + $0x3108] sm:$0xff] }
 0x615   :  { %19802 = vmatpush.bf16.msra.mxu2 %v30327_v60  ;;  %v30357_v60 = vld [vmem:[#allocation5 + $0x31a0] sm:$0xff] }
 0x616   :  { %19815 = vmatpush.bf16.msra.mxu3 %v30335_v61  ;;  %v31082_v18 = vadd.f32 %v19563_v16, %v19551_v14  ;;  %v114_v14 = vld [vmem:[#allocation2 + $0x190] sm:$0xff]  ;;  %v30354_v16 = vld [vmem:[#allocation5 + $0x3188] sm:$0xff]  ;;  %v30337_v20 = vld [vmem:[#allocation5 + $0x3100] sm:$0xff] }
 0x617   :  { %19777 = vmatpush.bf16.msra.mxu0 %v30310_v62  ;;  %v30365_v62 = vld [vmem:[#allocation5 + $0x31e0] sm:$0xff]  ;;  %443 = vst [vmem:[#allocation1] ss:$4 sm:$0xff] %v114_v14  ;;  %v30408_v14 = vld [vmem:[#allocation5 + $0x3338] sm:$0xff] }
 0x618   :  { %19790 = vmatpush.bf16.msra.mxu1 %v30318_v63  ;;  %v30340_v63 = vld [vmem:[#allocation5 + $0x3118] sm:$0xff] }
 0x619   :  { %19803 = vmatpush.bf16.msra.mxu2 %v30326_v0  ;;  %v30348_v0 = vld [vmem:[#allocation5 + $0x3158] sm:$0xff] }
 0x61a   :  { %19816 = vmatpush.bf16.msra.mxu3 %v30334_v1  ;;  %v30356_v1 = vld [vmem:[#allocation5 + $0x3198] sm:$0xff] }
 0x61b   :  { %19778 = vmatpush.bf16.msra.mxu0 %v30309_v4  ;;  %v19552_v28 = vpop.f32.mrf.mxu2  ;;  %v30364_v4 = vld [vmem:[#allocation5 + $0x31d8] sm:$0xff] }
 0x61c   :  { %19791 = vmatpush.bf16.msra.mxu1 %v30317_v6  ;;  %v19565_v30 = vpop.f32.mrf.mxu3  ;;  %v30392_v28 = vld [vmem:[#allocation5 + $0x32b8] sm:$0xff] }
 0x61d   :  { %19804 = vmatpush.bf16.msra.mxu2 %v30325_v7  ;;  %v442_v30 = vld.sshfl [vmem:[#allocation1 + $0x38] sm:$0xff pattern:$0x73625140] }
 0x61e   :  { %19817 = vmatpush.bf16.msra.mxu3 %v30333_v9  ;;  %v964_v35 = vpack.c.bf16 %v442_v30, %v442_v30  ;;  %v30414_v30 = vld [vmem:[#allocation5 + $0x3368] sm:$0xff] }
 0x61f   :  { %19779 = vmatpush.bf16.msra.mxu0 %v30308_v10  ;;  %v30347_v10 = vld [vmem:[#allocation5 + $0x3150] sm:$0xff] }
 0x620   :  { %19792 = vmatpush.bf16.msra.mxu1 %v30316_v11  ;;  %v30355_v11 = vld [vmem:[#allocation5 + $0x3190] sm:$0xff] }
 0x621   :  { %19805 = vmatpush.bf16.msra.mxu2 %v30324_v12  ;;  %v30363_v12 = vld [vmem:[#allocation5 + $0x31d0] sm:$0xff] }
 0x622   :  { %19818 = vmatpush.bf16.msra.mxu3 %v30332_v15  ;;  %v30346_v15 = vld [vmem:[#allocation5 + $0x3148] sm:$0xff] }
 0x623   :  { %19780 = vmatpush.bf16.msra.mxu0 %v30307_v19 }
 0x624   :  { %19793 = vmatpush.bf16.msra.mxu1 %v30315_v21  ;;  %v30345_v21 = vld [vmem:[#allocation5 + $0x3140] sm:$0xff] }
 0x625   :  { %19806 = vmatpush.bf16.msra.mxu2 %v30323_v22  ;;  %v30353_v22 = vld [vmem:[#allocation5 + $0x3180] sm:$0xff] }
 0x626   :  { %19819 = vmatpush.bf16.msra.mxu3 %v30331_v23  ;;  %v439_v23 = vld.sshfl [vmem:[#allocation1 + $0x20] sm:$0xff pattern:$0x73625140] }
 0x627   :  { %19781 = vmatpush.bf16.msra.mxu0 %v30306_v24  ;;  %v441_v24 = vld.sshfl [vmem:[#allocation1 + $0x30] sm:$0xff pattern:$0x73625140] }
 0x628   :  { %19794 = vmatpush.bf16.msra.mxu1 %v30314_v26  ;;  %v30384_v26 = vld [vmem:[#allocation5 + $0x3278] sm:$0xff] }
 0x629   :  { %19807 = vmatpush.bf16.msra.mxu2 %v30322_v27  ;;  %v440_v27 = vld.sshfl [vmem:[#allocation1 + $0x28] sm:$0xff pattern:$0x73625140] }
 0x62a   :  { %19820 = vmatpush.bf16.msra.mxu3 %v30330_v29  ;;  %v30361_v29 = vld [vmem:[#allocation5 + $0x31c0] sm:$0xff]  ;;  %v962_v34 = vpack.c.bf16 %v440_v27, %v440_v27  ;;  %v30423_v27 = vld [vmem:[#allocation5 + $0x33b0] sm:$0xff] }
 0x62b   :  { %19782 = vmatpush.bf16.msra.mxu0 %v30305_v31  ;;  %v19576_v55 = vpop.f32.mrf.mxu0  ;;  %v961_v31 = vpack.c.bf16 %v439_v23, %v439_v23 }
 0x62c   :  { %19795 = vmatpush.bf16.msra.mxu1 %v30313_v32  ;;  %v19577_v56 = vadd.f32 %v19576_v55, %v31082_v18  ;;  %v19589_v58 = vpop.f32.mrf.mxu1  ;;  %v30362_v18 = vld [vmem:[#allocation5 + $0x31c8] sm:$0xff]  ;;  %v963_v32 = vpack.c.bf16 %v441_v24, %v441_v24 }
 0x62d   :  { %19808 = vmatpush.bf16.msra.mxu2 %v30321_v33  ;;  %v30400_v33 = vld [vmem:[#allocation5 + $0x32f8] sm:$0xff] }
 0x62e   :  { %19821 = vmatpush.bf16.msra.mxu3 %v30329_v40  ;;  %19783 = vmatmul.bf16.vlgmr.msra.gmra.mxu0 %v957_v42  ;;  %v19590_v61 = vadd.f32 %v19589_v58, %v19577_v56  ;;  %v30374_v40 = vld [vmem:[#allocation5 + $0x3228] sm:$0xff] }
 0x62f   :  { %19827 = vmatpush.bf16.msrb.mxu0 %v30344_v36  ;;  %19796 = vmatmul.bf16.vlgmr.msra.gmra.mxu1 %v958_v45  ;;  %v30375_v36 = vld [vmem:[#allocation5 + $0x3230] sm:$0xff]  ;;  %v30390_v42 = vld [vmem:[#allocation5 + $0x32a8] sm:$0xff] }
 0x630   :  { %19840 = vmatpush.bf16.msrb.mxu1 %v30352_v37  ;;  %19809 = vmatmul.bf16.vlgmr.msra.gmra.mxu2 %v959_v43  ;;  %v30383_v37 = vld [vmem:[#allocation5 + $0x3270] sm:$0xff]  ;;  %v30398_v43 = vld [vmem:[#allocation5 + $0x32e8] sm:$0xff] }
 0x631   :  { %19853 = vmatpush.bf16.msrb.mxu2 %v30360_v39  ;;  %19822 = vmatmul.bf16.vlgmr.msra.gmra.mxu3 %v960_v46  ;;  %v30399_v39 = vld [vmem:[#allocation5 + $0x32f0] sm:$0xff]  ;;  %v30373_v46 = vld [vmem:[#allocation5 + $0x3220] sm:$0xff] }
 0x632   :  { %19866 = vmatpush.bf16.msrb.mxu3 %v30368_v44 }
 0x633   :  { %19828 = vmatpush.bf16.msrb.mxu0 %v30343_v47  ;;  %v19602_v2 = vpop.f32.mrf.mxu2  ;;  %v19578_v6 = vpop.f32.mrf.mxu0 }
 0x634   :  { %19841 = vmatpush.bf16.msrb.mxu1 %v30351_v48  ;;  %v19603_v3 = vadd.f32 %v19602_v2, %v19590_v61  ;;  %v19615_v5 = vpop.f32.mrf.mxu3  ;;  %v19591_v9 = vpop.f32.mrf.mxu1  ;;  %v30381_v48 = vld [vmem:[#allocation5 + $0x3260] sm:$0xff]  ;;  %v30371_v61 = vld [vmem:[#allocation5 + $0x3210] sm:$0xff]  ;;  %v30370_v2 = vld [vmem:[#allocation5 + $0x3208] sm:$0xff] }
 0x635   :  { %19854 = vmatpush.bf16.msrb.mxu2 %v30359_v49  ;;  %v30389_v49 = vld [vmem:[#allocation5 + $0x32a0] sm:$0xff] }
 0x636   :  { %19867 = vmatpush.bf16.msrb.mxu3 %v30367_v50  ;;  %v31085_v7 = vadd.f32 %v19615_v5, %v19603_v3  ;;  %v115_v3 = vld [vmem:[#allocation2 + $0x198] sm:$0xff]  ;;  %v30386_v5 = vld [vmem:[#allocation5 + $0x3288] sm:$0xff] }
 0x637   :  { %19829 = vmatpush.bf16.msrb.mxu0 %v30342_v51  ;;  %v30397_v51 = vld [vmem:[#allocation5 + $0x32e0] sm:$0xff]  ;;  %444 = vst [vmem:[#allocation1 + $0x20] ss:$4 sm:$0xff] %v115_v3  ;;  %v30440_v3 = vld [vmem:[#allocation5 + $0x3438] sm:$0xff] }
 0x638   :  { %19842 = vmatpush.bf16.msrb.mxu1 %v30350_v52  ;;  %v30372_v52 = vld [vmem:[#allocation5 + $0x3218] sm:$0xff]  ;;  %v30369_v9 = vld [vmem:[#allocation5 + $0x3200] sm:$0xff] }
 0x639   :  { %19855 = vmatpush.bf16.msrb.mxu2 %v30358_v53  ;;  %v30380_v53 = vld [vmem:[#allocation5 + $0x3258] sm:$0xff] }
 0x63a   :  { %19868 = vmatpush.bf16.msrb.mxu3 %v30366_v54  ;;  %v30388_v54 = vld [vmem:[#allocation5 + $0x3298] sm:$0xff] }
 0x63b   :  { %19830 = vmatpush.bf16.msrb.mxu0 %v30341_v57  ;;  %v19604_v17 = vpop.f32.mrf.mxu2  ;;  %v30396_v57 = vld [vmem:[#allocation5 + $0x32d8] sm:$0xff] }
 0x63c   :  { %19843 = vmatpush.bf16.msrb.mxu1 %v30349_v59  ;;  %v19617_v19 = vpop.f32.mrf.mxu3  ;;  %v30424_v17 = vld [vmem:[#allocation5 + $0x33b8] sm:$0xff] }
 0x63d   :  { %19856 = vmatpush.bf16.msrb.mxu2 %v30357_v60  ;;  %v448_v19 = vld.sshfl [vmem:[#allocation1 + $0x18] sm:$0xff pattern:$0x73625140] }
 0x63e   :  { %19869 = vmatpush.bf16.msrb.mxu3 %v30365_v62  ;;  %v968_v24 = vpack.c.bf16 %v448_v19, %v448_v19  ;;  %v30446_v19 = vld [vmem:[#allocation5 + $0x3468] sm:$0xff] }
 0x63f   :  { %19831 = vmatpush.bf16.msrb.mxu0 %v30340_v63  ;;  %v30379_v63 = vld [vmem:[#allocation5 + $0x3250] sm:$0xff] }
 0x640   :  { %19844 = vmatpush.bf16.msrb.mxu1 %v30348_v0  ;;  %v30387_v0 = vld [vmem:[#allocation5 + $0x3290] sm:$0xff] }
 0x641   :  { %19857 = vmatpush.bf16.msrb.mxu2 %v30356_v1  ;;  %v30395_v1 = vld [vmem:[#allocation5 + $0x32d0] sm:$0xff] }
 0x642   :  { %19870 = vmatpush.bf16.msrb.mxu3 %v30364_v4  ;;  %v30378_v4 = vld [vmem:[#allocation5 + $0x3248] sm:$0xff] }
 0x643   :  { %19832 = vmatpush.bf16.msrb.mxu0 %v30339_v8 }
 0x644   :  { %19845 = vmatpush.bf16.msrb.mxu1 %v30347_v10  ;;  %v30377_v10 = vld [vmem:[#allocation5 + $0x3240] sm:$0xff] }
 0x645   :  { %19858 = vmatpush.bf16.msrb.mxu2 %v30355_v11  ;;  %v30385_v11 = vld [vmem:[#allocation5 + $0x3280] sm:$0xff] }
 0x646   :  { %19871 = vmatpush.bf16.msrb.mxu3 %v30363_v12  ;;  %v445_v12 = vld.sshfl [vmem:[#allocation1] sm:$0xff pattern:$0x73625140] }
 0x647   :  { %19833 = vmatpush.bf16.msrb.mxu0 %v30338_v13  ;;  %v447_v13 = vld.sshfl [vmem:[#allocation1 + $0x10] sm:$0xff pattern:$0x73625140] }
 0x648   :  { %19846 = vmatpush.bf16.msrb.mxu1 %v30346_v15  ;;  %v30416_v15 = vld [vmem:[#allocation5 + $0x3378] sm:$0xff] }
 0x649   :  { %19859 = vmatpush.bf16.msrb.mxu2 %v30354_v16  ;;  %v446_v16 = vld.sshfl [vmem:[#allocation1 + $0x8] sm:$0xff pattern:$0x73625140] }
 0x64a   :  { %19872 = vmatpush.bf16.msrb.mxu3 %v30362_v18  ;;  %v30393_v18 = vld [vmem:[#allocation5 + $0x32c0] sm:$0xff]  ;;  %v966_v23 = vpack.c.bf16 %v446_v16, %v446_v16  ;;  %v30455_v16 = vld [vmem:[#allocation5 + $0x34b0] sm:$0xff] }
 0x64b   :  { %19834 = vmatpush.bf16.msrb.mxu0 %v30337_v20  ;;  %v19628_v44 = vpop.f32.mrf.mxu0  ;;  %v965_v20 = vpack.c.bf16 %v445_v12, %v445_v12 }
 0x64c   :  { %19847 = vmatpush.bf16.msrb.mxu1 %v30345_v21  ;;  %v19629_v45 = vadd.f32 %v19628_v44, %v31085_v7  ;;  %v19641_v47 = vpop.f32.mrf.mxu1  ;;  %v30394_v7 = vld [vmem:[#allocation5 + $0x32c8] sm:$0xff]  ;;  %v967_v21 = vpack.c.bf16 %v447_v13, %v447_v13 }
 0x64d   :  { %19860 = vmatpush.bf16.msrb.mxu2 %v30353_v22  ;;  %v30432_v22 = vld [vmem:[#allocation5 + $0x33f8] sm:$0xff] }
 0x64e   :  { %19873 = vmatpush.bf16.msrb.mxu3 %v30361_v29  ;;  %19835 = vmatmul.bf16.vlgmr.msrb.gmra.mxu0 %v961_v31  ;;  %v19642_v50 = vadd.f32 %v19641_v47, %v19629_v45  ;;  %v30406_v29 = vld [vmem:[#allocation5 + $0x3328] sm:$0xff] }
 0x64f   :  { %19879 = vmatpush.bf16.msra.mxu0 %v30376_v25  ;;  %19848 = vmatmul.bf16.vlgmr.msrb.gmra.mxu1 %v962_v34  ;;  %v30407_v25 = vld [vmem:[#allocation5 + $0x3330] sm:$0xff]  ;;  %v30422_v31 = vld [vmem:[#allocation5 + $0x33a8] sm:$0xff] }
 0x650   :  { %19892 = vmatpush.bf16.msra.mxu1 %v30384_v26  ;;  %19861 = vmatmul.bf16.vlgmr.msrb.gmra.mxu2 %v963_v32  ;;  %v30415_v26 = vld [vmem:[#allocation5 + $0x3370] sm:$0xff]  ;;  %v30430_v32 = vld [vmem:[#allocation5 + $0x33e8] sm:$0xff] }
 0x651   :  { %19905 = vmatpush.bf16.msra.mxu2 %v30392_v28  ;;  %19874 = vmatmul.bf16.vlgmr.msrb.gmra.mxu3 %v964_v35  ;;  %v30431_v28 = vld [vmem:[#allocation5 + $0x33f0] sm:$0xff]  ;;  %v30405_v35 = vld [vmem:[#allocation5 + $0x3320] sm:$0xff] }
 0x652   :  { %19918 = vmatpush.bf16.msra.mxu3 %v30400_v33 }
 0x653   :  { %19880 = vmatpush.bf16.msra.mxu0 %v30375_v36  ;;  %v19654_v55 = vpop.f32.mrf.mxu2  ;;  %v19630_v59 = vpop.f32.mrf.mxu0 }
 0x654   :  { %19893 = vmatpush.bf16.msra.mxu1 %v30383_v37  ;;  %v19655_v56 = vadd.f32 %v19654_v55, %v19642_v50  ;;  %v19667_v58 = vpop.f32.mrf.mxu3  ;;  %v19643_v62 = vpop.f32.mrf.mxu1  ;;  %v30413_v37 = vld [vmem:[#allocation5 + $0x3360] sm:$0xff]  ;;  %v30403_v50 = vld [vmem:[#allocation5 + $0x3310] sm:$0xff]  ;;  %v30402_v55 = vld [vmem:[#allocation5 + $0x3308] sm:$0xff] }
 0x655   :  { %19906 = vmatpush.bf16.msra.mxu2 %v30391_v38  ;;  %v30421_v38 = vld [vmem:[#allocation5 + $0x33a0] sm:$0xff] }
 0x656   :  { %19919 = vmatpush.bf16.msra.mxu3 %v30399_v39  ;;  %v31088_v60 = vadd.f32 %v19667_v58, %v19655_v56  ;;  %v116_v56 = vld [vmem:[#allocation2 + $0x1a0] sm:$0xff] }
 0x657   :  { %19881 = vmatpush.bf16.msra.mxu0 %v30374_v40  ;;  %v30429_v40 = vld [vmem:[#allocation5 + $0x33e0] sm:$0xff]  ;;  %v30418_v58 = vld [vmem:[#allocation5 + $0x3388] sm:$0xff]  ;;  %453 = vst [vmem:[#allocation1] ss:$4 sm:$0xff] %v116_v56  ;;  %v30472_v56 = vld [vmem:[#allocation5 + $0x3538] sm:$0xff] }
 0x658   :  { %19894 = vmatpush.bf16.msra.mxu1 %v30382_v41  ;;  %v30404_v41 = vld [vmem:[#allocation5 + $0x3318] sm:$0xff]  ;;  %v30401_v62 = vld [vmem:[#allocation5 + $0x3300] sm:$0xff] }
 0x659   :  { %19907 = vmatpush.bf16.msra.mxu2 %v30390_v42  ;;  %v30412_v42 = vld [vmem:[#allocation5 + $0x3358] sm:$0xff] }
 0x65a   :  { %19920 = vmatpush.bf16.msra.mxu3 %v30398_v43  ;;  %v30420_v43 = vld [vmem:[#allocation5 + $0x3398] sm:$0xff] }
 0x65b   :  { %19882 = vmatpush.bf16.msra.mxu0 %v30373_v46  ;;  %v19656_v6 = vpop.f32.mrf.mxu2  ;;  %v30428_v46 = vld [vmem:[#allocation5 + $0x33d8] sm:$0xff] }
 0x65c   :  { %19895 = vmatpush.bf16.msra.mxu1 %v30381_v48  ;;  %v19669_v8 = vpop.f32.mrf.mxu3  ;;  %v30456_v6 = vld [vmem:[#allocation5 + $0x34b8] sm:$0xff] }
 0x65d   :  { %19908 = vmatpush.bf16.msra.mxu2 %v30389_v49  ;;  %v452_v8 = vld.sshfl [vmem:[#allocation1 + $0x38] sm:$0xff pattern:$0x73625140] }
 0x65e   :  { %19921 = vmatpush.bf16.msra.mxu3 %v30397_v51  ;;  %v972_v13 = vpack.c.bf16 %v452_v8, %v452_v8  ;;  %v30478_v8 = vld [vmem:[#allocation5 + $0x3568] sm:$0xff] }
 0x65f   :  { %19883 = vmatpush.bf16.msra.mxu0 %v30372_v52  ;;  %v30411_v52 = vld [vmem:[#allocation5 + $0x3350] sm:$0xff] }
 0x660   :  { %19896 = vmatpush.bf16.msra.mxu1 %v30380_v53  ;;  %v30419_v53 = vld [vmem:[#allocation5 + $0x3390] sm:$0xff] }
 0x661   :  { %19909 = vmatpush.bf16.msra.mxu2 %v30388_v54  ;;  %v30427_v54 = vld [vmem:[#allocation5 + $0x33d0] sm:$0xff] }
 0x662   :  { %19922 = vmatpush.bf16.msra.mxu3 %v30396_v57  ;;  %v30410_v57 = vld [vmem:[#allocation5 + $0x3348] sm:$0xff] }
 0x663   :  { %19884 = vmatpush.bf16.msra.mxu0 %v30371_v61 }
 0x664   :  { %19897 = vmatpush.bf16.msra.mxu1 %v30379_v63  ;;  %v30409_v63 = vld [vmem:[#allocation5 + $0x3340] sm:$0xff] }
 0x665   :  { %19910 = vmatpush.bf16.msra.mxu2 %v30387_v0  ;;  %v30417_v0 = vld [vmem:[#allocation5 + $0x3380] sm:$0xff] }
 0x666   :  { %19923 = vmatpush.bf16.msra.mxu3 %v30395_v1  ;;  %v449_v1 = vld.sshfl [vmem:[#allocation1 + $0x20] sm:$0xff pattern:$0x73625140] }
 0x667   :  { %19885 = vmatpush.bf16.msra.mxu0 %v30370_v2  ;;  %v451_v2 = vld.sshfl [vmem:[#allocation1 + $0x30] sm:$0xff pattern:$0x73625140] }
 0x668   :  { %19898 = vmatpush.bf16.msra.mxu1 %v30378_v4  ;;  %v30448_v4 = vld [vmem:[#allocation5 + $0x3478] sm:$0xff] }
 0x669   :  { %19911 = vmatpush.bf16.msra.mxu2 %v30386_v5  ;;  %v450_v5 = vld.sshfl [vmem:[#allocation1 + $0x28] sm:$0xff pattern:$0x73625140] }
 0x66a   :  { %19924 = vmatpush.bf16.msra.mxu3 %v30394_v7  ;;  %v30425_v7 = vld [vmem:[#allocation5 + $0x33c0] sm:$0xff]  ;;  %v970_v12 = vpack.c.bf16 %v450_v5, %v450_v5  ;;  %v30487_v5 = vld [vmem:[#allocation5 + $0x35b0] sm:$0xff] }
 0x66b   :  { %19886 = vmatpush.bf16.msra.mxu0 %v30369_v9  ;;  %v19680_v33 = vpop.f32.mrf.mxu0  ;;  %v969_v9 = vpack.c.bf16 %v449_v1, %v449_v1 }
 0x66c   :  { %19899 = vmatpush.bf16.msra.mxu1 %v30377_v10  ;;  %v19681_v34 = vadd.f32 %v19680_v33, %v31088_v60  ;;  %v19693_v36 = vpop.f32.mrf.mxu1  ;;  %v30426_v60 = vld [vmem:[#allocation5 + $0x33c8] sm:$0xff]  ;;  %v971_v10 = vpack.c.bf16 %v451_v2, %v451_v2 }
 0x66d   :  { %19912 = vmatpush.bf16.msra.mxu2 %v30385_v11  ;;  %v30464_v11 = vld [vmem:[#allocation5 + $0x34f8] sm:$0xff] }
 0x66e   :  { %19925 = vmatpush.bf16.msra.mxu3 %v30393_v18  ;;  %19887 = vmatmul.bf16.vlgmr.msra.gmra.mxu0 %v965_v20  ;;  %v19694_v39 = vadd.f32 %v19693_v36, %v19681_v34  ;;  %v30438_v18 = vld [vmem:[#allocation5 + $0x3428] sm:$0xff] }
 0x66f   :  { %19931 = vmatpush.bf16.msrb.mxu0 %v30408_v14  ;;  %19900 = vmatmul.bf16.vlgmr.msra.gmra.mxu1 %v966_v23  ;;  %v30439_v14 = vld [vmem:[#allocation5 + $0x3430] sm:$0xff]  ;;  %v30454_v20 = vld [vmem:[#allocation5 + $0x34a8] sm:$0xff] }
 0x670   :  { %19944 = vmatpush.bf16.msrb.mxu1 %v30416_v15  ;;  %19913 = vmatmul.bf16.vlgmr.msra.gmra.mxu2 %v967_v21  ;;  %v30447_v15 = vld [vmem:[#allocation5 + $0x3470] sm:$0xff]  ;;  %v30462_v21 = vld [vmem:[#allocation5 + $0x34e8] sm:$0xff] }
 0x671   :  { %19957 = vmatpush.bf16.msrb.mxu2 %v30424_v17  ;;  %19926 = vmatmul.bf16.vlgmr.msra.gmra.mxu3 %v968_v24  ;;  %v30463_v17 = vld [vmem:[#allocation5 + $0x34f0] sm:$0xff]  ;;  %v30437_v24 = vld [vmem:[#allocation5 + $0x3420] sm:$0xff] }
 0x672   :  { %19970 = vmatpush.bf16.msrb.mxu3 %v30432_v22 }
 0x673   :  { %19932 = vmatpush.bf16.msrb.mxu0 %v30407_v25  ;;  %v19706_v44 = vpop.f32.mrf.mxu2  ;;  %v19682_v48 = vpop.f32.mrf.mxu0 }
 0x674   :  { %19945 = vmatpush.bf16.msrb.mxu1 %v30415_v26  ;;  %v19707_v45 = vadd.f32 %v19706_v44, %v19694_v39  ;;  %v19719_v47 = vpop.f32.mrf.mxu3  ;;  %v19695_v51 = vpop.f32.mrf.mxu1  ;;  %v30445_v26 = vld [vmem:[#allocation5 + $0x3460] sm:$0xff]  ;;  %v30435_v39 = vld [vmem:[#allocation5 + $0x3410] sm:$0xff]  ;;  %v30434_v44 = vld [vmem:[#allocation5 + $0x3408] sm:$0xff] }
 0x675   :  { %19958 = vmatpush.bf16.msrb.mxu2 %v30423_v27  ;;  %v30453_v27 = vld [vmem:[#allocation5 + $0x34a0] sm:$0xff] }
 0x676   :  { %19971 = vmatpush.bf16.msrb.mxu3 %v30431_v28  ;;  %v31091_v49 = vadd.f32 %v19719_v47, %v19707_v45  ;;  %v117_v45 = vld [vmem:[#allocation2 + $0x1a8] sm:$0xff]  ;;  %v30433_v51 = vld [vmem:[#allocation5 + $0x3400] sm:$0xff] }
 0x677   :  { %19933 = vmatpush.bf16.msrb.mxu0 %v30406_v29  ;;  %v30461_v29 = vld [vmem:[#allocation5 + $0x34e0] sm:$0xff]  ;;  %v30450_v47 = vld [vmem:[#allocation5 + $0x3488] sm:$0xff]  ;;  %454 = vst [vmem:[#allocation1 + $0x20] ss:$4 sm:$0xff] %v117_v45  ;;  %v30504_v45 = vld [vmem:[#allocation5 + $0x3638] sm:$0xff] }
 0x678   :  { %19946 = vmatpush.bf16.msrb.mxu1 %v30414_v30  ;;  %v30436_v30 = vld [vmem:[#allocation5 + $0x3418] sm:$0xff] }
 0x679   :  { %19959 = vmatpush.bf16.msrb.mxu2 %v30422_v31  ;;  %v30444_v31 = vld [vmem:[#allocation5 + $0x3458] sm:$0xff] }
 0x67a   :  { %19972 = vmatpush.bf16.msrb.mxu3 %v30430_v32  ;;  %v30452_v32 = vld [vmem:[#allocation5 + $0x3498] sm:$0xff] }
 0x67b   :  { %19934 = vmatpush.bf16.msrb.mxu0 %v30405_v35  ;;  %v19708_v59 = vpop.f32.mrf.mxu2  ;;  %v30460_v35 = vld [vmem:[#allocation5 + $0x34d8] sm:$0xff] }
 0x67c   :  { %19947 = vmatpush.bf16.msrb.mxu1 %v30413_v37  ;;  %v19721_v61 = vpop.f32.mrf.mxu3  ;;  %v30488_v59 = vld [vmem:[#allocation5 + $0x35b8] sm:$0xff] }
 0x67d   :  { %19960 = vmatpush.bf16.msrb.mxu2 %v30421_v38  ;;  %v458_v61 = vld.sshfl [vmem:[#allocation1 + $0x18] sm:$0xff pattern:$0x73625140] }
 0x67e   :  { %19973 = vmatpush.bf16.msrb.mxu3 %v30429_v40  ;;  %v976_v2 = vpack.c.bf16 %v458_v61, %v458_v61  ;;  %v30510_v61 = vld [vmem:[#allocation5 + $0x3668] sm:$0xff] }
 0x67f   :  { %19935 = vmatpush.bf16.msrb.mxu0 %v30404_v41  ;;  %v30443_v41 = vld [vmem:[#allocation5 + $0x3450] sm:$0xff] }
 0x680   :  { %19948 = vmatpush.bf16.msrb.mxu1 %v30412_v42  ;;  %v30451_v42 = vld [vmem:[#allocation5 + $0x3490] sm:$0xff] }
 0x681   :  { %19961 = vmatpush.bf16.msrb.mxu2 %v30420_v43  ;;  %v30459_v43 = vld [vmem:[#allocation5 + $0x34d0] sm:$0xff] }
 0x682   :  { %19974 = vmatpush.bf16.msrb.mxu3 %v30428_v46  ;;  %v30442_v46 = vld [vmem:[#allocation5 + $0x3448] sm:$0xff] }
 0x683   :  { %19936 = vmatpush.bf16.msrb.mxu0 %v30403_v50 }
 0x684   :  { %19949 = vmatpush.bf16.msrb.mxu1 %v30411_v52  ;;  %v30441_v52 = vld [vmem:[#allocation5 + $0x3440] sm:$0xff] }
 0x685   :  { %19962 = vmatpush.bf16.msrb.mxu2 %v30419_v53  ;;  %v30449_v53 = vld [vmem:[#allocation5 + $0x3480] sm:$0xff] }
 0x686   :  { %19975 = vmatpush.bf16.msrb.mxu3 %v30427_v54  ;;  %v455_v54 = vld.sshfl [vmem:[#allocation1] sm:$0xff pattern:$0x73625140] }
 0x687   :  { %19937 = vmatpush.bf16.msrb.mxu0 %v30402_v55  ;;  %v457_v55 = vld.sshfl [vmem:[#allocation1 + $0x10] sm:$0xff pattern:$0x73625140] }
 0x688   :  { %19950 = vmatpush.bf16.msrb.mxu1 %v30410_v57  ;;  %v30480_v57 = vld [vmem:[#allocation5 + $0x3578] sm:$0xff] }
 0x689   :  { %19963 = vmatpush.bf16.msrb.mxu2 %v30418_v58  ;;  %v456_v58 = vld.sshfl [vmem:[#allocation1 + $0x8] sm:$0xff pattern:$0x73625140] }
 0x68a   :  { %19976 = vmatpush.bf16.msrb.mxu3 %v30426_v60  ;;  %v30457_v60 = vld [vmem:[#allocation5 + $0x34c0] sm:$0xff]  ;;  %v974_v1 = vpack.c.bf16 %v456_v58, %v456_v58  ;;  %v30519_v58 = vld [vmem:[#allocation5 + $0x36b0] sm:$0xff] }
 0x68b   :  { %19938 = vmatpush.bf16.msrb.mxu0 %v30401_v62  ;;  %v19732_v22 = vpop.f32.mrf.mxu0  ;;  %v973_v62 = vpack.c.bf16 %v455_v54, %v455_v54 }
 0x68c   :  { %19951 = vmatpush.bf16.msrb.mxu1 %v30409_v63  ;;  %v19733_v23 = vadd.f32 %v19732_v22, %v31091_v49  ;;  %v19745_v25 = vpop.f32.mrf.mxu1  ;;  %v30458_v49 = vld [vmem:[#allocation5 + $0x34c8] sm:$0xff]  ;;  %v975_v63 = vpack.c.bf16 %v457_v55, %v457_v55 }
 0x68d   :  { %19964 = vmatpush.bf16.msrb.mxu2 %v30417_v0  ;;  %v30496_v0 = vld [vmem:[#allocation5 + $0x35f8] sm:$0xff] }
 0x68e   :  { %19977 = vmatpush.bf16.msrb.mxu3 %v30425_v7  ;;  %19939 = vmatmul.bf16.vlgmr.msrb.gmra.mxu0 %v969_v9  ;;  %v19746_v28 = vadd.f32 %v19745_v25, %v19733_v23  ;;  %v30470_v7 = vld [vmem:[#allocation5 + $0x3528] sm:$0xff] }
 0x68f   :  { %19983 = vmatpush.bf16.msra.mxu0 %v30440_v3  ;;  %19952 = vmatmul.bf16.vlgmr.msrb.gmra.mxu1 %v970_v12  ;;  %v30471_v3 = vld [vmem:[#allocation5 + $0x3530] sm:$0xff]  ;;  %v30486_v9 = vld [vmem:[#allocation5 + $0x35a8] sm:$0xff] }
 0x690   :  { %19996 = vmatpush.bf16.msra.mxu1 %v30448_v4  ;;  %19965 = vmatmul.bf16.vlgmr.msrb.gmra.mxu2 %v971_v10  ;;  %v30479_v4 = vld [vmem:[#allocation5 + $0x3570] sm:$0xff]  ;;  %v30494_v10 = vld [vmem:[#allocation5 + $0x35e8] sm:$0xff] }
 0x691   :  { %20009 = vmatpush.bf16.msra.mxu2 %v30456_v6  ;;  %19978 = vmatmul.bf16.vlgmr.msrb.gmra.mxu3 %v972_v13  ;;  %v30495_v6 = vld [vmem:[#allocation5 + $0x35f0] sm:$0xff]  ;;  %v30469_v13 = vld [vmem:[#allocation5 + $0x3520] sm:$0xff] }
 0x692   :  { %20022 = vmatpush.bf16.msra.mxu3 %v30464_v11 }
 0x693   :  { %19984 = vmatpush.bf16.msra.mxu0 %v30439_v14  ;;  %v19758_v33 = vpop.f32.mrf.mxu2  ;;  %v19734_v37 = vpop.f32.mrf.mxu0 }
 0x694   :  { %19997 = vmatpush.bf16.msra.mxu1 %v30447_v15  ;;  %v19759_v34 = vadd.f32 %v19758_v33, %v19746_v28  ;;  %v19771_v36 = vpop.f32.mrf.mxu3  ;;  %v19747_v40 = vpop.f32.mrf.mxu1  ;;  %v30477_v15 = vld [vmem:[#allocation5 + $0x3560] sm:$0xff]  ;;  %v30467_v28 = vld [vmem:[#allocation5 + $0x3510] sm:$0xff]  ;;  %v30466_v33 = vld [vmem:[#allocation5 + $0x3508] sm:$0xff] }
 0x695   :  { %20010 = vmatpush.bf16.msra.mxu2 %v30455_v16  ;;  %v30485_v16 = vld [vmem:[#allocation5 + $0x35a0] sm:$0xff] }
 0x696   :  { %20023 = vmatpush.bf16.msra.mxu3 %v30463_v17  ;;  %v31094_v38 = vadd.f32 %v19771_v36, %v19759_v34  ;;  %v118_v34 = vld [vmem:[#allocation2 + $0x1b0] sm:$0xff]  ;;  %v30482_v36 = vld [vmem:[#allocation5 + $0x3588] sm:$0xff]  ;;  %v30465_v40 = vld [vmem:[#allocation5 + $0x3500] sm:$0xff] }
 0x697   :  { %19985 = vmatpush.bf16.msra.mxu0 %v30438_v18  ;;  %v30493_v18 = vld [vmem:[#allocation5 + $0x35e0] sm:$0xff]  ;;  %463 = vst [vmem:[#allocation1] ss:$4 sm:$0xff] %v118_v34  ;;  %v30536_v34 = vld [vmem:[#allocation5 + $0x3738] sm:$0xff] }
 0x698   :  { %19998 = vmatpush.bf16.msra.mxu1 %v30446_v19  ;;  %v30468_v19 = vld [vmem:[#allocation5 + $0x3518] sm:$0xff] }
 0x699   :  { %20011 = vmatpush.bf16.msra.mxu2 %v30454_v20  ;;  %v30476_v20 = vld [vmem:[#allocation5 + $0x3558] sm:$0xff] }
 0x69a   :  { %20024 = vmatpush.bf16.msra.mxu3 %v30462_v21  ;;  %v30484_v21 = vld [vmem:[#allocation5 + $0x3598] sm:$0xff] }
 0x69b   :  { %19986 = vmatpush.bf16.msra.mxu0 %v30437_v24  ;;  %v19760_v48 = vpop.f32.mrf.mxu2  ;;  %v30492_v24 = vld [vmem:[#allocation5 + $0x35d8] sm:$0xff] }
 0x69c   :  { %19999 = vmatpush.bf16.msra.mxu1 %v30445_v26  ;;  %v19773_v50 = vpop.f32.mrf.mxu3  ;;  %v30520_v48 = vld [vmem:[#allocation5 + $0x36b8] sm:$0xff] }
 0x69d   :  { %20012 = vmatpush.bf16.msra.mxu2 %v30453_v27  ;;  %v462_v50 = vld.sshfl [vmem:[#allocation1 + $0x38] sm:$0xff pattern:$0x73625140] }
 0x69e   :  { %20025 = vmatpush.bf16.msra.mxu3 %v30461_v29  ;;  %v980_v55 = vpack.c.bf16 %v462_v50, %v462_v50  ;;  %v30542_v50 = vld [vmem:[#allocation5 + $0x3768] sm:$0xff] }
 0x69f   :  { %19987 = vmatpush.bf16.msra.mxu0 %v30436_v30  ;;  %v30475_v30 = vld [vmem:[#allocation5 + $0x3550] sm:$0xff] }
 0x6a0   :  { %20000 = vmatpush.bf16.msra.mxu1 %v30444_v31  ;;  %v30483_v31 = vld [vmem:[#allocation5 + $0x3590] sm:$0xff] }
 0x6a1   :  { %20013 = vmatpush.bf16.msra.mxu2 %v30452_v32  ;;  %v30491_v32 = vld [vmem:[#allocation5 + $0x35d0] sm:$0xff] }
 0x6a2   :  { %20026 = vmatpush.bf16.msra.mxu3 %v30460_v35  ;;  %v30474_v35 = vld [vmem:[#allocation5 + $0x3548] sm:$0xff] }
 0x6a3   :  { %19988 = vmatpush.bf16.msra.mxu0 %v30435_v39 }
 0x6a4   :  { %20001 = vmatpush.bf16.msra.mxu1 %v30443_v41  ;;  %v30473_v41 = vld [vmem:[#allocation5 + $0x3540] sm:$0xff] }
 0x6a5   :  { %20014 = vmatpush.bf16.msra.mxu2 %v30451_v42  ;;  %v30481_v42 = vld [vmem:[#allocation5 + $0x3580] sm:$0xff] }
 0x6a6   :  { %20027 = vmatpush.bf16.msra.mxu3 %v30459_v43  ;;  %v459_v43 = vld.sshfl [vmem:[#allocation1 + $0x20] sm:$0xff pattern:$0x73625140] }
 0x6a7   :  { %19989 = vmatpush.bf16.msra.mxu0 %v30434_v44  ;;  %v461_v44 = vld.sshfl [vmem:[#allocation1 + $0x30] sm:$0xff pattern:$0x73625140] }
 0x6a8   :  { %20002 = vmatpush.bf16.msra.mxu1 %v30442_v46  ;;  %v30512_v46 = vld [vmem:[#allocation5 + $0x3678] sm:$0xff] }
 0x6a9   :  { %20015 = vmatpush.bf16.msra.mxu2 %v30450_v47  ;;  %v460_v47 = vld.sshfl [vmem:[#allocation1 + $0x28] sm:$0xff pattern:$0x73625140] }
 0x6aa   :  { %20028 = vmatpush.bf16.msra.mxu3 %v30458_v49  ;;  %v30489_v49 = vld [vmem:[#allocation5 + $0x35c0] sm:$0xff]  ;;  %v978_v54 = vpack.c.bf16 %v460_v47, %v460_v47  ;;  %v30551_v47 = vld [vmem:[#allocation5 + $0x37b0] sm:$0xff] }
 0x6ab   :  { %19990 = vmatpush.bf16.msra.mxu0 %v30433_v51  ;;  %v19784_v11 = vpop.f32.mrf.mxu0  ;;  %v977_v51 = vpack.c.bf16 %v459_v43, %v459_v43 }
 0x6ac   :  { %20003 = vmatpush.bf16.msra.mxu1 %v30441_v52  ;;  %v19785_v12 = vadd.f32 %v19784_v11, %v31094_v38  ;;  %v19797_v14 = vpop.f32.mrf.mxu1  ;;  %v30490_v38 = vld [vmem:[#allocation5 + $0x35c8] sm:$0xff]  ;;  %v979_v52 = vpack.c.bf16 %v461_v44, %v461_v44 }
 0x6ad   :  { %20016 = vmatpush.bf16.msra.mxu2 %v30449_v53  ;;  %v30528_v53 = vld [vmem:[#allocation5 + $0x36f8] sm:$0xff] }
 0x6ae   :  { %20029 = vmatpush.bf16.msra.mxu3 %v30457_v60  ;;  %19991 = vmatmul.bf16.vlgmr.msra.gmra.mxu0 %v973_v62  ;;  %v19798_v17 = vadd.f32 %v19797_v14, %v19785_v12  ;;  %v30502_v60 = vld [vmem:[#allocation5 + $0x3628] sm:$0xff] }
 0x6af   :  { %20035 = vmatpush.bf16.msrb.mxu0 %v30472_v56  ;;  %20004 = vmatmul.bf16.vlgmr.msra.gmra.mxu1 %v974_v1  ;;  %v30503_v56 = vld [vmem:[#allocation5 + $0x3630] sm:$0xff]  ;;  %v30518_v62 = vld [vmem:[#allocation5 + $0x36a8] sm:$0xff] }
 0x6b0   :  { %20048 = vmatpush.bf16.msrb.mxu1 %v30480_v57  ;;  %20017 = vmatmul.bf16.vlgmr.msra.gmra.mxu2 %v975_v63  ;;  %v30511_v57 = vld [vmem:[#allocation5 + $0x3670] sm:$0xff]  ;;  %v30526_v63 = vld [vmem:[#allocation5 + $0x36e8] sm:$0xff] }
 0x6b1   :  { %20061 = vmatpush.bf16.msrb.mxu2 %v30488_v59  ;;  %20030 = vmatmul.bf16.vlgmr.msra.gmra.mxu3 %v976_v2  ;;  %v30527_v59 = vld [vmem:[#allocation5 + $0x36f0] sm:$0xff]  ;;  %v30501_v2 = vld [vmem:[#allocation5 + $0x3620] sm:$0xff] }
 0x6b2   :  { %20074 = vmatpush.bf16.msrb.mxu3 %v30496_v0 }
 0x6b3   :  { %20036 = vmatpush.bf16.msrb.mxu0 %v30471_v3  ;;  %v19810_v22 = vpop.f32.mrf.mxu2  ;;  %v19786_v26 = vpop.f32.mrf.mxu0 }
 0x6b4   :  { %20049 = vmatpush.bf16.msrb.mxu1 %v30479_v4  ;;  %v19811_v23 = vadd.f32 %v19810_v22, %v19798_v17  ;;  %v19823_v25 = vpop.f32.mrf.mxu3  ;;  %v19799_v29 = vpop.f32.mrf.mxu1  ;;  %v30509_v4 = vld [vmem:[#allocation5 + $0x3660] sm:$0xff]  ;;  %v30499_v17 = vld [vmem:[#allocation5 + $0x3610] sm:$0xff]  ;;  %v30498_v22 = vld [vmem:[#allocation5 + $0x3608] sm:$0xff] }
 0x6b5   :  { %20062 = vmatpush.bf16.msrb.mxu2 %v30487_v5  ;;  %v30517_v5 = vld [vmem:[#allocation5 + $0x36a0] sm:$0xff] }
 0x6b6   :  { %20075 = vmatpush.bf16.msrb.mxu3 %v30495_v6  ;;  %v31097_v27 = vadd.f32 %v19823_v25, %v19811_v23  ;;  %v119_v23 = vld [vmem:[#allocation2 + $0x1b8] sm:$0xff]  ;;  %v30514_v25 = vld [vmem:[#allocation5 + $0x3688] sm:$0xff] }
 0x6b7   :  { %20037 = vmatpush.bf16.msrb.mxu0 %v30470_v7  ;;  %v30525_v7 = vld [vmem:[#allocation5 + $0x36e0] sm:$0xff]  ;;  %464 = vst [vmem:[#allocation1 + $0x20] ss:$4 sm:$0xff] %v119_v23  ;;  %v30568_v23 = vld [vmem:[#allocation5 + $0x3838] sm:$0xff] }
 0x6b8   :  { %20050 = vmatpush.bf16.msrb.mxu1 %v30478_v8  ;;  %v30500_v8 = vld [vmem:[#allocation5 + $0x3618] sm:$0xff]  ;;  %v30497_v29 = vld [vmem:[#allocation5 + $0x3600] sm:$0xff] }
 0x6b9   :  { %20063 = vmatpush.bf16.msrb.mxu2 %v30486_v9  ;;  %v30508_v9 = vld [vmem:[#allocation5 + $0x3658] sm:$0xff] }
 0x6ba   :  { %20076 = vmatpush.bf16.msrb.mxu3 %v30494_v10  ;;  %v30516_v10 = vld [vmem:[#allocation5 + $0x3698] sm:$0xff] }
 0x6bb   :  { %20038 = vmatpush.bf16.msrb.mxu0 %v30469_v13  ;;  %v19812_v37 = vpop.f32.mrf.mxu2  ;;  %v30524_v13 = vld [vmem:[#allocation5 + $0x36d8] sm:$0xff] }
 0x6bc   :  { %20051 = vmatpush.bf16.msrb.mxu1 %v30477_v15  ;;  %v19825_v39 = vpop.f32.mrf.mxu3  ;;  %v30552_v37 = vld [vmem:[#allocation5 + $0x37b8] sm:$0xff] }
 0x6bd   :  { %20064 = vmatpush.bf16.msrb.mxu2 %v30485_v16  ;;  %v468_v39 = vld.sshfl [vmem:[#allocation1 + $0x18] sm:$0xff pattern:$0x73625140] }
 0x6be   :  { %20077 = vmatpush.bf16.msrb.mxu3 %v30493_v18  ;;  %v984_v44 = vpack.c.bf16 %v468_v39, %v468_v39  ;;  %v30574_v39 = vld [vmem:[#allocation5 + $0x3868] sm:$0xff] }
 0x6bf   :  { %20039 = vmatpush.bf16.msrb.mxu0 %v30468_v19  ;;  %v30507_v19 = vld [vmem:[#allocation5 + $0x3650] sm:$0xff] }
 0x6c0   :  { %20052 = vmatpush.bf16.msrb.mxu1 %v30476_v20  ;;  %v30515_v20 = vld [vmem:[#allocation5 + $0x3690] sm:$0xff] }
 0x6c1   :  { %20065 = vmatpush.bf16.msrb.mxu2 %v30484_v21  ;;  %v30523_v21 = vld [vmem:[#allocation5 + $0x36d0] sm:$0xff] }
 0x6c2   :  { %20078 = vmatpush.bf16.msrb.mxu3 %v30492_v24  ;;  %v30506_v24 = vld [vmem:[#allocation5 + $0x3648] sm:$0xff] }
 0x6c3   :  { %20040 = vmatpush.bf16.msrb.mxu0 %v30467_v28 }
 0x6c4   :  { %20053 = vmatpush.bf16.msrb.mxu1 %v30475_v30  ;;  %v30505_v30 = vld [vmem:[#allocation5 + $0x3640] sm:$0xff] }
 0x6c5   :  { %20066 = vmatpush.bf16.msrb.mxu2 %v30483_v31  ;;  %v30513_v31 = vld [vmem:[#allocation5 + $0x3680] sm:$0xff] }
 0x6c6   :  { %20079 = vmatpush.bf16.msrb.mxu3 %v30491_v32  ;;  %v465_v32 = vld.sshfl [vmem:[#allocation1] sm:$0xff pattern:$0x73625140] }
 0x6c7   :  { %20041 = vmatpush.bf16.msrb.mxu0 %v30466_v33  ;;  %v467_v33 = vld.sshfl [vmem:[#allocation1 + $0x10] sm:$0xff pattern:$0x73625140] }
 0x6c8   :  { %20054 = vmatpush.bf16.msrb.mxu1 %v30474_v35  ;;  %v30544_v35 = vld [vmem:[#allocation5 + $0x3778] sm:$0xff] }
 0x6c9   :  { %20067 = vmatpush.bf16.msrb.mxu2 %v30482_v36  ;;  %v466_v36 = vld.sshfl [vmem:[#allocation1 + $0x8] sm:$0xff pattern:$0x73625140] }
 0x6ca   :  { %20080 = vmatpush.bf16.msrb.mxu3 %v30490_v38  ;;  %v30521_v38 = vld [vmem:[#allocation5 + $0x36c0] sm:$0xff]  ;;  %v982_v43 = vpack.c.bf16 %v466_v36, %v466_v36  ;;  %v30583_v36 = vld [vmem:[#allocation5 + $0x38b0] sm:$0xff] }
 0x6cb   :  { %20042 = vmatpush.bf16.msrb.mxu0 %v30465_v40  ;;  %v19836_v0 = vpop.f32.mrf.mxu0  ;;  %v981_v40 = vpack.c.bf16 %v465_v32, %v465_v32 }
 0x6cc   :  { %20055 = vmatpush.bf16.msrb.mxu1 %v30473_v41  ;;  %v19837_v1 = vadd.f32 %v19836_v0, %v31097_v27  ;;  %v19849_v3 = vpop.f32.mrf.mxu1  ;;  %v30522_v27 = vld [vmem:[#allocation5 + $0x36c8] sm:$0xff]  ;;  %v983_v41 = vpack.c.bf16 %v467_v33, %v467_v33 }
 0x6cd   :  { %20068 = vmatpush.bf16.msrb.mxu2 %v30481_v42  ;;  %v30560_v42 = vld [vmem:[#allocation5 + $0x37f8] sm:$0xff] }
 0x6ce   :  { %20081 = vmatpush.bf16.msrb.mxu3 %v30489_v49  ;;  %20043 = vmatmul.bf16.vlgmr.msrb.gmra.mxu0 %v977_v51  ;;  %v19850_v6 = vadd.f32 %v19849_v3, %v19837_v1  ;;  %v30534_v49 = vld [vmem:[#allocation5 + $0x3728] sm:$0xff] }
 0x6cf   :  { %20087 = vmatpush.bf16.msra.mxu0 %v30504_v45  ;;  %20056 = vmatmul.bf16.vlgmr.msrb.gmra.mxu1 %v978_v54  ;;  %v30535_v45 = vld [vmem:[#allocation5 + $0x3730] sm:$0xff]  ;;  %v30550_v51 = vld [vmem:[#allocation5 + $0x37a8] sm:$0xff] }
 0x6d0   :  { %20100 = vmatpush.bf16.msra.mxu1 %v30512_v46  ;;  %20069 = vmatmul.bf16.vlgmr.msrb.gmra.mxu2 %v979_v52  ;;  %v30543_v46 = vld [vmem:[#allocation5 + $0x3770] sm:$0xff]  ;;  %v30558_v52 = vld [vmem:[#allocation5 + $0x37e8] sm:$0xff] }
 0x6d1   :  { %20113 = vmatpush.bf16.msra.mxu2 %v30520_v48  ;;  %20082 = vmatmul.bf16.vlgmr.msrb.gmra.mxu3 %v980_v55  ;;  %v30559_v48 = vld [vmem:[#allocation5 + $0x37f0] sm:$0xff]  ;;  %v30533_v55 = vld [vmem:[#allocation5 + $0x3720] sm:$0xff] }
 0x6d2   :  { %20126 = vmatpush.bf16.msra.mxu3 %v30528_v53 }
 0x6d3   :  { %20088 = vmatpush.bf16.msra.mxu0 %v30503_v56  ;;  %v19862_v11 = vpop.f32.mrf.mxu2  ;;  %v19838_v15 = vpop.f32.mrf.mxu0 }
 0x6d4   :  { %20101 = vmatpush.bf16.msra.mxu1 %v30511_v57  ;;  %v19863_v12 = vadd.f32 %v19862_v11, %v19850_v6  ;;  %v19875_v14 = vpop.f32.mrf.mxu3  ;;  %v19851_v18 = vpop.f32.mrf.mxu1  ;;  %v30541_v57 = vld [vmem:[#allocation5 + $0x3760] sm:$0xff]  ;;  %v30531_v6 = vld [vmem:[#allocation5 + $0x3710] sm:$0xff]  ;;  %v30530_v11 = vld [vmem:[#allocation5 + $0x3708] sm:$0xff] }
 0x6d5   :  { %20114 = vmatpush.bf16.msra.mxu2 %v30519_v58  ;;  %v30549_v58 = vld [vmem:[#allocation5 + $0x37a0] sm:$0xff] }
 0x6d6   :  { %20127 = vmatpush.bf16.msra.mxu3 %v30527_v59  ;;  %v31100_v16 = vadd.f32 %v19875_v14, %v19863_v12  ;;  %v120_v12 = vld [vmem:[#allocation2 + $0x1c0] sm:$0xff] }
 0x6d7   :  { %20089 = vmatpush.bf16.msra.mxu0 %v30502_v60  ;;  %v30557_v60 = vld [vmem:[#allocation5 + $0x37e0] sm:$0xff]  ;;  %v30546_v14 = vld [vmem:[#allocation5 + $0x3788] sm:$0xff]  ;;  %473 = vst [vmem:[#allocation1] ss:$4 sm:$0xff] %v120_v12  ;;  %v30600_v12 = vld [vmem:[#allocation5 + $0x3938] sm:$0xff] }
 0x6d8   :  { %20102 = vmatpush.bf16.msra.mxu1 %v30510_v61  ;;  %v30532_v61 = vld [vmem:[#allocation5 + $0x3718] sm:$0xff]  ;;  %v30529_v18 = vld [vmem:[#allocation5 + $0x3700] sm:$0xff] }
 0x6d9   :  { %20115 = vmatpush.bf16.msra.mxu2 %v30518_v62  ;;  %v30540_v62 = vld [vmem:[#allocation5 + $0x3758] sm:$0xff] }
 0x6da   :  { %20128 = vmatpush.bf16.msra.mxu3 %v30526_v63  ;;  %v30548_v63 = vld [vmem:[#allocation5 + $0x3798] sm:$0xff] }
 0x6db   :  { %20090 = vmatpush.bf16.msra.mxu0 %v30501_v2  ;;  %v19864_v26 = vpop.f32.mrf.mxu2  ;;  %v30556_v2 = vld [vmem:[#allocation5 + $0x37d8] sm:$0xff] }
 0x6dc   :  { %20103 = vmatpush.bf16.msra.mxu1 %v30509_v4  ;;  %v19877_v28 = vpop.f32.mrf.mxu3  ;;  %v30584_v26 = vld [vmem:[#allocation5 + $0x38b8] sm:$0xff] }
 0x6dd   :  { %20116 = vmatpush.bf16.msra.mxu2 %v30517_v5  ;;  %v472_v28 = vld.sshfl [vmem:[#allocation1 + $0x38] sm:$0xff pattern:$0x73625140] }
 0x6de   :  { %20129 = vmatpush.bf16.msra.mxu3 %v30525_v7  ;;  %v988_v33 = vpack.c.bf16 %v472_v28, %v472_v28  ;;  %v30606_v28 = vld [vmem:[#allocation5 + $0x3968] sm:$0xff] }
 0x6df   :  { %20091 = vmatpush.bf16.msra.mxu0 %v30500_v8  ;;  %v30539_v8 = vld [vmem:[#allocation5 + $0x3750] sm:$0xff] }
 0x6e0   :  { %20104 = vmatpush.bf16.msra.mxu1 %v30508_v9  ;;  %v30547_v9 = vld [vmem:[#allocation5 + $0x3790] sm:$0xff] }
 0x6e1   :  { %20117 = vmatpush.bf16.msra.mxu2 %v30516_v10  ;;  %v30555_v10 = vld [vmem:[#allocation5 + $0x37d0] sm:$0xff] }
 0x6e2   :  { %20130 = vmatpush.bf16.msra.mxu3 %v30524_v13  ;;  %v30538_v13 = vld [vmem:[#allocation5 + $0x3748] sm:$0xff] }
 0x6e3   :  { %20092 = vmatpush.bf16.msra.mxu0 %v30499_v17 }
 0x6e4   :  { %20105 = vmatpush.bf16.msra.mxu1 %v30507_v19  ;;  %v30537_v19 = vld [vmem:[#allocation5 + $0x3740] sm:$0xff] }
 0x6e5   :  { %20118 = vmatpush.bf16.msra.mxu2 %v30515_v20  ;;  %v30545_v20 = vld [vmem:[#allocation5 + $0x3780] sm:$0xff] }
 0x6e6   :  { %20131 = vmatpush.bf16.msra.mxu3 %v30523_v21  ;;  %v469_v21 = vld.sshfl [vmem:[#allocation1 + $0x20] sm:$0xff pattern:$0x73625140] }
 0x6e7   :  { %20093 = vmatpush.bf16.msra.mxu0 %v30498_v22  ;;  %v471_v22 = vld.sshfl [vmem:[#allocation1 + $0x30] sm:$0xff pattern:$0x73625140] }
 0x6e8   :  { %20106 = vmatpush.bf16.msra.mxu1 %v30506_v24  ;;  %v30576_v24 = vld [vmem:[#allocation5 + $0x3878] sm:$0xff] }
 0x6e9   :  { %20119 = vmatpush.bf16.msra.mxu2 %v30514_v25  ;;  %v470_v25 = vld.sshfl [vmem:[#allocation1 + $0x28] sm:$0xff pattern:$0x73625140] }
 0x6ea   :  { %20132 = vmatpush.bf16.msra.mxu3 %v30522_v27  ;;  %v30553_v27 = vld [vmem:[#allocation5 + $0x37c0] sm:$0xff]  ;;  %v986_v32 = vpack.c.bf16 %v470_v25, %v470_v25  ;;  %v30615_v25 = vld [vmem:[#allocation5 + $0x39b0] sm:$0xff] }
 0x6eb   :  { %20094 = vmatpush.bf16.msra.mxu0 %v30497_v29  ;;  %v19888_v53 = vpop.f32.mrf.mxu0  ;;  %v985_v29 = vpack.c.bf16 %v469_v21, %v469_v21 }
 0x6ec   :  { %20107 = vmatpush.bf16.msra.mxu1 %v30505_v30  ;;  %v19889_v54 = vadd.f32 %v19888_v53, %v31100_v16  ;;  %v19901_v56 = vpop.f32.mrf.mxu1  ;;  %v30554_v16 = vld [vmem:[#allocation5 + $0x37c8] sm:$0xff]  ;;  %v987_v30 = vpack.c.bf16 %v471_v22, %v471_v22 }
 0x6ed   :  { %20120 = vmatpush.bf16.msra.mxu2 %v30513_v31  ;;  %v30592_v31 = vld [vmem:[#allocation5 + $0x38f8] sm:$0xff] }
 0x6ee   :  { %20133 = vmatpush.bf16.msra.mxu3 %v30521_v38  ;;  %20095 = vmatmul.bf16.vlgmr.msra.gmra.mxu0 %v981_v40  ;;  %v19902_v59 = vadd.f32 %v19901_v56, %v19889_v54  ;;  %v30566_v38 = vld [vmem:[#allocation5 + $0x3828] sm:$0xff] }
 0x6ef   :  { %20139 = vmatpush.bf16.msrb.mxu0 %v30536_v34  ;;  %20108 = vmatmul.bf16.vlgmr.msra.gmra.mxu1 %v982_v43  ;;  %v30567_v34 = vld [vmem:[#allocation5 + $0x3830] sm:$0xff]  ;;  %v30582_v40 = vld [vmem:[#allocation5 + $0x38a8] sm:$0xff] }
 0x6f0   :  { %20152 = vmatpush.bf16.msrb.mxu1 %v30544_v35  ;;  %20121 = vmatmul.bf16.vlgmr.msra.gmra.mxu2 %v983_v41  ;;  %v30575_v35 = vld [vmem:[#allocation5 + $0x3870] sm:$0xff]  ;;  %v30590_v41 = vld [vmem:[#allocation5 + $0x38e8] sm:$0xff] }
 0x6f1   :  { %20165 = vmatpush.bf16.msrb.mxu2 %v30552_v37  ;;  %20134 = vmatmul.bf16.vlgmr.msra.gmra.mxu3 %v984_v44  ;;  %v30591_v37 = vld [vmem:[#allocation5 + $0x38f0] sm:$0xff]  ;;  %v30565_v44 = vld [vmem:[#allocation5 + $0x3820] sm:$0xff] }
 0x6f2   :  { %20178 = vmatpush.bf16.msrb.mxu3 %v30560_v42 }
 0x6f3   :  { %20140 = vmatpush.bf16.msrb.mxu0 %v30535_v45  ;;  %v19914_v0 = vpop.f32.mrf.mxu2  ;;  %v19890_v4 = vpop.f32.mrf.mxu0 }
 0x6f4   :  { %20153 = vmatpush.bf16.msrb.mxu1 %v30543_v46  ;;  %v19915_v1 = vadd.f32 %v19914_v0, %v19902_v59  ;;  %v19927_v3 = vpop.f32.mrf.mxu3  ;;  %v19903_v7 = vpop.f32.mrf.mxu1  ;;  %v30573_v46 = vld [vmem:[#allocation5 + $0x3860] sm:$0xff]  ;;  %v30563_v59 = vld [vmem:[#allocation5 + $0x3810] sm:$0xff]  ;;  %v30562_v0 = vld [vmem:[#allocation5 + $0x3808] sm:$0xff] }
 0x6f5   :  { %20166 = vmatpush.bf16.msrb.mxu2 %v30551_v47  ;;  %v30581_v47 = vld [vmem:[#allocation5 + $0x38a0] sm:$0xff] }
 0x6f6   :  { %20179 = vmatpush.bf16.msrb.mxu3 %v30559_v48  ;;  %v31103_v5 = vadd.f32 %v19927_v3, %v19915_v1  ;;  %v121_v1 = vld [vmem:[#allocation2 + $0x1c8] sm:$0xff]  ;;  %v30561_v7 = vld [vmem:[#allocation5 + $0x3800] sm:$0xff] }
 0x6f7   :  { %20141 = vmatpush.bf16.msrb.mxu0 %v30534_v49  ;;  %v30589_v49 = vld [vmem:[#allocation5 + $0x38e0] sm:$0xff]  ;;  %v30578_v3 = vld [vmem:[#allocation5 + $0x3888] sm:$0xff]  ;;  %474 = vst [vmem:[#allocation1 + $0x20] ss:$4 sm:$0xff] %v121_v1  ;;  %v30632_v1 = vld [vmem:[#allocation5 + $0x3a38] sm:$0xff] }
 0x6f8   :  { %20154 = vmatpush.bf16.msrb.mxu1 %v30542_v50  ;;  %v30564_v50 = vld [vmem:[#allocation5 + $0x3818] sm:$0xff] }
 0x6f9   :  { %20167 = vmatpush.bf16.msrb.mxu2 %v30550_v51  ;;  %v30572_v51 = vld [vmem:[#allocation5 + $0x3858] sm:$0xff] }
 0x6fa   :  { %20180 = vmatpush.bf16.msrb.mxu3 %v30558_v52  ;;  %v30580_v52 = vld [vmem:[#allocation5 + $0x3898] sm:$0xff] }
 0x6fb   :  { %20142 = vmatpush.bf16.msrb.mxu0 %v30533_v55  ;;  %v19916_v15 = vpop.f32.mrf.mxu2  ;;  %v30588_v55 = vld [vmem:[#allocation5 + $0x38d8] sm:$0xff] }
 0x6fc   :  { %20155 = vmatpush.bf16.msrb.mxu1 %v30541_v57  ;;  %v19929_v17 = vpop.f32.mrf.mxu3  ;;  %v30616_v15 = vld [vmem:[#allocation5 + $0x39b8] sm:$0xff] }
 0x6fd   :  { %20168 = vmatpush.bf16.msrb.mxu2 %v30549_v58  ;;  %v478_v17 = vld.sshfl [vmem:[#allocation1 + $0x18] sm:$0xff pattern:$0x73625140] }
 0x6fe   :  { %20181 = vmatpush.bf16.msrb.mxu3 %v30557_v60  ;;  %v992_v22 = vpack.c.bf16 %v478_v17, %v478_v17  ;;  %v30638_v17 = vld [vmem:[#allocation5 + $0x3a68] sm:$0xff] }
 0x6ff   :  { %20143 = vmatpush.bf16.msrb.mxu0 %v30532_v61  ;;  %v30571_v61 = vld [vmem:[#allocation5 + $0x3850] sm:$0xff] }
 0x700   :  { %20156 = vmatpush.bf16.msrb.mxu1 %v30540_v62  ;;  %v30579_v62 = vld [vmem:[#allocation5 + $0x3890] sm:$0xff] }
 0x701   :  { %20169 = vmatpush.bf16.msrb.mxu2 %v30548_v63  ;;  %v30587_v63 = vld [vmem:[#allocation5 + $0x38d0] sm:$0xff] }
 0x702   :  { %20182 = vmatpush.bf16.msrb.mxu3 %v30556_v2  ;;  %v30570_v2 = vld [vmem:[#allocation5 + $0x3848] sm:$0xff] }
 0x703   :  { %20144 = vmatpush.bf16.msrb.mxu0 %v30531_v6 }
 0x704   :  { %20157 = vmatpush.bf16.msrb.mxu1 %v30539_v8  ;;  %v30569_v8 = vld [vmem:[#allocation5 + $0x3840] sm:$0xff] }
 0x705   :  { %20170 = vmatpush.bf16.msrb.mxu2 %v30547_v9  ;;  %v30577_v9 = vld [vmem:[#allocation5 + $0x3880] sm:$0xff] }
 0x706   :  { %20183 = vmatpush.bf16.msrb.mxu3 %v30555_v10  ;;  %v475_v10 = vld.sshfl [vmem:[#allocation1] sm:$0xff pattern:$0x73625140] }
 0x707   :  { %20145 = vmatpush.bf16.msrb.mxu0 %v30530_v11  ;;  %v477_v11 = vld.sshfl [vmem:[#allocation1 + $0x10] sm:$0xff pattern:$0x73625140] }
 0x708   :  { %20158 = vmatpush.bf16.msrb.mxu1 %v30538_v13  ;;  %v30608_v13 = vld [vmem:[#allocation5 + $0x3978] sm:$0xff] }
 0x709   :  { %20171 = vmatpush.bf16.msrb.mxu2 %v30546_v14  ;;  %v476_v14 = vld.sshfl [vmem:[#allocation1 + $0x8] sm:$0xff pattern:$0x73625140] }
 0x70a   :  { %20184 = vmatpush.bf16.msrb.mxu3 %v30554_v16  ;;  %v30585_v16 = vld [vmem:[#allocation5 + $0x38c0] sm:$0xff]  ;;  %v990_v21 = vpack.c.bf16 %v476_v14, %v476_v14  ;;  %v30647_v14 = vld [vmem:[#allocation5 + $0x3ab0] sm:$0xff] }
 0x70b   :  { %20146 = vmatpush.bf16.msrb.mxu0 %v30529_v18  ;;  %v19940_v42 = vpop.f32.mrf.mxu0  ;;  %v989_v18 = vpack.c.bf16 %v475_v10, %v475_v10 }
 0x70c   :  { %20159 = vmatpush.bf16.msrb.mxu1 %v30537_v19  ;;  %v19941_v43 = vadd.f32 %v19940_v42, %v31103_v5  ;;  %v19953_v45 = vpop.f32.mrf.mxu1  ;;  %v30586_v5 = vld [vmem:[#allocation5 + $0x38c8] sm:$0xff]  ;;  %v991_v19 = vpack.c.bf16 %v477_v11, %v477_v11 }
 0x70d   :  { %20172 = vmatpush.bf16.msrb.mxu2 %v30545_v20  ;;  %v30624_v20 = vld [vmem:[#allocation5 + $0x39f8] sm:$0xff] }
 0x70e   :  { %20185 = vmatpush.bf16.msrb.mxu3 %v30553_v27  ;;  %20147 = vmatmul.bf16.vlgmr.msrb.gmra.mxu0 %v985_v29  ;;  %v19954_v48 = vadd.f32 %v19953_v45, %v19941_v43  ;;  %v30598_v27 = vld [vmem:[#allocation5 + $0x3928] sm:$0xff] }
 0x70f   :  { %20191 = vmatpush.bf16.msra.mxu0 %v30568_v23  ;;  %20160 = vmatmul.bf16.vlgmr.msrb.gmra.mxu1 %v986_v32  ;;  %v30599_v23 = vld [vmem:[#allocation5 + $0x3930] sm:$0xff]  ;;  %v30614_v29 = vld [vmem:[#allocation5 + $0x39a8] sm:$0xff] }
 0x710   :  { %20204 = vmatpush.bf16.msra.mxu1 %v30576_v24  ;;  %20173 = vmatmul.bf16.vlgmr.msrb.gmra.mxu2 %v987_v30  ;;  %v30607_v24 = vld [vmem:[#allocation5 + $0x3970] sm:$0xff]  ;;  %v30622_v30 = vld [vmem:[#allocation5 + $0x39e8] sm:$0xff] }
 0x711   :  { %20217 = vmatpush.bf16.msra.mxu2 %v30584_v26  ;;  %20186 = vmatmul.bf16.vlgmr.msrb.gmra.mxu3 %v988_v33  ;;  %v30623_v26 = vld [vmem:[#allocation5 + $0x39f0] sm:$0xff]  ;;  %v30597_v33 = vld [vmem:[#allocation5 + $0x3920] sm:$0xff] }
 0x712   :  { %20230 = vmatpush.bf16.msra.mxu3 %v30592_v31 }
 0x713   :  { %20192 = vmatpush.bf16.msra.mxu0 %v30567_v34  ;;  %v19966_v53 = vpop.f32.mrf.mxu2  ;;  %v19942_v57 = vpop.f32.mrf.mxu0 }
 0x714   :  { %20205 = vmatpush.bf16.msra.mxu1 %v30575_v35  ;;  %v19967_v54 = vadd.f32 %v19966_v53, %v19954_v48  ;;  %v19979_v56 = vpop.f32.mrf.mxu3  ;;  %v19955_v60 = vpop.f32.mrf.mxu1  ;;  %v30605_v35 = vld [vmem:[#allocation5 + $0x3960] sm:$0xff]  ;;  %v30595_v48 = vld [vmem:[#allocation5 + $0x3910] sm:$0xff]  ;;  %v30594_v53 = vld [vmem:[#allocation5 + $0x3908] sm:$0xff] }
 0x715   :  { %20218 = vmatpush.bf16.msra.mxu2 %v30583_v36  ;;  %v30613_v36 = vld [vmem:[#allocation5 + $0x39a0] sm:$0xff] }
 0x716   :  { %20231 = vmatpush.bf16.msra.mxu3 %v30591_v37  ;;  %v31106_v58 = vadd.f32 %v19979_v56, %v19967_v54  ;;  %v122_v54 = vld [vmem:[#allocation2 + $0x1d0] sm:$0xff]  ;;  %v30610_v56 = vld [vmem:[#allocation5 + $0x3988] sm:$0xff]  ;;  %v30593_v60 = vld [vmem:[#allocation5 + $0x3900] sm:$0xff] }
 0x717   :  { %20193 = vmatpush.bf16.msra.mxu0 %v30566_v38  ;;  %v30621_v38 = vld [vmem:[#allocation5 + $0x39e0] sm:$0xff]  ;;  %483 = vst [vmem:[#allocation1] ss:$4 sm:$0xff] %v122_v54  ;;  %v30664_v54 = vld [vmem:[#allocation5 + $0x3b38] sm:$0xff] }
 0x718   :  { %20206 = vmatpush.bf16.msra.mxu1 %v30574_v39  ;;  %v30596_v39 = vld [vmem:[#allocation5 + $0x3918] sm:$0xff] }
 0x719   :  { %20219 = vmatpush.bf16.msra.mxu2 %v30582_v40  ;;  %v30604_v40 = vld [vmem:[#allocation5 + $0x3958] sm:$0xff] }
 0x71a   :  { %20232 = vmatpush.bf16.msra.mxu3 %v30590_v41  ;;  %v30612_v41 = vld [vmem:[#allocation5 + $0x3998] sm:$0xff] }
 0x71b   :  { %20194 = vmatpush.bf16.msra.mxu0 %v30565_v44  ;;  %v19968_v4 = vpop.f32.mrf.mxu2  ;;  %v30620_v44 = vld [vmem:[#allocation5 + $0x39d8] sm:$0xff] }
 0x71c   :  { %20207 = vmatpush.bf16.msra.mxu1 %v30573_v46  ;;  %v19981_v6 = vpop.f32.mrf.mxu3  ;;  %v30648_v4 = vld [vmem:[#allocation5 + $0x3ab8] sm:$0xff] }
 0x71d   :  { %20220 = vmatpush.bf16.msra.mxu2 %v30581_v47  ;;  %v482_v6 = vld.sshfl [vmem:[#allocation1 + $0x38] sm:$0xff pattern:$0x73625140] }
 0x71e   :  { %20233 = vmatpush.bf16.msra.mxu3 %v30589_v49  ;;  %v996_v11 = vpack.c.bf16 %v482_v6, %v482_v6  ;;  %v30670_v6 = vld [vmem:[#allocation5 + $0x3b68] sm:$0xff] }
 0x71f   :  { %20195 = vmatpush.bf16.msra.mxu0 %v30564_v50  ;;  %v30603_v50 = vld [vmem:[#allocation5 + $0x3950] sm:$0xff] }
 0x720   :  { %20208 = vmatpush.bf16.msra.mxu1 %v30572_v51  ;;  %v30611_v51 = vld [vmem:[#allocation5 + $0x3990] sm:$0xff] }
 0x721   :  { %20221 = vmatpush.bf16.msra.mxu2 %v30580_v52  ;;  %v30619_v52 = vld [vmem:[#allocation5 + $0x39d0] sm:$0xff] }
 0x722   :  { %20234 = vmatpush.bf16.msra.mxu3 %v30588_v55  ;;  %v30602_v55 = vld [vmem:[#allocation5 + $0x3948] sm:$0xff] }
 0x723   :  { %20196 = vmatpush.bf16.msra.mxu0 %v30563_v59 }
 0x724   :  { %20209 = vmatpush.bf16.msra.mxu1 %v30571_v61  ;;  %v30601_v61 = vld [vmem:[#allocation5 + $0x3940] sm:$0xff] }
 0x725   :  { %20222 = vmatpush.bf16.msra.mxu2 %v30579_v62  ;;  %v30609_v62 = vld [vmem:[#allocation5 + $0x3980] sm:$0xff] }
 0x726   :  { %20235 = vmatpush.bf16.msra.mxu3 %v30587_v63  ;;  %v479_v63 = vld.sshfl [vmem:[#allocation1 + $0x20] sm:$0xff pattern:$0x73625140] }
 0x727   :  { %20197 = vmatpush.bf16.msra.mxu0 %v30562_v0  ;;  %v481_v0 = vld.sshfl [vmem:[#allocation1 + $0x30] sm:$0xff pattern:$0x73625140] }
 0x728   :  { %20210 = vmatpush.bf16.msra.mxu1 %v30570_v2  ;;  %v30640_v2 = vld [vmem:[#allocation5 + $0x3a78] sm:$0xff] }
 0x729   :  { %20223 = vmatpush.bf16.msra.mxu2 %v30578_v3  ;;  %v480_v3 = vld.sshfl [vmem:[#allocation1 + $0x28] sm:$0xff pattern:$0x73625140] }
 0x72a   :  { %20236 = vmatpush.bf16.msra.mxu3 %v30586_v5  ;;  %v30617_v5 = vld [vmem:[#allocation5 + $0x39c0] sm:$0xff]  ;;  %v994_v10 = vpack.c.bf16 %v480_v3, %v480_v3  ;;  %v30679_v3 = vld [vmem:[#allocation5 + $0x3bb0] sm:$0xff] }
 0x72b   :  { %20198 = vmatpush.bf16.msra.mxu0 %v30561_v7  ;;  %v19992_v31 = vpop.f32.mrf.mxu0  ;;  %v993_v7 = vpack.c.bf16 %v479_v63, %v479_v63 }
 0x72c   :  { %20211 = vmatpush.bf16.msra.mxu1 %v30569_v8  ;;  %v19993_v32 = vadd.f32 %v19992_v31, %v31106_v58  ;;  %v20005_v34 = vpop.f32.mrf.mxu1  ;;  %v30618_v58 = vld [vmem:[#allocation5 + $0x39c8] sm:$0xff]  ;;  %v995_v8 = vpack.c.bf16 %v481_v0, %v481_v0 }
 0x72d   :  { %20224 = vmatpush.bf16.msra.mxu2 %v30577_v9  ;;  %v30656_v9 = vld [vmem:[#allocation5 + $0x3af8] sm:$0xff] }
 0x72e   :  { %20237 = vmatpush.bf16.msra.mxu3 %v30585_v16  ;;  %20199 = vmatmul.bf16.vlgmr.msra.gmra.mxu0 %v989_v18  ;;  %v20006_v37 = vadd.f32 %v20005_v34, %v19993_v32  ;;  %v30630_v16 = vld [vmem:[#allocation5 + $0x3a28] sm:$0xff] }
 0x72f   :  { %20243 = vmatpush.bf16.msrb.mxu0 %v30600_v12  ;;  %20212 = vmatmul.bf16.vlgmr.msra.gmra.mxu1 %v990_v21  ;;  %v30631_v12 = vld [vmem:[#allocation5 + $0x3a30] sm:$0xff]  ;;  %v30646_v18 = vld [vmem:[#allocation5 + $0x3aa8] sm:$0xff] }
 0x730   :  { %20256 = vmatpush.bf16.msrb.mxu1 %v30608_v13  ;;  %20225 = vmatmul.bf16.vlgmr.msra.gmra.mxu2 %v991_v19  ;;  %v30639_v13 = vld [vmem:[#allocation5 + $0x3a70] sm:$0xff]  ;;  %v30654_v19 = vld [vmem:[#allocation5 + $0x3ae8] sm:$0xff] }
 0x731   :  { %20269 = vmatpush.bf16.msrb.mxu2 %v30616_v15  ;;  %20238 = vmatmul.bf16.vlgmr.msra.gmra.mxu3 %v992_v22  ;;  %v30655_v15 = vld [vmem:[#allocation5 + $0x3af0] sm:$0xff]  ;;  %v30629_v22 = vld [vmem:[#allocation5 + $0x3a20] sm:$0xff] }
 0x732   :  { %20282 = vmatpush.bf16.msrb.mxu3 %v30624_v20 }
 0x733   :  { %20244 = vmatpush.bf16.msrb.mxu0 %v30599_v23  ;;  %v20018_v42 = vpop.f32.mrf.mxu2  ;;  %v19994_v46 = vpop.f32.mrf.mxu0 }
 0x734   :  { %20257 = vmatpush.bf16.msrb.mxu1 %v30607_v24  ;;  %v20019_v43 = vadd.f32 %v20018_v42, %v20006_v37  ;;  %v20031_v45 = vpop.f32.mrf.mxu3  ;;  %v20007_v49 = vpop.f32.mrf.mxu1  ;;  %v30637_v24 = vld [vmem:[#allocation5 + $0x3a60] sm:$0xff]  ;;  %v30627_v37 = vld [vmem:[#allocation5 + $0x3a10] sm:$0xff]  ;;  %v30626_v42 = vld [vmem:[#allocation5 + $0x3a08] sm:$0xff] }
 0x735   :  { %20270 = vmatpush.bf16.msrb.mxu2 %v30615_v25  ;;  %v30645_v25 = vld [vmem:[#allocation5 + $0x3aa0] sm:$0xff] }
 0x736   :  { %20283 = vmatpush.bf16.msrb.mxu3 %v30623_v26  ;;  %v31109_v47 = vadd.f32 %v20031_v45, %v20019_v43  ;;  %v123_v43 = vld [vmem:[#allocation2 + $0x1d8] sm:$0xff]  ;;  %v30642_v45 = vld [vmem:[#allocation5 + $0x3a88] sm:$0xff] }
 0x737   :  { %20245 = vmatpush.bf16.msrb.mxu0 %v30598_v27  ;;  %v30653_v27 = vld [vmem:[#allocation5 + $0x3ae0] sm:$0xff]  ;;  %484 = vst [vmem:[#allocation1 + $0x20] ss:$4 sm:$0xff] %v123_v43  ;;  %v30696_v43 = vld [vmem:[#allocation5 + $0x3c38] sm:$0xff] }
 0x738   :  { %20258 = vmatpush.bf16.msrb.mxu1 %v30606_v28  ;;  %v30628_v28 = vld [vmem:[#allocation5 + $0x3a18] sm:$0xff]  ;;  %v30625_v49 = vld [vmem:[#allocation5 + $0x3a00] sm:$0xff] }
 0x739   :  { %20271 = vmatpush.bf16.msrb.mxu2 %v30614_v29  ;;  %v30636_v29 = vld [vmem:[#allocation5 + $0x3a58] sm:$0xff] }
 0x73a   :  { %20284 = vmatpush.bf16.msrb.mxu3 %v30622_v30  ;;  %v30644_v30 = vld [vmem:[#allocation5 + $0x3a98] sm:$0xff] }
 0x73b   :  { %20246 = vmatpush.bf16.msrb.mxu0 %v30597_v33  ;;  %v20020_v57 = vpop.f32.mrf.mxu2  ;;  %v30652_v33 = vld [vmem:[#allocation5 + $0x3ad8] sm:$0xff] }
 0x73c   :  { %20259 = vmatpush.bf16.msrb.mxu1 %v30605_v35  ;;  %v20033_v59 = vpop.f32.mrf.mxu3  ;;  %v30680_v57 = vld [vmem:[#allocation5 + $0x3bb8] sm:$0xff] }
 0x73d   :  { %20272 = vmatpush.bf16.msrb.mxu2 %v30613_v36  ;;  %v488_v59 = vld.sshfl [vmem:[#allocation1 + $0x18] sm:$0xff pattern:$0x73625140] }
 0x73e   :  { %20285 = vmatpush.bf16.msrb.mxu3 %v30621_v38  ;;  %v1000_v0 = vpack.c.bf16 %v488_v59, %v488_v59  ;;  %v30702_v59 = vld [vmem:[#allocation5 + $0x3c68] sm:$0xff] }
 0x73f   :  { %20247 = vmatpush.bf16.msrb.mxu0 %v30596_v39  ;;  %v30635_v39 = vld [vmem:[#allocation5 + $0x3a50] sm:$0xff] }
 0x740   :  { %20260 = vmatpush.bf16.msrb.mxu1 %v30604_v40  ;;  %v30643_v40 = vld [vmem:[#allocation5 + $0x3a90] sm:$0xff] }
 0x741   :  { %20273 = vmatpush.bf16.msrb.mxu2 %v30612_v41  ;;  %v30651_v41 = vld [vmem:[#allocation5 + $0x3ad0] sm:$0xff] }
 0x742   :  { %20286 = vmatpush.bf16.msrb.mxu3 %v30620_v44  ;;  %v30634_v44 = vld [vmem:[#allocation5 + $0x3a48] sm:$0xff] }
 0x743   :  { %20248 = vmatpush.bf16.msrb.mxu0 %v30595_v48 }
 0x744   :  { %20261 = vmatpush.bf16.msrb.mxu1 %v30603_v50  ;;  %v30633_v50 = vld [vmem:[#allocation5 + $0x3a40] sm:$0xff] }
 0x745   :  { %20274 = vmatpush.bf16.msrb.mxu2 %v30611_v51  ;;  %v30641_v51 = vld [vmem:[#allocation5 + $0x3a80] sm:$0xff] }
 0x746   :  { %20287 = vmatpush.bf16.msrb.mxu3 %v30619_v52  ;;  %v485_v52 = vld.sshfl [vmem:[#allocation1] sm:$0xff pattern:$0x73625140] }
 0x747   :  { %20249 = vmatpush.bf16.msrb.mxu0 %v30594_v53  ;;  %v487_v53 = vld.sshfl [vmem:[#allocation1 + $0x10] sm:$0xff pattern:$0x73625140] }
 0x748   :  { %20262 = vmatpush.bf16.msrb.mxu1 %v30602_v55  ;;  %v30672_v55 = vld [vmem:[#allocation5 + $0x3b78] sm:$0xff] }
 0x749   :  { %20275 = vmatpush.bf16.msrb.mxu2 %v30610_v56  ;;  %v486_v56 = vld.sshfl [vmem:[#allocation1 + $0x8] sm:$0xff pattern:$0x73625140] }
 0x74a   :  { %20288 = vmatpush.bf16.msrb.mxu3 %v30618_v58  ;;  %v30649_v58 = vld [vmem:[#allocation5 + $0x3ac0] sm:$0xff]  ;;  %v998_v63 = vpack.c.bf16 %v486_v56, %v486_v56  ;;  %v30711_v56 = vld [vmem:[#allocation5 + $0x3cb0] sm:$0xff] }
 0x74b   :  { %20250 = vmatpush.bf16.msrb.mxu0 %v30593_v60  ;;  %v20044_v20 = vpop.f32.mrf.mxu0  ;;  %v997_v60 = vpack.c.bf16 %v485_v52, %v485_v52 }
 0x74c   :  { %20263 = vmatpush.bf16.msrb.mxu1 %v30601_v61  ;;  %v20045_v21 = vadd.f32 %v20044_v20, %v31109_v47  ;;  %v20057_v23 = vpop.f32.mrf.mxu1  ;;  %v30650_v47 = vld [vmem:[#allocation5 + $0x3ac8] sm:$0xff]  ;;  %v999_v61 = vpack.c.bf16 %v487_v53, %v487_v53 }
 0x74d   :  { %20276 = vmatpush.bf16.msrb.mxu2 %v30609_v62  ;;  %v30688_v62 = vld [vmem:[#allocation5 + $0x3bf8] sm:$0xff] }
 0x74e   :  { %20289 = vmatpush.bf16.msrb.mxu3 %v30617_v5  ;;  %20251 = vmatmul.bf16.vlgmr.msrb.gmra.mxu0 %v993_v7  ;;  %v20058_v26 = vadd.f32 %v20057_v23, %v20045_v21  ;;  %v30662_v5 = vld [vmem:[#allocation5 + $0x3b28] sm:$0xff] }
 0x74f   :  { %20295 = vmatpush.bf16.msra.mxu0 %v30632_v1  ;;  %20264 = vmatmul.bf16.vlgmr.msrb.gmra.mxu1 %v994_v10  ;;  %v30663_v1 = vld [vmem:[#allocation5 + $0x3b30] sm:$0xff]  ;;  %v30678_v7 = vld [vmem:[#allocation5 + $0x3ba8] sm:$0xff] }
 0x750   :  { %20308 = vmatpush.bf16.msra.mxu1 %v30640_v2  ;;  %20277 = vmatmul.bf16.vlgmr.msrb.gmra.mxu2 %v995_v8  ;;  %v30671_v2 = vld [vmem:[#allocation5 + $0x3b70] sm:$0xff]  ;;  %v30686_v8 = vld [vmem:[#allocation5 + $0x3be8] sm:$0xff] }
 0x751   :  { %20321 = vmatpush.bf16.msra.mxu2 %v30648_v4  ;;  %20290 = vmatmul.bf16.vlgmr.msrb.gmra.mxu3 %v996_v11  ;;  %v30687_v4 = vld [vmem:[#allocation5 + $0x3bf0] sm:$0xff]  ;;  %v30661_v11 = vld [vmem:[#allocation5 + $0x3b20] sm:$0xff] }
 0x752   :  { %20334 = vmatpush.bf16.msra.mxu3 %v30656_v9 }
 0x753   :  { %20296 = vmatpush.bf16.msra.mxu0 %v30631_v12  ;;  %v20070_v31 = vpop.f32.mrf.mxu2  ;;  %v20046_v35 = vpop.f32.mrf.mxu0 }
 0x754   :  { %20309 = vmatpush.bf16.msra.mxu1 %v30639_v13  ;;  %v20071_v32 = vadd.f32 %v20070_v31, %v20058_v26  ;;  %v20083_v34 = vpop.f32.mrf.mxu3  ;;  %v20059_v38 = vpop.f32.mrf.mxu1  ;;  %v30669_v13 = vld [vmem:[#allocation5 + $0x3b60] sm:$0xff]  ;;  %v30659_v26 = vld [vmem:[#allocation5 + $0x3b10] sm:$0xff]  ;;  %v30658_v31 = vld [vmem:[#allocation5 + $0x3b08] sm:$0xff] }
 0x755   :  { %20322 = vmatpush.bf16.msra.mxu2 %v30647_v14  ;;  %v30677_v14 = vld [vmem:[#allocation5 + $0x3ba0] sm:$0xff] }
 0x756   :  { %20335 = vmatpush.bf16.msra.mxu3 %v30655_v15  ;;  %v31112_v36 = vadd.f32 %v20083_v34, %v20071_v32  ;;  %v124_v32 = vld [vmem:[#allocation2 + $0x1e0] sm:$0xff] }
 0x757   :  { %20297 = vmatpush.bf16.msra.mxu0 %v30630_v16  ;;  %v30685_v16 = vld [vmem:[#allocation5 + $0x3be0] sm:$0xff]  ;;  %v30674_v34 = vld [vmem:[#allocation5 + $0x3b88] sm:$0xff]  ;;  %493 = vst [vmem:[#allocation1] ss:$4 sm:$0xff] %v124_v32  ;;  %v30728_v32 = vld [vmem:[#allocation5 + $0x3d38] sm:$0xff] }
 0x758   :  { %20310 = vmatpush.bf16.msra.mxu1 %v30638_v17  ;;  %v30660_v17 = vld [vmem:[#allocation5 + $0x3b18] sm:$0xff]  ;;  %v30657_v38 = vld [vmem:[#allocation5 + $0x3b00] sm:$0xff] }
 0x759   :  { %20323 = vmatpush.bf16.msra.mxu2 %v30646_v18  ;;  %v30668_v18 = vld [vmem:[#allocation5 + $0x3b58] sm:$0xff] }
 0x75a   :  { %20336 = vmatpush.bf16.msra.mxu3 %v30654_v19  ;;  %v30676_v19 = vld [vmem:[#allocation5 + $0x3b98] sm:$0xff] }
 0x75b   :  { %20298 = vmatpush.bf16.msra.mxu0 %v30629_v22  ;;  %v20072_v46 = vpop.f32.mrf.mxu2  ;;  %v30684_v22 = vld [vmem:[#allocation5 + $0x3bd8] sm:$0xff] }
 0x75c   :  { %20311 = vmatpush.bf16.msra.mxu1 %v30637_v24  ;;  %v20085_v48 = vpop.f32.mrf.mxu3  ;;  %v30712_v46 = vld [vmem:[#allocation5 + $0x3cb8] sm:$0xff] }
 0x75d   :  { %20324 = vmatpush.bf16.msra.mxu2 %v30645_v25  ;;  %v492_v48 = vld.sshfl [vmem:[#allocation1 + $0x38] sm:$0xff pattern:$0x73625140] }
 0x75e   :  { %20337 = vmatpush.bf16.msra.mxu3 %v30653_v27  ;;  %v1004_v53 = vpack.c.bf16 %v492_v48, %v492_v48  ;;  %v30734_v48 = vld [vmem:[#allocation5 + $0x3d68] sm:$0xff] }
 0x75f   :  { %20299 = vmatpush.bf16.msra.mxu0 %v30628_v28  ;;  %v30667_v28 = vld [vmem:[#allocation5 + $0x3b50] sm:$0xff] }
 0x760   :  { %20312 = vmatpush.bf16.msra.mxu1 %v30636_v29  ;;  %v30675_v29 = vld [vmem:[#allocation5 + $0x3b90] sm:$0xff] }
 0x761   :  { %20325 = vmatpush.bf16.msra.mxu2 %v30644_v30  ;;  %v30683_v30 = vld [vmem:[#allocation5 + $0x3bd0] sm:$0xff] }
 0x762   :  { %20338 = vmatpush.bf16.msra.mxu3 %v30652_v33  ;;  %v30666_v33 = vld [vmem:[#allocation5 + $0x3b48] sm:$0xff] }
 0x763   :  { %20300 = vmatpush.bf16.msra.mxu0 %v30627_v37 }
 0x764   :  { %20313 = vmatpush.bf16.msra.mxu1 %v30635_v39  ;;  %v30665_v39 = vld [vmem:[#allocation5 + $0x3b40] sm:$0xff] }
 0x765   :  { %20326 = vmatpush.bf16.msra.mxu2 %v30643_v40  ;;  %v30673_v40 = vld [vmem:[#allocation5 + $0x3b80] sm:$0xff] }
 0x766   :  { %20339 = vmatpush.bf16.msra.mxu3 %v30651_v41  ;;  %v489_v41 = vld.sshfl [vmem:[#allocation1 + $0x20] sm:$0xff pattern:$0x73625140] }
 0x767   :  { %20301 = vmatpush.bf16.msra.mxu0 %v30626_v42  ;;  %v491_v42 = vld.sshfl [vmem:[#allocation1 + $0x30] sm:$0xff pattern:$0x73625140] }
 0x768   :  { %20314 = vmatpush.bf16.msra.mxu1 %v30634_v44  ;;  %v30704_v44 = vld [vmem:[#allocation5 + $0x3c78] sm:$0xff] }
 0x769   :  { %20327 = vmatpush.bf16.msra.mxu2 %v30642_v45  ;;  %v490_v45 = vld.sshfl [vmem:[#allocation1 + $0x28] sm:$0xff pattern:$0x73625140] }
 0x76a   :  { %20340 = vmatpush.bf16.msra.mxu3 %v30650_v47  ;;  %v30681_v47 = vld [vmem:[#allocation5 + $0x3bc0] sm:$0xff]  ;;  %v1002_v52 = vpack.c.bf16 %v490_v45, %v490_v45  ;;  %v30743_v45 = vld [vmem:[#allocation5 + $0x3db0] sm:$0xff] }
 0x76b   :  { %20302 = vmatpush.bf16.msra.mxu0 %v30625_v49  ;;  %v20096_v9 = vpop.f32.mrf.mxu0  ;;  %v1001_v49 = vpack.c.bf16 %v489_v41, %v489_v41 }
 0x76c   :  { %20315 = vmatpush.bf16.msra.mxu1 %v30633_v50  ;;  %v20097_v10 = vadd.f32 %v20096_v9, %v31112_v36  ;;  %v20109_v12 = vpop.f32.mrf.mxu1  ;;  %v30682_v36 = vld [vmem:[#allocation5 + $0x3bc8] sm:$0xff]  ;;  %v1003_v50 = vpack.c.bf16 %v491_v42, %v491_v42 }
 0x76d   :  { %20328 = vmatpush.bf16.msra.mxu2 %v30641_v51  ;;  %v30720_v51 = vld [vmem:[#allocation5 + $0x3cf8] sm:$0xff] }
 0x76e   :  { %20341 = vmatpush.bf16.msra.mxu3 %v30649_v58  ;;  %20303 = vmatmul.bf16.vlgmr.msra.gmra.mxu0 %v997_v60  ;;  %v20110_v15 = vadd.f32 %v20109_v12, %v20097_v10  ;;  %v30694_v58 = vld [vmem:[#allocation5 + $0x3c28] sm:$0xff] }
 0x76f   :  { %20347 = vmatpush.bf16.msrb.mxu0 %v30664_v54  ;;  %20316 = vmatmul.bf16.vlgmr.msra.gmra.mxu1 %v998_v63  ;;  %v30695_v54 = vld [vmem:[#allocation5 + $0x3c30] sm:$0xff]  ;;  %v30710_v60 = vld [vmem:[#allocation5 + $0x3ca8] sm:$0xff] }
 0x770   :  { %20360 = vmatpush.bf16.msrb.mxu1 %v30672_v55  ;;  %20329 = vmatmul.bf16.vlgmr.msra.gmra.mxu2 %v999_v61  ;;  %v30703_v55 = vld [vmem:[#allocation5 + $0x3c70] sm:$0xff]  ;;  %v30718_v61 = vld [vmem:[#allocation5 + $0x3ce8] sm:$0xff] }
 0x771   :  { %20373 = vmatpush.bf16.msrb.mxu2 %v30680_v57  ;;  %20342 = vmatmul.bf16.vlgmr.msra.gmra.mxu3 %v1000_v0  ;;  %v30719_v57 = vld [vmem:[#allocation5 + $0x3cf0] sm:$0xff]  ;;  %v30693_v0 = vld [vmem:[#allocation5 + $0x3c20] sm:$0xff] }
 0x772   :  { %20386 = vmatpush.bf16.msrb.mxu3 %v30688_v62 }
 0x773   :  { %20348 = vmatpush.bf16.msrb.mxu0 %v30663_v1  ;;  %v20122_v20 = vpop.f32.mrf.mxu2  ;;  %v20098_v24 = vpop.f32.mrf.mxu0 }
 0x774   :  { %20361 = vmatpush.bf16.msrb.mxu1 %v30671_v2  ;;  %v20123_v21 = vadd.f32 %v20122_v20, %v20110_v15  ;;  %v20135_v23 = vpop.f32.mrf.mxu3  ;;  %v20111_v27 = vpop.f32.mrf.mxu1  ;;  %v30701_v2 = vld [vmem:[#allocation5 + $0x3c60] sm:$0xff]  ;;  %v30691_v15 = vld [vmem:[#allocation5 + $0x3c10] sm:$0xff]  ;;  %v30690_v20 = vld [vmem:[#allocation5 + $0x3c08] sm:$0xff] }
 0x775   :  { %20374 = vmatpush.bf16.msrb.mxu2 %v30679_v3  ;;  %v30709_v3 = vld [vmem:[#allocation5 + $0x3ca0] sm:$0xff] }
 0x776   :  { %20387 = vmatpush.bf16.msrb.mxu3 %v30687_v4  ;;  %v31115_v25 = vadd.f32 %v20135_v23, %v20123_v21  ;;  %v125_v21 = vld [vmem:[#allocation2 + $0x1e8] sm:$0xff]  ;;  %v30689_v27 = vld [vmem:[#allocation5 + $0x3c00] sm:$0xff] }
 0x777   :  { %20349 = vmatpush.bf16.msrb.mxu0 %v30662_v5  ;;  %v30717_v5 = vld [vmem:[#allocation5 + $0x3ce0] sm:$0xff]  ;;  %v30706_v23 = vld [vmem:[#allocation5 + $0x3c88] sm:$0xff]  ;;  %494 = vst [vmem:[#allocation1 + $0x20] ss:$4 sm:$0xff] %v125_v21  ;;  %v30760_v21 = vld [vmem:[#allocation5 + $0x3e38] sm:$0xff] }
 0x778   :  { %20362 = vmatpush.bf16.msrb.mxu1 %v30670_v6  ;;  %v30692_v6 = vld [vmem:[#allocation5 + $0x3c18] sm:$0xff] }
 0x779   :  { %20375 = vmatpush.bf16.msrb.mxu2 %v30678_v7  ;;  %v30700_v7 = vld [vmem:[#allocation5 + $0x3c58] sm:$0xff] }
 0x77a   :  { %20388 = vmatpush.bf16.msrb.mxu3 %v30686_v8  ;;  %v30708_v8 = vld [vmem:[#allocation5 + $0x3c98] sm:$0xff] }
 0x77b   :  { %20350 = vmatpush.bf16.msrb.mxu0 %v30661_v11  ;;  %v20124_v35 = vpop.f32.mrf.mxu2  ;;  %v30716_v11 = vld [vmem:[#allocation5 + $0x3cd8] sm:$0xff] }
 0x77c   :  { %20363 = vmatpush.bf16.msrb.mxu1 %v30669_v13  ;;  %v20137_v37 = vpop.f32.mrf.mxu3  ;;  %v30744_v35 = vld [vmem:[#allocation5 + $0x3db8] sm:$0xff] }
 0x77d   :  { %20376 = vmatpush.bf16.msrb.mxu2 %v30677_v14  ;;  %v498_v37 = vld.sshfl [vmem:[#allocation1 + $0x18] sm:$0xff pattern:$0x73625140] }
 0x77e   :  { %20389 = vmatpush.bf16.msrb.mxu3 %v30685_v16  ;;  %v1008_v42 = vpack.c.bf16 %v498_v37, %v498_v37  ;;  %v30766_v37 = vld [vmem:[#allocation5 + $0x3e68] sm:$0xff] }
 0x77f   :  { %20351 = vmatpush.bf16.msrb.mxu0 %v30660_v17  ;;  %v30699_v17 = vld [vmem:[#allocation5 + $0x3c50] sm:$0xff] }
 0x780   :  { %20364 = vmatpush.bf16.msrb.mxu1 %v30668_v18  ;;  %v30707_v18 = vld [vmem:[#allocation5 + $0x3c90] sm:$0xff] }
 0x781   :  { %20377 = vmatpush.bf16.msrb.mxu2 %v30676_v19  ;;  %v30715_v19 = vld [vmem:[#allocation5 + $0x3cd0] sm:$0xff] }
 0x782   :  { %20390 = vmatpush.bf16.msrb.mxu3 %v30684_v22  ;;  %v30698_v22 = vld [vmem:[#allocation5 + $0x3c48] sm:$0xff] }
 0x783   :  { %20352 = vmatpush.bf16.msrb.mxu0 %v30659_v26 }
 0x784   :  { %20365 = vmatpush.bf16.msrb.mxu1 %v30667_v28  ;;  %v30697_v28 = vld [vmem:[#allocation5 + $0x3c40] sm:$0xff] }
 0x785   :  { %20378 = vmatpush.bf16.msrb.mxu2 %v30675_v29  ;;  %v30705_v29 = vld [vmem:[#allocation5 + $0x3c80] sm:$0xff] }
 0x786   :  { %20391 = vmatpush.bf16.msrb.mxu3 %v30683_v30  ;;  %v495_v30 = vld.sshfl [vmem:[#allocation1] sm:$0xff pattern:$0x73625140] }
 0x787   :  { %20353 = vmatpush.bf16.msrb.mxu0 %v30658_v31  ;;  %v497_v31 = vld.sshfl [vmem:[#allocation1 + $0x10] sm:$0xff pattern:$0x73625140] }
 0x788   :  { %20366 = vmatpush.bf16.msrb.mxu1 %v30666_v33  ;;  %v30736_v33 = vld [vmem:[#allocation5 + $0x3d78] sm:$0xff] }
 0x789   :  { %20379 = vmatpush.bf16.msrb.mxu2 %v30674_v34  ;;  %v496_v34 = vld.sshfl [vmem:[#allocation1 + $0x8] sm:$0xff pattern:$0x73625140] }
 0x78a   :  { %20392 = vmatpush.bf16.msrb.mxu3 %v30682_v36  ;;  %v30713_v36 = vld [vmem:[#allocation5 + $0x3cc0] sm:$0xff]  ;;  %v1006_v41 = vpack.c.bf16 %v496_v34, %v496_v34  ;;  %v30775_v34 = vld [vmem:[#allocation5 + $0x3eb0] sm:$0xff] }
 0x78b   :  { %20354 = vmatpush.bf16.msrb.mxu0 %v30657_v38  ;;  %v20148_v62 = vpop.f32.mrf.mxu0  ;;  %v1005_v38 = vpack.c.bf16 %v495_v30, %v495_v30 }
 0x78c   :  { %20367 = vmatpush.bf16.msrb.mxu1 %v30665_v39  ;;  %v20149_v63 = vadd.f32 %v20148_v62, %v31115_v25  ;;  %v20161_v1 = vpop.f32.mrf.mxu1  ;;  %v30714_v25 = vld [vmem:[#allocation5 + $0x3cc8] sm:$0xff]  ;;  %v1007_v39 = vpack.c.bf16 %v497_v31, %v497_v31 }
 0x78d   :  { %20380 = vmatpush.bf16.msrb.mxu2 %v30673_v40  ;;  %v30752_v40 = vld [vmem:[#allocation5 + $0x3df8] sm:$0xff] }
 0x78e   :  { %20393 = vmatpush.bf16.msrb.mxu3 %v30681_v47  ;;  %20355 = vmatmul.bf16.vlgmr.msrb.gmra.mxu0 %v1001_v49  ;;  %v20162_v4 = vadd.f32 %v20161_v1, %v20149_v63  ;;  %v30726_v47 = vld [vmem:[#allocation5 + $0x3d28] sm:$0xff] }
 0x78f   :  { %20399 = vmatpush.bf16.msra.mxu0 %v30696_v43  ;;  %20368 = vmatmul.bf16.vlgmr.msrb.gmra.mxu1 %v1002_v52  ;;  %v30727_v43 = vld [vmem:[#allocation5 + $0x3d30] sm:$0xff]  ;;  %v30742_v49 = vld [vmem:[#allocation5 + $0x3da8] sm:$0xff] }
 0x790   :  { %20412 = vmatpush.bf16.msra.mxu1 %v30704_v44  ;;  %20381 = vmatmul.bf16.vlgmr.msrb.gmra.mxu2 %v1003_v50  ;;  %v30735_v44 = vld [vmem:[#allocation5 + $0x3d70] sm:$0xff]  ;;  %v30750_v50 = vld [vmem:[#allocation5 + $0x3de8] sm:$0xff] }
 0x791   :  { %20425 = vmatpush.bf16.msra.mxu2 %v30712_v46  ;;  %20394 = vmatmul.bf16.vlgmr.msrb.gmra.mxu3 %v1004_v53  ;;  %v30751_v46 = vld [vmem:[#allocation5 + $0x3df0] sm:$0xff]  ;;  %v30725_v53 = vld [vmem:[#allocation5 + $0x3d20] sm:$0xff] }
 0x792   :  { %20438 = vmatpush.bf16.msra.mxu3 %v30720_v51 }
 0x793   :  { %20400 = vmatpush.bf16.msra.mxu0 %v30695_v54  ;;  %v20174_v9 = vpop.f32.mrf.mxu2  ;;  %v20150_v13 = vpop.f32.mrf.mxu0 }
 0x794   :  { %20413 = vmatpush.bf16.msra.mxu1 %v30703_v55  ;;  %v20175_v10 = vadd.f32 %v20174_v9, %v20162_v4  ;;  %v20187_v12 = vpop.f32.mrf.mxu3  ;;  %v20163_v16 = vpop.f32.mrf.mxu1  ;;  %v30733_v55 = vld [vmem:[#allocation5 + $0x3d60] sm:$0xff]  ;;  %v30723_v4 = vld [vmem:[#allocation5 + $0x3d10] sm:$0xff] }
 0x795   :  { %20426 = vmatpush.bf16.msra.mxu2 %v30711_v56  ;;  %v30741_v56 = vld [vmem:[#allocation5 + $0x3da0] sm:$0xff]  ;;  %v126_v9 = vld [vmem:[#allocation2 + $0x1f0] sm:$0xff] }
 0x796   :  { %20439 = vmatpush.bf16.msra.mxu3 %v30719_v57  ;;  %v31118_v14 = vadd.f32 %v20187_v12, %v20175_v10  ;;  %v30722_v10 = vld [vmem:[#allocation5 + $0x3d08] sm:$0xff]  ;;  %503 = vst [vmem:[#allocation1] ss:$4 sm:$0xff] %v126_v9  ;;  %v30721_v16 = vld [vmem:[#allocation5 + $0x3d00] sm:$0xff] }
 0x797   :  { %20401 = vmatpush.bf16.msra.mxu0 %v30694_v58  ;;  %v30749_v58 = vld [vmem:[#allocation5 + $0x3de0] sm:$0xff]  ;;  %v30738_v12 = vld [vmem:[#allocation5 + $0x3d88] sm:$0xff] }
 0x798   :  { %20414 = vmatpush.bf16.msra.mxu1 %v30702_v59  ;;  %v30724_v59 = vld [vmem:[#allocation5 + $0x3d18] sm:$0xff] }
 0x799   :  { %20427 = vmatpush.bf16.msra.mxu2 %v30710_v60  ;;  %v30732_v60 = vld [vmem:[#allocation5 + $0x3d58] sm:$0xff] }
 0x79a   :  { %20440 = vmatpush.bf16.msra.mxu3 %v30718_v61  ;;  %v30740_v61 = vld [vmem:[#allocation5 + $0x3d98] sm:$0xff] }
 0x79b   :  { %20402 = vmatpush.bf16.msra.mxu0 %v30693_v0  ;;  %v20176_v24 = vpop.f32.mrf.mxu2  ;;  %v30748_v0 = vld [vmem:[#allocation5 + $0x3dd8] sm:$0xff] }
 0x79c   :  { %20415 = vmatpush.bf16.msra.mxu1 %v30701_v2  ;;  %v20189_v26 = vpop.f32.mrf.mxu3  ;;  %v30776_v24 = vld [vmem:[#allocation5 + $0x3eb8] sm:$0xff] }
 0x79d   :  { %20428 = vmatpush.bf16.msra.mxu2 %v30709_v3  ;;  %v502_v26 = vld.sshfl [vmem:[#allocation1 + $0x38] sm:$0xff pattern:$0x73625140]  ;;  %v507_v9 = vld.sshfl [vmem:[#allocation1 + $0x10] sm:$0xff pattern:$0x73625140] }
 0x79e   :  { %20441 = vmatpush.bf16.msra.mxu3 %v30717_v5  ;;  %v1012_v31 = vpack.c.bf16 %v502_v26, %v502_v26 }
 0x79f   :  { %20403 = vmatpush.bf16.msra.mxu0 %v30692_v6  ;;  %v30731_v6 = vld [vmem:[#allocation5 + $0x3d50] sm:$0xff] }
 0x7a0   :  { %20416 = vmatpush.bf16.msra.mxu1 %v30700_v7  ;;  %v30739_v7 = vld [vmem:[#allocation5 + $0x3d90] sm:$0xff] }
 0x7a1   :  { %20429 = vmatpush.bf16.msra.mxu2 %v30708_v8  ;;  %v30747_v8 = vld [vmem:[#allocation5 + $0x3dd0] sm:$0xff] }
 0x7a2   :  { %20442 = vmatpush.bf16.msra.mxu3 %v30716_v11  ;;  %v30730_v11 = vld [vmem:[#allocation5 + $0x3d48] sm:$0xff] }
 0x7a3   :  { %20404 = vmatpush.bf16.msra.mxu0 %v30691_v15 }
 0x7a4   :  { %20417 = vmatpush.bf16.msra.mxu1 %v30699_v17  ;;  %v30729_v17 = vld [vmem:[#allocation5 + $0x3d40] sm:$0xff] }
 0x7a5   :  { %20430 = vmatpush.bf16.msra.mxu2 %v30707_v18  ;;  %v30737_v18 = vld [vmem:[#allocation5 + $0x3d80] sm:$0xff] }
 0x7a6   :  { %20443 = vmatpush.bf16.msra.mxu3 %v30715_v19  ;;  %v499_v19 = vld.sshfl [vmem:[#allocation1 + $0x20] sm:$0xff pattern:$0x73625140] }
 0x7a7   :  { %20405 = vmatpush.bf16.msra.mxu0 %v30690_v20  ;;  %v501_v20 = vld.sshfl [vmem:[#allocation1 + $0x30] sm:$0xff pattern:$0x73625140] }
 0x7a8   :  { %20418 = vmatpush.bf16.msra.mxu1 %v30698_v22  ;;  %v30768_v22 = vld [vmem:[#allocation5 + $0x3e78] sm:$0xff] }
 0x7a9   :  { %20431 = vmatpush.bf16.msra.mxu2 %v30706_v23  ;;  %v500_v23 = vld.sshfl [vmem:[#allocation1 + $0x28] sm:$0xff pattern:$0x73625140] }
 0x7aa   :  { %20444 = vmatpush.bf16.msra.mxu3 %v30714_v25  ;;  %v30745_v25 = vld [vmem:[#allocation5 + $0x3dc0] sm:$0xff]  ;;  %v1010_v30 = vpack.c.bf16 %v500_v23, %v500_v23 }
 0x7ab   :  { %20406 = vmatpush.bf16.msra.mxu0 %v30689_v27  ;;  %v20200_v51 = vpop.f32.mrf.mxu0  ;;  %v1009_v27 = vpack.c.bf16 %v499_v19, %v499_v19  ;;  %v30791_v19 = vld [vmem:[#allocation5 + $0x3f30] sm:$0xff] }
 0x7ac   :  { %20419 = vmatpush.bf16.msra.mxu1 %v30697_v28  ;;  %v20201_v52 = vadd.f32 %v20200_v51, %v31118_v14  ;;  %v20213_v54 = vpop.f32.mrf.mxu1  ;;  %v30746_v14 = vld [vmem:[#allocation5 + $0x3dc8] sm:$0xff]  ;;  %v1011_v28 = vpack.c.bf16 %v501_v20, %v501_v20  ;;  %v30799_v20 = vld [vmem:[#allocation5 + $0x3f70] sm:$0xff] }
 0x7ad   :  { %20432 = vmatpush.bf16.msra.mxu2 %v30705_v29  ;;  %v30784_v29 = vld [vmem:[#allocation5 + $0x3ef8] sm:$0xff] }
 0x7ae   :  { %20445 = vmatpush.bf16.msra.mxu3 %v30713_v36  ;;  %20407 = vmatmul.bf16.vlgmr.msra.gmra.mxu0 %v1005_v38  ;;  %v20214_v57 = vadd.f32 %v20213_v54, %v20201_v52  ;;  %v30758_v36 = vld [vmem:[#allocation5 + $0x3e28] sm:$0xff] }
 0x7af   :  { %20451 = vmatpush.bf16.msrb.mxu0 %v30728_v32  ;;  %20420 = vmatmul.bf16.vlgmr.msra.gmra.mxu1 %v1006_v41  ;;  %v30759_v32 = vld [vmem:[#allocation5 + $0x3e30] sm:$0xff]  ;;  %v30774_v38 = vld [vmem:[#allocation5 + $0x3ea8] sm:$0xff] }
 0x7b0   :  { %20464 = vmatpush.bf16.msrb.mxu1 %v30736_v33  ;;  %20433 = vmatmul.bf16.vlgmr.msra.gmra.mxu2 %v1007_v39  ;;  %v30767_v33 = vld [vmem:[#allocation5 + $0x3e70] sm:$0xff]  ;;  %v30782_v39 = vld [vmem:[#allocation5 + $0x3ee8] sm:$0xff] }
 0x7b1   :  { %20477 = vmatpush.bf16.msrb.mxu2 %v30744_v35  ;;  %20446 = vmatmul.bf16.vlgmr.msra.gmra.mxu3 %v1008_v42  ;;  %v30783_v35 = vld [vmem:[#allocation5 + $0x3ef0] sm:$0xff]  ;;  %v30757_v42 = vld [vmem:[#allocation5 + $0x3e20] sm:$0xff] }
 0x7b2   :  { %20490 = vmatpush.bf16.msrb.mxu3 %v30752_v40 }
 0x7b3   :  { %20452 = vmatpush.bf16.msrb.mxu0 %v30727_v43  ;;  %v20226_v62 = vpop.f32.mrf.mxu2  ;;  %v20202_v2 = vpop.f32.mrf.mxu0 }
 0x7b4   :  { %20465 = vmatpush.bf16.msrb.mxu1 %v30735_v44  ;;  %v20227_v63 = vadd.f32 %v20226_v62, %v20214_v57  ;;  %v20239_v1 = vpop.f32.mrf.mxu3  ;;  %v20215_v5 = vpop.f32.mrf.mxu1  ;;  %v30765_v44 = vld [vmem:[#allocation5 + $0x3e60] sm:$0xff]  ;;  %v30755_v57 = vld [vmem:[#allocation5 + $0x3e10] sm:$0xff]  ;;  %v127_v62 = vld [vmem:[#allocation2 + $0x1f8] sm:$0xf] }
 0x7b5   :  { %20478 = vmatpush.bf16.msrb.mxu2 %v30743_v45  ;;  %v30773_v45 = vld [vmem:[#allocation5 + $0x3ea0] sm:$0xff]  ;;  %504 = vst [vmem:[#allocation1 + $0x20] ss:$4 sm:$0xff] %v127_v62 }
 0x7b6   :  { %20491 = vmatpush.bf16.msrb.mxu3 %v30751_v46  ;;  %v31121_v3 = vadd.f32 %v20239_v1, %v20227_v63  ;;  %v30754_v63 = vld [vmem:[#allocation5 + $0x3e08] sm:$0xff] }
 0x7b7   :  { %20453 = vmatpush.bf16.msrb.mxu0 %v30726_v47  ;;  %v30781_v47 = vld [vmem:[#allocation5 + $0x3ee0] sm:$0xff]  ;;  %v30770_v1 = vld [vmem:[#allocation5 + $0x3e88] sm:$0xff] }
 0x7b8   :  { %20466 = vmatpush.bf16.msrb.mxu1 %v30734_v48  ;;  %v30756_v48 = vld [vmem:[#allocation5 + $0x3e18] sm:$0xff] }
 0x7b9   :  { %20479 = vmatpush.bf16.msrb.mxu2 %v30742_v49  ;;  %v30764_v49 = vld [vmem:[#allocation5 + $0x3e58] sm:$0xff] }
 0x7ba   :  { %20492 = vmatpush.bf16.msrb.mxu3 %v30750_v50  ;;  %v30772_v50 = vld [vmem:[#allocation5 + $0x3e98] sm:$0xff] }
 0x7bb   :  { %20454 = vmatpush.bf16.msrb.mxu0 %v30725_v53  ;;  %v20228_v13 = vpop.f32.mrf.mxu2  ;;  %v30780_v53 = vld [vmem:[#allocation5 + $0x3ed8] sm:$0xff] }
 0x7bc   :  { %20467 = vmatpush.bf16.msrb.mxu1 %v30733_v55  ;;  %v20241_v15 = vpop.f32.mrf.mxu3  ;;  %v30777_v13 = vld [vmem:[#allocation5 + $0x3ec0] sm:$0xff] }
 0x7bd   :  { %20480 = vmatpush.bf16.msrb.mxu2 %v30741_v56  ;;  %v508_v15 = vld.sshfl [vmem:[#allocation1 + $0x18] sm:$0xff pattern:$0x73625140] }
 0x7be   :  { %20493 = vmatpush.bf16.msrb.mxu3 %v30749_v58 }
 0x7bf   :  { %20455 = vmatpush.bf16.msrb.mxu0 %v30724_v59  ;;  %v30763_v59 = vld [vmem:[#allocation5 + $0x3e50] sm:$0xff] }
 0x7c0   :  { %20468 = vmatpush.bf16.msrb.mxu1 %v30732_v60  ;;  %v30771_v60 = vld [vmem:[#allocation5 + $0x3e90] sm:$0xff] }
 0x7c1   :  { %20481 = vmatpush.bf16.msrb.mxu2 %v30740_v61  ;;  %v30779_v61 = vld [vmem:[#allocation5 + $0x3ed0] sm:$0xff] }
 0x7c2   :  { %20494 = vmatpush.bf16.msrb.mxu3 %v30748_v0  ;;  %v30762_v0 = vld [vmem:[#allocation5 + $0x3e48] sm:$0xff] }
 0x7c3   :  { %20456 = vmatpush.bf16.msrb.mxu0 %v30723_v4  ;;  %v30753_v4 = vld [vmem:[#allocation5 + $0x3e00] sm:$0xff] }
 0x7c4   :  { %20469 = vmatpush.bf16.msrb.mxu1 %v30731_v6  ;;  %v30761_v6 = vld [vmem:[#allocation5 + $0x3e40] sm:$0xff] }
 0x7c5   :  { %20482 = vmatpush.bf16.msrb.mxu2 %v30739_v7  ;;  %v30769_v7 = vld [vmem:[#allocation5 + $0x3e80] sm:$0xff] }
 0x7c6   :  { %20495 = vmatpush.bf16.msrb.mxu3 %v30747_v8  ;;  %v505_v8 = vld.sshfl [vmem:[#allocation1] sm:$0xff pattern:$0x73625140] }
 0x7c7   :  { %20457 = vmatpush.bf16.msrb.mxu0 %v30722_v10  ;;  %v506_v10 = vld.sshfl [vmem:[#allocation1 + $0x8] sm:$0xff pattern:$0x73625140] }
 0x7c8   :  { %20470 = vmatpush.bf16.msrb.mxu1 %v30730_v11  ;;  %v30792_v11 = vld [vmem:[#allocation5 + $0x3f38] sm:$0xff] }
 0x7c9   :  { %20483 = vmatpush.bf16.msrb.mxu2 %v30738_v12  ;;  %v30800_v12 = vld [vmem:[#allocation5 + $0x3f78] sm:$0xff] }
 0x7ca   :  { %20496 = vmatpush.bf16.msrb.mxu3 %v30746_v14  ;;  %v1013_v14 = vpack.c.bf16 %v505_v8, %v505_v8  ;;  %v20597_v8 = vld [vmem:[%s31181_s3 + $0x78] sm:$0xff] }
 0x7cb   :  { %20458 = vmatpush.bf16.msrb.mxu0 %v30721_v16  ;;  %v20252_v40 = vpop.f32.mrf.mxu0  ;;  %v1015_v16 = vpack.c.bf16 %v507_v9, %v507_v9 }
 0x7cc   :  { %20471 = vmatpush.bf16.msrb.mxu1 %v30729_v17  ;;  %v20253_v41 = vadd.f32 %v20252_v40, %v31121_v3  ;;  %v20265_v43 = vpop.f32.mrf.mxu1  ;;  %v30778_v3 = vld [vmem:[#allocation5 + $0x3ec8] sm:$0xff]  ;;  %v1014_v17 = vpack.c.bf16 %v506_v10, %v506_v10 }
 0x7cd   :  { %20484 = vmatpush.bf16.msrb.mxu2 %v30737_v18  ;;  %v1016_v18 = vpack.c.bf16 %v508_v15, %v508_v15  ;;  %v30794_v40 = vld [vmem:[#allocation5 + $0x3f48] sm:$0xff] }
 0x7ce   :  { %20497 = vmatpush.bf16.msrb.mxu3 %v30745_v25  ;;  %20459 = vmatmul.bf16.vlgmr.msrb.gmra.mxu0 %v1009_v27  ;;  %v20266_v46 = vadd.f32 %v20265_v43, %v20253_v41  ;;  %v30789_v25 = vld [vmem:[#allocation5 + $0x3f20] sm:$0xff]  ;;  %v20596_v10 = vld [vmem:[%s31181_s3 + $0x70] sm:$0xff] }
 0x7cf   :  { %20503 = vmatpush.bf16.msra.mxu0 %v30760_v21  ;;  %20472 = vmatmul.bf16.vlgmr.msrb.gmra.mxu1 %v1010_v30  ;;  %v30790_v21 = vld [vmem:[#allocation5 + $0x3f28] sm:$0xff]  ;;  %v30797_v27 = vld [vmem:[#allocation5 + $0x3f60] sm:$0xff]  ;;  %v30796_v30 = vld [vmem:[#allocation5 + $0x3f58] sm:$0xff] }
 0x7d0   :  { %20516 = vmatpush.bf16.msra.mxu1 %v30768_v22  ;;  %20485 = vmatmul.bf16.vlgmr.msrb.gmra.mxu2 %v1011_v28  ;;  %v30798_v22 = vld [vmem:[#allocation5 + $0x3f68] sm:$0xff]  ;;  %v30785_v43 = vld [vmem:[#allocation5 + $0x3f00] sm:$0xff] }
 0x7d1   :  { %20529 = vmatpush.bf16.msra.mxu2 %v30776_v24  ;;  %20498 = vmatmul.bf16.vlgmr.msrb.gmra.mxu3 %v1012_v31 }
 0x7d2   :  { %20542 = vmatpush.bf16.msra.mxu3 %v30784_v29  ;;  %v30788_v29 = vld [vmem:[#allocation5 + $0x3f18] sm:$0xff] }
 0x7d3   :  { %20504 = vmatpush.bf16.msra.mxu0 %v30759_v32  ;;  %v20278_v51 = vpop.f32.mrf.mxu2  ;;  %v20254_v55 = vpop.f32.mrf.mxu0 }
 0x7d4   :  { %20517 = vmatpush.bf16.msra.mxu1 %v30767_v33  ;;  %v20279_v52 = vadd.f32 %v20278_v51, %v20266_v46  ;;  %v20291_v54 = vpop.f32.mrf.mxu3  ;;  %v20267_v58 = vpop.f32.mrf.mxu1  ;;  %v510_v46 = vld.sshfl [vmem:[#allocation1 + $0x28] sm:$0xff pattern:$0x73625140] }
 0x7d5   :  { %20530 = vmatpush.bf16.msra.mxu2 %v30775_v34 }
 0x7d6   :  { %20543 = vmatpush.bf16.msra.mxu3 %v30783_v35  ;;  %v20292_v56 = vadd.f32 %v20291_v54, %v20279_v52 }
 0x7d7   :  { %20505 = vmatpush.bf16.msra.mxu0 %v30758_v36  ;;  %v30787_v36 = vld [vmem:[#allocation5 + $0x3f10] sm:$0xff] }
 0x7d8   :  { %20518 = vmatpush.bf16.msra.mxu1 %v30766_v37 }
 0x7d9   :  { %20531 = vmatpush.bf16.msra.mxu2 %v30774_v38  ;;  %v30795_v38 = vld [vmem:[#allocation5 + $0x3f50] sm:$0xff] }
 0x7da   :  { %20544 = vmatpush.bf16.msra.mxu3 %v30782_v39  ;;  %v30786_v39 = vld [vmem:[#allocation5 + $0x3f08] sm:$0xff] }
 0x7db   :  { %20506 = vmatpush.bf16.msra.mxu0 %v30757_v42  ;;  %v20280_v2 = vpop.f32.mrf.mxu2 }
 0x7dc   :  { %20519 = vmatpush.bf16.msra.mxu1 %v30765_v44  ;;  %v20293_v5 = vpop.f32.mrf.mxu3  ;;  %v509_v44 = vld.sshfl [vmem:[#allocation1 + $0x20] sm:$0xff pattern:$0x73625140] }
 0x7dd   :  { %20532 = vmatpush.bf16.msra.mxu2 %v30773_v45  ;;  %v30793_v45 = vld [vmem:[#allocation5 + $0x3f40] sm:$0xff] }
 0x7de   :  { %20545 = vmatpush.bf16.msra.mxu3 %v30781_v47  ;;  %v1017_v47 = vpack.c.bf16 %v509_v44, %v509_v44 }
 0x7df   :  { %20507 = vmatpush.bf16.msra.mxu0 %v30756_v48  ;;  %v1018_v48 = vpack.c.bf16 %v510_v46, %v510_v46 }
 0x7e0   :  { %20520 = vmatpush.bf16.msra.mxu1 %v30764_v49 }
 0x7e1   :  { %20533 = vmatpush.bf16.msra.mxu2 %v30772_v50 }
 0x7e2   :  { %20546 = vmatpush.bf16.msra.mxu3 %v30780_v53 }
 0x7e3   :  { %20508 = vmatpush.bf16.msra.mxu0 %v30755_v57 }
 0x7e4   :  { %20521 = vmatpush.bf16.msra.mxu1 %v30763_v59 }
 0x7e5   :  { %20534 = vmatpush.bf16.msra.mxu2 %v30771_v60 }
 0x7e6   :  { %20547 = vmatpush.bf16.msra.mxu3 %v30779_v61 }
 0x7e7   :  { %20509 = vmatpush.bf16.msra.mxu0 %v30754_v63 }
 0x7e8   :  { %20522 = vmatpush.bf16.msra.mxu1 %v30762_v0 }
 0x7e9   :  { %20535 = vmatpush.bf16.msra.mxu2 %v30770_v1 }
 0x7ea   :  { %20548 = vmatpush.bf16.msra.mxu3 %v30778_v3 }
 0x7eb   :  { %20510 = vmatpush.bf16.msra.mxu0 %v30753_v4  ;;  %v20304_v23 = vpop.f32.mrf.mxu0 }
 0x7ec   :  { %20523 = vmatpush.bf16.msra.mxu1 %v30761_v6  ;;  %v20305_v24 = vadd.f32 %v20304_v23, %v20292_v56  ;;  %v20317_v26 = vpop.f32.mrf.mxu1  ;;  %v20589_v23 = vld [vmem:[%s31181_s3 + $0x38] sm:$0xff] }
 0x7ed   :  { %20536 = vmatpush.bf16.msra.mxu2 %v30769_v7 }
 0x7ee   :  { %20549 = vmatpush.bf16.msra.mxu3 %v30777_v13  ;;  %20511 = vmatmul.bf16.vlgmr.msra.gmra.mxu0 %v1013_v14  ;;  %v20318_v28 = vadd.f32 %v20317_v26, %v20305_v24  ;;  %v20594_v13 = vld [vmem:[%s31181_s3 + $0x60] sm:$0xff]  ;;  %v20588_v24 = vld [vmem:[%s31181_s3 + $0x30] sm:$0xff] }
 0x7ef   :  { %20555 = vmatpush.bf16.msrb.mxu0 %v30792_v11  ;;  %20524 = vmatmul.bf16.vlgmr.msra.gmra.mxu1 %v1014_v17  ;;  %v20593_v17 = vld [vmem:[%s31181_s3 + $0x58] sm:$0xff]  ;;  %v20586_v26 = vld [vmem:[%s31181_s3 + $0x20] sm:$0xff] }
 0x7f0   :  { %20568 = vmatpush.bf16.msrb.mxu1 %v30800_v12  ;;  %20537 = vmatmul.bf16.vlgmr.msra.gmra.mxu2 %v1015_v16  ;;  %v20595_v12 = vld [vmem:[%s31181_s3 + $0x68] sm:$0xff] }
 0x7f1   :  { %20550 = vmatmul.bf16.vlgmr.msra.gmra.mxu3 %v1016_v18  ;;  %20602 = vmatpush.msrb.mxu2 %v20597_v8  ;;  %v20592_v18 = vld [vmem:[%s31181_s3 + $0x50] sm:$0xff] }
 0x7f3   :  { %20556 = vmatpush.bf16.msrb.mxu0 %v30791_v19  ;;  %v20330_v31 = vpop.f32.mrf.mxu2  ;;  %v20306_v34 = vpop.f32.mrf.mxu0  ;;  %20603 = vmatpush.msrb.mxu2 %v20596_v10  ;;  %v20591_v19 = vld [vmem:[%s31181_s3 + $0x48] sm:$0xff] }
 0x7f4   :  { %20569 = vmatpush.bf16.msrb.mxu1 %v30799_v20  ;;  %v20331_v32 = vadd.f32 %v20330_v31, %v20318_v28  ;;  %v20343_v33 = vpop.f32.mrf.mxu3  ;;  %v20319_v37 = vpop.f32.mrf.mxu1 }
 0x7f5   :  { %20604 = vmatpush.msrb.mxu2 %v20595_v12 }
 0x7f6   :  { %v20344_v35 = vadd.f32 %v20343_v33, %v20331_v32  ;;  %v20583_v32 = vld [vmem:[%s31181_s3 + $0x8] sm:$0xff]  ;;  %v20582_v33 = vld [vmem:[%s31181_s3] sm:$0xff] }
 0x7f7   :  { %20557 = vmatpush.bf16.msrb.mxu0 %v30790_v21  ;;  %20605 = vmatpush.msrb.mxu2 %v20594_v13  ;;  %v20590_v21 = vld [vmem:[%s31181_s3 + $0x40] sm:$0xff] }
 0x7f8   :  { %20570 = vmatpush.bf16.msrb.mxu1 %v30798_v22 }
 0x7f9   :  { %20606 = vmatpush.msrb.mxu2 %v20593_v17 }
 0x7fb   :  { %20558 = vmatpush.bf16.msrb.mxu0 %v30789_v25  ;;  %v20332_v41 = vpop.f32.mrf.mxu2  ;;  %20607 = vmatpush.msrb.mxu2 %v20592_v18  ;;  %v20587_v25 = vld [vmem:[%s31181_s3 + $0x28] sm:$0xff] }
 0x7fc   :  { %20571 = vmatpush.bf16.msrb.mxu1 %v30797_v27  ;;  %v20345_v42 = vpop.f32.mrf.mxu3  ;;  %v20585_v27 = vld [vmem:[%s31181_s3 + $0x18] sm:$0xff] }
 0x7fd   :  { %20608 = vmatpush.msrb.mxu2 %v20591_v19 }
 0x7ff   :  { %20559 = vmatpush.bf16.msrb.mxu0 %v30788_v29  ;;  %20609 = vmatpush.msrb.mxu2 %v20590_v21  ;;  %v20584_v29 = vld [vmem:[%s31181_s3 + $0x10] sm:$0xff] }
 0x800   :  { %20572 = vmatpush.bf16.msrb.mxu1 %v30796_v30 }
 0x801   :  { %20610 = vmatpush.msrb.mxu2 %v20589_v23 }
 0x803   :  { %20560 = vmatpush.bf16.msrb.mxu0 %v30787_v36  ;;  %20611 = vmatpush.msrb.mxu2 %v20588_v24 }
 0x804   :  { %20573 = vmatpush.bf16.msrb.mxu1 %v30795_v38 }
 0x805   :  { %20612 = vmatpush.msrb.mxu2 %v20587_v25 }
 0x807   :  { %20561 = vmatpush.bf16.msrb.mxu0 %v30786_v39  ;;  %20613 = vmatpush.msrb.mxu2 %v20586_v26 }
 0x808   :  { %20574 = vmatpush.bf16.msrb.mxu1 %v30794_v40 }
 0x809   :  { %20614 = vmatpush.msrb.mxu2 %v20585_v27 }
 0x80b   :  { %20562 = vmatpush.bf16.msrb.mxu0 %v30785_v43  ;;  %v20356_v49 = vpop.f32.mrf.mxu0  ;;  %20615 = vmatpush.msrb.mxu2 %v20584_v29 }
 0x80c   :  { %20575 = vmatpush.bf16.msrb.mxu1 %v30793_v45  ;;  %v20357_v50 = vadd.f32 %v20356_v49, %v20344_v35  ;;  %v20369_v51 = vpop.f32.mrf.mxu1 }
 0x80d   :  { %20616 = vmatpush.msrb.mxu2 %v20583_v32 }
 0x80e   :  { %20563 = vmatmul.bf16.vlgmr.msrb.gmra.mxu0 %v1017_v47  ;;  %v20370_v52 = vadd.f32 %v20369_v51, %v20357_v50 }
 0x80f   :  { %20576 = vmatmul.bf16.vlgmr.msrb.gmra.mxu1 %v1018_v48  ;;  %20617 = vmatpush.msrb.mxu2 %v20582_v33 }
 0x813   :  { %v20382_v53 = vpop.f32.mrf.mxu2  ;;  %v20358_v56 = vpop.f32.mrf.mxu0 }
 0x814   :  { %v20383_v54 = vadd.f32 %v20382_v53, %v20370_v52  ;;  %v20395_v55 = vpop.f32.mrf.mxu3  ;;  %v20371_v58 = vpop.f32.mrf.mxu1  ;;  %v30808_v56 = vld [vmem:[%s31182_s4] ss:$0 sm:$0xff] }
 0x816   :  { %v20396_v57 = vadd.f32 %v20395_v55, %v20383_v54 }
 0x81b   :  { %v20384_v59 = vpop.f32.mrf.mxu2 }
 0x81c   :  { %v20397_v60 = vpop.f32.mrf.mxu3 }
 0x82b   :  { %v20408_v61 = vpop.f32.mrf.mxu0 }
 0x82c   :  { %v20409_v62 = vadd.f32 %v20408_v61, %v20396_v57  ;;  %v20421_v63 = vpop.f32.mrf.mxu1 }
 0x82e   :  { %v20422_v0 = vadd.f32 %v20421_v63, %v20409_v62 }
 0x833   :  { %v20434_v1 = vpop.f32.mrf.mxu2  ;;  %v20410_v3 = vpop.f32.mrf.mxu0 }
 0x834   :  { %v20447_v2 = vpop.f32.mrf.mxu3  ;;  %v20423_v4 = vpop.f32.mrf.mxu1  ;;  %v20435_v30 = vadd.f32 %v20434_v1, %v20422_v0 }
 0x836   :  { %v20448_v34 = vadd.f32 %v20447_v2, %v20435_v30 }
 0x83b   :  { %v20436_v5 = vpop.f32.mrf.mxu2 }
 0x83c   :  { %v20449_v6 = vpop.f32.mrf.mxu3 }
 0x84b   :  { %v20460_v7 = vpop.f32.mrf.mxu0 }
 0x84c   :  { %v20473_v9 = vpop.f32.mrf.mxu1  ;;  %v20461_v35 = vadd.f32 %v20460_v7, %v20448_v34 }
 0x84e   :  { %v20474_v40 = vadd.f32 %v20473_v9, %v20461_v35 }
 0x853   :  { %v20486_v11 = vpop.f32.mrf.mxu2  ;;  %v20462_v15 = vpop.f32.mrf.mxu0 }
 0x854   :  { %v20499_v14 = vpop.f32.mrf.mxu3  ;;  %v20475_v16 = vpop.f32.mrf.mxu1  ;;  %v20487_v41 = vadd.f32 %v20486_v11, %v20474_v40 }
 0x856   :  { %v20500_v43 = vadd.f32 %v20499_v14, %v20487_v41 }
 0x85b   :  { %v20488_v20 = vpop.f32.mrf.mxu2 }
 0x85c   :  { %v20501_v22 = vpop.f32.mrf.mxu3 }
 0x86b   :  { %v20512_v28 = vpop.f32.mrf.mxu0 }
 0x86c   :  { %v20525_v31 = vpop.f32.mrf.mxu1  ;;  %v20513_v45 = vadd.f32 %v20512_v28, %v20500_v43 }
 0x86e   :  { %v20526_v46 = vadd.f32 %v20525_v31, %v20513_v45 }
 0x873   :  { %v20538_v36 = vpop.f32.mrf.mxu2  ;;  %v20514_v37 = vpop.f32.mrf.mxu0 }
 0x874   :  { %v20551_v38 = vpop.f32.mrf.mxu3  ;;  %v20527_v39 = vpop.f32.mrf.mxu1  ;;  %v20539_v47 = vadd.f32 %v20538_v36, %v20526_v46 }
 0x876   :  { %v20552_v48 = vadd.f32 %v20551_v38, %v20539_v47 }
 0x87b   :  { %v20540_v42 = vpop.f32.mrf.mxu2 }
 0x87c   :  { %v20553_v44 = vpop.f32.mrf.mxu3 }
 0x88b   :  { %v20564_v49 = vpop.f32.mrf.mxu0 }
 0x88c   :  { %v20565_v50 = vadd.f32 %v20564_v49, %v20552_v48  ;;  %v20577_v51 = vpop.f32.mrf.mxu1 }
 0x88e   :  { %v20578_v52 = vadd.f32 %v20577_v51, %v20565_v50 }
 0x890   :  { %v20581_v53 = vmax.f32 %v20578_v52, 0.0 }
 0x892   :  { %20618 = vmatmul.f32.vlgmr.msrb.gmra.mxu2 %v20581_v53 }
 0x893   :  { %v20566_v54 = vpop.f32.mrf.mxu0 }
 0x894   :  { %v20579_v55 = vpop.f32.mrf.mxu1 }
 0x915   :  { %v20619_v57 = vpop.f32.mrf.mxu2 }
 0x916   :  { %v20620_v58 = vadd.f32 %v30808_v56, %v20619_v57 }
 0x918   :  { %20622 = vst [vmem:[#allocation8] sm:$0x3] %v20620_v58 }
 0x919   :  { %20633 = dma.vmem_to_hbm [thread:$0]  %s20629_s13, 32, %s20631_s16, [#allocation4]  }
 0x91a   :  { %30909 = dma.done.wait [#allocation4], 32  }
 0x91b   :  { %30910 = vsyncadd [#allocation4], 4294967264 }
 0x91c   :  { %20638 = vsyncpa [#allocation3], 1 }
 0x91d   :  { %20639 = vsyncpa [#allocation6], 1 }
 0x91e   :  { %20640 = vsyncpa [#allocation4], 1 }

</bundles_post_ra>
